<compile_context>
chip_gen: v5e
topology: v5e:2x2
jax: 0.10.0
libtpu: 0.0.40
codegen_flags: <defaults>
</compile_context>

<pallas_src>
import functools
import math

import jax
import jax.numpy as jnp
from jax.experimental import pallas as pl
from jax.experimental.pallas import tpu as pltpu


# ----------------------------------------------------------------------------
# small helpers
# ----------------------------------------------------------------------------
def _cdiv(a, b):
    return (a + b - 1) // b


def _round_up(a, m):
    return _cdiv(a, m) * m


def _choose_row_tile(M, cap):
    """Pick a row tile (multiple of 8) and a padded M that tiles evenly.
    Force an even step count (>1) so v7x megacore stays balanced."""
    Mp = _round_up(M, 8)
    n = max(1, _cdiv(Mp, cap))
    if n > 1 and (n % 2):
        n += 1
    tm = _round_up(_cdiv(Mp, n), 8)
    Mp = tm * n
    return tm, Mp, n


def _pad_rows(x, Mp):
    M = x.shape[0]
    if Mp == M:
        return x
    return jnp.pad(x, ((0, Mp - M), (0, 0)))


_PARALLEL = pltpu.CompilerParams(dimension_semantics=("parallel",))


# ----------------------------------------------------------------------------
# Pallas kernels
# ----------------------------------------------------------------------------
def _matmul_bias_kernel(x_ref, w_ref, b_ref, o_ref, *, relu):
    # w_ref is already bf16 (pre-cast once in prepare_params)
    acc = jnp.dot(x_ref[...].astype(jnp.bfloat16), w_ref[...],
                  preferred_element_type=jnp.float32) + b_ref[...]
    if relu:
        acc = jnp.maximum(acc, 0.0)
    o_ref[...] = acc.astype(o_ref.dtype)


def pallas_linear(x, w, b, relu=False, row_tile=512):
    """y = x @ w + b (optional ReLU).  x:(M,K) f32, w:(K,N) bf16, b:(N,) f32."""
    M, K = x.shape
    N = w.shape[1]
    tm, Mp, n = _choose_row_tile(M, row_tile)
    xp = _pad_rows(x, Mp)
    out = pl.pallas_call(
        functools.partial(_matmul_bias_kernel, relu=relu),
        grid=(n,),
        in_specs=[
            pl.BlockSpec((tm, K), lambda i: (i, 0)),
            pl.BlockSpec((K, N), lambda i: (0, 0)),
            pl.BlockSpec((1, N), lambda i: (0, 0)),
        ],
        out_specs=pl.BlockSpec((tm, N), lambda i: (i, 0)),
        out_shape=jax.ShapeDtypeStruct((Mp, N), jnp.float32),
        compiler_params=_PARALLEL,
    )(xp, w, b.reshape(1, N))
    return out[:M] if Mp != M else out


def _conv_relu_pool_kernel(x0_ref, x1_ref, w_ref, b_ref, o_ref):
    # fused Conv1d(k=3,p=1) + ReLU + MaxPool1d(2,2):
    #   out = relu(max(x_even @ W, x_odd @ W) + b)
    w = w_ref[...]                                            # bf16
    y0 = jnp.dot(x0_ref[...].astype(jnp.bfloat16), w,
                 preferred_element_type=jnp.float32)
    y1 = jnp.dot(x1_ref[...].astype(jnp.bfloat16), w,
                 preferred_element_type=jnp.float32)
    y = jnp.maximum(y0, y1) + b_ref[...]
    o_ref[...] = jnp.maximum(y, 0.0).astype(o_ref.dtype)


def pallas_conv_relu_pool(x0, x1, w, b, row_tile=512):
    M, K = x0.shape
    N = w.shape[1]
    tm, Mp, n = _choose_row_tile(M, row_tile)
    x0p = _pad_rows(x0, Mp)
    x1p = _pad_rows(x1, Mp)
    out = pl.pallas_call(
        _conv_relu_pool_kernel,
        grid=(n,),
        in_specs=[
            pl.BlockSpec((tm, K), lambda i: (i, 0)),
            pl.BlockSpec((tm, K), lambda i: (i, 0)),
            pl.BlockSpec((K, N), lambda i: (0, 0)),
            pl.BlockSpec((1, N), lambda i: (0, 0)),
        ],
        out_specs=pl.BlockSpec((tm, N), lambda i: (i, 0)),
        out_shape=jax.ShapeDtypeStruct((Mp, N), jnp.float32),
        compiler_params=_PARALLEL,
    )(x0p, x1p, w, b.reshape(1, N))
    return out[:M] if Mp != M else out


def _ffn_ln_kernel(x_ref, w1_ref, b1_ref, w2_ref, b2_ref, g_ref, beta_ref,
                   o_ref, acc_ref):
    # out = LayerNorm(x + relu(x@w1+b1)@w2 + b2); hidden dim chunked over
    # grid axis 1, accumulated in an f32 VMEM scratch.
    j = pl.program_id(1)

    @pl.when(j == 0)
    def _():
        acc_ref[...] = jnp.zeros_like(acc_ref)

    xb = x_ref[...].astype(jnp.bfloat16)
    h = jnp.dot(xb, w1_ref[...], preferred_element_type=jnp.float32) + b1_ref[...]
    h = jnp.maximum(h, 0.0)
    acc_ref[...] += jnp.dot(h.astype(jnp.bfloat16), w2_ref[...],
                            preferred_element_type=jnp.float32)

    @pl.when(j == pl.num_programs(1) - 1)
    def _():
        y = x_ref[...].astype(jnp.float32) + acc_ref[...] + b2_ref[...]
        mu = jnp.mean(y, axis=-1, keepdims=True)
        var = jnp.mean(jnp.square(y - mu), axis=-1, keepdims=True)
        out = (y - mu) * jax.lax.rsqrt(var + 1e-5) * g_ref[...] + beta_ref[...]
        o_ref[...] = out.astype(o_ref.dtype)


def pallas_ffn_ln(x, p, ln, row_tile=256, f_chunk=512):
    """LayerNorm(x + FFN(x)) fused; FFN hidden iterated in f_chunk slices."""
    M, D = x.shape
    F = p["w1"].shape[1]
    f_chunk = min(f_chunk, F)
    assert F % f_chunk == 0
    nf = F // f_chunk
    tm, Mp, n = _choose_row_tile(M, row_tile)
    xp = _pad_rows(x, Mp)
    out = pl.pallas_call(
        _ffn_ln_kernel,
        grid=(n, nf),
        in_specs=[
            pl.BlockSpec((tm, D), lambda i, j: (i, 0)),
            pl.BlockSpec((D, f_chunk), lambda i, j: (0, j)),
            pl.BlockSpec((1, f_chunk), lambda i, j: (0, j)),
            pl.BlockSpec((f_chunk, D), lambda i, j: (j, 0)),
            pl.BlockSpec((1, D), lambda i, j: (0, 0)),
            pl.BlockSpec((1, D), lambda i, j: (0, 0)),
            pl.BlockSpec((1, D), lambda i, j: (0, 0)),
        ],
        out_specs=pl.BlockSpec((tm, D), lambda i, j: (i, 0)),
        out_shape=jax.ShapeDtypeStruct((Mp, D), jnp.float32),
        scratch_shapes=[pltpu.VMEM((tm, D), jnp.float32)],
        compiler_params=pltpu.CompilerParams(
            dimension_semantics=("parallel", "arbitrary")),
    )(xp, p["w1"], p["b1"].reshape(1, F), p["w2"], p["b2"].reshape(1, D),
      ln["g"].reshape(1, D), ln["b"].reshape(1, D))
    return out[:M] if Mp != M else out


def _layernorm_kernel(x_ref, g_ref, b_ref, o_ref):
    x = x_ref[...].astype(jnp.float32)
    mu = jnp.mean(x, axis=-1, keepdims=True)
    var = jnp.mean(jnp.square(x - mu), axis=-1, keepdims=True)
    y = (x - mu) * jax.lax.rsqrt(var + 1e-5)
    o_ref[...] = (y * g_ref[...] + b_ref[...]).astype(o_ref.dtype)


def pallas_layernorm(x, g, b, row_tile=512):
    M, D = x.shape
    tm, Mp, n = _choose_row_tile(M, row_tile)
    xp = _pad_rows(x, Mp)
    out = pl.pallas_call(
        _layernorm_kernel,
        grid=(n,),
        in_specs=[
            pl.BlockSpec((tm, D), lambda i: (i, 0)),
            pl.BlockSpec((1, D), lambda i: (0, 0)),
            pl.BlockSpec((1, D), lambda i: (0, 0)),
        ],
        out_specs=pl.BlockSpec((tm, D), lambda i: (i, 0)),
        out_shape=jax.ShapeDtypeStruct((Mp, D), jnp.float32),
        compiler_params=_PARALLEL,
    )(xp, g.reshape(1, D), b.reshape(1, D))
    return out[:M] if Mp != M else out


def _heads_attention(q, k, v, wo_ref, *, nhead, scale):
    """Per-head attention + output projection, all 2-D ops (lowering-safe).
    q:(Sq,D) k,v:(Sk,D) f32 values; wo_ref:(D,D) bf16 ref.  Returns (Sq,D) f32.
    Uses linearity: concat(heads) @ wo == sum_h head_h @ wo[h*Dh:(h+1)*Dh]."""
    Sq, D = q.shape
    Dh = D // nhead
    acc = jnp.zeros((Sq, D), jnp.float32)
    for h in range(nhead):
        lo = h * Dh
        qh = (q[:, lo:lo + Dh] * scale).astype(jnp.bfloat16)       # (Sq, Dh)
        kh = k[:, lo:lo + Dh].astype(jnp.bfloat16)                 # (Sk, Dh)
        vh = v[:, lo:lo + Dh].astype(jnp.bfloat16)                 # (Sk, Dh)
        s = jax.lax.dot_general(qh, kh, (((1,), (1,)), ((), ())),
                                preferred_element_type=jnp.float32)  # (Sq, Sk)
        m = jnp.max(s, axis=-1, keepdims=True)
        p = jnp.exp(s - m)
        denom = jnp.sum(p, axis=-1, keepdims=True)
        p = p * pl.reciprocal(denom, approx=True)
        oh = jnp.dot(p.astype(jnp.bfloat16), vh,
                     preferred_element_type=jnp.float32)             # (Sq, Dh)
        acc = acc + jnp.dot(oh.astype(jnp.bfloat16), wo_ref[lo:lo + Dh, :],
                            preferred_element_type=jnp.float32)
    return acc


def _self_mha_ln_kernel(x_ref, wqkv_ref, bqkv_ref, wo_ref, bo_ref,
                        g_ref, beta_ref, o_ref, *, nhead, scale):
    # one batch element per grid step; everything (QKV proj, attention,
    # out-proj, residual add, LayerNorm) stays in VMEM.
    x = x_ref[0]                                                    # (S, D)
    S, D = x.shape
    xb = x.astype(jnp.bfloat16)
    qkv = jnp.dot(xb, wqkv_ref[...],
                  preferred_element_type=jnp.float32) + bqkv_ref[...]  # (S, 3D)
    q, k, v = qkv[:, :D], qkv[:, D:2 * D], qkv[:, 2 * D:]
    attn = _heads_attention(q, k, v, wo_ref, nhead=nhead, scale=scale)
    y = x + attn + bo_ref[...]
    mu = jnp.mean(y, axis=-1, keepdims=True)
    var = jnp.mean(jnp.square(y - mu), axis=-1, keepdims=True)
    out = (y - mu) * jax.lax.rsqrt(var + 1e-5) * g_ref[...] + beta_ref[...]
    o_ref[0] = out.astype(o_ref.dtype)


def _cross_mha_ln_kernel(x_ref, m_ref, wq_ref, bq_ref, wkv_ref, bkv_ref,
                         wo_ref, bo_ref, g_ref, beta_ref, o_ref,
                         *, nhead, scale):
    x = x_ref[0]                                                    # (Sq, D)
    mem = m_ref[0]                                                  # (Sk, D)
    Sq, D = x.shape
    q = jnp.dot(x.astype(jnp.bfloat16), wq_ref[...],
                preferred_element_type=jnp.float32) + bq_ref[...]   # (Sq, D)
    kv = jnp.dot(mem.astype(jnp.bfloat16), wkv_ref[...],
                 preferred_element_type=jnp.float32) + bkv_ref[...]  # (Sk, 2D)
    k, v = kv[:, :D], kv[:, D:]
    attn = _heads_attention(q, k, v, wo_ref, nhead=nhead, scale=scale)
    y = x + attn + bo_ref[...]
    mu = jnp.mean(y, axis=-1, keepdims=True)
    var = jnp.mean(jnp.square(y - mu), axis=-1, keepdims=True)
    out = (y - mu) * jax.lax.rsqrt(var + 1e-5) * g_ref[...] + beta_ref[...]
    o_ref[0] = out.astype(o_ref.dtype)


def fused_self_mha_ln(x, p, ln, nhead):
    """LayerNorm(x + SelfAttention(x)) in one kernel.  x:(B, S, D)."""
    B, S, D = x.shape
    scale = 1.0 / math.sqrt(D // nhead)
    return pl.pallas_call(
        functools.partial(_self_mha_ln_kernel, nhead=nhead, scale=scale),
        grid=(B,),
        in_specs=[
            pl.BlockSpec((1, S, D), lambda b: (b, 0, 0)),
            pl.BlockSpec((D, 3 * D), lambda b: (0, 0)),
            pl.BlockSpec((1, 3 * D), lambda b: (0, 0)),
            pl.BlockSpec((D, D), lambda b: (0, 0)),
            pl.BlockSpec((1, D), lambda b: (0, 0)),
            pl.BlockSpec((1, D), lambda b: (0, 0)),
            pl.BlockSpec((1, D), lambda b: (0, 0)),
        ],
        out_specs=pl.BlockSpec((1, S, D), lambda b: (b, 0, 0)),
        out_shape=jax.ShapeDtypeStruct((B, S, D), jnp.float32),
        compiler_params=_PARALLEL,
    )(x, p["wqkv"], p["bqkv"].reshape(1, 3 * D), p["wo"],
      p["bo"].reshape(1, D), ln["g"].reshape(1, D), ln["b"].reshape(1, D))


def fused_cross_mha_ln(x, mem, p, ln, nhead):
    """LayerNorm(x + CrossAttention(x, mem)) in one kernel.  x,mem:(B, S, D)."""
    B, Sq, D = x.shape
    Sk = mem.shape[1]
    scale = 1.0 / math.sqrt(D // nhead)
    return pl.pallas_call(
        functools.partial(_cross_mha_ln_kernel, nhead=nhead, scale=scale),
        grid=(B,),
        in_specs=[
            pl.BlockSpec((1, Sq, D), lambda b: (b, 0, 0)),
            pl.BlockSpec((1, Sk, D), lambda b: (b, 0, 0)),
            pl.BlockSpec((D, D), lambda b: (0, 0)),
            pl.BlockSpec((1, D), lambda b: (0, 0)),
            pl.BlockSpec((D, 2 * D), lambda b: (0, 0)),
            pl.BlockSpec((1, 2 * D), lambda b: (0, 0)),
            pl.BlockSpec((D, D), lambda b: (0, 0)),
            pl.BlockSpec((1, D), lambda b: (0, 0)),
            pl.BlockSpec((1, D), lambda b: (0, 0)),
            pl.BlockSpec((1, D), lambda b: (0, 0)),
        ],
        out_specs=pl.BlockSpec((1, Sq, D), lambda b: (b, 0, 0)),
        out_shape=jax.ShapeDtypeStruct((B, Sq, D), jnp.float32),
        compiler_params=_PARALLEL,
    )(x, mem, p["wq"], p["bq"].reshape(1, D), p["wkv"],
      p["bkv"].reshape(1, 2 * D), p["wo"], p["bo"].reshape(1, D),
      ln["g"].reshape(1, D), ln["b"].reshape(1, D))


# ----------------------------------------------------------------------------
# Plain-JAX glue around the kernels
# ----------------------------------------------------------------------------
def interp_linear(x, out_size):
    """F.interpolate(mode='linear', align_corners=False).  x:(B, C, Lin)."""
    Lin = x.shape[-1]
    scale = Lin / out_size
    i = jnp.arange(out_size, dtype=jnp.float32)
    src = jnp.maximum((i + 0.5) * scale - 0.5, 0.0)
    i0 = jnp.floor(src).astype(jnp.int32)
    i0 = jnp.minimum(i0, Lin - 1)
    i1 = jnp.minimum(i0 + 1, Lin - 1)
    lam = src - i0.astype(jnp.float32)
    return x[..., i0] * (1.0 - lam) + x[..., i1] * lam


def conv1d_relu_pool(x, w_flat, b):
    """Conv1d(k=3,s=1,p=1) + ReLU + MaxPool1d(2,2), fused.
    x:(B, L, Cin) channels-last; w_flat:(Cin*3, Cout) bf16 (pre-flattened)."""
    B, L, Cin = x.shape
    Cout = w_flat.shape[1]
    Lo = L // 2
    xp = jnp.pad(x, ((0, 0), (1, 1), (0, 0)))
    cols = jnp.stack([xp[:, k:k + L, :] for k in range(3)], axis=-1)  # (B,L,Cin,3)
    cols = cols.reshape(B, L, Cin * 3)[:, : 2 * Lo, :].reshape(B, Lo, 2, Cin * 3)
    x_even = cols[:, :, 0, :].reshape(B * Lo, Cin * 3)
    x_odd = cols[:, :, 1, :].reshape(B * Lo, Cin * 3)
    y = pallas_conv_relu_pool(x_even, x_odd, w_flat, b)
    return y.reshape(B, Lo, Cout)


def layernorm_bsd(x, p):
    B, S, D = x.shape
    return pallas_layernorm(x.reshape(B * S, D), p["g"], p["b"]).reshape(B, S, D)


def ffn_ln_bsd(x, p, ln):
    B, S, D = x.shape
    return pallas_ffn_ln(x.reshape(B * S, D), p, ln).reshape(B, S, D)


def encoder_layer(x, p, nhead):
    # post-norm (norm_first=False); dropout omitted (eval semantics)
    x = fused_self_mha_ln(x, p["sa"], p["ln1"], nhead)
    x = ffn_ln_bsd(x, p["ffn"], p["ln2"])
    return x


def decoder_layer(x, mem, p, nhead):
    x = fused_self_mha_ln(x, p["sa"], p["ln1"], nhead)
    x = fused_cross_mha_ln(x, mem, p["ca"], p["ln2"], nhead)
    x = ffn_ln_bsd(x, p["ffn"], p["ln3"])
    return x


def forward(params, eye_data, eeg_data, *, eeg_length, nhead=8):
    """eye_data:(B, eye_len, 4)  eeg_data:(B, eeg_len, 32) -> (B, num_classes)."""
    B = eye_data.shape[0]

    # eye_data.permute(0,2,1) -> interpolate(size=eeg_length) -> permute back
    eye_ncl = jnp.transpose(eye_data, (0, 2, 1))              # (B, 4, eye_len)
    eye_ncl = interp_linear(eye_ncl, eeg_length)              # (B, 4, eeg_len)
    eye_blc = jnp.transpose(eye_ncl, (0, 2, 1))               # (B, eeg_len, 4)

    # EEG CNN (conv+relu+pool fused per stage)
    x = conv1d_relu_pool(eeg_data, params["eeg_c1_w"], params["eeg_c1_b"])
    eeg_feat = conv1d_relu_pool(x, params["eeg_c2_w"], params["eeg_c2_b"])   # (B,L/4,128)

    # Eye CNN
    y = conv1d_relu_pool(eye_blc, params["eye_c1_w"], params["eye_c1_b"])
    eye_feat = conv1d_relu_pool(y, params["eye_c2_w"], params["eye_c2_b"])   # (B,L/4,64)

    combined = jnp.concatenate([eeg_feat, eye_feat], axis=2)  # (B, S, 192)
    S = combined.shape[1]
    combined = pallas_linear(combined.reshape(B * S, 192),
                             params["fusion_w"], params["fusion_b"])
    combined = combined.reshape(B, S, 128)                    # batch-first (B, S, D)

    # nn.Transformer(src=combined, tgt=combined), eval semantics
    # TODO(synk): no tgt/src masks, matching the reference call (no masks passed).
    mem = combined
    for lp in params["enc"]:
        mem = encoder_layer(mem, lp, nhead)
    mem = layernorm_bsd(mem, params["enc_norm"])

    out = combined
    for lp in params["dec"]:
        out = decoder_layer(out, mem, lp, nhead)
    out = layernorm_bsd(out, params["dec_norm"])

    pooled = jnp.mean(out, axis=1)                             # (B, 128)
    # tiny 128->num_classes head: sub-tile sized, leave to XLA
    logits = pooled @ params["fc_w"] + params["fc_b"]
    return logits


# ----------------------------------------------------------------------------
# Deterministic parameter construction (synthetic, not a checkpoint load)
# ----------------------------------------------------------------------------
def init_params(key, d_model=128, nhead=8, ff=2048, num_classes=13,
                n_enc=2, n_dec=6):
    keys = iter(jax.random.split(key, 512))

    def w(shape, scale=0.05):
        return jax.random.normal(next(keys), shape, jnp.float32) * scale

    def mha_p():
        # packed QKV projection weight (D, 3D) and bias (3D,)
        return {"wqkv": w((d_model, 3 * d_model)), "bqkv": w((3 * d_model,), 0.01),
                "wo": w((d_model, d_model)), "bo": w((d_model,), 0.01)}

    def ln_p():
        return {"g": jnp.ones((d_model,), jnp.float32),
                "b": jnp.zeros((d_model,), jnp.float32)}

    def ffn_p():
        return {"w1": w((d_model, ff)), "b1": w((ff,), 0.01),
                "w2": w((ff, d_model)), "b2": w((d_model,), 0.01)}

    params = {
        "eeg_c1_w": w((64, 32, 3)), "eeg_c1_b": w((64,), 0.01),
        "eeg_c2_w": w((128, 64, 3)), "eeg_c2_b": w((128,), 0.01),
        "eye_c1_w": w((32, 4, 3)), "eye_c1_b": w((32,), 0.01),
        "eye_c2_w": w((64, 32, 3)), "eye_c2_b": w((64,), 0.01),
        "fusion_w": w((128 + 64, d_model)), "fusion_b": w((d_model,), 0.01),
        "enc": [{"sa": mha_p(), "ln1": ln_p(), "ffn": ffn_p(), "ln2": ln_p()}
                for _ in range(n_enc)],
        "dec": [{"sa": mha_p(), "ln1": ln_p(), "ca": mha_p(), "ln2": ln_p(),
                 "ffn": ffn_p(), "ln3": ln_p()} for _ in range(n_dec)],
        "enc_norm": ln_p(),
        "dec_norm": ln_p(),
        "fc_w": w((d_model, num_classes)), "fc_b": w((num_classes,), 0.01),
    }
    return params


def prepare_params(p, d_model=128):
    """One-time conversion to kernel-ready layouts: bf16 matmul weights,
    flattened conv weights, pre-split cross-attention projections."""
    bf16 = jnp.bfloat16

    def conv_w(w):                       # (Cout, Cin, 3) -> (Cin*3, Cout) bf16
        return w.reshape(w.shape[0], -1).T.astype(bf16)

    def self_mha(m):
        return {"wqkv": m["wqkv"].astype(bf16), "bqkv": m["bqkv"],
                "wo": m["wo"].astype(bf16), "bo": m["bo"]}

    def cross_mha(m):
        D = d_model
        return {"wq": m["wqkv"][:, :D].astype(bf16), "bq": m["bqkv"][:D],
                "wkv": m["wqkv"][:, D:].astype(bf16), "bkv": m["bqkv"][D:],
                "wo": m["wo"].astype(bf16), "bo": m["bo"]}

    def ffn(m):
        return {"w1": m["w1"].astype(bf16), "b1": m["b1"],
                "w2": m["w2"].astype(bf16), "b2": m["b2"]}

    out = {
        "eeg_c1_w": conv_w(p["eeg_c1_w"]), "eeg_c1_b": p["eeg_c1_b"],
        "eeg_c2_w": conv_w(p["eeg_c2_w"]), "eeg_c2_b": p["eeg_c2_b"],
        "eye_c1_w": conv_w(p["eye_c1_w"]), "eye_c1_b": p["eye_c1_b"],
        "eye_c2_w": conv_w(p["eye_c2_w"]), "eye_c2_b": p["eye_c2_b"],
        "fusion_w": p["fusion_w"].astype(bf16), "fusion_b": p["fusion_b"],
        "enc": [{"sa": self_mha(lp["sa"]), "ln1": lp["ln1"],
                 "ffn": ffn(lp["ffn"]), "ln2": lp["ln2"]} for lp in p["enc"]],
        "dec": [{"sa": self_mha(lp["sa"]), "ln1": lp["ln1"],
                 "ca": cross_mha(lp["ca"]), "ln2": lp["ln2"],
                 "ffn": ffn(lp["ffn"]), "ln3": lp["ln3"]} for lp in p["dec"]],
        "enc_norm": p["enc_norm"], "dec_norm": p["dec_norm"],
        "fc_w": p["fc_w"], "fc_b": p["fc_b"],
    }
    return out


# ----------------------------------------------------------------------------
if __name__ == "__main__":
    # Small shapes consistent with the module (original: eeg_len=1280, eye_len=600)
    B = 2
    EEG_LEN, EYE_LEN = 128, 60
    EEG_CH, EYE_CH = 32, 4
    NUM_CLASSES = 13

    key = jax.random.PRNGKey(0)
    kp, ke, kg = jax.random.split(key, 3)
    params = prepare_params(init_params(kp, num_classes=NUM_CLASSES))

    eye_data = jax.random.normal(ke, (B, EYE_LEN, EYE_CH), jnp.float32)
    eeg_data = jax.random.normal(kg, (B, EEG_LEN, EEG_CH), jnp.float32)

    fwd = jax.jit(functools.partial(forward, eeg_length=EEG_LEN))
    out = fwd(params, eye_data, eeg_data)
    jax.block_until_ready(out)
    assert out.shape == (B, NUM_CLASSES) and out.dtype == jnp.float32
    assert bool(jnp.all(jnp.isfinite(out)))
    print("KERNEL_OK")
</pallas_src>

<mosaic_0001>
module attributes {stable_mosaic.version = 11 : i64} {
  func.func @_conv_relu_pool_kernel(%arg0: i32, %arg1: memref<128x12xf32, #tpu.memory_space<vmem>>, %arg2: memref<128x12xf32, #tpu.memory_space<vmem>>, %arg3: memref<12x32xbf16, #tpu.memory_space<vmem>>, %arg4: memref<1x32xf32, #tpu.memory_space<vmem>>, %arg5: memref<128x32xf32, #tpu.memory_space<vmem>>) attributes {dimension_semantics = [#tpu.dimension_semantics<parallel>], iteration_bounds = array<i64: 1>, scalar_prefetch = 0 : i64, scratch_operands = 0 : i64, tpu.core_type = #tpu.core_type<tc>, window_params = [{transform_indices = @transform_0, window_bounds = array<i64: 128, 12>}, {transform_indices = @transform_1, window_bounds = array<i64: 128, 12>}, {pipeline_mode = #tpu.pipeline_mode<synchronous>, transform_indices = @transform_2, window_bounds = array<i64: 12, 32>}, {pipeline_mode = #tpu.pipeline_mode<synchronous>, transform_indices = @transform_3, window_bounds = array<i64: 1, 32>}, {transform_indices = @transform_4, window_bounds = array<i64: 128, 32>}]} {
    %c0 = arith.constant 0 : index
    %c0_0 = arith.constant 0 : index
    %0 = vector.load %arg3[%c0, %c0_0] : memref<12x32xbf16, #tpu.memory_space<vmem>>, vector<12x32xbf16>
    %c0_1 = arith.constant 0 : index
    %c0_2 = arith.constant 0 : index
    %1 = vector.load %arg1[%c0_1, %c0_2] : memref<128x12xf32, #tpu.memory_space<vmem>>, vector<128x12xf32>
    %2 = arith.truncf %1 : vector<128x12xf32> to vector<128x12xbf16>
    %cst = arith.constant dense<0.000000e+00> : vector<128x32xf32>
    %3 = tpu.matmul %2, %0, %cst {dimension_numbers = #tpu.dot_dimension_numbers<[1], [0], [0], [1], [0, 0, 1, 1], [], []>} : vector<128x12xbf16>, vector<12x32xbf16>, vector<128x32xf32> -> vector<128x32xf32>
    %c0_3 = arith.constant 0 : index
    %c0_4 = arith.constant 0 : index
    %4 = vector.load %arg2[%c0_3, %c0_4] : memref<128x12xf32, #tpu.memory_space<vmem>>, vector<128x12xf32>
    %5 = arith.truncf %4 : vector<128x12xf32> to vector<128x12xbf16>
    %cst_5 = arith.constant dense<0.000000e+00> : vector<128x32xf32>
    %6 = tpu.matmul %5, %0, %cst_5 {dimension_numbers = #tpu.dot_dimension_numbers<[1], [0], [0], [1], [0, 0, 1, 1], [], []>} : vector<128x12xbf16>, vector<12x32xbf16>, vector<128x32xf32> -> vector<128x32xf32>
    %7 = arith.maximumf %3, %6 : vector<128x32xf32>
    %c0_6 = arith.constant 0 : index
    %c0_7 = arith.constant 0 : index
    %8 = vector.load %arg4[%c0_6, %c0_7] : memref<1x32xf32, #tpu.memory_space<vmem>>, vector<1x32xf32>
    %9 = vector.broadcast %8 : vector<1x32xf32> to vector<128x32xf32>
    %10 = arith.addf %7, %9 : vector<128x32xf32>
    %cst_8 = arith.constant 0.000000e+00 : f32
    %11 = vector.broadcast %cst_8 : f32 to vector<128x32xf32>
    %12 = arith.maximumf %10, %11 : vector<128x32xf32>
    %c0_9 = arith.constant 0 : index
    %c0_10 = arith.constant 0 : index
    %13 = vector.load %arg5[%c0_9, %c0_10] : memref<128x32xf32, #tpu.memory_space<vmem>>, vector<128x32xf32>
    tpu.vector_store %arg5[%c0_9, %c0_10], %12 {strides = array<i32>} : memref<128x32xf32, #tpu.memory_space<vmem>>, vector<128x32xf32>,
    return
  }
  func.func @transform_0(%arg0: i32) -> (i32, i32) {
    %c0_i32 = arith.constant 0 : i32
    %c0_i32_0 = arith.constant 0 : i32
    return %arg0, %c0_i32 : i32, i32
  }
  func.func @transform_1(%arg0: i32) -> (i32, i32) {
    %c0_i32 = arith.constant 0 : i32
    %c0_i32_0 = arith.constant 0 : i32
    return %arg0, %c0_i32 : i32, i32
  }
  func.func @transform_2(%arg0: i32) -> (i32, i32) {
    %c0_i32 = arith.constant 0 : i32
    %c0_i32_0 = arith.constant 0 : i32
    %c0_i32_1 = arith.constant 0 : i32
    return %c0_i32, %c0_i32_0 : i32, i32
  }
  func.func @transform_3(%arg0: i32) -> (i32, i32) {
    %c0_i32 = arith.constant 0 : i32
    %c0_i32_0 = arith.constant 0 : i32
    %c0_i32_1 = arith.constant 0 : i32
    return %c0_i32, %c0_i32_0 : i32, i32
  }
  func.func @transform_4(%arg0: i32) -> (i32, i32) {
    %c0_i32 = arith.constant 0 : i32
    %c0_i32_0 = arith.constant 0 : i32
    return %arg0, %c0_i32 : i32, i32
  }
}

module attributes {stable_mosaic.version = 11 : i64} {
  func.func @_conv_relu_pool_kernel(%arg0: i32, %arg1: memref<64x96xf32, #tpu.memory_space<vmem>>, %arg2: memref<64x96xf32, #tpu.memory_space<vmem>>, %arg3: memref<96x64xbf16, #tpu.memory_space<vmem>>, %arg4: memref<1x64xf32, #tpu.memory_space<vmem>>, %arg5: memref<64x64xf32, #tpu.memory_space<vmem>>) attributes {dimension_semantics = [#tpu.dimension_semantics<parallel>], iteration_bounds = array<i64: 1>, scalar_prefetch = 0 : i64, scratch_operands = 0 : i64, tpu.core_type = #tpu.core_type<tc>, window_params = [{transform_indices = @transform_0, window_bounds = array<i64: 64, 96>}, {transform_indices = @transform_1, window_bounds = array<i64: 64, 96>}, {pipeline_mode = #tpu.pipeline_mode<synchronous>, transform_indices = @transform_2, window_bounds = array<i64: 96, 64>}, {pipeline_mode = #tpu.pipeline_mode<synchronous>, transform_indices = @transform_3, window_bounds = array<i64: 1, 64>}, {transform_indices = @transform_4, window_bounds = array<i64: 64, 64>}]} {
    %c0 = arith.constant 0 : index
    %c0_0 = arith.constant 0 : index
    %0 = vector.load %arg3[%c0, %c0_0] : memref<96x64xbf16, #tpu.memory_space<vmem>>, vector<96x64xbf16>
    %c0_1 = arith.constant 0 : index
    %c0_2 = arith.constant 0 : index
    %1 = vector.load %arg1[%c0_1, %c0_2] : memref<64x96xf32, #tpu.memory_space<vmem>>, vector<64x96xf32>
    %2 = arith.truncf %1 : vector<64x96xf32> to vector<64x96xbf16>
    %cst = arith.constant dense<0.000000e+00> : vector<64x64xf32>
    %3 = tpu.matmul %2, %0, %cst {dimension_numbers = #tpu.dot_dimension_numbers<[1], [0], [0], [1], [0, 0, 1, 1], [], []>} : vector<64x96xbf16>, vector<96x64xbf16>, vector<64x64xf32> -> vector<64x64xf32>
    %c0_3 = arith.constant 0 : index
    %c0_4 = arith.constant 0 : index
    %4 = vector.load %arg2[%c0_3, %c0_4] : memref<64x96xf32, #tpu.memory_space<vmem>>, vector<64x96xf32>
    %5 = arith.truncf %4 : vector<64x96xf32> to vector<64x96xbf16>
    %cst_5 = arith.constant dense<0.000000e+00> : vector<64x64xf32>
    %6 = tpu.matmul %5, %0, %cst_5 {dimension_numbers = #tpu.dot_dimension_numbers<[1], [0], [0], [1], [0, 0, 1, 1], [], []>} : vector<64x96xbf16>, vector<96x64xbf16>, vector<64x64xf32> -> vector<64x64xf32>
    %7 = arith.maximumf %3, %6 : vector<64x64xf32>
    %c0_6 = arith.constant 0 : index
    %c0_7 = arith.constant 0 : index
    %8 = vector.load %arg4[%c0_6, %c0_7] : memref<1x64xf32, #tpu.memory_space<vmem>>, vector<1x64xf32>
    %9 = vector.broadcast %8 : vector<1x64xf32> to vector<64x64xf32>
    %10 = arith.addf %7, %9 : vector<64x64xf32>
    %cst_8 = arith.constant 0.000000e+00 : f32
    %11 = vector.broadcast %cst_8 : f32 to vector<64x64xf32>
    %12 = arith.maximumf %10, %11 : vector<64x64xf32>
    %c0_9 = arith.constant 0 : index
    %c0_10 = arith.constant 0 : index
    %13 = vector.load %arg5[%c0_9, %c0_10] : memref<64x64xf32, #tpu.memory_space<vmem>>, vector<64x64xf32>
    tpu.vector_store %arg5[%c0_9, %c0_10], %12 {strides = array<i32>} : memref<64x64xf32, #tpu.memory_space<vmem>>, vector<64x64xf32>,
    return
  }
  func.func @transform_0(%arg0: i32) -> (i32, i32) {
    %c0_i32 = arith.constant 0 : i32
    %c0_i32_0 = arith.constant 0 : i32
    return %arg0, %c0_i32 : i32, i32
  }
  func.func @transform_1(%arg0: i32) -> (i32, i32) {
    %c0_i32 = arith.constant 0 : i32
    %c0_i32_0 = arith.constant 0 : i32
    return %arg0, %c0_i32 : i32, i32
  }
  func.func @transform_2(%arg0: i32) -> (i32, i32) {
    %c0_i32 = arith.constant 0 : i32
    %c0_i32_0 = arith.constant 0 : i32
    %c0_i32_1 = arith.constant 0 : i32
    return %c0_i32, %c0_i32_0 : i32, i32
  }
  func.func @transform_3(%arg0: i32) -> (i32, i32) {
    %c0_i32 = arith.constant 0 : i32
    %c0_i32_0 = arith.constant 0 : i32
    %c0_i32_1 = arith.constant 0 : i32
    return %c0_i32, %c0_i32_0 : i32, i32
  }
  func.func @transform_4(%arg0: i32) -> (i32, i32) {
    %c0_i32 = arith.constant 0 : i32
    %c0_i32_0 = arith.constant 0 : i32
    return %arg0, %c0_i32 : i32, i32
  }
}

module attributes {stable_mosaic.version = 11 : i64} {
  func.func @_conv_relu_pool_kernel(%arg0: i32, %arg1: memref<128x96xf32, #tpu.memory_space<vmem>>, %arg2: memref<128x96xf32, #tpu.memory_space<vmem>>, %arg3: memref<96x64xbf16, #tpu.memory_space<vmem>>, %arg4: memref<1x64xf32, #tpu.memory_space<vmem>>, %arg5: memref<128x64xf32, #tpu.memory_space<vmem>>) attributes {dimension_semantics = [#tpu.dimension_semantics<parallel>], iteration_bounds = array<i64: 1>, scalar_prefetch = 0 : i64, scratch_operands = 0 : i64, tpu.core_type = #tpu.core_type<tc>, window_params = [{transform_indices = @transform_0, window_bounds = array<i64: 128, 96>}, {transform_indices = @transform_1, window_bounds = array<i64: 128, 96>}, {pipeline_mode = #tpu.pipeline_mode<synchronous>, transform_indices = @transform_2, window_bounds = array<i64: 96, 64>}, {pipeline_mode = #tpu.pipeline_mode<synchronous>, transform_indices = @transform_3, window_bounds = array<i64: 1, 64>}, {transform_indices = @transform_4, window_bounds = array<i64: 128, 64>}]} {
    %c0 = arith.constant 0 : index
    %c0_0 = arith.constant 0 : index
    %0 = vector.load %arg3[%c0, %c0_0] : memref<96x64xbf16, #tpu.memory_space<vmem>>, vector<96x64xbf16>
    %c0_1 = arith.constant 0 : index
    %c0_2 = arith.constant 0 : index
    %1 = vector.load %arg1[%c0_1, %c0_2] : memref<128x96xf32, #tpu.memory_space<vmem>>, vector<128x96xf32>
    %2 = arith.truncf %1 : vector<128x96xf32> to vector<128x96xbf16>
    %cst = arith.constant dense<0.000000e+00> : vector<128x64xf32>
    %3 = tpu.matmul %2, %0, %cst {dimension_numbers = #tpu.dot_dimension_numbers<[1], [0], [0], [1], [0, 0, 1, 1], [], []>} : vector<128x96xbf16>, vector<96x64xbf16>, vector<128x64xf32> -> vector<128x64xf32>
    %c0_3 = arith.constant 0 : index
    %c0_4 = arith.constant 0 : index
    %4 = vector.load %arg2[%c0_3, %c0_4] : memref<128x96xf32, #tpu.memory_space<vmem>>, vector<128x96xf32>
    %5 = arith.truncf %4 : vector<128x96xf32> to vector<128x96xbf16>
    %cst_5 = arith.constant dense<0.000000e+00> : vector<128x64xf32>
    %6 = tpu.matmul %5, %0, %cst_5 {dimension_numbers = #tpu.dot_dimension_numbers<[1], [0], [0], [1], [0, 0, 1, 1], [], []>} : vector<128x96xbf16>, vector<96x64xbf16>, vector<128x64xf32> -> vector<128x64xf32>
    %7 = arith.maximumf %3, %6 : vector<128x64xf32>
    %c0_6 = arith.constant 0 : index
    %c0_7 = arith.constant 0 : index
    %8 = vector.load %arg4[%c0_6, %c0_7] : memref<1x64xf32, #tpu.memory_space<vmem>>, vector<1x64xf32>
    %9 = vector.broadcast %8 : vector<1x64xf32> to vector<128x64xf32>
    %10 = arith.addf %7, %9 : vector<128x64xf32>
    %cst_8 = arith.constant 0.000000e+00 : f32
    %11 = vector.broadcast %cst_8 : f32 to vector<128x64xf32>
    %12 = arith.maximumf %10, %11 : vector<128x64xf32>
    %c0_9 = arith.constant 0 : index
    %c0_10 = arith.constant 0 : index
    %13 = vector.load %arg5[%c0_9, %c0_10] : memref<128x64xf32, #tpu.memory_space<vmem>>, vector<128x64xf32>
    tpu.vector_store %arg5[%c0_9, %c0_10], %12 {strides = array<i32>} : memref<128x64xf32, #tpu.memory_space<vmem>>, vector<128x64xf32>,
    return
  }
  func.func @transform_0(%arg0: i32) -> (i32, i32) {
    %c0_i32 = arith.constant 0 : i32
    %c0_i32_0 = arith.constant 0 : i32
    return %arg0, %c0_i32 : i32, i32
  }
  func.func @transform_1(%arg0: i32) -> (i32, i32) {
    %c0_i32 = arith.constant 0 : i32
    %c0_i32_0 = arith.constant 0 : i32
    return %arg0, %c0_i32 : i32, i32
  }
  func.func @transform_2(%arg0: i32) -> (i32, i32) {
    %c0_i32 = arith.constant 0 : i32
    %c0_i32_0 = arith.constant 0 : i32
    %c0_i32_1 = arith.constant 0 : i32
    return %c0_i32, %c0_i32_0 : i32, i32
  }
  func.func @transform_3(%arg0: i32) -> (i32, i32) {
    %c0_i32 = arith.constant 0 : i32
    %c0_i32_0 = arith.constant 0 : i32
    %c0_i32_1 = arith.constant 0 : i32
    return %c0_i32, %c0_i32_0 : i32, i32
  }
  func.func @transform_4(%arg0: i32) -> (i32, i32) {
    %c0_i32 = arith.constant 0 : i32
    %c0_i32_0 = arith.constant 0 : i32
    return %arg0, %c0_i32 : i32, i32
  }
}

module attributes {stable_mosaic.version = 11 : i64} {
  func.func @_conv_relu_pool_kernel(%arg0: i32, %arg1: memref<64x192xf32, #tpu.memory_space<vmem>>, %arg2: memref<64x192xf32, #tpu.memory_space<vmem>>, %arg3: memref<192x128xbf16, #tpu.memory_space<vmem>>, %arg4: memref<1x128xf32, #tpu.memory_space<vmem>>, %arg5: memref<64x128xf32, #tpu.memory_space<vmem>>) attributes {dimension_semantics = [#tpu.dimension_semantics<parallel>], iteration_bounds = array<i64: 1>, scalar_prefetch = 0 : i64, scratch_operands = 0 : i64, tpu.core_type = #tpu.core_type<tc>, window_params = [{transform_indices = @transform_0, window_bounds = array<i64: 64, 192>}, {transform_indices = @transform_1, window_bounds = array<i64: 64, 192>}, {pipeline_mode = #tpu.pipeline_mode<synchronous>, transform_indices = @transform_2, window_bounds = array<i64: 192, 128>}, {pipeline_mode = #tpu.pipeline_mode<synchronous>, transform_indices = @transform_3, window_bounds = array<i64: 1, 128>}, {transform_indices = @transform_4, window_bounds = array<i64: 64, 128>}]} {
    %c0 = arith.constant 0 : index
    %c0_0 = arith.constant 0 : index
    %0 = vector.load %arg3[%c0, %c0_0] : memref<192x128xbf16, #tpu.memory_space<vmem>>, vector<192x128xbf16>
    %c0_1 = arith.constant 0 : index
    %c0_2 = arith.constant 0 : index
    %1 = vector.load %arg1[%c0_1, %c0_2] : memref<64x192xf32, #tpu.memory_space<vmem>>, vector<64x192xf32>
    %2 = arith.truncf %1 : vector<64x192xf32> to vector<64x192xbf16>
    %cst = arith.constant dense<0.000000e+00> : vector<64x128xf32>
    %3 = tpu.matmul %2, %0, %cst {dimension_numbers = #tpu.dot_dimension_numbers<[1], [0], [0], [1], [0, 0, 1, 1], [], []>} : vector<64x192xbf16>, vector<192x128xbf16>, vector<64x128xf32> -> vector<64x128xf32>
    %c0_3 = arith.constant 0 : index
    %c0_4 = arith.constant 0 : index
    %4 = vector.load %arg2[%c0_3, %c0_4] : memref<64x192xf32, #tpu.memory_space<vmem>>, vector<64x192xf32>
    %5 = arith.truncf %4 : vector<64x192xf32> to vector<64x192xbf16>
    %cst_5 = arith.constant dense<0.000000e+00> : vector<64x128xf32>
    %6 = tpu.matmul %5, %0, %cst_5 {dimension_numbers = #tpu.dot_dimension_numbers<[1], [0], [0], [1], [0, 0, 1, 1], [], []>} : vector<64x192xbf16>, vector<192x128xbf16>, vector<64x128xf32> -> vector<64x128xf32>
    %7 = arith.maximumf %3, %6 : vector<64x128xf32>
    %c0_6 = arith.constant 0 : index
    %c0_7 = arith.constant 0 : index
    %8 = vector.load %arg4[%c0_6, %c0_7] : memref<1x128xf32, #tpu.memory_space<vmem>>, vector<1x128xf32>
    %9 = vector.broadcast %8 : vector<1x128xf32> to vector<64x128xf32>
    %10 = arith.addf %7, %9 : vector<64x128xf32>
    %cst_8 = arith.constant 0.000000e+00 : f32
    %11 = vector.broadcast %cst_8 : f32 to vector<64x128xf32>
    %12 = arith.maximumf %10, %11 : vector<64x128xf32>
    %c0_9 = arith.constant 0 : index
    %c0_10 = arith.constant 0 : index
    %13 = vector.load %arg5[%c0_9, %c0_10] : memref<64x128xf32, #tpu.memory_space<vmem>>, vector<64x128xf32>
    tpu.vector_store %arg5[%c0_9, %c0_10], %12 {strides = array<i32>} : memref<64x128xf32, #tpu.memory_space<vmem>>, vector<64x128xf32>,
    return
  }
  func.func @transform_0(%arg0: i32) -> (i32, i32) {
    %c0_i32 = arith.constant 0 : i32
    %c0_i32_0 = arith.constant 0 : i32
    return %arg0, %c0_i32 : i32, i32
  }
  func.func @transform_1(%arg0: i32) -> (i32, i32) {
    %c0_i32 = arith.constant 0 : i32
    %c0_i32_0 = arith.constant 0 : i32
    return %arg0, %c0_i32 : i32, i32
  }
  func.func @transform_2(%arg0: i32) -> (i32, i32) {
    %c0_i32 = arith.constant 0 : i32
    %c0_i32_0 = arith.constant 0 : i32
    %c0_i32_1 = arith.constant 0 : i32
    return %c0_i32, %c0_i32_0 : i32, i32
  }
  func.func @transform_3(%arg0: i32) -> (i32, i32) {
    %c0_i32 = arith.constant 0 : i32
    %c0_i32_0 = arith.constant 0 : i32
    %c0_i32_1 = arith.constant 0 : i32
    return %c0_i32, %c0_i32_0 : i32, i32
  }
  func.func @transform_4(%arg0: i32) -> (i32, i32) {
    %c0_i32 = arith.constant 0 : i32
    %c0_i32_0 = arith.constant 0 : i32
    return %arg0, %c0_i32 : i32, i32
  }
}

module attributes {stable_mosaic.version = 11 : i64} {
  func.func @_matmul_bias_kernel(%arg0: i32, %arg1: memref<64x192xf32, #tpu.memory_space<vmem>>, %arg2: memref<192x128xbf16, #tpu.memory_space<vmem>>, %arg3: memref<1x128xf32, #tpu.memory_space<vmem>>, %arg4: memref<64x128xf32, #tpu.memory_space<vmem>>) attributes {dimension_semantics = [#tpu.dimension_semantics<parallel>], iteration_bounds = array<i64: 1>, scalar_prefetch = 0 : i64, scratch_operands = 0 : i64, tpu.core_type = #tpu.core_type<tc>, window_params = [{transform_indices = @transform_0, window_bounds = array<i64: 64, 192>}, {pipeline_mode = #tpu.pipeline_mode<synchronous>, transform_indices = @transform_1, window_bounds = array<i64: 192, 128>}, {pipeline_mode = #tpu.pipeline_mode<synchronous>, transform_indices = @transform_2, window_bounds = array<i64: 1, 128>}, {transform_indices = @transform_3, window_bounds = array<i64: 64, 128>}]} {
    %c0 = arith.constant 0 : index
    %c0_0 = arith.constant 0 : index
    %0 = vector.load %arg1[%c0, %c0_0] : memref<64x192xf32, #tpu.memory_space<vmem>>, vector<64x192xf32>
    %1 = arith.truncf %0 : vector<64x192xf32> to vector<64x192xbf16>
    %c0_1 = arith.constant 0 : index
    %c0_2 = arith.constant 0 : index
    %2 = vector.load %arg2[%c0_1, %c0_2] : memref<192x128xbf16, #tpu.memory_space<vmem>>, vector<192x128xbf16>
    %cst = arith.constant dense<0.000000e+00> : vector<64x128xf32>
    %3 = tpu.matmul %1, %2, %cst {dimension_numbers = #tpu.dot_dimension_numbers<[1], [0], [0], [1], [0, 0, 1, 1], [], []>} : vector<64x192xbf16>, vector<192x128xbf16>, vector<64x128xf32> -> vector<64x128xf32>
    %c0_3 = arith.constant 0 : index
    %c0_4 = arith.constant 0 : index
    %4 = vector.load %arg3[%c0_3, %c0_4] : memref<1x128xf32, #tpu.memory_space<vmem>>, vector<1x128xf32>
    %5 = vector.broadcast %4 : vector<1x128xf32> to vector<64x128xf32>
    %6 = arith.addf %3, %5 : vector<64x128xf32>
    %c0_5 = arith.constant 0 : index
    %c0_6 = arith.constant 0 : index
    %7 = vector.load %arg4[%c0_5, %c0_6] : memref<64x128xf32, #tpu.memory_space<vmem>>, vector<64x128xf32>
    tpu.vector_store %arg4[%c0_5, %c0_6], %6 {strides = array<i32>} : memref<64x128xf32, #tpu.memory_space<vmem>>, vector<64x128xf32>,
    return
  }
  func.func @transform_0(%arg0: i32) -> (i32, i32) {
    %c0_i32 = arith.constant 0 : i32
    %c0_i32_0 = arith.constant 0 : i32
    return %arg0, %c0_i32 : i32, i32
  }
  func.func @transform_1(%arg0: i32) -> (i32, i32) {
    %c0_i32 = arith.constant 0 : i32
    %c0_i32_0 = arith.constant 0 : i32
    %c0_i32_1 = arith.constant 0 : i32
    return %c0_i32, %c0_i32_0 : i32, i32
  }
  func.func @transform_2(%arg0: i32) -> (i32, i32) {
    %c0_i32 = arith.constant 0 : i32
    %c0_i32_0 = arith.constant 0 : i32
    %c0_i32_1 = arith.constant 0 : i32
    return %c0_i32, %c0_i32_0 : i32, i32
  }
  func.func @transform_3(%arg0: i32) -> (i32, i32) {
    %c0_i32 = arith.constant 0 : i32
    %c0_i32_0 = arith.constant 0 : i32
    return %arg0, %c0_i32 : i32, i32
  }
}

module attributes {stable_mosaic.version = 11 : i64} {
  func.func @_ffn_ln_kernel(%arg0: i32, %arg1: i32, %arg2: memref<64x128xf32, #tpu.memory_space<vmem>>, %arg3: memref<128x512xbf16, #tpu.memory_space<vmem>>, %arg4: memref<1x512xf32, #tpu.memory_space<vmem>>, %arg5: memref<512x128xbf16, #tpu.memory_space<vmem>>, %arg6: memref<1x128xf32, #tpu.memory_space<vmem>>, %arg7: memref<1x128xf32, #tpu.memory_space<vmem>>, %arg8: memref<1x128xf32, #tpu.memory_space<vmem>>, %arg9: memref<64x128xf32, #tpu.memory_space<vmem>>, %arg10: memref<64x128xf32, #tpu.memory_space<vmem>>) attributes {dimension_semantics = [#tpu.dimension_semantics<parallel>, #tpu.dimension_semantics<arbitrary>], iteration_bounds = array<i64: 1, 4>, scalar_prefetch = 0 : i64, scratch_operands = 1 : i64, tpu.core_type = #tpu.core_type<tc>, window_params = [{transform_indices = @transform_0, window_bounds = array<i64: 64, 128>}, {transform_indices = @transform_1, window_bounds = array<i64: 128, 512>}, {transform_indices = @transform_2, window_bounds = array<i64: 1, 512>}, {transform_indices = @transform_3, window_bounds = array<i64: 512, 128>}, {pipeline_mode = #tpu.pipeline_mode<synchronous>, transform_indices = @transform_4, window_bounds = array<i64: 1, 128>}, {pipeline_mode = #tpu.pipeline_mode<synchronous>, transform_indices = @transform_5, window_bounds = array<i64: 1, 128>}, {pipeline_mode = #tpu.pipeline_mode<synchronous>, transform_indices = @transform_6, window_bounds = array<i64: 1, 128>}, {transform_indices = @transform_7, window_bounds = array<i64: 64, 128>}]} {
    %c0_i32 = arith.constant 0 : i32
    %0 = arith.cmpi eq, %arg1, %c0_i32 : i32
    %1 = arith.extui %0 : i1 to i32
    %c0_i32_0 = arith.constant 0 : i32
    %2 = arith.cmpi ne, %1, %c0_i32_0 : i32
    scf.if %2 {
      %cst_15 = arith.constant 0.000000e+00 : f32
      %21 = vector.broadcast %cst_15 : f32 to vector<64x128xf32>
      %c0_16 = arith.constant 0 : index
      %c0_17 = arith.constant 0 : index
      %22 = vector.load %arg10[%c0_16, %c0_17] : memref<64x128xf32, #tpu.memory_space<vmem>>, vector<64x128xf32>
      tpu.vector_store %arg10[%c0_16, %c0_17], %21 {strides = array<i32>} : memref<64x128xf32, #tpu.memory_space<vmem>>, vector<64x128xf32>,
    } else {
    }
    %c0 = arith.constant 0 : index
    %c0_1 = arith.constant 0 : index
    %3 = vector.load %arg2[%c0, %c0_1] : memref<64x128xf32, #tpu.memory_space<vmem>>, vector<64x128xf32>
    %4 = arith.truncf %3 : vector<64x128xf32> to vector<64x128xbf16>
    %c0_2 = arith.constant 0 : index
    %c0_3 = arith.constant 0 : index
    %5 = vector.load %arg3[%c0_2, %c0_3] : memref<128x512xbf16, #tpu.memory_space<vmem>>, vector<128x512xbf16>
    %cst = arith.constant dense<0.000000e+00> : vector<64x512xf32>
    %6 = tpu.matmul %4, %5, %cst {dimension_numbers = #tpu.dot_dimension_numbers<[1], [0], [0], [1], [0, 0, 1, 1], [], []>} : vector<64x128xbf16>, vector<128x512xbf16>, vector<64x512xf32> -> vector<64x512xf32>
    %c0_4 = arith.constant 0 : index
    %c0_5 = arith.constant 0 : index
    %7 = vector.load %arg4[%c0_4, %c0_5] : memref<1x512xf32, #tpu.memory_space<vmem>>, vector<1x512xf32>
    %8 = vector.broadcast %7 : vector<1x512xf32> to vector<64x512xf32>
    %9 = arith.addf %6, %8 : vector<64x512xf32>
    %cst_6 = arith.constant 0.000000e+00 : f32
    %10 = vector.broadcast %cst_6 : f32 to vector<64x512xf32>
    %11 = arith.maximumf %9, %10 : vector<64x512xf32>
    %c0_7 = arith.constant 0 : index
    %c0_8 = arith.constant 0 : index
    %12 = vector.load %arg10[%c0_7, %c0_8] : memref<64x128xf32, #tpu.memory_space<vmem>>, vector<64x128xf32>
    %13 = arith.truncf %11 : vector<64x512xf32> to vector<64x512xbf16>
    %c0_9 = arith.constant 0 : index
    %c0_10 = arith.constant 0 : index
    %14 = vector.load %arg5[%c0_9, %c0_10] : memref<512x128xbf16, #tpu.memory_space<vmem>>, vector<512x128xbf16>
    %cst_11 = arith.constant dense<0.000000e+00> : vector<64x128xf32>
    %15 = tpu.matmul %13, %14, %cst_11 {dimension_numbers = #tpu.dot_dimension_numbers<[1], [0], [0], [1], [0, 0, 1, 1], [], []>} : vector<64x512xbf16>, vector<512x128xbf16>, vector<64x128xf32> -> vector<64x128xf32>
    %16 = arith.addf %12, %15 : vector<64x128xf32>
    %c0_12 = arith.constant 0 : index
    %c0_13 = arith.constant 0 : index
    %17 = vector.load %arg10[%c0_12, %c0_13] : memref<64x128xf32, #tpu.memory_space<vmem>>, vector<64x128xf32>
    tpu.vector_store %arg10[%c0_12, %c0_13], %16 {strides = array<i32>} : memref<64x128xf32, #tpu.memory_space<vmem>>, vector<64x128xf32>,
    %c3_i32 = arith.constant 3 : i32
    %18 = arith.cmpi eq, %arg1, %c3_i32 : i32
    %19 = arith.extui %18 : i1 to i32
    %c0_i32_14 = arith.constant 0 : i32
    %20 = arith.cmpi ne, %19, %c0_i32_14 : i32
    scf.if %20 {
      %c0_15 = arith.constant 0 : index
      %c0_16 = arith.constant 0 : index
      %21 = vector.load %arg2[%c0_15, %c0_16] : memref<64x128xf32, #tpu.memory_space<vmem>>, vector<64x128xf32>
      %c0_17 = arith.constant 0 : index
      %c0_18 = arith.constant 0 : index
      %22 = vector.load %arg10[%c0_17, %c0_18] : memref<64x128xf32, #tpu.memory_space<vmem>>, vector<64x128xf32>
      %23 = arith.addf %21, %22 : vector<64x128xf32>
      %c0_19 = arith.constant 0 : index
      %c0_20 = arith.constant 0 : index
      %24 = vector.load %arg6[%c0_19, %c0_20] : memref<1x128xf32, #tpu.memory_space<vmem>>, vector<1x128xf32>
      %25 = vector.broadcast %24 : vector<1x128xf32> to vector<64x128xf32>
      %26 = arith.addf %23, %25 : vector<64x128xf32>
      %cst_21 = arith.constant dense<0.000000e+00> : vector<64xf32>
      %27 = vector.multi_reduction <add>, %26, %cst_21 [1] : vector<64x128xf32> to vector<64xf32>
      %28 = vector.shape_cast %27 : vector<64xf32> to vector<64x1xf32>
      %cst_22 = arith.constant 1.280000e+02 : f32
      %29 = vector.broadcast %cst_22 : f32 to vector<64x1xf32>
      %30 = arith.divf %28, %29 : vector<64x1xf32>
      %31 = vector.broadcast %30 : vector<64x1xf32> to vector<64x128xf32>
      %32 = arith.subf %26, %31 : vector<64x128xf32>
      %33 = arith.mulf %32, %32 : vector<64x128xf32>
      %cst_23 = arith.constant dense<0.000000e+00> : vector<64xf32>
      %34 = vector.multi_reduction <add>, %33, %cst_23 [1] : vector<64x128xf32> to vector<64xf32>
      %35 = vector.shape_cast %34 : vector<64xf32> to vector<64x1xf32>
      %cst_24 = arith.constant 1.280000e+02 : f32
      %36 = vector.broadcast %cst_24 : f32 to vector<64x1xf32>
      %37 = arith.divf %35, %36 : vector<64x1xf32>
      %38 = vector.broadcast %30 : vector<64x1xf32> to vector<64x128xf32>
      %39 = arith.subf %26, %38 : vector<64x128xf32>
      %cst_25 = arith.constant 9.99999974E-6 : f32
      %40 = vector.broadcast %cst_25 : f32 to vector<64x1xf32>
      %41 = arith.addf %37, %40 : vector<64x1xf32>
      %42 = math.rsqrt %41 : vector<64x1xf32>
      %43 = vector.broadcast %42 : vector<64x1xf32> to vector<64x128xf32>
      %44 = arith.mulf %39, %43 : vector<64x128xf32>
      %c0_26 = arith.constant 0 : index
      %c0_27 = arith.constant 0 : index
      %45 = vector.load %arg7[%c0_26, %c0_27] : memref<1x128xf32, #tpu.memory_space<vmem>>, vector<1x128xf32>
      %46 = vector.broadcast %45 : vector<1x128xf32> to vector<64x128xf32>
      %47 = arith.mulf %44, %46 : vector<64x128xf32>
      %c0_28 = arith.constant 0 : index
      %c0_29 = arith.constant 0 : index
      %48 = vector.load %arg8[%c0_28, %c0_29] : memref<1x128xf32, #tpu.memory_space<vmem>>, vector<1x128xf32>
      %49 = vector.broadcast %48 : vector<1x128xf32> to vector<64x128xf32>
      %50 = arith.addf %47, %49 : vector<64x128xf32>
      %c0_30 = arith.constant 0 : index
      %c0_31 = arith.constant 0 : index
      %51 = vector.load %arg9[%c0_30, %c0_31] : memref<64x128xf32, #tpu.memory_space<vmem>>, vector<64x128xf32>
      tpu.vector_store %arg9[%c0_30, %c0_31], %50 {strides = array<i32>} : memref<64x128xf32, #tpu.memory_space<vmem>>, vector<64x128xf32>,
    } else {
    }
    return
  }
  func.func @transform_0(%arg0: i32, %arg1: i32) -> (i32, i32) {
    %c0_i32 = arith.constant 0 : i32
    %c0_i32_0 = arith.constant 0 : i32
    return %arg0, %c0_i32 : i32, i32
  }
  func.func @transform_1(%arg0: i32, %arg1: i32) -> (i32, i32) {
    %c0_i32 = arith.constant 0 : i32
    %c0_i32_0 = arith.constant 0 : i32
    return %c0_i32, %arg1 : i32, i32
  }
  func.func @transform_2(%arg0: i32, %arg1: i32) -> (i32, i32) {
    %c0_i32 = arith.constant 0 : i32
    %c0_i32_0 = arith.constant 0 : i32
    return %c0_i32, %arg1 : i32, i32
  }
  func.func @transform_3(%arg0: i32, %arg1: i32) -> (i32, i32) {
    %c0_i32 = arith.constant 0 : i32
    %c0_i32_0 = arith.constant 0 : i32
    return %arg1, %c0_i32 : i32, i32
  }
  func.func @transform_4(%arg0: i32, %arg1: i32) -> (i32, i32) {
    %c0_i32 = arith.constant 0 : i32
    %c0_i32_0 = arith.constant 0 : i32
    %c0_i32_1 = arith.constant 0 : i32
    return %c0_i32, %c0_i32_0 : i32, i32
  }
  func.func @transform_5(%arg0: i32, %arg1: i32) -> (i32, i32) {
    %c0_i32 = arith.constant 0 : i32
    %c0_i32_0 = arith.constant 0 : i32
    %c0_i32_1 = arith.constant 0 : i32
    return %c0_i32, %c0_i32_0 : i32, i32
  }
  func.func @transform_6(%arg0: i32, %arg1: i32) -> (i32, i32) {
    %c0_i32 = arith.constant 0 : i32
    %c0_i32_0 = arith.constant 0 : i32
    %c0_i32_1 = arith.constant 0 : i32
    return %c0_i32, %c0_i32_0 : i32, i32
  }
  func.func @transform_7(%arg0: i32, %arg1: i32) -> (i32, i32) {
    %c0_i32 = arith.constant 0 : i32
    %c0_i32_0 = arith.constant 0 : i32
    return %arg0, %c0_i32 : i32, i32
  }
}

module attributes {stable_mosaic.version = 11 : i64} {
  func.func @_self_mha_ln_kernel(%arg0: i32, %arg1: memref<1x32x128xf32, #tpu.memory_space<vmem>>, %arg2: memref<128x384xbf16, #tpu.memory_space<vmem>>, %arg3: memref<1x384xf32, #tpu.memory_space<vmem>>, %arg4: memref<128x128xbf16, #tpu.memory_space<vmem>>, %arg5: memref<1x128xf32, #tpu.memory_space<vmem>>, %arg6: memref<1x128xf32, #tpu.memory_space<vmem>>, %arg7: memref<1x128xf32, #tpu.memory_space<vmem>>, %arg8: memref<1x32x128xf32, #tpu.memory_space<vmem>>) attributes {dimension_semantics = [#tpu.dimension_semantics<parallel>], iteration_bounds = array<i64: 2>, scalar_prefetch = 0 : i64, scratch_operands = 0 : i64, tpu.core_type = #tpu.core_type<tc>, window_params = [{transform_indices = @transform_0, window_bounds = array<i64: 1, 32, 128>}, {pipeline_mode = #tpu.pipeline_mode<synchronous>, transform_indices = @transform_1, window_bounds = array<i64: 128, 384>}, {pipeline_mode = #tpu.pipeline_mode<synchronous>, transform_indices = @transform_2, window_bounds = array<i64: 1, 384>}, {pipeline_mode = #tpu.pipeline_mode<synchronous>, transform_indices = @transform_3, window_bounds = array<i64: 128, 128>}, {pipeline_mode = #tpu.pipeline_mode<synchronous>, transform_indices = @transform_4, window_bounds = array<i64: 1, 128>}, {pipeline_mode = #tpu.pipeline_mode<synchronous>, transform_indices = @transform_5, window_bounds = array<i64: 1, 128>}, {pipeline_mode = #tpu.pipeline_mode<synchronous>, transform_indices = @transform_6, window_bounds = array<i64: 1, 128>}, {transform_indices = @transform_7, window_bounds = array<i64: 1, 32, 128>}]} {
    %c0 = arith.constant 0 : index
    %c0_0 = arith.constant 0 : index
    %c0_1 = arith.constant 0 : index
    %0 = vector.load %arg1[%c0, %c0_0, %c0_1] : memref<1x32x128xf32, #tpu.memory_space<vmem>>, vector<1x32x128xf32>
    %1 = vector.shape_cast %0 : vector<1x32x128xf32> to vector<32x128xf32>
    %2 = arith.truncf %1 : vector<32x128xf32> to vector<32x128xbf16>
    %c0_2 = arith.constant 0 : index
    %c0_3 = arith.constant 0 : index
    %3 = vector.load %arg2[%c0_2, %c0_3] : memref<128x384xbf16, #tpu.memory_space<vmem>>, vector<128x384xbf16>
    %cst = arith.constant dense<0.000000e+00> : vector<32x384xf32>
    %4 = tpu.matmul %2, %3, %cst {dimension_numbers = #tpu.dot_dimension_numbers<[1], [0], [0], [1], [0, 0, 1, 1], [], []>} : vector<32x128xbf16>, vector<128x384xbf16>, vector<32x384xf32> -> vector<32x384xf32>
    %c0_4 = arith.constant 0 : index
    %c0_5 = arith.constant 0 : index
    %5 = vector.load %arg3[%c0_4, %c0_5] : memref<1x384xf32, #tpu.memory_space<vmem>>, vector<1x384xf32>
    %6 = vector.broadcast %5 : vector<1x384xf32> to vector<32x384xf32>
    %7 = arith.addf %4, %6 : vector<32x384xf32>
    %8 = vector.extract_strided_slice %7 {offsets = [0, 0], sizes = [32, 128], strides = [1, 1]} : vector<32x384xf32> to vector<32x128xf32>
    %9 = vector.extract_strided_slice %7 {offsets = [0, 128], sizes = [32, 128], strides = [1, 1]} : vector<32x384xf32> to vector<32x128xf32>
    %10 = vector.extract_strided_slice %7 {offsets = [0, 256], sizes = [32, 128], strides = [1, 1]} : vector<32x384xf32> to vector<32x128xf32>
    %cst_6 = arith.constant 0.000000e+00 : f32
    %11 = vector.broadcast %cst_6 : f32 to vector<32x128xf32>
    %12 = vector.extract_strided_slice %8 {offsets = [0, 0], sizes = [32, 16], strides = [1, 1]} : vector<32x128xf32> to vector<32x16xf32>
    %cst_7 = arith.constant 2.500000e-01 : f32
    %13 = vector.broadcast %cst_7 : f32 to vector<32x16xf32>
    %14 = arith.mulf %12, %13 : vector<32x16xf32>
    %15 = arith.truncf %14 : vector<32x16xf32> to vector<32x16xbf16>
    %16 = vector.extract_strided_slice %9 {offsets = [0, 0], sizes = [32, 16], strides = [1, 1]} : vector<32x128xf32> to vector<32x16xf32>
    %17 = arith.truncf %16 : vector<32x16xf32> to vector<32x16xbf16>
    %18 = vector.extract_strided_slice %10 {offsets = [0, 0], sizes = [32, 16], strides = [1, 1]} : vector<32x128xf32> to vector<32x16xf32>
    %19 = arith.truncf %18 : vector<32x16xf32> to vector<32x16xbf16>
    %cst_8 = arith.constant dense<0.000000e+00> : vector<32x32xf32>
    %20 = tpu.matmul %15, %17, %cst_8 {dimension_numbers = #tpu.dot_dimension_numbers<[1], [1], [0], [0], [0, 0, 1, 0], [], []>} : vector<32x16xbf16>, vector<32x16xbf16>, vector<32x32xf32> -> vector<32x32xf32>
    %cst_9 = arith.constant dense<0xFF800000> : vector<32xf32>
    %21 = vector.multi_reduction <maximumf>, %20, %cst_9 [1] : vector<32x32xf32> to vector<32xf32>
    %22 = vector.shape_cast %21 : vector<32xf32> to vector<32x1xf32>
    %23 = vector.broadcast %22 : vector<32x1xf32> to vector<32x32xf32>
    %24 = arith.subf %20, %23 : vector<32x32xf32>
    %25 = math.exp %24 : vector<32x32xf32>
    %cst_10 = arith.constant dense<0.000000e+00> : vector<32xf32>
    %26 = vector.multi_reduction <add>, %25, %cst_10 [1] : vector<32x32xf32> to vector<32xf32>
    %27 = vector.shape_cast %26 : vector<32xf32> to vector<32x1xf32>
    %28 = tpu.reciprocal %27 {approx = true} : vector<32x1xf32> -> vector<32x1xf32>
    %29 = vector.broadcast %28 : vector<32x1xf32> to vector<32x32xf32>
    %30 = arith.mulf %25, %29 : vector<32x32xf32>
    %31 = arith.truncf %30 : vector<32x32xf32> to vector<32x32xbf16>
    %cst_11 = arith.constant dense<0.000000e+00> : vector<32x16xf32>
    %32 = tpu.matmul %31, %19, %cst_11 {dimension_numbers = #tpu.dot_dimension_numbers<[1], [0], [0], [1], [0, 0, 1, 1], [], []>} : vector<32x32xbf16>, vector<32x16xbf16>, vector<32x16xf32> -> vector<32x16xf32>
    %33 = arith.truncf %32 : vector<32x16xf32> to vector<32x16xbf16>
    %c0_12 = arith.constant 0 : index
    %c0_13 = arith.constant 0 : index
    %34 = vector.load %arg4[%c0_12, %c0_13] : memref<128x128xbf16, #tpu.memory_space<vmem>>, vector<16x128xbf16>
    %cst_14 = arith.constant dense<0.000000e+00> : vector<32x128xf32>
    %35 = tpu.matmul %33, %34, %cst_14 {dimension_numbers = #tpu.dot_dimension_numbers<[1], [0], [0], [1], [0, 0, 1, 1], [], []>} : vector<32x16xbf16>, vector<16x128xbf16>, vector<32x128xf32> -> vector<32x128xf32>
    %36 = arith.addf %11, %35 : vector<32x128xf32>
    %37 = vector.extract_strided_slice %8 {offsets = [0, 16], sizes = [32, 16], strides = [1, 1]} : vector<32x128xf32> to vector<32x16xf32>
    %cst_15 = arith.constant 2.500000e-01 : f32
    %38 = vector.broadcast %cst_15 : f32 to vector<32x16xf32>
    %39 = arith.mulf %37, %38 : vector<32x16xf32>
    %40 = arith.truncf %39 : vector<32x16xf32> to vector<32x16xbf16>
    %41 = vector.extract_strided_slice %9 {offsets = [0, 16], sizes = [32, 16], strides = [1, 1]} : vector<32x128xf32> to vector<32x16xf32>
    %42 = arith.truncf %41 : vector<32x16xf32> to vector<32x16xbf16>
    %43 = vector.extract_strided_slice %10 {offsets = [0, 16], sizes = [32, 16], strides = [1, 1]} : vector<32x128xf32> to vector<32x16xf32>
    %44 = arith.truncf %43 : vector<32x16xf32> to vector<32x16xbf16>
    %cst_16 = arith.constant dense<0.000000e+00> : vector<32x32xf32>
    %45 = tpu.matmul %40, %42, %cst_16 {dimension_numbers = #tpu.dot_dimension_numbers<[1], [1], [0], [0], [0, 0, 1, 0], [], []>} : vector<32x16xbf16>, vector<32x16xbf16>, vector<32x32xf32> -> vector<32x32xf32>
    %cst_17 = arith.constant dense<0xFF800000> : vector<32xf32>
    %46 = vector.multi_reduction <maximumf>, %45, %cst_17 [1] : vector<32x32xf32> to vector<32xf32>
    %47 = vector.shape_cast %46 : vector<32xf32> to vector<32x1xf32>
    %48 = vector.broadcast %47 : vector<32x1xf32> to vector<32x32xf32>
    %49 = arith.subf %45, %48 : vector<32x32xf32>
    %50 = math.exp %49 : vector<32x32xf32>
    %cst_18 = arith.constant dense<0.000000e+00> : vector<32xf32>
    %51 = vector.multi_reduction <add>, %50, %cst_18 [1] : vector<32x32xf32> to vector<32xf32>
    %52 = vector.shape_cast %51 : vector<32xf32> to vector<32x1xf32>
    %53 = tpu.reciprocal %52 {approx = true} : vector<32x1xf32> -> vector<32x1xf32>
    %54 = vector.broadcast %53 : vector<32x1xf32> to vector<32x32xf32>
    %55 = arith.mulf %50, %54 : vector<32x32xf32>
    %56 = arith.truncf %55 : vector<32x32xf32> to vector<32x32xbf16>
    %cst_19 = arith.constant dense<0.000000e+00> : vector<32x16xf32>
    %57 = tpu.matmul %56, %44, %cst_19 {dimension_numbers = #tpu.dot_dimension_numbers<[1], [0], [0], [1], [0, 0, 1, 1], [], []>} : vector<32x32xbf16>, vector<32x16xbf16>, vector<32x16xf32> -> vector<32x16xf32>
    %58 = arith.truncf %57 : vector<32x16xf32> to vector<32x16xbf16>
    %c16 = arith.constant 16 : index
    %c0_20 = arith.constant 0 : index
    %59 = vector.load %arg4[%c16, %c0_20] : memref<128x128xbf16, #tpu.memory_space<vmem>>, vector<16x128xbf16>
    %cst_21 = arith.constant dense<0.000000e+00> : vector<32x128xf32>
    %60 = tpu.matmul %58, %59, %cst_21 {dimension_numbers = #tpu.dot_dimension_numbers<[1], [0], [0], [1], [0, 0, 1, 1], [], []>} : vector<32x16xbf16>, vector<16x128xbf16>, vector<32x128xf32> -> vector<32x128xf32>
    %61 = arith.addf %36, %60 : vector<32x128xf32>
    %62 = vector.extract_strided_slice %8 {offsets = [0, 32], sizes = [32, 16], strides = [1, 1]} : vector<32x128xf32> to vector<32x16xf32>
    %cst_22 = arith.constant 2.500000e-01 : f32
    %63 = vector.broadcast %cst_22 : f32 to vector<32x16xf32>
    %64 = arith.mulf %62, %63 : vector<32x16xf32>
    %65 = arith.truncf %64 : vector<32x16xf32> to vector<32x16xbf16>
    %66 = vector.extract_strided_slice %9 {offsets = [0, 32], sizes = [32, 16], strides = [1, 1]} : vector<32x128xf32> to vector<32x16xf32>
    %67 = arith.truncf %66 : vector<32x16xf32> to vector<32x16xbf16>
    %68 = vector.extract_strided_slice %10 {offsets = [0, 32], sizes = [32, 16], strides = [1, 1]} : vector<32x128xf32> to vector<32x16xf32>
    %69 = arith.truncf %68 : vector<32x16xf32> to vector<32x16xbf16>
    %cst_23 = arith.constant dense<0.000000e+00> : vector<32x32xf32>
    %70 = tpu.matmul %65, %67, %cst_23 {dimension_numbers = #tpu.dot_dimension_numbers<[1], [1], [0], [0], [0, 0, 1, 0], [], []>} : vector<32x16xbf16>, vector<32x16xbf16>, vector<32x32xf32> -> vector<32x32xf32>
    %cst_24 = arith.constant dense<0xFF800000> : vector<32xf32>
    %71 = vector.multi_reduction <maximumf>, %70, %cst_24 [1] : vector<32x32xf32> to vector<32xf32>
    %72 = vector.shape_cast %71 : vector<32xf32> to vector<32x1xf32>
    %73 = vector.broadcast %72 : vector<32x1xf32> to vector<32x32xf32>
    %74 = arith.subf %70, %73 : vector<32x32xf32>
    %75 = math.exp %74 : vector<32x32xf32>
    %cst_25 = arith.constant dense<0.000000e+00> : vector<32xf32>
    %76 = vector.multi_reduction <add>, %75, %cst_25 [1] : vector<32x32xf32> to vector<32xf32>
    %77 = vector.shape_cast %76 : vector<32xf32> to vector<32x1xf32>
    %78 = tpu.reciprocal %77 {approx = true} : vector<32x1xf32> -> vector<32x1xf32>
    %79 = vector.broadcast %78 : vector<32x1xf32> to vector<32x32xf32>
    %80 = arith.mulf %75, %79 : vector<32x32xf32>
    %81 = arith.truncf %80 : vector<32x32xf32> to vector<32x32xbf16>
    %cst_26 = arith.constant dense<0.000000e+00> : vector<32x16xf32>
    %82 = tpu.matmul %81, %69, %cst_26 {dimension_numbers = #tpu.dot_dimension_numbers<[1], [0], [0], [1], [0, 0, 1, 1], [], []>} : vector<32x32xbf16>, vector<32x16xbf16>, vector<32x16xf32> -> vector<32x16xf32>
    %83 = arith.truncf %82 : vector<32x16xf32> to vector<32x16xbf16>
    %c32 = arith.constant 32 : index
    %c0_27 = arith.constant 0 : index
    %84 = vector.load %arg4[%c32, %c0_27] : memref<128x128xbf16, #tpu.memory_space<vmem>>, vector<16x128xbf16>
    %cst_28 = arith.constant dense<0.000000e+00> : vector<32x128xf32>
    %85 = tpu.matmul %83, %84, %cst_28 {dimension_numbers = #tpu.dot_dimension_numbers<[1], [0], [0], [1], [0, 0, 1, 1], [], []>} : vector<32x16xbf16>, vector<16x128xbf16>, vector<32x128xf32> -> vector<32x128xf32>
    %86 = arith.addf %61, %85 : vector<32x128xf32>
    %87 = vector.extract_strided_slice %8 {offsets = [0, 48], sizes = [32, 16], strides = [1, 1]} : vector<32x128xf32> to vector<32x16xf32>
    %cst_29 = arith.constant 2.500000e-01 : f32
    %88 = vector.broadcast %cst_29 : f32 to vector<32x16xf32>
    %89 = arith.mulf %87, %88 : vector<32x16xf32>
    %90 = arith.truncf %89 : vector<32x16xf32> to vector<32x16xbf16>
    %91 = vector.extract_strided_slice %9 {offsets = [0, 48], sizes = [32, 16], strides = [1, 1]} : vector<32x128xf32> to vector<32x16xf32>
    %92 = arith.truncf %91 : vector<32x16xf32> to vector<32x16xbf16>
    %93 = vector.extract_strided_slice %10 {offsets = [0, 48], sizes = [32, 16], strides = [1, 1]} : vector<32x128xf32> to vector<32x16xf32>
    %94 = arith.truncf %93 : vector<32x16xf32> to vector<32x16xbf16>
    %cst_30 = arith.constant dense<0.000000e+00> : vector<32x32xf32>
    %95 = tpu.matmul %90, %92, %cst_30 {dimension_numbers = #tpu.dot_dimension_numbers<[1], [1], [0], [0], [0, 0, 1, 0], [], []>} : vector<32x16xbf16>, vector<32x16xbf16>, vector<32x32xf32> -> vector<32x32xf32>
    %cst_31 = arith.constant dense<0xFF800000> : vector<32xf32>
    %96 = vector.multi_reduction <maximumf>, %95, %cst_31 [1] : vector<32x32xf32> to vector<32xf32>
    %97 = vector.shape_cast %96 : vector<32xf32> to vector<32x1xf32>
    %98 = vector.broadcast %97 : vector<32x1xf32> to vector<32x32xf32>
    %99 = arith.subf %95, %98 : vector<32x32xf32>
    %100 = math.exp %99 : vector<32x32xf32>
    %cst_32 = arith.constant dense<0.000000e+00> : vector<32xf32>
    %101 = vector.multi_reduction <add>, %100, %cst_32 [1] : vector<32x32xf32> to vector<32xf32>
    %102 = vector.shape_cast %101 : vector<32xf32> to vector<32x1xf32>
    %103 = tpu.reciprocal %102 {approx = true} : vector<32x1xf32> -> vector<32x1xf32>
    %104 = vector.broadcast %103 : vector<32x1xf32> to vector<32x32xf32>
    %105 = arith.mulf %100, %104 : vector<32x32xf32>
    %106 = arith.truncf %105 : vector<32x32xf32> to vector<32x32xbf16>
    %cst_33 = arith.constant dense<0.000000e+00> : vector<32x16xf32>
    %107 = tpu.matmul %106, %94, %cst_33 {dimension_numbers = #tpu.dot_dimension_numbers<[1], [0], [0], [1], [0, 0, 1, 1], [], []>} : vector<32x32xbf16>, vector<32x16xbf16>, vector<32x16xf32> -> vector<32x16xf32>
    %108 = arith.truncf %107 : vector<32x16xf32> to vector<32x16xbf16>
    %c48 = arith.constant 48 : index
    %c0_34 = arith.constant 0 : index
    %109 = vector.load %arg4[%c48, %c0_34] : memref<128x128xbf16, #tpu.memory_space<vmem>>, vector<16x128xbf16>
    %cst_35 = arith.constant dense<0.000000e+00> : vector<32x128xf32>
    %110 = tpu.matmul %108, %109, %cst_35 {dimension_numbers = #tpu.dot_dimension_numbers<[1], [0], [0], [1], [0, 0, 1, 1], [], []>} : vector<32x16xbf16>, vector<16x128xbf16>, vector<32x128xf32> -> vector<32x128xf32>
    %111 = arith.addf %86, %110 : vector<32x128xf32>
    %112 = vector.extract_strided_slice %8 {offsets = [0, 64], sizes = [32, 16], strides = [1, 1]} : vector<32x128xf32> to vector<32x16xf32>
    %cst_36 = arith.constant 2.500000e-01 : f32
    %113 = vector.broadcast %cst_36 : f32 to vector<32x16xf32>
    %114 = arith.mulf %112, %113 : vector<32x16xf32>
    %115 = arith.truncf %114 : vector<32x16xf32> to vector<32x16xbf16>
    %116 = vector.extract_strided_slice %9 {offsets = [0, 64], sizes = [32, 16], strides = [1, 1]} : vector<32x128xf32> to vector<32x16xf32>
    %117 = arith.truncf %116 : vector<32x16xf32> to vector<32x16xbf16>
    %118 = vector.extract_strided_slice %10 {offsets = [0, 64], sizes = [32, 16], strides = [1, 1]} : vector<32x128xf32> to vector<32x16xf32>
    %119 = arith.truncf %118 : vector<32x16xf32> to vector<32x16xbf16>
    %cst_37 = arith.constant dense<0.000000e+00> : vector<32x32xf32>
    %120 = tpu.matmul %115, %117, %cst_37 {dimension_numbers = #tpu.dot_dimension_numbers<[1], [1], [0], [0], [0, 0, 1, 0], [], []>} : vector<32x16xbf16>, vector<32x16xbf16>, vector<32x32xf32> -> vector<32x32xf32>
    %cst_38 = arith.constant dense<0xFF800000> : vector<32xf32>
    %121 = vector.multi_reduction <maximumf>, %120, %cst_38 [1] : vector<32x32xf32> to vector<32xf32>
    %122 = vector.shape_cast %121 : vector<32xf32> to vector<32x1xf32>
    %123 = vector.broadcast %122 : vector<32x1xf32> to vector<32x32xf32>
    %124 = arith.subf %120, %123 : vector<32x32xf32>
    %125 = math.exp %124 : vector<32x32xf32>
    %cst_39 = arith.constant dense<0.000000e+00> : vector<32xf32>
    %126 = vector.multi_reduction <add>, %125, %cst_39 [1] : vector<32x32xf32> to vector<32xf32>
    %127 = vector.shape_cast %126 : vector<32xf32> to vector<32x1xf32>
    %128 = tpu.reciprocal %127 {approx = true} : vector<32x1xf32> -> vector<32x1xf32>
    %129 = vector.broadcast %128 : vector<32x1xf32> to vector<32x32xf32>
    %130 = arith.mulf %125, %129 : vector<32x32xf32>
    %131 = arith.truncf %130 : vector<32x32xf32> to vector<32x32xbf16>
    %cst_40 = arith.constant dense<0.000000e+00> : vector<32x16xf32>
    %132 = tpu.matmul %131, %119, %cst_40 {dimension_numbers = #tpu.dot_dimension_numbers<[1], [0], [0], [1], [0, 0, 1, 1], [], []>} : vector<32x32xbf16>, vector<32x16xbf16>, vector<32x16xf32> -> vector<32x16xf32>
    %133 = arith.truncf %132 : vector<32x16xf32> to vector<32x16xbf16>
    %c64 = arith.constant 64 : index
    %c0_41 = arith.constant 0 : index
    %134 = vector.load %arg4[%c64, %c0_41] : memref<128x128xbf16, #tpu.memory_space<vmem>>, vector<16x128xbf16>
    %cst_42 = arith.constant dense<0.000000e+00> : vector<32x128xf32>
    %135 = tpu.matmul %133, %134, %cst_42 {dimension_numbers = #tpu.dot_dimension_numbers<[1], [0], [0], [1], [0, 0, 1, 1], [], []>} : vector<32x16xbf16>, vector<16x128xbf16>, vector<32x128xf32> -> vector<32x128xf32>
    %136 = arith.addf %111, %135 : vector<32x128xf32>
    %137 = vector.extract_strided_slice %8 {offsets = [0, 80], sizes = [32, 16], strides = [1, 1]} : vector<32x128xf32> to vector<32x16xf32>
    %cst_43 = arith.constant 2.500000e-01 : f32
    %138 = vector.broadcast %cst_43 : f32 to vector<32x16xf32>
    %139 = arith.mulf %137, %138 : vector<32x16xf32>
    %140 = arith.truncf %139 : vector<32x16xf32> to vector<32x16xbf16>
    %141 = vector.extract_strided_slice %9 {offsets = [0, 80], sizes = [32, 16], strides = [1, 1]} : vector<32x128xf32> to vector<32x16xf32>
    %142 = arith.truncf %141 : vector<32x16xf32> to vector<32x16xbf16>
    %143 = vector.extract_strided_slice %10 {offsets = [0, 80], sizes = [32, 16], strides = [1, 1]} : vector<32x128xf32> to vector<32x16xf32>
    %144 = arith.truncf %143 : vector<32x16xf32> to vector<32x16xbf16>
    %cst_44 = arith.constant dense<0.000000e+00> : vector<32x32xf32>
    %145 = tpu.matmul %140, %142, %cst_44 {dimension_numbers = #tpu.dot_dimension_numbers<[1], [1], [0], [0], [0, 0, 1, 0], [], []>} : vector<32x16xbf16>, vector<32x16xbf16>, vector<32x32xf32> -> vector<32x32xf32>
    %cst_45 = arith.constant dense<0xFF800000> : vector<32xf32>
    %146 = vector.multi_reduction <maximumf>, %145, %cst_45 [1] : vector<32x32xf32> to vector<32xf32>
    %147 = vector.shape_cast %146 : vector<32xf32> to vector<32x1xf32>
    %148 = vector.broadcast %147 : vector<32x1xf32> to vector<32x32xf32>
    %149 = arith.subf %145, %148 : vector<32x32xf32>
    %150 = math.exp %149 : vector<32x32xf32>
    %cst_46 = arith.constant dense<0.000000e+00> : vector<32xf32>
    %151 = vector.multi_reduction <add>, %150, %cst_46 [1] : vector<32x32xf32> to vector<32xf32>
    %152 = vector.shape_cast %151 : vector<32xf32> to vector<32x1xf32>
    %153 = tpu.reciprocal %152 {approx = true} : vector<32x1xf32> -> vector<32x1xf32>
    %154 = vector.broadcast %153 : vector<32x1xf32> to vector<32x32xf32>
    %155 = arith.mulf %150, %154 : vector<32x32xf32>
    %156 = arith.truncf %155 : vector<32x32xf32> to vector<32x32xbf16>
    %cst_47 = arith.constant dense<0.000000e+00> : vector<32x16xf32>
    %157 = tpu.matmul %156, %144, %cst_47 {dimension_numbers = #tpu.dot_dimension_numbers<[1], [0], [0], [1], [0, 0, 1, 1], [], []>} : vector<32x32xbf16>, vector<32x16xbf16>, vector<32x16xf32> -> vector<32x16xf32>
    %158 = arith.truncf %157 : vector<32x16xf32> to vector<32x16xbf16>
    %c80 = arith.constant 80 : index
    %c0_48 = arith.constant 0 : index
    %159 = vector.load %arg4[%c80, %c0_48] : memref<128x128xbf16, #tpu.memory_space<vmem>>, vector<16x128xbf16>
    %cst_49 = arith.constant dense<0.000000e+00> : vector<32x128xf32>
    %160 = tpu.matmul %158, %159, %cst_49 {dimension_numbers = #tpu.dot_dimension_numbers<[1], [0], [0], [1], [0, 0, 1, 1], [], []>} : vector<32x16xbf16>, vector<16x128xbf16>, vector<32x128xf32> -> vector<32x128xf32>
    %161 = arith.addf %136, %160 : vector<32x128xf32>
    %162 = vector.extract_strided_slice %8 {offsets = [0, 96], sizes = [32, 16], strides = [1, 1]} : vector<32x128xf32> to vector<32x16xf32>
    %cst_50 = arith.constant 2.500000e-01 : f32
    %163 = vector.broadcast %cst_50 : f32 to vector<32x16xf32>
    %164 = arith.mulf %162, %163 : vector<32x16xf32>
    %165 = arith.truncf %164 : vector<32x16xf32> to vector<32x16xbf16>
    %166 = vector.extract_strided_slice %9 {offsets = [0, 96], sizes = [32, 16], strides = [1, 1]} : vector<32x128xf32> to vector<32x16xf32>
    %167 = arith.truncf %166 : vector<32x16xf32> to vector<32x16xbf16>
    %168 = vector.extract_strided_slice %10 {offsets = [0, 96], sizes = [32, 16], strides = [1, 1]} : vector<32x128xf32> to vector<32x16xf32>
    %169 = arith.truncf %168 : vector<32x16xf32> to vector<32x16xbf16>
    %cst_51 = arith.constant dense<0.000000e+00> : vector<32x32xf32>
    %170 = tpu.matmul %165, %167, %cst_51 {dimension_numbers = #tpu.dot_dimension_numbers<[1], [1], [0], [0], [0, 0, 1, 0], [], []>} : vector<32x16xbf16>, vector<32x16xbf16>, vector<32x32xf32> -> vector<32x32xf32>
    %cst_52 = arith.constant dense<0xFF800000> : vector<32xf32>
    %171 = vector.multi_reduction <maximumf>, %170, %cst_52 [1] : vector<32x32xf32> to vector<32xf32>
    %172 = vector.shape_cast %171 : vector<32xf32> to vector<32x1xf32>
    %173 = vector.broadcast %172 : vector<32x1xf32> to vector<32x32xf32>
    %174 = arith.subf %170, %173 : vector<32x32xf32>
    %175 = math.exp %174 : vector<32x32xf32>
    %cst_53 = arith.constant dense<0.000000e+00> : vector<32xf32>
    %176 = vector.multi_reduction <add>, %175, %cst_53 [1] : vector<32x32xf32> to vector<32xf32>
    %177 = vector.shape_cast %176 : vector<32xf32> to vector<32x1xf32>
    %178 = tpu.reciprocal %177 {approx = true} : vector<32x1xf32> -> vector<32x1xf32>
    %179 = vector.broadcast %178 : vector<32x1xf32> to vector<32x32xf32>
    %180 = arith.mulf %175, %179 : vector<32x32xf32>
    %181 = arith.truncf %180 : vector<32x32xf32> to vector<32x32xbf16>
    %cst_54 = arith.constant dense<0.000000e+00> : vector<32x16xf32>
    %182 = tpu.matmul %181, %169, %cst_54 {dimension_numbers = #tpu.dot_dimension_numbers<[1], [0], [0], [1], [0, 0, 1, 1], [], []>} : vector<32x32xbf16>, vector<32x16xbf16>, vector<32x16xf32> -> vector<32x16xf32>
    %183 = arith.truncf %182 : vector<32x16xf32> to vector<32x16xbf16>
    %c96 = arith.constant 96 : index
    %c0_55 = arith.constant 0 : index
    %184 = vector.load %arg4[%c96, %c0_55] : memref<128x128xbf16, #tpu.memory_space<vmem>>, vector<16x128xbf16>
    %cst_56 = arith.constant dense<0.000000e+00> : vector<32x128xf32>
    %185 = tpu.matmul %183, %184, %cst_56 {dimension_numbers = #tpu.dot_dimension_numbers<[1], [0], [0], [1], [0, 0, 1, 1], [], []>} : vector<32x16xbf16>, vector<16x128xbf16>, vector<32x128xf32> -> vector<32x128xf32>
    %186 = arith.addf %161, %185 : vector<32x128xf32>
    %187 = vector.extract_strided_slice %8 {offsets = [0, 112], sizes = [32, 16], strides = [1, 1]} : vector<32x128xf32> to vector<32x16xf32>
    %cst_57 = arith.constant 2.500000e-01 : f32
    %188 = vector.broadcast %cst_57 : f32 to vector<32x16xf32>
    %189 = arith.mulf %187, %188 : vector<32x16xf32>
    %190 = arith.truncf %189 : vector<32x16xf32> to vector<32x16xbf16>
    %191 = vector.extract_strided_slice %9 {offsets = [0, 112], sizes = [32, 16], strides = [1, 1]} : vector<32x128xf32> to vector<32x16xf32>
    %192 = arith.truncf %191 : vector<32x16xf32> to vector<32x16xbf16>
    %193 = vector.extract_strided_slice %10 {offsets = [0, 112], sizes = [32, 16], strides = [1, 1]} : vector<32x128xf32> to vector<32x16xf32>
    %194 = arith.truncf %193 : vector<32x16xf32> to vector<32x16xbf16>
    %cst_58 = arith.constant dense<0.000000e+00> : vector<32x32xf32>
    %195 = tpu.matmul %190, %192, %cst_58 {dimension_numbers = #tpu.dot_dimension_numbers<[1], [1], [0], [0], [0, 0, 1, 0], [], []>} : vector<32x16xbf16>, vector<32x16xbf16>, vector<32x32xf32> -> vector<32x32xf32>
    %cst_59 = arith.constant dense<0xFF800000> : vector<32xf32>
    %196 = vector.multi_reduction <maximumf>, %195, %cst_59 [1] : vector<32x32xf32> to vector<32xf32>
    %197 = vector.shape_cast %196 : vector<32xf32> to vector<32x1xf32>
    %198 = vector.broadcast %197 : vector<32x1xf32> to vector<32x32xf32>
    %199 = arith.subf %195, %198 : vector<32x32xf32>
    %200 = math.exp %199 : vector<32x32xf32>
    %cst_60 = arith.constant dense<0.000000e+00> : vector<32xf32>
    %201 = vector.multi_reduction <add>, %200, %cst_60 [1] : vector<32x32xf32> to vector<32xf32>
    %202 = vector.shape_cast %201 : vector<32xf32> to vector<32x1xf32>
    %203 = tpu.reciprocal %202 {approx = true} : vector<32x1xf32> -> vector<32x1xf32>
    %204 = vector.broadcast %203 : vector<32x1xf32> to vector<32x32xf32>
    %205 = arith.mulf %200, %204 : vector<32x32xf32>
    %206 = arith.truncf %205 : vector<32x32xf32> to vector<32x32xbf16>
    %cst_61 = arith.constant dense<0.000000e+00> : vector<32x16xf32>
    %207 = tpu.matmul %206, %194, %cst_61 {dimension_numbers = #tpu.dot_dimension_numbers<[1], [0], [0], [1], [0, 0, 1, 1], [], []>} : vector<32x32xbf16>, vector<32x16xbf16>, vector<32x16xf32> -> vector<32x16xf32>
    %208 = arith.truncf %207 : vector<32x16xf32> to vector<32x16xbf16>
    %c112 = arith.constant 112 : index
    %c0_62 = arith.constant 0 : index
    %209 = vector.load %arg4[%c112, %c0_62] : memref<128x128xbf16, #tpu.memory_space<vmem>>, vector<16x128xbf16>
    %cst_63 = arith.constant dense<0.000000e+00> : vector<32x128xf32>
    %210 = tpu.matmul %208, %209, %cst_63 {dimension_numbers = #tpu.dot_dimension_numbers<[1], [0], [0], [1], [0, 0, 1, 1], [], []>} : vector<32x16xbf16>, vector<16x128xbf16>, vector<32x128xf32> -> vector<32x128xf32>
    %211 = arith.addf %186, %210 : vector<32x128xf32>
    %212 = arith.addf %1, %211 : vector<32x128xf32>
    %c0_64 = arith.constant 0 : index
    %c0_65 = arith.constant 0 : index
    %213 = vector.load %arg5[%c0_64, %c0_65] : memref<1x128xf32, #tpu.memory_space<vmem>>, vector<1x128xf32>
    %214 = vector.broadcast %213 : vector<1x128xf32> to vector<32x128xf32>
    %215 = arith.addf %212, %214 : vector<32x128xf32>
    %cst_66 = arith.constant dense<0.000000e+00> : vector<32xf32>
    %216 = vector.multi_reduction <add>, %215, %cst_66 [1] : vector<32x128xf32> to vector<32xf32>
    %217 = vector.shape_cast %216 : vector<32xf32> to vector<32x1xf32>
    %cst_67 = arith.constant 1.280000e+02 : f32
    %218 = vector.broadcast %cst_67 : f32 to vector<32x1xf32>
    %219 = arith.divf %217, %218 : vector<32x1xf32>
    %220 = vector.broadcast %219 : vector<32x1xf32> to vector<32x128xf32>
    %221 = arith.subf %215, %220 : vector<32x128xf32>
    %222 = arith.mulf %221, %221 : vector<32x128xf32>
    %cst_68 = arith.constant dense<0.000000e+00> : vector<32xf32>
    %223 = vector.multi_reduction <add>, %222, %cst_68 [1] : vector<32x128xf32> to vector<32xf32>
    %224 = vector.shape_cast %223 : vector<32xf32> to vector<32x1xf32>
    %cst_69 = arith.constant 1.280000e+02 : f32
    %225 = vector.broadcast %cst_69 : f32 to vector<32x1xf32>
    %226 = arith.divf %224, %225 : vector<32x1xf32>
    %227 = vector.broadcast %219 : vector<32x1xf32> to vector<32x128xf32>
    %228 = arith.subf %215, %227 : vector<32x128xf32>
    %cst_70 = arith.constant 9.99999974E-6 : f32
    %229 = vector.broadcast %cst_70 : f32 to vector<32x1xf32>
    %230 = arith.addf %226, %229 : vector<32x1xf32>
    %231 = math.rsqrt %230 : vector<32x1xf32>
    %232 = vector.broadcast %231 : vector<32x1xf32> to vector<32x128xf32>
    %233 = arith.mulf %228, %232 : vector<32x128xf32>
    %c0_71 = arith.constant 0 : index
    %c0_72 = arith.constant 0 : index
    %234 = vector.load %arg6[%c0_71, %c0_72] : memref<1x128xf32, #tpu.memory_space<vmem>>, vector<1x128xf32>
    %235 = vector.broadcast %234 : vector<1x128xf32> to vector<32x128xf32>
    %236 = arith.mulf %233, %235 : vector<32x128xf32>
    %c0_73 = arith.constant 0 : index
    %c0_74 = arith.constant 0 : index
    %237 = vector.load %arg7[%c0_73, %c0_74] : memref<1x128xf32, #tpu.memory_space<vmem>>, vector<1x128xf32>
    %238 = vector.broadcast %237 : vector<1x128xf32> to vector<32x128xf32>
    %239 = arith.addf %236, %238 : vector<32x128xf32>
    %c0_75 = arith.constant 0 : index
    %c0_76 = arith.constant 0 : index
    %c0_77 = arith.constant 0 : index
    %240 = vector.load %arg8[%c0_75, %c0_76, %c0_77] : memref<1x32x128xf32, #tpu.memory_space<vmem>>, vector<1x32x128xf32>
    %241 = vector.shape_cast %240 : vector<1x32x128xf32> to vector<32x128xf32>
    %242 = vector.shape_cast %239 : vector<32x128xf32> to vector<1x32x128xf32>
    tpu.vector_store %arg8[%c0_75, %c0_76, %c0_77], %242 {strides = array<i32>} : memref<1x32x128xf32, #tpu.memory_space<vmem>>, vector<1x32x128xf32>,
    return
  }
  func.func @transform_0(%arg0: i32) -> (i32, i32, i32) {
    %c0_i32 = arith.constant 0 : i32
    %c0_i32_0 = arith.constant 0 : i32
    %c0_i32_1 = arith.constant 0 : i32
    return %arg0, %c0_i32, %c0_i32_0 : i32, i32, i32
  }
  func.func @transform_1(%arg0: i32) -> (i32, i32) {
    %c0_i32 = arith.constant 0 : i32
    %c0_i32_0 = arith.constant 0 : i32
    %c0_i32_1 = arith.constant 0 : i32
    return %c0_i32, %c0_i32_0 : i32, i32
  }
  func.func @transform_2(%arg0: i32) -> (i32, i32) {
    %c0_i32 = arith.constant 0 : i32
    %c0_i32_0 = arith.constant 0 : i32
    %c0_i32_1 = arith.constant 0 : i32
    return %c0_i32, %c0_i32_0 : i32, i32
  }
  func.func @transform_3(%arg0: i32) -> (i32, i32) {
    %c0_i32 = arith.constant 0 : i32
    %c0_i32_0 = arith.constant 0 : i32
    %c0_i32_1 = arith.constant 0 : i32
    return %c0_i32, %c0_i32_0 : i32, i32
  }
  func.func @transform_4(%arg0: i32) -> (i32, i32) {
    %c0_i32 = arith.constant 0 : i32
    %c0_i32_0 = arith.constant 0 : i32
    %c0_i32_1 = arith.constant 0 : i32
    return %c0_i32, %c0_i32_0 : i32, i32
  }
  func.func @transform_5(%arg0: i32) -> (i32, i32) {
    %c0_i32 = arith.constant 0 : i32
    %c0_i32_0 = arith.constant 0 : i32
    %c0_i32_1 = arith.constant 0 : i32
    return %c0_i32, %c0_i32_0 : i32, i32
  }
  func.func @transform_6(%arg0: i32) -> (i32, i32) {
    %c0_i32 = arith.constant 0 : i32
    %c0_i32_0 = arith.constant 0 : i32
    %c0_i32_1 = arith.constant 0 : i32
    return %c0_i32, %c0_i32_0 : i32, i32
  }
  func.func @transform_7(%arg0: i32) -> (i32, i32, i32) {
    %c0_i32 = arith.constant 0 : i32
    %c0_i32_0 = arith.constant 0 : i32
    %c0_i32_1 = arith.constant 0 : i32
    return %arg0, %c0_i32, %c0_i32_0 : i32, i32, i32
  }
}

module attributes {stable_mosaic.version = 11 : i64} {
  func.func @_layernorm_kernel(%arg0: i32, %arg1: memref<64x128xf32, #tpu.memory_space<vmem>>, %arg2: memref<1x128xf32, #tpu.memory_space<vmem>>, %arg3: memref<1x128xf32, #tpu.memory_space<vmem>>, %arg4: memref<64x128xf32, #tpu.memory_space<vmem>>) attributes {dimension_semantics = [#tpu.dimension_semantics<parallel>], iteration_bounds = array<i64: 1>, scalar_prefetch = 0 : i64, scratch_operands = 0 : i64, tpu.core_type = #tpu.core_type<tc>, window_params = [{transform_indices = @transform_0, window_bounds = array<i64: 64, 128>}, {pipeline_mode = #tpu.pipeline_mode<synchronous>, transform_indices = @transform_1, window_bounds = array<i64: 1, 128>}, {pipeline_mode = #tpu.pipeline_mode<synchronous>, transform_indices = @transform_2, window_bounds = array<i64: 1, 128>}, {transform_indices = @transform_3, window_bounds = array<i64: 64, 128>}]} {
    %c0 = arith.constant 0 : index
    %c0_0 = arith.constant 0 : index
    %0 = vector.load %arg1[%c0, %c0_0] : memref<64x128xf32, #tpu.memory_space<vmem>>, vector<64x128xf32>
    %cst = arith.constant dense<0.000000e+00> : vector<64xf32>
    %1 = vector.multi_reduction <add>, %0, %cst [1] : vector<64x128xf32> to vector<64xf32>
    %2 = vector.shape_cast %1 : vector<64xf32> to vector<64x1xf32>
    %cst_1 = arith.constant 1.280000e+02 : f32
    %3 = vector.broadcast %cst_1 : f32 to vector<64x1xf32>
    %4 = arith.divf %2, %3 : vector<64x1xf32>
    %5 = vector.broadcast %4 : vector<64x1xf32> to vector<64x128xf32>
    %6 = arith.subf %0, %5 : vector<64x128xf32>
    %7 = arith.mulf %6, %6 : vector<64x128xf32>
    %cst_2 = arith.constant dense<0.000000e+00> : vector<64xf32>
    %8 = vector.multi_reduction <add>, %7, %cst_2 [1] : vector<64x128xf32> to vector<64xf32>
    %9 = vector.shape_cast %8 : vector<64xf32> to vector<64x1xf32>
    %cst_3 = arith.constant 1.280000e+02 : f32
    %10 = vector.broadcast %cst_3 : f32 to vector<64x1xf32>
    %11 = arith.divf %9, %10 : vector<64x1xf32>
    %12 = vector.broadcast %4 : vector<64x1xf32> to vector<64x128xf32>
    %13 = arith.subf %0, %12 : vector<64x128xf32>
    %cst_4 = arith.constant 9.99999974E-6 : f32
    %14 = vector.broadcast %cst_4 : f32 to vector<64x1xf32>
    %15 = arith.addf %11, %14 : vector<64x1xf32>
    %16 = math.rsqrt %15 : vector<64x1xf32>
    %17 = vector.broadcast %16 : vector<64x1xf32> to vector<64x128xf32>
    %18 = arith.mulf %13, %17 : vector<64x128xf32>
    %c0_5 = arith.constant 0 : index
    %c0_6 = arith.constant 0 : index
    %19 = vector.load %arg2[%c0_5, %c0_6] : memref<1x128xf32, #tpu.memory_space<vmem>>, vector<1x128xf32>
    %20 = vector.broadcast %19 : vector<1x128xf32> to vector<64x128xf32>
    %21 = arith.mulf %18, %20 : vector<64x128xf32>
    %c0_7 = arith.constant 0 : index
    %c0_8 = arith.constant 0 : index
    %22 = vector.load %arg3[%c0_7, %c0_8] : memref<1x128xf32, #tpu.memory_space<vmem>>, vector<1x128xf32>
    %23 = vector.broadcast %22 : vector<1x128xf32> to vector<64x128xf32>
    %24 = arith.addf %21, %23 : vector<64x128xf32>
    %c0_9 = arith.constant 0 : index
    %c0_10 = arith.constant 0 : index
    %25 = vector.load %arg4[%c0_9, %c0_10] : memref<64x128xf32, #tpu.memory_space<vmem>>, vector<64x128xf32>
    tpu.vector_store %arg4[%c0_9, %c0_10], %24 {strides = array<i32>} : memref<64x128xf32, #tpu.memory_space<vmem>>, vector<64x128xf32>,
    return
  }
  func.func @transform_0(%arg0: i32) -> (i32, i32) {
    %c0_i32 = arith.constant 0 : i32
    %c0_i32_0 = arith.constant 0 : i32
    return %arg0, %c0_i32 : i32, i32
  }
  func.func @transform_1(%arg0: i32) -> (i32, i32) {
    %c0_i32 = arith.constant 0 : i32
    %c0_i32_0 = arith.constant 0 : i32
    %c0_i32_1 = arith.constant 0 : i32
    return %c0_i32, %c0_i32_0 : i32, i32
  }
  func.func @transform_2(%arg0: i32) -> (i32, i32) {
    %c0_i32 = arith.constant 0 : i32
    %c0_i32_0 = arith.constant 0 : i32
    %c0_i32_1 = arith.constant 0 : i32
    return %c0_i32, %c0_i32_0 : i32, i32
  }
  func.func @transform_3(%arg0: i32) -> (i32, i32) {
    %c0_i32 = arith.constant 0 : i32
    %c0_i32_0 = arith.constant 0 : i32
    return %arg0, %c0_i32 : i32, i32
  }
}

module attributes {stable_mosaic.version = 11 : i64} {
  func.func @_cross_mha_ln_kernel(%arg0: i32, %arg1: memref<1x32x128xf32, #tpu.memory_space<vmem>>, %arg2: memref<1x32x128xf32, #tpu.memory_space<vmem>>, %arg3: memref<128x128xbf16, #tpu.memory_space<vmem>>, %arg4: memref<1x128xf32, #tpu.memory_space<vmem>>, %arg5: memref<128x256xbf16, #tpu.memory_space<vmem>>, %arg6: memref<1x256xf32, #tpu.memory_space<vmem>>, %arg7: memref<128x128xbf16, #tpu.memory_space<vmem>>, %arg8: memref<1x128xf32, #tpu.memory_space<vmem>>, %arg9: memref<1x128xf32, #tpu.memory_space<vmem>>, %arg10: memref<1x128xf32, #tpu.memory_space<vmem>>, %arg11: memref<1x32x128xf32, #tpu.memory_space<vmem>>) attributes {dimension_semantics = [#tpu.dimension_semantics<parallel>], iteration_bounds = array<i64: 2>, scalar_prefetch = 0 : i64, scratch_operands = 0 : i64, tpu.core_type = #tpu.core_type<tc>, window_params = [{transform_indices = @transform_0, window_bounds = array<i64: 1, 32, 128>}, {transform_indices = @transform_1, window_bounds = array<i64: 1, 32, 128>}, {pipeline_mode = #tpu.pipeline_mode<synchronous>, transform_indices = @transform_2, window_bounds = array<i64: 128, 128>}, {pipeline_mode = #tpu.pipeline_mode<synchronous>, transform_indices = @transform_3, window_bounds = array<i64: 1, 128>}, {pipeline_mode = #tpu.pipeline_mode<synchronous>, transform_indices = @transform_4, window_bounds = array<i64: 128, 256>}, {pipeline_mode = #tpu.pipeline_mode<synchronous>, transform_indices = @transform_5, window_bounds = array<i64: 1, 256>}, {pipeline_mode = #tpu.pipeline_mode<synchronous>, transform_indices = @transform_6, window_bounds = array<i64: 128, 128>}, {pipeline_mode = #tpu.pipeline_mode<synchronous>, transform_indices = @transform_7, window_bounds = array<i64: 1, 128>}, {pipeline_mode = #tpu.pipeline_mode<synchronous>, transform_indices = @transform_8, window_bounds = array<i64: 1, 128>}, {pipeline_mode = #tpu.pipeline_mode<synchronous>, transform_indices = @transform_9, window_bounds = array<i64: 1, 128>}, {transform_indices = @transform_10, window_bounds = array<i64: 1, 32, 128>}]} {
    %c0 = arith.constant 0 : index
    %c0_0 = arith.constant 0 : index
    %c0_1 = arith.constant 0 : index
    %0 = vector.load %arg1[%c0, %c0_0, %c0_1] : memref<1x32x128xf32, #tpu.memory_space<vmem>>, vector<1x32x128xf32>
    %1 = vector.shape_cast %0 : vector<1x32x128xf32> to vector<32x128xf32>
    %c0_2 = arith.constant 0 : index
    %c0_3 = arith.constant 0 : index
    %c0_4 = arith.constant 0 : index
    %2 = vector.load %arg2[%c0_2, %c0_3, %c0_4] : memref<1x32x128xf32, #tpu.memory_space<vmem>>, vector<1x32x128xf32>
    %3 = vector.shape_cast %2 : vector<1x32x128xf32> to vector<32x128xf32>
    %4 = arith.truncf %1 : vector<32x128xf32> to vector<32x128xbf16>
    %c0_5 = arith.constant 0 : index
    %c0_6 = arith.constant 0 : index
    %5 = vector.load %arg3[%c0_5, %c0_6] : memref<128x128xbf16, #tpu.memory_space<vmem>>, vector<128x128xbf16>
    %cst = arith.constant dense<0.000000e+00> : vector<32x128xf32>
    %6 = tpu.matmul %4, %5, %cst {dimension_numbers = #tpu.dot_dimension_numbers<[1], [0], [0], [1], [0, 0, 1, 1], [], []>} : vector<32x128xbf16>, vector<128x128xbf16>, vector<32x128xf32> -> vector<32x128xf32>
    %c0_7 = arith.constant 0 : index
    %c0_8 = arith.constant 0 : index
    %7 = vector.load %arg4[%c0_7, %c0_8] : memref<1x128xf32, #tpu.memory_space<vmem>>, vector<1x128xf32>
    %8 = vector.broadcast %7 : vector<1x128xf32> to vector<32x128xf32>
    %9 = arith.addf %6, %8 : vector<32x128xf32>
    %10 = arith.truncf %3 : vector<32x128xf32> to vector<32x128xbf16>
    %c0_9 = arith.constant 0 : index
    %c0_10 = arith.constant 0 : index
    %11 = vector.load %arg5[%c0_9, %c0_10] : memref<128x256xbf16, #tpu.memory_space<vmem>>, vector<128x256xbf16>
    %cst_11 = arith.constant dense<0.000000e+00> : vector<32x256xf32>
    %12 = tpu.matmul %10, %11, %cst_11 {dimension_numbers = #tpu.dot_dimension_numbers<[1], [0], [0], [1], [0, 0, 1, 1], [], []>} : vector<32x128xbf16>, vector<128x256xbf16>, vector<32x256xf32> -> vector<32x256xf32>
    %c0_12 = arith.constant 0 : index
    %c0_13 = arith.constant 0 : index
    %13 = vector.load %arg6[%c0_12, %c0_13] : memref<1x256xf32, #tpu.memory_space<vmem>>, vector<1x256xf32>
    %14 = vector.broadcast %13 : vector<1x256xf32> to vector<32x256xf32>
    %15 = arith.addf %12, %14 : vector<32x256xf32>
    %16 = vector.extract_strided_slice %15 {offsets = [0, 0], sizes = [32, 128], strides = [1, 1]} : vector<32x256xf32> to vector<32x128xf32>
    %17 = vector.extract_strided_slice %15 {offsets = [0, 128], sizes = [32, 128], strides = [1, 1]} : vector<32x256xf32> to vector<32x128xf32>
    %cst_14 = arith.constant 0.000000e+00 : f32
    %18 = vector.broadcast %cst_14 : f32 to vector<32x128xf32>
    %19 = vector.extract_strided_slice %9 {offsets = [0, 0], sizes = [32, 16], strides = [1, 1]} : vector<32x128xf32> to vector<32x16xf32>
    %cst_15 = arith.constant 2.500000e-01 : f32
    %20 = vector.broadcast %cst_15 : f32 to vector<32x16xf32>
    %21 = arith.mulf %19, %20 : vector<32x16xf32>
    %22 = arith.truncf %21 : vector<32x16xf32> to vector<32x16xbf16>
    %23 = vector.extract_strided_slice %16 {offsets = [0, 0], sizes = [32, 16], strides = [1, 1]} : vector<32x128xf32> to vector<32x16xf32>
    %24 = arith.truncf %23 : vector<32x16xf32> to vector<32x16xbf16>
    %25 = vector.extract_strided_slice %17 {offsets = [0, 0], sizes = [32, 16], strides = [1, 1]} : vector<32x128xf32> to vector<32x16xf32>
    %26 = arith.truncf %25 : vector<32x16xf32> to vector<32x16xbf16>
    %cst_16 = arith.constant dense<0.000000e+00> : vector<32x32xf32>
    %27 = tpu.matmul %22, %24, %cst_16 {dimension_numbers = #tpu.dot_dimension_numbers<[1], [1], [0], [0], [0, 0, 1, 0], [], []>} : vector<32x16xbf16>, vector<32x16xbf16>, vector<32x32xf32> -> vector<32x32xf32>
    %cst_17 = arith.constant dense<0xFF800000> : vector<32xf32>
    %28 = vector.multi_reduction <maximumf>, %27, %cst_17 [1] : vector<32x32xf32> to vector<32xf32>
    %29 = vector.shape_cast %28 : vector<32xf32> to vector<32x1xf32>
    %30 = vector.broadcast %29 : vector<32x1xf32> to vector<32x32xf32>
    %31 = arith.subf %27, %30 : vector<32x32xf32>
    %32 = math.exp %31 : vector<32x32xf32>
    %cst_18 = arith.constant dense<0.000000e+00> : vector<32xf32>
    %33 = vector.multi_reduction <add>, %32, %cst_18 [1] : vector<32x32xf32> to vector<32xf32>
    %34 = vector.shape_cast %33 : vector<32xf32> to vector<32x1xf32>
    %35 = tpu.reciprocal %34 {approx = true} : vector<32x1xf32> -> vector<32x1xf32>
    %36 = vector.broadcast %35 : vector<32x1xf32> to vector<32x32xf32>
    %37 = arith.mulf %32, %36 : vector<32x32xf32>
    %38 = arith.truncf %37 : vector<32x32xf32> to vector<32x32xbf16>
    %cst_19 = arith.constant dense<0.000000e+00> : vector<32x16xf32>
    %39 = tpu.matmul %38, %26, %cst_19 {dimension_numbers = #tpu.dot_dimension_numbers<[1], [0], [0], [1], [0, 0, 1, 1], [], []>} : vector<32x32xbf16>, vector<32x16xbf16>, vector<32x16xf32> -> vector<32x16xf32>
    %40 = arith.truncf %39 : vector<32x16xf32> to vector<32x16xbf16>
    %c0_20 = arith.constant 0 : index
    %c0_21 = arith.constant 0 : index
    %41 = vector.load %arg7[%c0_20, %c0_21] : memref<128x128xbf16, #tpu.memory_space<vmem>>, vector<16x128xbf16>
    %cst_22 = arith.constant dense<0.000000e+00> : vector<32x128xf32>
    %42 = tpu.matmul %40, %41, %cst_22 {dimension_numbers = #tpu.dot_dimension_numbers<[1], [0], [0], [1], [0, 0, 1, 1], [], []>} : vector<32x16xbf16>, vector<16x128xbf16>, vector<32x128xf32> -> vector<32x128xf32>
    %43 = arith.addf %18, %42 : vector<32x128xf32>
    %44 = vector.extract_strided_slice %9 {offsets = [0, 16], sizes = [32, 16], strides = [1, 1]} : vector<32x128xf32> to vector<32x16xf32>
    %cst_23 = arith.constant 2.500000e-01 : f32
    %45 = vector.broadcast %cst_23 : f32 to vector<32x16xf32>
    %46 = arith.mulf %44, %45 : vector<32x16xf32>
    %47 = arith.truncf %46 : vector<32x16xf32> to vector<32x16xbf16>
    %48 = vector.extract_strided_slice %16 {offsets = [0, 16], sizes = [32, 16], strides = [1, 1]} : vector<32x128xf32> to vector<32x16xf32>
    %49 = arith.truncf %48 : vector<32x16xf32> to vector<32x16xbf16>
    %50 = vector.extract_strided_slice %17 {offsets = [0, 16], sizes = [32, 16], strides = [1, 1]} : vector<32x128xf32> to vector<32x16xf32>
    %51 = arith.truncf %50 : vector<32x16xf32> to vector<32x16xbf16>
    %cst_24 = arith.constant dense<0.000000e+00> : vector<32x32xf32>
    %52 = tpu.matmul %47, %49, %cst_24 {dimension_numbers = #tpu.dot_dimension_numbers<[1], [1], [0], [0], [0, 0, 1, 0], [], []>} : vector<32x16xbf16>, vector<32x16xbf16>, vector<32x32xf32> -> vector<32x32xf32>
    %cst_25 = arith.constant dense<0xFF800000> : vector<32xf32>
    %53 = vector.multi_reduction <maximumf>, %52, %cst_25 [1] : vector<32x32xf32> to vector<32xf32>
    %54 = vector.shape_cast %53 : vector<32xf32> to vector<32x1xf32>
    %55 = vector.broadcast %54 : vector<32x1xf32> to vector<32x32xf32>
    %56 = arith.subf %52, %55 : vector<32x32xf32>
    %57 = math.exp %56 : vector<32x32xf32>
    %cst_26 = arith.constant dense<0.000000e+00> : vector<32xf32>
    %58 = vector.multi_reduction <add>, %57, %cst_26 [1] : vector<32x32xf32> to vector<32xf32>
    %59 = vector.shape_cast %58 : vector<32xf32> to vector<32x1xf32>
    %60 = tpu.reciprocal %59 {approx = true} : vector<32x1xf32> -> vector<32x1xf32>
    %61 = vector.broadcast %60 : vector<32x1xf32> to vector<32x32xf32>
    %62 = arith.mulf %57, %61 : vector<32x32xf32>
    %63 = arith.truncf %62 : vector<32x32xf32> to vector<32x32xbf16>
    %cst_27 = arith.constant dense<0.000000e+00> : vector<32x16xf32>
    %64 = tpu.matmul %63, %51, %cst_27 {dimension_numbers = #tpu.dot_dimension_numbers<[1], [0], [0], [1], [0, 0, 1, 1], [], []>} : vector<32x32xbf16>, vector<32x16xbf16>, vector<32x16xf32> -> vector<32x16xf32>
    %65 = arith.truncf %64 : vector<32x16xf32> to vector<32x16xbf16>
    %c16 = arith.constant 16 : index
    %c0_28 = arith.constant 0 : index
    %66 = vector.load %arg7[%c16, %c0_28] : memref<128x128xbf16, #tpu.memory_space<vmem>>, vector<16x128xbf16>
    %cst_29 = arith.constant dense<0.000000e+00> : vector<32x128xf32>
    %67 = tpu.matmul %65, %66, %cst_29 {dimension_numbers = #tpu.dot_dimension_numbers<[1], [0], [0], [1], [0, 0, 1, 1], [], []>} : vector<32x16xbf16>, vector<16x128xbf16>, vector<32x128xf32> -> vector<32x128xf32>
    %68 = arith.addf %43, %67 : vector<32x128xf32>
    %69 = vector.extract_strided_slice %9 {offsets = [0, 32], sizes = [32, 16], strides = [1, 1]} : vector<32x128xf32> to vector<32x16xf32>
    %cst_30 = arith.constant 2.500000e-01 : f32
    %70 = vector.broadcast %cst_30 : f32 to vector<32x16xf32>
    %71 = arith.mulf %69, %70 : vector<32x16xf32>
    %72 = arith.truncf %71 : vector<32x16xf32> to vector<32x16xbf16>
    %73 = vector.extract_strided_slice %16 {offsets = [0, 32], sizes = [32, 16], strides = [1, 1]} : vector<32x128xf32> to vector<32x16xf32>
    %74 = arith.truncf %73 : vector<32x16xf32> to vector<32x16xbf16>
    %75 = vector.extract_strided_slice %17 {offsets = [0, 32], sizes = [32, 16], strides = [1, 1]} : vector<32x128xf32> to vector<32x16xf32>
    %76 = arith.truncf %75 : vector<32x16xf32> to vector<32x16xbf16>
    %cst_31 = arith.constant dense<0.000000e+00> : vector<32x32xf32>
    %77 = tpu.matmul %72, %74, %cst_31 {dimension_numbers = #tpu.dot_dimension_numbers<[1], [1], [0], [0], [0, 0, 1, 0], [], []>} : vector<32x16xbf16>, vector<32x16xbf16>, vector<32x32xf32> -> vector<32x32xf32>
    %cst_32 = arith.constant dense<0xFF800000> : vector<32xf32>
    %78 = vector.multi_reduction <maximumf>, %77, %cst_32 [1] : vector<32x32xf32> to vector<32xf32>
    %79 = vector.shape_cast %78 : vector<32xf32> to vector<32x1xf32>
    %80 = vector.broadcast %79 : vector<32x1xf32> to vector<32x32xf32>
    %81 = arith.subf %77, %80 : vector<32x32xf32>
    %82 = math.exp %81 : vector<32x32xf32>
    %cst_33 = arith.constant dense<0.000000e+00> : vector<32xf32>
    %83 = vector.multi_reduction <add>, %82, %cst_33 [1] : vector<32x32xf32> to vector<32xf32>
    %84 = vector.shape_cast %83 : vector<32xf32> to vector<32x1xf32>
    %85 = tpu.reciprocal %84 {approx = true} : vector<32x1xf32> -> vector<32x1xf32>
    %86 = vector.broadcast %85 : vector<32x1xf32> to vector<32x32xf32>
    %87 = arith.mulf %82, %86 : vector<32x32xf32>
    %88 = arith.truncf %87 : vector<32x32xf32> to vector<32x32xbf16>
    %cst_34 = arith.constant dense<0.000000e+00> : vector<32x16xf32>
    %89 = tpu.matmul %88, %76, %cst_34 {dimension_numbers = #tpu.dot_dimension_numbers<[1], [0], [0], [1], [0, 0, 1, 1], [], []>} : vector<32x32xbf16>, vector<32x16xbf16>, vector<32x16xf32> -> vector<32x16xf32>
    %90 = arith.truncf %89 : vector<32x16xf32> to vector<32x16xbf16>
    %c32 = arith.constant 32 : index
    %c0_35 = arith.constant 0 : index
    %91 = vector.load %arg7[%c32, %c0_35] : memref<128x128xbf16, #tpu.memory_space<vmem>>, vector<16x128xbf16>
    %cst_36 = arith.constant dense<0.000000e+00> : vector<32x128xf32>
    %92 = tpu.matmul %90, %91, %cst_36 {dimension_numbers = #tpu.dot_dimension_numbers<[1], [0], [0], [1], [0, 0, 1, 1], [], []>} : vector<32x16xbf16>, vector<16x128xbf16>, vector<32x128xf32> -> vector<32x128xf32>
    %93 = arith.addf %68, %92 : vector<32x128xf32>
    %94 = vector.extract_strided_slice %9 {offsets = [0, 48], sizes = [32, 16], strides = [1, 1]} : vector<32x128xf32> to vector<32x16xf32>
    %cst_37 = arith.constant 2.500000e-01 : f32
    %95 = vector.broadcast %cst_37 : f32 to vector<32x16xf32>
    %96 = arith.mulf %94, %95 : vector<32x16xf32>
    %97 = arith.truncf %96 : vector<32x16xf32> to vector<32x16xbf16>
    %98 = vector.extract_strided_slice %16 {offsets = [0, 48], sizes = [32, 16], strides = [1, 1]} : vector<32x128xf32> to vector<32x16xf32>
    %99 = arith.truncf %98 : vector<32x16xf32> to vector<32x16xbf16>
    %100 = vector.extract_strided_slice %17 {offsets = [0, 48], sizes = [32, 16], strides = [1, 1]} : vector<32x128xf32> to vector<32x16xf32>
    %101 = arith.truncf %100 : vector<32x16xf32> to vector<32x16xbf16>
    %cst_38 = arith.constant dense<0.000000e+00> : vector<32x32xf32>
    %102 = tpu.matmul %97, %99, %cst_38 {dimension_numbers = #tpu.dot_dimension_numbers<[1], [1], [0], [0], [0, 0, 1, 0], [], []>} : vector<32x16xbf16>, vector<32x16xbf16>, vector<32x32xf32> -> vector<32x32xf32>
    %cst_39 = arith.constant dense<0xFF800000> : vector<32xf32>
    %103 = vector.multi_reduction <maximumf>, %102, %cst_39 [1] : vector<32x32xf32> to vector<32xf32>
    %104 = vector.shape_cast %103 : vector<32xf32> to vector<32x1xf32>
    %105 = vector.broadcast %104 : vector<32x1xf32> to vector<32x32xf32>
    %106 = arith.subf %102, %105 : vector<32x32xf32>
    %107 = math.exp %106 : vector<32x32xf32>
    %cst_40 = arith.constant dense<0.000000e+00> : vector<32xf32>
    %108 = vector.multi_reduction <add>, %107, %cst_40 [1] : vector<32x32xf32> to vector<32xf32>
    %109 = vector.shape_cast %108 : vector<32xf32> to vector<32x1xf32>
    %110 = tpu.reciprocal %109 {approx = true} : vector<32x1xf32> -> vector<32x1xf32>
    %111 = vector.broadcast %110 : vector<32x1xf32> to vector<32x32xf32>
    %112 = arith.mulf %107, %111 : vector<32x32xf32>
    %113 = arith.truncf %112 : vector<32x32xf32> to vector<32x32xbf16>
    %cst_41 = arith.constant dense<0.000000e+00> : vector<32x16xf32>
    %114 = tpu.matmul %113, %101, %cst_41 {dimension_numbers = #tpu.dot_dimension_numbers<[1], [0], [0], [1], [0, 0, 1, 1], [], []>} : vector<32x32xbf16>, vector<32x16xbf16>, vector<32x16xf32> -> vector<32x16xf32>
    %115 = arith.truncf %114 : vector<32x16xf32> to vector<32x16xbf16>
    %c48 = arith.constant 48 : index
    %c0_42 = arith.constant 0 : index
    %116 = vector.load %arg7[%c48, %c0_42] : memref<128x128xbf16, #tpu.memory_space<vmem>>, vector<16x128xbf16>
    %cst_43 = arith.constant dense<0.000000e+00> : vector<32x128xf32>
    %117 = tpu.matmul %115, %116, %cst_43 {dimension_numbers = #tpu.dot_dimension_numbers<[1], [0], [0], [1], [0, 0, 1, 1], [], []>} : vector<32x16xbf16>, vector<16x128xbf16>, vector<32x128xf32> -> vector<32x128xf32>
    %118 = arith.addf %93, %117 : vector<32x128xf32>
    %119 = vector.extract_strided_slice %9 {offsets = [0, 64], sizes = [32, 16], strides = [1, 1]} : vector<32x128xf32> to vector<32x16xf32>
    %cst_44 = arith.constant 2.500000e-01 : f32
    %120 = vector.broadcast %cst_44 : f32 to vector<32x16xf32>
    %121 = arith.mulf %119, %120 : vector<32x16xf32>
    %122 = arith.truncf %121 : vector<32x16xf32> to vector<32x16xbf16>
    %123 = vector.extract_strided_slice %16 {offsets = [0, 64], sizes = [32, 16], strides = [1, 1]} : vector<32x128xf32> to vector<32x16xf32>
    %124 = arith.truncf %123 : vector<32x16xf32> to vector<32x16xbf16>
    %125 = vector.extract_strided_slice %17 {offsets = [0, 64], sizes = [32, 16], strides = [1, 1]} : vector<32x128xf32> to vector<32x16xf32>
    %126 = arith.truncf %125 : vector<32x16xf32> to vector<32x16xbf16>
    %cst_45 = arith.constant dense<0.000000e+00> : vector<32x32xf32>
    %127 = tpu.matmul %122, %124, %cst_45 {dimension_numbers = #tpu.dot_dimension_numbers<[1], [1], [0], [0], [0, 0, 1, 0], [], []>} : vector<32x16xbf16>, vector<32x16xbf16>, vector<32x32xf32> -> vector<32x32xf32>
    %cst_46 = arith.constant dense<0xFF800000> : vector<32xf32>
    %128 = vector.multi_reduction <maximumf>, %127, %cst_46 [1] : vector<32x32xf32> to vector<32xf32>
    %129 = vector.shape_cast %128 : vector<32xf32> to vector<32x1xf32>
    %130 = vector.broadcast %129 : vector<32x1xf32> to vector<32x32xf32>
    %131 = arith.subf %127, %130 : vector<32x32xf32>
    %132 = math.exp %131 : vector<32x32xf32>
    %cst_47 = arith.constant dense<0.000000e+00> : vector<32xf32>
    %133 = vector.multi_reduction <add>, %132, %cst_47 [1] : vector<32x32xf32> to vector<32xf32>
    %134 = vector.shape_cast %133 : vector<32xf32> to vector<32x1xf32>
    %135 = tpu.reciprocal %134 {approx = true} : vector<32x1xf32> -> vector<32x1xf32>
    %136 = vector.broadcast %135 : vector<32x1xf32> to vector<32x32xf32>
    %137 = arith.mulf %132, %136 : vector<32x32xf32>
    %138 = arith.truncf %137 : vector<32x32xf32> to vector<32x32xbf16>
    %cst_48 = arith.constant dense<0.000000e+00> : vector<32x16xf32>
    %139 = tpu.matmul %138, %126, %cst_48 {dimension_numbers = #tpu.dot_dimension_numbers<[1], [0], [0], [1], [0, 0, 1, 1], [], []>} : vector<32x32xbf16>, vector<32x16xbf16>, vector<32x16xf32> -> vector<32x16xf32>
    %140 = arith.truncf %139 : vector<32x16xf32> to vector<32x16xbf16>
    %c64 = arith.constant 64 : index
    %c0_49 = arith.constant 0 : index
    %141 = vector.load %arg7[%c64, %c0_49] : memref<128x128xbf16, #tpu.memory_space<vmem>>, vector<16x128xbf16>
    %cst_50 = arith.constant dense<0.000000e+00> : vector<32x128xf32>
    %142 = tpu.matmul %140, %141, %cst_50 {dimension_numbers = #tpu.dot_dimension_numbers<[1], [0], [0], [1], [0, 0, 1, 1], [], []>} : vector<32x16xbf16>, vector<16x128xbf16>, vector<32x128xf32> -> vector<32x128xf32>
    %143 = arith.addf %118, %142 : vector<32x128xf32>
    %144 = vector.extract_strided_slice %9 {offsets = [0, 80], sizes = [32, 16], strides = [1, 1]} : vector<32x128xf32> to vector<32x16xf32>
    %cst_51 = arith.constant 2.500000e-01 : f32
    %145 = vector.broadcast %cst_51 : f32 to vector<32x16xf32>
    %146 = arith.mulf %144, %145 : vector<32x16xf32>
    %147 = arith.truncf %146 : vector<32x16xf32> to vector<32x16xbf16>
    %148 = vector.extract_strided_slice %16 {offsets = [0, 80], sizes = [32, 16], strides = [1, 1]} : vector<32x128xf32> to vector<32x16xf32>
    %149 = arith.truncf %148 : vector<32x16xf32> to vector<32x16xbf16>
    %150 = vector.extract_strided_slice %17 {offsets = [0, 80], sizes = [32, 16], strides = [1, 1]} : vector<32x128xf32> to vector<32x16xf32>
    %151 = arith.truncf %150 : vector<32x16xf32> to vector<32x16xbf16>
    %cst_52 = arith.constant dense<0.000000e+00> : vector<32x32xf32>
    %152 = tpu.matmul %147, %149, %cst_52 {dimension_numbers = #tpu.dot_dimension_numbers<[1], [1], [0], [0], [0, 0, 1, 0], [], []>} : vector<32x16xbf16>, vector<32x16xbf16>, vector<32x32xf32> -> vector<32x32xf32>
    %cst_53 = arith.constant dense<0xFF800000> : vector<32xf32>
    %153 = vector.multi_reduction <maximumf>, %152, %cst_53 [1] : vector<32x32xf32> to vector<32xf32>
    %154 = vector.shape_cast %153 : vector<32xf32> to vector<32x1xf32>
    %155 = vector.broadcast %154 : vector<32x1xf32> to vector<32x32xf32>
    %156 = arith.subf %152, %155 : vector<32x32xf32>
    %157 = math.exp %156 : vector<32x32xf32>
    %cst_54 = arith.constant dense<0.000000e+00> : vector<32xf32>
    %158 = vector.multi_reduction <add>, %157, %cst_54 [1] : vector<32x32xf32> to vector<32xf32>
    %159 = vector.shape_cast %158 : vector<32xf32> to vector<32x1xf32>
    %160 = tpu.reciprocal %159 {approx = true} : vector<32x1xf32> -> vector<32x1xf32>
    %161 = vector.broadcast %160 : vector<32x1xf32> to vector<32x32xf32>
    %162 = arith.mulf %157, %161 : vector<32x32xf32>
    %163 = arith.truncf %162 : vector<32x32xf32> to vector<32x32xbf16>
    %cst_55 = arith.constant dense<0.000000e+00> : vector<32x16xf32>
    %164 = tpu.matmul %163, %151, %cst_55 {dimension_numbers = #tpu.dot_dimension_numbers<[1], [0], [0], [1], [0, 0, 1, 1], [], []>} : vector<32x32xbf16>, vector<32x16xbf16>, vector<32x16xf32> -> vector<32x16xf32>
    %165 = arith.truncf %164 : vector<32x16xf32> to vector<32x16xbf16>
    %c80 = arith.constant 80 : index
    %c0_56 = arith.constant 0 : index
    %166 = vector.load %arg7[%c80, %c0_56] : memref<128x128xbf16, #tpu.memory_space<vmem>>, vector<16x128xbf16>
    %cst_57 = arith.constant dense<0.000000e+00> : vector<32x128xf32>
    %167 = tpu.matmul %165, %166, %cst_57 {dimension_numbers = #tpu.dot_dimension_numbers<[1], [0], [0], [1], [0, 0, 1, 1], [], []>} : vector<32x16xbf16>, vector<16x128xbf16>, vector<32x128xf32> -> vector<32x128xf32>
    %168 = arith.addf %143, %167 : vector<32x128xf32>
    %169 = vector.extract_strided_slice %9 {offsets = [0, 96], sizes = [32, 16], strides = [1, 1]} : vector<32x128xf32> to vector<32x16xf32>
    %cst_58 = arith.constant 2.500000e-01 : f32
    %170 = vector.broadcast %cst_58 : f32 to vector<32x16xf32>
    %171 = arith.mulf %169, %170 : vector<32x16xf32>
    %172 = arith.truncf %171 : vector<32x16xf32> to vector<32x16xbf16>
    %173 = vector.extract_strided_slice %16 {offsets = [0, 96], sizes = [32, 16], strides = [1, 1]} : vector<32x128xf32> to vector<32x16xf32>
    %174 = arith.truncf %173 : vector<32x16xf32> to vector<32x16xbf16>
    %175 = vector.extract_strided_slice %17 {offsets = [0, 96], sizes = [32, 16], strides = [1, 1]} : vector<32x128xf32> to vector<32x16xf32>
    %176 = arith.truncf %175 : vector<32x16xf32> to vector<32x16xbf16>
    %cst_59 = arith.constant dense<0.000000e+00> : vector<32x32xf32>
    %177 = tpu.matmul %172, %174, %cst_59 {dimension_numbers = #tpu.dot_dimension_numbers<[1], [1], [0], [0], [0, 0, 1, 0], [], []>} : vector<32x16xbf16>, vector<32x16xbf16>, vector<32x32xf32> -> vector<32x32xf32>
    %cst_60 = arith.constant dense<0xFF800000> : vector<32xf32>
    %178 = vector.multi_reduction <maximumf>, %177, %cst_60 [1] : vector<32x32xf32> to vector<32xf32>
    %179 = vector.shape_cast %178 : vector<32xf32> to vector<32x1xf32>
    %180 = vector.broadcast %179 : vector<32x1xf32> to vector<32x32xf32>
    %181 = arith.subf %177, %180 : vector<32x32xf32>
    %182 = math.exp %181 : vector<32x32xf32>
    %cst_61 = arith.constant dense<0.000000e+00> : vector<32xf32>
    %183 = vector.multi_reduction <add>, %182, %cst_61 [1] : vector<32x32xf32> to vector<32xf32>
    %184 = vector.shape_cast %183 : vector<32xf32> to vector<32x1xf32>
    %185 = tpu.reciprocal %184 {approx = true} : vector<32x1xf32> -> vector<32x1xf32>
    %186 = vector.broadcast %185 : vector<32x1xf32> to vector<32x32xf32>
    %187 = arith.mulf %182, %186 : vector<32x32xf32>
    %188 = arith.truncf %187 : vector<32x32xf32> to vector<32x32xbf16>
    %cst_62 = arith.constant dense<0.000000e+00> : vector<32x16xf32>
    %189 = tpu.matmul %188, %176, %cst_62 {dimension_numbers = #tpu.dot_dimension_numbers<[1], [0], [0], [1], [0, 0, 1, 1], [], []>} : vector<32x32xbf16>, vector<32x16xbf16>, vector<32x16xf32> -> vector<32x16xf32>
    %190 = arith.truncf %189 : vector<32x16xf32> to vector<32x16xbf16>
    %c96 = arith.constant 96 : index
    %c0_63 = arith.constant 0 : index
    %191 = vector.load %arg7[%c96, %c0_63] : memref<128x128xbf16, #tpu.memory_space<vmem>>, vector<16x128xbf16>
    %cst_64 = arith.constant dense<0.000000e+00> : vector<32x128xf32>
    %192 = tpu.matmul %190, %191, %cst_64 {dimension_numbers = #tpu.dot_dimension_numbers<[1], [0], [0], [1], [0, 0, 1, 1], [], []>} : vector<32x16xbf16>, vector<16x128xbf16>, vector<32x128xf32> -> vector<32x128xf32>
    %193 = arith.addf %168, %192 : vector<32x128xf32>
    %194 = vector.extract_strided_slice %9 {offsets = [0, 112], sizes = [32, 16], strides = [1, 1]} : vector<32x128xf32> to vector<32x16xf32>
    %cst_65 = arith.constant 2.500000e-01 : f32
    %195 = vector.broadcast %cst_65 : f32 to vector<32x16xf32>
    %196 = arith.mulf %194, %195 : vector<32x16xf32>
    %197 = arith.truncf %196 : vector<32x16xf32> to vector<32x16xbf16>
    %198 = vector.extract_strided_slice %16 {offsets = [0, 112], sizes = [32, 16], strides = [1, 1]} : vector<32x128xf32> to vector<32x16xf32>
    %199 = arith.truncf %198 : vector<32x16xf32> to vector<32x16xbf16>
    %200 = vector.extract_strided_slice %17 {offsets = [0, 112], sizes = [32, 16], strides = [1, 1]} : vector<32x128xf32> to vector<32x16xf32>
    %201 = arith.truncf %200 : vector<32x16xf32> to vector<32x16xbf16>
    %cst_66 = arith.constant dense<0.000000e+00> : vector<32x32xf32>
    %202 = tpu.matmul %197, %199, %cst_66 {dimension_numbers = #tpu.dot_dimension_numbers<[1], [1], [0], [0], [0, 0, 1, 0], [], []>} : vector<32x16xbf16>, vector<32x16xbf16>, vector<32x32xf32> -> vector<32x32xf32>
    %cst_67 = arith.constant dense<0xFF800000> : vector<32xf32>
    %203 = vector.multi_reduction <maximumf>, %202, %cst_67 [1] : vector<32x32xf32> to vector<32xf32>
    %204 = vector.shape_cast %203 : vector<32xf32> to vector<32x1xf32>
    %205 = vector.broadcast %204 : vector<32x1xf32> to vector<32x32xf32>
    %206 = arith.subf %202, %205 : vector<32x32xf32>
    %207 = math.exp %206 : vector<32x32xf32>
    %cst_68 = arith.constant dense<0.000000e+00> : vector<32xf32>
    %208 = vector.multi_reduction <add>, %207, %cst_68 [1] : vector<32x32xf32> to vector<32xf32>
    %209 = vector.shape_cast %208 : vector<32xf32> to vector<32x1xf32>
    %210 = tpu.reciprocal %209 {approx = true} : vector<32x1xf32> -> vector<32x1xf32>
    %211 = vector.broadcast %210 : vector<32x1xf32> to vector<32x32xf32>
    %212 = arith.mulf %207, %211 : vector<32x32xf32>
    %213 = arith.truncf %212 : vector<32x32xf32> to vector<32x32xbf16>
    %cst_69 = arith.constant dense<0.000000e+00> : vector<32x16xf32>
    %214 = tpu.matmul %213, %201, %cst_69 {dimension_numbers = #tpu.dot_dimension_numbers<[1], [0], [0], [1], [0, 0, 1, 1], [], []>} : vector<32x32xbf16>, vector<32x16xbf16>, vector<32x16xf32> -> vector<32x16xf32>
    %215 = arith.truncf %214 : vector<32x16xf32> to vector<32x16xbf16>
    %c112 = arith.constant 112 : index
    %c0_70 = arith.constant 0 : index
    %216 = vector.load %arg7[%c112, %c0_70] : memref<128x128xbf16, #tpu.memory_space<vmem>>, vector<16x128xbf16>
    %cst_71 = arith.constant dense<0.000000e+00> : vector<32x128xf32>
    %217 = tpu.matmul %215, %216, %cst_71 {dimension_numbers = #tpu.dot_dimension_numbers<[1], [0], [0], [1], [0, 0, 1, 1], [], []>} : vector<32x16xbf16>, vector<16x128xbf16>, vector<32x128xf32> -> vector<32x128xf32>
    %218 = arith.addf %193, %217 : vector<32x128xf32>
    %219 = arith.addf %1, %218 : vector<32x128xf32>
    %c0_72 = arith.constant 0 : index
    %c0_73 = arith.constant 0 : index
    %220 = vector.load %arg8[%c0_72, %c0_73] : memref<1x128xf32, #tpu.memory_space<vmem>>, vector<1x128xf32>
    %221 = vector.broadcast %220 : vector<1x128xf32> to vector<32x128xf32>
    %222 = arith.addf %219, %221 : vector<32x128xf32>
    %cst_74 = arith.constant dense<0.000000e+00> : vector<32xf32>
    %223 = vector.multi_reduction <add>, %222, %cst_74 [1] : vector<32x128xf32> to vector<32xf32>
    %224 = vector.shape_cast %223 : vector<32xf32> to vector<32x1xf32>
    %cst_75 = arith.constant 1.280000e+02 : f32
    %225 = vector.broadcast %cst_75 : f32 to vector<32x1xf32>
    %226 = arith.divf %224, %225 : vector<32x1xf32>
    %227 = vector.broadcast %226 : vector<32x1xf32> to vector<32x128xf32>
    %228 = arith.subf %222, %227 : vector<32x128xf32>
    %229 = arith.mulf %228, %228 : vector<32x128xf32>
    %cst_76 = arith.constant dense<0.000000e+00> : vector<32xf32>
    %230 = vector.multi_reduction <add>, %229, %cst_76 [1] : vector<32x128xf32> to vector<32xf32>
    %231 = vector.shape_cast %230 : vector<32xf32> to vector<32x1xf32>
    %cst_77 = arith.constant 1.280000e+02 : f32
    %232 = vector.broadcast %cst_77 : f32 to vector<32x1xf32>
    %233 = arith.divf %231, %232 : vector<32x1xf32>
    %234 = vector.broadcast %226 : vector<32x1xf32> to vector<32x128xf32>
    %235 = arith.subf %222, %234 : vector<32x128xf32>
    %cst_78 = arith.constant 9.99999974E-6 : f32
    %236 = vector.broadcast %cst_78 : f32 to vector<32x1xf32>
    %237 = arith.addf %233, %236 : vector<32x1xf32>
    %238 = math.rsqrt %237 : vector<32x1xf32>
    %239 = vector.broadcast %238 : vector<32x1xf32> to vector<32x128xf32>
    %240 = arith.mulf %235, %239 : vector<32x128xf32>
    %c0_79 = arith.constant 0 : index
    %c0_80 = arith.constant 0 : index
    %241 = vector.load %arg9[%c0_79, %c0_80] : memref<1x128xf32, #tpu.memory_space<vmem>>, vector<1x128xf32>
    %242 = vector.broadcast %241 : vector<1x128xf32> to vector<32x128xf32>
    %243 = arith.mulf %240, %242 : vector<32x128xf32>
    %c0_81 = arith.constant 0 : index
    %c0_82 = arith.constant 0 : index
    %244 = vector.load %arg10[%c0_81, %c0_82] : memref<1x128xf32, #tpu.memory_space<vmem>>, vector<1x128xf32>
    %245 = vector.broadcast %244 : vector<1x128xf32> to vector<32x128xf32>
    %246 = arith.addf %243, %245 : vector<32x128xf32>
    %c0_83 = arith.constant 0 : index
    %c0_84 = arith.constant 0 : index
    %c0_85 = arith.constant 0 : index
    %247 = vector.load %arg11[%c0_83, %c0_84, %c0_85] : memref<1x32x128xf32, #tpu.memory_space<vmem>>, vector<1x32x128xf32>
    %248 = vector.shape_cast %247 : vector<1x32x128xf32> to vector<32x128xf32>
    %249 = vector.shape_cast %246 : vector<32x128xf32> to vector<1x32x128xf32>
    tpu.vector_store %arg11[%c0_83, %c0_84, %c0_85], %249 {strides = array<i32>} : memref<1x32x128xf32, #tpu.memory_space<vmem>>, vector<1x32x128xf32>,
    return
  }
  func.func @transform_0(%arg0: i32) -> (i32, i32, i32) {
    %c0_i32 = arith.constant 0 : i32
    %c0_i32_0 = arith.constant 0 : i32
    %c0_i32_1 = arith.constant 0 : i32
    return %arg0, %c0_i32, %c0_i32_0 : i32, i32, i32
  }
  func.func @transform_1(%arg0: i32) -> (i32, i32, i32) {
    %c0_i32 = arith.constant 0 : i32
    %c0_i32_0 = arith.constant 0 : i32
    %c0_i32_1 = arith.constant 0 : i32
    return %arg0, %c0_i32, %c0_i32_0 : i32, i32, i32
  }
  func.func @transform_2(%arg0: i32) -> (i32, i32) {
    %c0_i32 = arith.constant 0 : i32
    %c0_i32_0 = arith.constant 0 : i32
    %c0_i32_1 = arith.constant 0 : i32
    return %c0_i32, %c0_i32_0 : i32, i32
  }
  func.func @transform_3(%arg0: i32) -> (i32, i32) {
    %c0_i32 = arith.constant 0 : i32
    %c0_i32_0 = arith.constant 0 : i32
    %c0_i32_1 = arith.constant 0 : i32
    return %c0_i32, %c0_i32_0 : i32, i32
  }
  func.func @transform_4(%arg0: i32) -> (i32, i32) {
    %c0_i32 = arith.constant 0 : i32
    %c0_i32_0 = arith.constant 0 : i32
    %c0_i32_1 = arith.constant 0 : i32
    return %c0_i32, %c0_i32_0 : i32, i32
  }
  func.func @transform_5(%arg0: i32) -> (i32, i32) {
    %c0_i32 = arith.constant 0 : i32
    %c0_i32_0 = arith.constant 0 : i32
    %c0_i32_1 = arith.constant 0 : i32
    return %c0_i32, %c0_i32_0 : i32, i32
  }
  func.func @transform_6(%arg0: i32) -> (i32, i32) {
    %c0_i32 = arith.constant 0 : i32
    %c0_i32_0 = arith.constant 0 : i32
    %c0_i32_1 = arith.constant 0 : i32
    return %c0_i32, %c0_i32_0 : i32, i32
  }
  func.func @transform_7(%arg0: i32) -> (i32, i32) {
    %c0_i32 = arith.constant 0 : i32
    %c0_i32_0 = arith.constant 0 : i32
    %c0_i32_1 = arith.constant 0 : i32
    return %c0_i32, %c0_i32_0 : i32, i32
  }
  func.func @transform_8(%arg0: i32) -> (i32, i32) {
    %c0_i32 = arith.constant 0 : i32
    %c0_i32_0 = arith.constant 0 : i32
    %c0_i32_1 = arith.constant 0 : i32
    return %c0_i32, %c0_i32_0 : i32, i32
  }
  func.func @transform_9(%arg0: i32) -> (i32, i32) {
    %c0_i32 = arith.constant 0 : i32
    %c0_i32_0 = arith.constant 0 : i32
    %c0_i32_1 = arith.constant 0 : i32
    return %c0_i32, %c0_i32_0 : i32, i32
  }
  func.func @transform_10(%arg0: i32) -> (i32, i32, i32) {
    %c0_i32 = arith.constant 0 : i32
    %c0_i32_0 = arith.constant 0 : i32
    %c0_i32_1 = arith.constant 0 : i32
    return %arg0, %c0_i32, %c0_i32_0 : i32, i32, i32
  }
}

</mosaic_0001>

<bundles_post_ra>
// kernel: forward.31
= control target key start
LH: loop header
LB: loop body
LE: loop exit
PB: predicated region body
PF: predicated region fallthrough
CT: control target
= control target key end

     0   :  { %9 = vsyncpa [#allocation3], 0  ;;  %s638_s0 = inlined_call_operand.vmem [shape: f32[128,12], index: 0, kind: input, shape index: {}]   ;;  %s639_s1 = inlined_call_operand.vmem [shape: f32[128,12], index: 1, kind: input, shape index: {}]   ;;  %s640_s2 = inlined_call_operand.hbm [shape: bf16[12,32], index: 2, kind: input, shape index: {}]   ;;  %s641_s3 = inlined_call_operand.hbm [shape: f32[1,32], index: 3, kind: input, shape index: {}]   ;;  %s642_s4 = inlined_call_operand.vmem [shape: f32[128,32], index: 4, kind: output, shape index: {}]  }
   0x1   :  { %s19_s17 = sshll.u32 %s640_s2, 4  ;;  %s20_s17 = int_to_ptr.hbm [resolvable:$true] %s19_s17 }
   0x2   :  { %10 = vsyncpa [#allocation5], 0  ;;  %s409_s18 = smov [#allocation2]   ;;  %s33_s22 = sshll.u32 %s641_s3, 4  ;;  %s34_s22 = int_to_ptr.hbm [resolvable:$true] %s33_s22 }
   0x3   :  { %s21_s19 = sshll.u32 %s409_s18, 4  ;;  %s410_s23 = smov 64   ;;  %s22_s19 = int_to_ptr.vmem [resolvable:$true] %s21_s19 }
   0x4   :  { %s411_s24 = smov 4   ;;  %s412_s25 = smov [#allocation4]  }
   0x5   :  { %27 = dma.hbm_to_vmem [thread:$0]  %s20_s17, 128, %s22_s19, [#allocation3], %s410_s23, %s410_s23, %s411_s24  }
   0x6   :  { %s35_s26 = sshll.u32 %s412_s25, 4  ;;  %s36_s26 = int_to_ptr.vmem [resolvable:$true] %s35_s26 }
   0x7   :  { %38 = dma.hbm_to_vmem [thread:$0]  %s34_s22, 16, %s36_s26, [#allocation5]  }
   0x8   :  { %405 = dma.done.wait [#allocation3], 128  }
   0x9   :  { %406 = vsyncadd [#allocation3], 4294967168 }
   0xa   :  { %407 = dma.done.wait [#allocation5], 16  }
   0xb   :  { %408 = vsyncadd [#allocation5], 4294967280  ;;  %v331_v0 = vld [vmem:[#allocation2] sm:$0xf]  ;;  %v349_v1 = vld [vmem:[#allocation2] sm:$0x30] }
   0xc   :  { %vm104_vm0 = vcmask 1045504   ;;  %v50_v2 = vld [vmem:[%s638_s0] sm:$0xff]  ;;  %v332_v3 = vor.u32 %v349_v1, %v331_v0  ;;  %v51_v4 = vld [vmem:[%s638_s0 + $0x8] sm:$0xff]  ;;  %vm79_vm1 = vcmask 97280   ;;  %v52_v16 = vld [vmem:[%s638_s0 + $0x10] sm:$0xff]  ;;  %vm306_vm2 = vcmask 261120  }
   0xd   :  { %v58_v5 = vld [vmem:[%s638_s0 + $0x40] sm:$0xff]  ;;  %v59_v6 = vld [vmem:[%s638_s0 + $0x48] sm:$0xff]  ;;  %v66_v11 = vpack.c.bf16 %v51_v4, %v50_v2  ;;  %v53_v17 = vld [vmem:[%s638_s0 + $0x18] sm:$0xff] }
   0xe   :  { %v157_v7 = vld [vmem:[%s639_s1] sm:$0xff]  ;;  %v158_v8 = vld [vmem:[%s639_s1 + $0x8] sm:$0xff]  ;;  %v106_v10 = vsel %vm104_vm0, %v332_v3, 0  ;;  %v70_v12 = vpack.c.bf16 %v59_v6, %v58_v5  ;;  %v60_v18 = vld [vmem:[%s638_s0 + $0x50] sm:$0xff]  ;;  %v67_v24 = vpack.c.bf16 %v53_v17, %v52_v16 }
   0xf   :  { %v165_v9 = vld [vmem:[%s639_s1 + $0x40] sm:$0xff]  ;;  %v166_v13 = vld [vmem:[%s639_s1 + $0x48] sm:$0xff]  ;;  %115 = vmatpush.bf16.msra.mxu0 %v106_v10  ;;  %350 = vmatpush.bf16.msra.mxu2 %v106_v10  ;;  %v173_v14 = vpack.c.bf16 %v158_v8, %v157_v7  ;;  %v61_v19 = vld [vmem:[%s638_s0 + $0x58] sm:$0xff] }
  0x10   :  { %v177_v15 = vpack.c.bf16 %v166_v13, %v165_v9  ;;  %212 = vmatpush.bf16.msra.mxu1 %v106_v10  ;;  %351 = vmatpush.bf16.msra.mxu3 %v106_v10  ;;  %v159_v20 = vld [vmem:[%s639_s1 + $0x10] sm:$0xff]  ;;  %v160_v21 = vld [vmem:[%s639_s1 + $0x18] sm:$0xff]  ;;  %v71_v25 = vpack.c.bf16 %v61_v19, %v60_v18  ;;  %v54_v28 = vld [vmem:[%s638_s0 + $0x20] sm:$0xff] }
  0x11   :  { %v167_v22 = vld [vmem:[%s639_s1 + $0x50] sm:$0xff]  ;;  %v168_v23 = vld [vmem:[%s639_s1 + $0x58] sm:$0xff]  ;;  %v174_v26 = vpack.c.bf16 %v160_v21, %v159_v20  ;;  %v55_v29 = vld [vmem:[%s638_s0 + $0x28] sm:$0xff] }
  0x12   :  { %333 = vmatmul.msk.bf16.vlgmr.msra.gmra.mxu0 %vm79_vm1, %v66_v11  ;;  %337 = vmatmul.msk.bf16.vlgmr.msra.gmra.mxu2 %vm79_vm1, %v70_v12  ;;  %v178_v27 = vpack.c.bf16 %v168_v23, %v167_v22  ;;  %v62_v30 = vld [vmem:[%s638_s0 + $0x60] sm:$0xff]  ;;  %v63_v31 = vld [vmem:[%s638_s0 + $0x68] sm:$0xff]  ;;  %v68_v36 = vpack.c.bf16 %v55_v29, %v54_v28  ;;  %v56_v40 = vld [vmem:[%s638_s0 + $0x30] sm:$0xff] }
  0x13   :  { %341 = vmatmul.msk.bf16.vlgmr.msra.gmra.mxu1 %vm79_vm1, %v173_v14  ;;  %345 = vmatmul.msk.bf16.vlgmr.msra.gmra.mxu3 %vm79_vm1, %v177_v15  ;;  %v161_v32 = vld [vmem:[%s639_s1 + $0x20] sm:$0xff]  ;;  %v162_v33 = vld [vmem:[%s639_s1 + $0x28] sm:$0xff]  ;;  %v72_v37 = vpack.c.bf16 %v63_v31, %v62_v30  ;;  %v57_v41 = vld [vmem:[%s638_s0 + $0x38] sm:$0xff] }
  0x14   :  { %v169_v34 = vld [vmem:[%s639_s1 + $0x60] sm:$0xff]  ;;  %v170_v35 = vld [vmem:[%s639_s1 + $0x68] sm:$0xff]  ;;  %v175_v38 = vpack.c.bf16 %v162_v33, %v161_v32  ;;  %v64_v42 = vld [vmem:[%s638_s0 + $0x70] sm:$0xff]  ;;  %v69_v48 = vpack.c.bf16 %v57_v41, %v56_v40 }
  0x15   :  { %v179_v39 = vpack.c.bf16 %v170_v35, %v169_v34  ;;  %v65_v43 = vld [vmem:[%s638_s0 + $0x78] sm:$0xff]  ;;  %v163_v44 = vld [vmem:[%s639_s1 + $0x30] sm:$0xff]  ;;  %v556_v53 = vld [vmem:[#allocation4] ss:$0 sm:$0xff] }
  0x16   :  { %v164_v45 = vld [vmem:[%s639_s1 + $0x38] sm:$0xff]  ;;  %v171_v46 = vld [vmem:[%s639_s1 + $0x70] sm:$0xff]  ;;  %v73_v49 = vpack.c.bf16 %v65_v43, %v64_v42 }
  0x17   :  { %v172_v47 = vld [vmem:[%s639_s1 + $0x78] sm:$0xff]  ;;  %v176_v50 = vpack.c.bf16 %v164_v45, %v163_v44 }
  0x18   :  { %v180_v51 = vpack.c.bf16 %v172_v47, %v171_v46 }
  0x22   :  { %334 = vmatmul.msk.bf16.gmra.mxu0 %vm79_vm1, %v67_v24  ;;  %338 = vmatmul.msk.bf16.gmra.mxu2 %vm79_vm1, %v71_v25 }
  0x23   :  { %342 = vmatmul.msk.bf16.gmra.mxu1 %vm79_vm1, %v174_v26  ;;  %346 = vmatmul.msk.bf16.gmra.mxu3 %vm79_vm1, %v178_v27 }
  0x32   :  { %335 = vmatmul.msk.bf16.gmra.mxu0 %vm79_vm1, %v68_v36  ;;  %339 = vmatmul.msk.bf16.gmra.mxu2 %vm79_vm1, %v72_v37 }
  0x33   :  { %343 = vmatmul.msk.bf16.gmra.mxu1 %vm79_vm1, %v175_v38  ;;  %347 = vmatmul.msk.bf16.gmra.mxu3 %vm79_vm1, %v179_v39 }
  0x42   :  { %336 = vmatmul.msk.bf16.gmra.mxu0 %vm79_vm1, %v69_v48  ;;  %340 = vmatmul.msk.bf16.gmra.mxu2 %vm79_vm1, %v73_v49 }
  0x43   :  { %344 = vmatmul.msk.bf16.gmra.mxu1 %vm79_vm1, %v176_v50  ;;  %348 = vmatmul.msk.bf16.gmra.mxu3 %vm79_vm1, %v180_v51 }
  0x8f   :  { %v117_v52 = vpop.f32.mrf.mxu0 }
  0x90   :  { %v214_v54 = vpop.f32.mrf.mxu1 }
  0x91   :  { %v254_v55 = vmax.f32 %v117_v52, %v214_v54 }
  0x93   :  { %v274_v56 = vadd.f32 %v556_v53, %v254_v55 }
  0x95   :  { %v290_v57 = vmax.f32 %v274_v56, 0.0  ;;  %v137_v58 = vpop.f32.mrf.mxu2 }
  0x96   :  { %v234_v59 = vpop.f32.mrf.mxu3 }
  0x97   :  { %307 = vst.msk [vmem:[%s642_s4] sm:$0xff] %vm306_vm2, %v290_v57  ;;  %v262_v60 = vmax.f32 %v137_v58, %v234_v59  ;;  %v119_v61 = vpop.f32.mrf.mxu0 }
  0x98   :  { %v216_v62 = vpop.f32.mrf.mxu1 }
  0x99   :  { %v282_v63 = vadd.f32 %v556_v53, %v262_v60  ;;  %v255_v0 = vmax.f32 %v119_v61, %v216_v62 }
  0x9b   :  { %v298_v1 = vmax.f32 %v282_v63, 0.0  ;;  %v275_v2 = vadd.f32 %v556_v53, %v255_v0 }
  0x9d   :  { %315 = vst.msk [vmem:[%s642_s4 + $0x40] sm:$0xff] %vm306_vm2, %v298_v1  ;;  %v291_v3 = vmax.f32 %v275_v2, 0.0  ;;  %v139_v4 = vpop.f32.mrf.mxu2 }
  0x9e   :  { %v236_v5 = vpop.f32.mrf.mxu3 }
  0x9f   :  { %308 = vst.msk [vmem:[%s642_s4 + $0x8] sm:$0xff] %vm306_vm2, %v291_v3  ;;  %v263_v6 = vmax.f32 %v139_v4, %v236_v5  ;;  %v122_v7 = vpop.f32.mrf.mxu0 }
  0xa0   :  { %v219_v8 = vpop.f32.mrf.mxu1 }
  0xa1   :  { %v283_v9 = vadd.f32 %v556_v53, %v263_v6  ;;  %v256_v10 = vmax.f32 %v122_v7, %v219_v8 }
  0xa3   :  { %v299_v11 = vmax.f32 %v283_v9, 0.0  ;;  %v276_v12 = vadd.f32 %v556_v53, %v256_v10 }
  0xa5   :  { %316 = vst.msk [vmem:[%s642_s4 + $0x48] sm:$0xff] %vm306_vm2, %v299_v11  ;;  %v292_v13 = vmax.f32 %v276_v12, 0.0  ;;  %v142_v14 = vpop.f32.mrf.mxu2 }
  0xa6   :  { %v239_v15 = vpop.f32.mrf.mxu3 }
  0xa7   :  { %309 = vst.msk [vmem:[%s642_s4 + $0x10] sm:$0xff] %vm306_vm2, %v292_v13  ;;  %v264_v16 = vmax.f32 %v142_v14, %v239_v15  ;;  %v124_v17 = vpop.f32.mrf.mxu0 }
  0xa8   :  { %v221_v18 = vpop.f32.mrf.mxu1 }
  0xa9   :  { %v284_v19 = vadd.f32 %v556_v53, %v264_v16  ;;  %v257_v20 = vmax.f32 %v124_v17, %v221_v18 }
  0xab   :  { %v300_v21 = vmax.f32 %v284_v19, 0.0  ;;  %v277_v22 = vadd.f32 %v556_v53, %v257_v20 }
  0xad   :  { %317 = vst.msk [vmem:[%s642_s4 + $0x50] sm:$0xff] %vm306_vm2, %v300_v21  ;;  %v293_v23 = vmax.f32 %v277_v22, 0.0  ;;  %v144_v24 = vpop.f32.mrf.mxu2 }
  0xae   :  { %v241_v25 = vpop.f32.mrf.mxu3 }
  0xaf   :  { %310 = vst.msk [vmem:[%s642_s4 + $0x18] sm:$0xff] %vm306_vm2, %v293_v23  ;;  %v265_v26 = vmax.f32 %v144_v24, %v241_v25  ;;  %v127_v27 = vpop.f32.mrf.mxu0 }
  0xb0   :  { %v224_v28 = vpop.f32.mrf.mxu1 }
  0xb1   :  { %v285_v29 = vadd.f32 %v556_v53, %v265_v26  ;;  %v258_v30 = vmax.f32 %v127_v27, %v224_v28 }
  0xb3   :  { %v301_v31 = vmax.f32 %v285_v29, 0.0  ;;  %v278_v32 = vadd.f32 %v556_v53, %v258_v30 }
  0xb5   :  { %318 = vst.msk [vmem:[%s642_s4 + $0x58] sm:$0xff] %vm306_vm2, %v301_v31  ;;  %v294_v33 = vmax.f32 %v278_v32, 0.0  ;;  %v147_v34 = vpop.f32.mrf.mxu2 }
  0xb6   :  { %v244_v35 = vpop.f32.mrf.mxu3 }
  0xb7   :  { %311 = vst.msk [vmem:[%s642_s4 + $0x20] sm:$0xff] %vm306_vm2, %v294_v33  ;;  %v266_v36 = vmax.f32 %v147_v34, %v244_v35  ;;  %v129_v37 = vpop.f32.mrf.mxu0 }
  0xb8   :  { %v226_v38 = vpop.f32.mrf.mxu1 }
  0xb9   :  { %v286_v39 = vadd.f32 %v556_v53, %v266_v36  ;;  %v259_v40 = vmax.f32 %v129_v37, %v226_v38 }
  0xbb   :  { %v302_v41 = vmax.f32 %v286_v39, 0.0  ;;  %v279_v42 = vadd.f32 %v556_v53, %v259_v40 }
  0xbd   :  { %319 = vst.msk [vmem:[%s642_s4 + $0x60] sm:$0xff] %vm306_vm2, %v302_v41  ;;  %v295_v43 = vmax.f32 %v279_v42, 0.0  ;;  %v149_v44 = vpop.f32.mrf.mxu2 }
  0xbe   :  { %v246_v45 = vpop.f32.mrf.mxu3 }
  0xbf   :  { %312 = vst.msk [vmem:[%s642_s4 + $0x28] sm:$0xff] %vm306_vm2, %v295_v43  ;;  %v267_v46 = vmax.f32 %v149_v44, %v246_v45  ;;  %v132_v47 = vpop.f32.mrf.mxu0 }
  0xc0   :  { %v229_v48 = vpop.f32.mrf.mxu1 }
  0xc1   :  { %v287_v49 = vadd.f32 %v556_v53, %v267_v46  ;;  %v260_v50 = vmax.f32 %v132_v47, %v229_v48 }
  0xc3   :  { %v303_v51 = vmax.f32 %v287_v49, 0.0  ;;  %v280_v52 = vadd.f32 %v556_v53, %v260_v50 }
  0xc5   :  { %320 = vst.msk [vmem:[%s642_s4 + $0x68] sm:$0xff] %vm306_vm2, %v303_v51  ;;  %v296_v54 = vmax.f32 %v280_v52, 0.0  ;;  %v152_v55 = vpop.f32.mrf.mxu2 }
  0xc6   :  { %v249_v56 = vpop.f32.mrf.mxu3 }
  0xc7   :  { %313 = vst.msk [vmem:[%s642_s4 + $0x30] sm:$0xff] %vm306_vm2, %v296_v54  ;;  %v268_v57 = vmax.f32 %v152_v55, %v249_v56  ;;  %v134_v58 = vpop.f32.mrf.mxu0 }
  0xc8   :  { %v231_v59 = vpop.f32.mrf.mxu1 }
  0xc9   :  { %v288_v60 = vadd.f32 %v556_v53, %v268_v57  ;;  %v261_v61 = vmax.f32 %v134_v58, %v231_v59 }
  0xcb   :  { %v304_v62 = vmax.f32 %v288_v60, 0.0  ;;  %v281_v63 = vadd.f32 %v556_v53, %v261_v61 }
  0xcd   :  { %321 = vst.msk [vmem:[%s642_s4 + $0x70] sm:$0xff] %vm306_vm2, %v304_v62  ;;  %v297_v0 = vmax.f32 %v281_v63, 0.0  ;;  %v154_v1 = vpop.f32.mrf.mxu2 }
  0xce   :  { %v251_v2 = vpop.f32.mrf.mxu3 }
  0xcf   :  { %314 = vst.msk [vmem:[%s642_s4 + $0x38] sm:$0xff] %vm306_vm2, %v297_v0  ;;  %v269_v3 = vmax.f32 %v154_v1, %v251_v2 }
  0xd1   :  { %v289_v4 = vadd.f32 %v556_v53, %v269_v3 }
  0xd3   :  { %v305_v5 = vmax.f32 %v289_v4, 0.0 }
  0xd5   :  { %322 = vst.msk [vmem:[%s642_s4 + $0x78] sm:$0xff] %vm306_vm2, %v305_v5 }
  0xd6   :  { %327 = vsyncpa [#allocation3], 1 }
  0xd7   :  { %328 = vsyncpa [#allocation5], 1 }

// kernel: forward.32
= control target key start
LH: loop header
LB: loop body
LE: loop exit
PB: predicated region body
PF: predicated region fallthrough
CT: control target
= control target key end

     0   :  { %vm78_vm0 = vcmask 785408   ;;  %vm201_vm1 = vcmask 523264   ;;  %s399_s2 = inlined_call_operand.vmem [shape: bf16[96,64], index: 2, kind: input, shape index: {}]   ;;  %s400_s0 = inlined_call_operand.vmem [shape: f32[64,96], index: 0, kind: input, shape index: {}]   ;;  %s401_s1 = inlined_call_operand.vmem [shape: f32[64,96], index: 1, kind: input, shape index: {}]   ;;  %s402_s3 = inlined_call_operand.vmem [shape: f32[1,64], index: 3, kind: input, shape index: {}]   ;;  %s403_s4 = inlined_call_operand.vmem [shape: f32[64,64], index: 4, kind: output, shape index: {}]  }
   0x1   :  { %v251_v0 = vld [vmem:[%s399_s2 + $0x28] sm:$0xff]  ;;  %v250_v1 = vld [vmem:[%s399_s2 + $0x20] sm:$0xff]  ;;  %v249_v2 = vld [vmem:[%s399_s2 + $0x18] sm:$0xff] }
   0x2   :  { %93 = vmatpush.bf16.msra.mxu0 %v251_v0  ;;  %252 = vmatpush.bf16.msra.mxu2 %v251_v0  ;;  %v248_v3 = vld [vmem:[%s399_s2 + $0x10] sm:$0xff]  ;;  %v247_v4 = vld [vmem:[%s399_s2 + $0x8] sm:$0xff]  ;;  %v246_v5 = vld [vmem:[%s399_s2] sm:$0xff] }
   0x3   :  { %146 = vmatpush.bf16.msra.mxu1 %v251_v0  ;;  %258 = vmatpush.bf16.msra.mxu3 %v251_v0  ;;  %v30_v6 = vld [vmem:[%s400_s0] sm:$0xff]  ;;  %v31_v7 = vld [vmem:[%s400_s0 + $0x8] sm:$0xff]  ;;  %v32_v18 = vld [vmem:[%s400_s0 + $0x10] sm:$0xff] }
   0x4   :  { %v34_v8 = vld [vmem:[%s400_s0 + $0x20] sm:$0xff]  ;;  %v35_v9 = vld [vmem:[%s400_s0 + $0x28] sm:$0xff]  ;;  %v38_v14 = vpack.c.bf16 %v31_v7, %v30_v6  ;;  %v33_v19 = vld [vmem:[%s400_s0 + $0x18] sm:$0xff] }
   0x5   :  { %v120_v10 = vld [vmem:[%s401_s1] sm:$0xff]  ;;  %v121_v11 = vld [vmem:[%s401_s1 + $0x8] sm:$0xff]  ;;  %v40_v15 = vpack.c.bf16 %v35_v9, %v34_v8  ;;  %v36_v20 = vld [vmem:[%s400_s0 + $0x30] sm:$0xff]  ;;  %v39_v26 = vpack.c.bf16 %v33_v19, %v32_v18 }
   0x6   :  { %94 = vmatpush.bf16.msra.mxu0 %v250_v1  ;;  %253 = vmatpush.bf16.msra.mxu2 %v250_v1  ;;  %v124_v12 = vld [vmem:[%s401_s1 + $0x20] sm:$0xff]  ;;  %v125_v13 = vld [vmem:[%s401_s1 + $0x28] sm:$0xff]  ;;  %v128_v16 = vpack.c.bf16 %v121_v11, %v120_v10  ;;  %v37_v21 = vld [vmem:[%s400_s0 + $0x38] sm:$0xff] }
   0x7   :  { %147 = vmatpush.bf16.msra.mxu1 %v250_v1  ;;  %259 = vmatpush.bf16.msra.mxu3 %v250_v1  ;;  %v130_v17 = vpack.c.bf16 %v125_v13, %v124_v12  ;;  %v122_v22 = vld [vmem:[%s401_s1 + $0x10] sm:$0xff]  ;;  %v123_v23 = vld [vmem:[%s401_s1 + $0x18] sm:$0xff]  ;;  %v41_v27 = vpack.c.bf16 %v37_v21, %v36_v20  ;;  %v264_v31 = vld [vmem:[%s402_s3] ss:$0 sm:$0xff] }
   0x8   :  { %v126_v24 = vld [vmem:[%s401_s1 + $0x30] sm:$0xff]  ;;  %v127_v25 = vld [vmem:[%s401_s1 + $0x38] sm:$0xff]  ;;  %v129_v28 = vpack.c.bf16 %v123_v23, %v122_v22 }
   0x9   :  { %v131_v29 = vpack.c.bf16 %v127_v25, %v126_v24 }
   0xa   :  { %95 = vmatpush.bf16.msra.mxu0 %v249_v2  ;;  %254 = vmatpush.bf16.msra.mxu2 %v249_v2 }
   0xb   :  { %148 = vmatpush.bf16.msra.mxu1 %v249_v2  ;;  %260 = vmatpush.bf16.msra.mxu3 %v249_v2 }
   0xe   :  { %96 = vmatpush.bf16.msra.mxu0 %v248_v3  ;;  %255 = vmatpush.bf16.msra.mxu2 %v248_v3 }
   0xf   :  { %149 = vmatpush.bf16.msra.mxu1 %v248_v3  ;;  %261 = vmatpush.bf16.msra.mxu3 %v248_v3 }
  0x12   :  { %97 = vmatpush.bf16.msra.mxu0 %v247_v4  ;;  %256 = vmatpush.bf16.msra.mxu2 %v247_v4 }
  0x13   :  { %150 = vmatpush.bf16.msra.mxu1 %v247_v4  ;;  %262 = vmatpush.bf16.msra.mxu3 %v247_v4 }
  0x16   :  { %98 = vmatpush.bf16.msra.mxu0 %v246_v5  ;;  %257 = vmatpush.bf16.msra.mxu2 %v246_v5 }
  0x17   :  { %151 = vmatpush.bf16.msra.mxu1 %v246_v5  ;;  %263 = vmatpush.bf16.msra.mxu3 %v246_v5 }
  0x19   :  { %238 = vmatmul.msk.bf16.vlgmr.msra.gmra.mxu0 %vm78_vm0, %v38_v14  ;;  %240 = vmatmul.msk.bf16.vlgmr.msra.gmra.mxu2 %vm78_vm0, %v40_v15 }
  0x1a   :  { %242 = vmatmul.msk.bf16.vlgmr.msra.gmra.mxu1 %vm78_vm0, %v128_v16  ;;  %244 = vmatmul.msk.bf16.vlgmr.msra.gmra.mxu3 %vm78_vm0, %v130_v17 }
  0x29   :  { %239 = vmatmul.msk.bf16.gmra.mxu0 %vm78_vm0, %v39_v26  ;;  %241 = vmatmul.msk.bf16.gmra.mxu2 %vm78_vm0, %v41_v27 }
  0x2a   :  { %243 = vmatmul.msk.bf16.gmra.mxu1 %vm78_vm0, %v129_v28  ;;  %245 = vmatmul.msk.bf16.gmra.mxu3 %vm78_vm0, %v131_v29 }
  0x96   :  { %v100_v30 = vpop.f32.mrf.mxu0 }
  0x97   :  { %v153_v32 = vpop.f32.mrf.mxu1 }
  0x98   :  { %v173_v33 = vmax.f32 %v100_v30, %v153_v32 }
  0x9a   :  { %v185_v34 = vadd.f32 %v264_v31, %v173_v33 }
  0x9c   :  { %v193_v35 = vmax.f32 %v185_v34, 0.0  ;;  %v110_v36 = vpop.f32.mrf.mxu2 }
  0x9d   :  { %v163_v37 = vpop.f32.mrf.mxu3 }
  0x9e   :  { %202 = vst.msk [vmem:[%s403_s4] sm:$0xff] %vm201_vm1, %v193_v35  ;;  %v177_v38 = vmax.f32 %v110_v36, %v163_v37  ;;  %v102_v39 = vpop.f32.mrf.mxu0 }
  0x9f   :  { %v155_v40 = vpop.f32.mrf.mxu1 }
  0xa0   :  { %v189_v41 = vadd.f32 %v264_v31, %v177_v38  ;;  %v174_v42 = vmax.f32 %v102_v39, %v155_v40 }
  0xa2   :  { %v197_v43 = vmax.f32 %v189_v41, 0.0  ;;  %v186_v44 = vadd.f32 %v264_v31, %v174_v42 }
  0xa4   :  { %206 = vst.msk [vmem:[%s403_s4 + $0x20] sm:$0xff] %vm201_vm1, %v197_v43  ;;  %v194_v45 = vmax.f32 %v186_v44, 0.0  ;;  %v112_v46 = vpop.f32.mrf.mxu2 }
  0xa5   :  { %v165_v47 = vpop.f32.mrf.mxu3 }
  0xa6   :  { %203 = vst.msk [vmem:[%s403_s4 + $0x8] sm:$0xff] %vm201_vm1, %v194_v45  ;;  %v178_v48 = vmax.f32 %v112_v46, %v165_v47  ;;  %v105_v49 = vpop.f32.mrf.mxu0 }
  0xa7   :  { %v158_v50 = vpop.f32.mrf.mxu1 }
  0xa8   :  { %v190_v51 = vadd.f32 %v264_v31, %v178_v48  ;;  %v175_v52 = vmax.f32 %v105_v49, %v158_v50 }
  0xaa   :  { %v198_v53 = vmax.f32 %v190_v51, 0.0  ;;  %v187_v54 = vadd.f32 %v264_v31, %v175_v52 }
  0xac   :  { %207 = vst.msk [vmem:[%s403_s4 + $0x28] sm:$0xff] %vm201_vm1, %v198_v53  ;;  %v195_v55 = vmax.f32 %v187_v54, 0.0  ;;  %v115_v56 = vpop.f32.mrf.mxu2 }
  0xad   :  { %v168_v57 = vpop.f32.mrf.mxu3 }
  0xae   :  { %204 = vst.msk [vmem:[%s403_s4 + $0x10] sm:$0xff] %vm201_vm1, %v195_v55  ;;  %v179_v58 = vmax.f32 %v115_v56, %v168_v57  ;;  %v107_v59 = vpop.f32.mrf.mxu0 }
  0xaf   :  { %v160_v60 = vpop.f32.mrf.mxu1 }
  0xb0   :  { %v191_v61 = vadd.f32 %v264_v31, %v179_v58  ;;  %v176_v62 = vmax.f32 %v107_v59, %v160_v60 }
  0xb2   :  { %v199_v63 = vmax.f32 %v191_v61, 0.0  ;;  %v188_v0 = vadd.f32 %v264_v31, %v176_v62 }
  0xb4   :  { %208 = vst.msk [vmem:[%s403_s4 + $0x30] sm:$0xff] %vm201_vm1, %v199_v63  ;;  %v196_v1 = vmax.f32 %v188_v0, 0.0  ;;  %v117_v2 = vpop.f32.mrf.mxu2 }
  0xb5   :  { %v170_v3 = vpop.f32.mrf.mxu3 }
  0xb6   :  { %205 = vst.msk [vmem:[%s403_s4 + $0x18] sm:$0xff] %vm201_vm1, %v196_v1  ;;  %v180_v4 = vmax.f32 %v117_v2, %v170_v3 }
  0xb8   :  { %v192_v5 = vadd.f32 %v264_v31, %v180_v4 }
  0xba   :  { %v200_v6 = vmax.f32 %v192_v5, 0.0 }
  0xbc   :  { %209 = vst.msk [vmem:[%s403_s4 + $0x38] sm:$0xff] %vm201_vm1, %v200_v6 }

// kernel: forward.29
= control target key start
LH: loop header
LB: loop body
LE: loop exit
PB: predicated region body
PF: predicated region fallthrough
CT: control target
= control target key end

     0   :  { %vm90_vm0 = vcmask 785408   ;;  %vm313_vm1 = vcmask 523264   ;;  %s633_s2 = inlined_call_operand.vmem [shape: bf16[96,64], index: 2, kind: input, shape index: {}]   ;;  %s634_s0 = inlined_call_operand.vmem [shape: f32[128,96], index: 0, kind: input, shape index: {}]   ;;  %s635_s1 = inlined_call_operand.vmem [shape: f32[128,96], index: 1, kind: input, shape index: {}]   ;;  %s636_s3 = inlined_call_operand.vmem [shape: f32[1,64], index: 3, kind: input, shape index: {}]   ;;  %s637_s4 = inlined_call_operand.vmem [shape: f32[128,64], index: 4, kind: output, shape index: {}]  }
   0x1   :  { %v379_v0 = vld [vmem:[%s633_s2 + $0x28] sm:$0xff]  ;;  %v378_v1 = vld [vmem:[%s633_s2 + $0x20] sm:$0xff]  ;;  %v377_v2 = vld [vmem:[%s633_s2 + $0x18] sm:$0xff] }
   0x2   :  { %117 = vmatpush.bf16.msra.mxu0 %v379_v0  ;;  %380 = vmatpush.bf16.msra.mxu2 %v379_v0  ;;  %v376_v3 = vld [vmem:[%s633_s2 + $0x10] sm:$0xff]  ;;  %v375_v4 = vld [vmem:[%s633_s2 + $0x8] sm:$0xff]  ;;  %v374_v5 = vld [vmem:[%s633_s2] sm:$0xff] }
   0x3   :  { %214 = vmatpush.bf16.msra.mxu1 %v379_v0  ;;  %386 = vmatpush.bf16.msra.mxu3 %v379_v0  ;;  %v30_v6 = vld [vmem:[%s634_s0] sm:$0xff]  ;;  %v31_v7 = vld [vmem:[%s634_s0 + $0x8] sm:$0xff]  ;;  %v32_v18 = vld [vmem:[%s634_s0 + $0x10] sm:$0xff] }
   0x4   :  { %v38_v8 = vld [vmem:[%s634_s0 + $0x40] sm:$0xff]  ;;  %v39_v9 = vld [vmem:[%s634_s0 + $0x48] sm:$0xff]  ;;  %v46_v14 = vpack.c.bf16 %v31_v7, %v30_v6  ;;  %v33_v19 = vld [vmem:[%s634_s0 + $0x18] sm:$0xff] }
   0x5   :  { %v164_v10 = vld [vmem:[%s635_s1] sm:$0xff]  ;;  %v165_v11 = vld [vmem:[%s635_s1 + $0x8] sm:$0xff]  ;;  %v50_v15 = vpack.c.bf16 %v39_v9, %v38_v8  ;;  %v40_v20 = vld [vmem:[%s634_s0 + $0x50] sm:$0xff]  ;;  %v47_v26 = vpack.c.bf16 %v33_v19, %v32_v18 }
   0x6   :  { %118 = vmatpush.bf16.msra.mxu0 %v378_v1  ;;  %381 = vmatpush.bf16.msra.mxu2 %v378_v1  ;;  %v172_v12 = vld [vmem:[%s635_s1 + $0x40] sm:$0xff]  ;;  %v173_v13 = vld [vmem:[%s635_s1 + $0x48] sm:$0xff]  ;;  %v180_v16 = vpack.c.bf16 %v165_v11, %v164_v10  ;;  %v41_v21 = vld [vmem:[%s634_s0 + $0x58] sm:$0xff] }
   0x7   :  { %215 = vmatpush.bf16.msra.mxu1 %v378_v1  ;;  %387 = vmatpush.bf16.msra.mxu3 %v378_v1  ;;  %v184_v17 = vpack.c.bf16 %v173_v13, %v172_v12  ;;  %v166_v22 = vld [vmem:[%s635_s1 + $0x10] sm:$0xff]  ;;  %v167_v23 = vld [vmem:[%s635_s1 + $0x18] sm:$0xff]  ;;  %v51_v27 = vpack.c.bf16 %v41_v21, %v40_v20  ;;  %v34_v30 = vld [vmem:[%s634_s0 + $0x20] sm:$0xff] }
   0x8   :  { %v174_v24 = vld [vmem:[%s635_s1 + $0x50] sm:$0xff]  ;;  %v175_v25 = vld [vmem:[%s635_s1 + $0x58] sm:$0xff]  ;;  %v181_v28 = vpack.c.bf16 %v167_v23, %v166_v22  ;;  %v35_v31 = vld [vmem:[%s634_s0 + $0x28] sm:$0xff] }
   0x9   :  { %v185_v29 = vpack.c.bf16 %v175_v25, %v174_v24  ;;  %v42_v32 = vld [vmem:[%s634_s0 + $0x60] sm:$0xff]  ;;  %v43_v33 = vld [vmem:[%s634_s0 + $0x68] sm:$0xff]  ;;  %v48_v38 = vpack.c.bf16 %v35_v31, %v34_v30  ;;  %v36_v42 = vld [vmem:[%s634_s0 + $0x30] sm:$0xff] }
   0xa   :  { %119 = vmatpush.bf16.msra.mxu0 %v377_v2  ;;  %382 = vmatpush.bf16.msra.mxu2 %v377_v2  ;;  %v168_v34 = vld [vmem:[%s635_s1 + $0x20] sm:$0xff]  ;;  %v169_v35 = vld [vmem:[%s635_s1 + $0x28] sm:$0xff]  ;;  %v52_v39 = vpack.c.bf16 %v43_v33, %v42_v32  ;;  %v37_v43 = vld [vmem:[%s634_s0 + $0x38] sm:$0xff] }
   0xb   :  { %216 = vmatpush.bf16.msra.mxu1 %v377_v2  ;;  %388 = vmatpush.bf16.msra.mxu3 %v377_v2  ;;  %v176_v36 = vld [vmem:[%s635_s1 + $0x60] sm:$0xff]  ;;  %v177_v37 = vld [vmem:[%s635_s1 + $0x68] sm:$0xff]  ;;  %v182_v40 = vpack.c.bf16 %v169_v35, %v168_v34  ;;  %v44_v44 = vld [vmem:[%s634_s0 + $0x70] sm:$0xff]  ;;  %v49_v50 = vpack.c.bf16 %v37_v43, %v36_v42 }
   0xc   :  { %v186_v41 = vpack.c.bf16 %v177_v37, %v176_v36  ;;  %v45_v45 = vld [vmem:[%s634_s0 + $0x78] sm:$0xff]  ;;  %v170_v46 = vld [vmem:[%s635_s1 + $0x30] sm:$0xff]  ;;  %v551_v55 = vld [vmem:[%s636_s3] ss:$0 sm:$0xff] }
   0xd   :  { %v171_v47 = vld [vmem:[%s635_s1 + $0x38] sm:$0xff]  ;;  %v178_v48 = vld [vmem:[%s635_s1 + $0x70] sm:$0xff]  ;;  %v53_v51 = vpack.c.bf16 %v45_v45, %v44_v44 }
   0xe   :  { %120 = vmatpush.bf16.msra.mxu0 %v376_v3  ;;  %383 = vmatpush.bf16.msra.mxu2 %v376_v3  ;;  %v179_v49 = vld [vmem:[%s635_s1 + $0x78] sm:$0xff]  ;;  %v183_v52 = vpack.c.bf16 %v171_v47, %v170_v46 }
   0xf   :  { %217 = vmatpush.bf16.msra.mxu1 %v376_v3  ;;  %389 = vmatpush.bf16.msra.mxu3 %v376_v3  ;;  %v187_v53 = vpack.c.bf16 %v179_v49, %v178_v48 }
  0x12   :  { %121 = vmatpush.bf16.msra.mxu0 %v375_v4  ;;  %384 = vmatpush.bf16.msra.mxu2 %v375_v4 }
  0x13   :  { %218 = vmatpush.bf16.msra.mxu1 %v375_v4  ;;  %390 = vmatpush.bf16.msra.mxu3 %v375_v4 }
  0x16   :  { %122 = vmatpush.bf16.msra.mxu0 %v374_v5  ;;  %385 = vmatpush.bf16.msra.mxu2 %v374_v5 }
  0x17   :  { %219 = vmatpush.bf16.msra.mxu1 %v374_v5  ;;  %391 = vmatpush.bf16.msra.mxu3 %v374_v5 }
  0x19   :  { %358 = vmatmul.msk.bf16.vlgmr.msra.gmra.mxu0 %vm90_vm0, %v46_v14  ;;  %362 = vmatmul.msk.bf16.vlgmr.msra.gmra.mxu2 %vm90_vm0, %v50_v15 }
  0x1a   :  { %366 = vmatmul.msk.bf16.vlgmr.msra.gmra.mxu1 %vm90_vm0, %v180_v16  ;;  %370 = vmatmul.msk.bf16.vlgmr.msra.gmra.mxu3 %vm90_vm0, %v184_v17 }
  0x29   :  { %359 = vmatmul.msk.bf16.gmra.mxu0 %vm90_vm0, %v47_v26  ;;  %363 = vmatmul.msk.bf16.gmra.mxu2 %vm90_vm0, %v51_v27 }
  0x2a   :  { %367 = vmatmul.msk.bf16.gmra.mxu1 %vm90_vm0, %v181_v28  ;;  %371 = vmatmul.msk.bf16.gmra.mxu3 %vm90_vm0, %v185_v29 }
  0x39   :  { %360 = vmatmul.msk.bf16.gmra.mxu0 %vm90_vm0, %v48_v38  ;;  %364 = vmatmul.msk.bf16.gmra.mxu2 %vm90_vm0, %v52_v39 }
  0x3a   :  { %368 = vmatmul.msk.bf16.gmra.mxu1 %vm90_vm0, %v182_v40  ;;  %372 = vmatmul.msk.bf16.gmra.mxu3 %vm90_vm0, %v186_v41 }
  0x49   :  { %361 = vmatmul.msk.bf16.gmra.mxu0 %vm90_vm0, %v49_v50  ;;  %365 = vmatmul.msk.bf16.gmra.mxu2 %vm90_vm0, %v53_v51 }
  0x4a   :  { %369 = vmatmul.msk.bf16.gmra.mxu1 %vm90_vm0, %v183_v52  ;;  %373 = vmatmul.msk.bf16.gmra.mxu3 %vm90_vm0, %v187_v53 }
  0x96   :  { %v124_v54 = vpop.f32.mrf.mxu0 }
  0x97   :  { %v221_v56 = vpop.f32.mrf.mxu1 }
  0x98   :  { %v261_v57 = vmax.f32 %v124_v54, %v221_v56 }
  0x9a   :  { %v281_v58 = vadd.f32 %v551_v55, %v261_v57 }
  0x9c   :  { %v297_v59 = vmax.f32 %v281_v58, 0.0  ;;  %v144_v60 = vpop.f32.mrf.mxu2 }
  0x9d   :  { %v241_v61 = vpop.f32.mrf.mxu3 }
  0x9e   :  { %314 = vst.msk [vmem:[%s637_s4] sm:$0xff] %vm313_vm1, %v297_v59  ;;  %v269_v62 = vmax.f32 %v144_v60, %v241_v61  ;;  %v126_v63 = vpop.f32.mrf.mxu0 }
  0x9f   :  { %v223_v0 = vpop.f32.mrf.mxu1 }
  0xa0   :  { %v289_v1 = vadd.f32 %v551_v55, %v269_v62  ;;  %v262_v2 = vmax.f32 %v126_v63, %v223_v0 }
  0xa2   :  { %v305_v3 = vmax.f32 %v289_v1, 0.0  ;;  %v282_v4 = vadd.f32 %v551_v55, %v262_v2 }
  0xa4   :  { %322 = vst.msk [vmem:[%s637_s4 + $0x40] sm:$0xff] %vm313_vm1, %v305_v3  ;;  %v298_v5 = vmax.f32 %v282_v4, 0.0  ;;  %v146_v6 = vpop.f32.mrf.mxu2 }
  0xa5   :  { %v243_v7 = vpop.f32.mrf.mxu3 }
  0xa6   :  { %315 = vst.msk [vmem:[%s637_s4 + $0x8] sm:$0xff] %vm313_vm1, %v298_v5  ;;  %v270_v8 = vmax.f32 %v146_v6, %v243_v7  ;;  %v129_v9 = vpop.f32.mrf.mxu0 }
  0xa7   :  { %v226_v10 = vpop.f32.mrf.mxu1 }
  0xa8   :  { %v290_v11 = vadd.f32 %v551_v55, %v270_v8  ;;  %v263_v12 = vmax.f32 %v129_v9, %v226_v10 }
  0xaa   :  { %v306_v13 = vmax.f32 %v290_v11, 0.0  ;;  %v283_v14 = vadd.f32 %v551_v55, %v263_v12 }
  0xac   :  { %323 = vst.msk [vmem:[%s637_s4 + $0x48] sm:$0xff] %vm313_vm1, %v306_v13  ;;  %v299_v15 = vmax.f32 %v283_v14, 0.0  ;;  %v149_v16 = vpop.f32.mrf.mxu2 }
  0xad   :  { %v246_v17 = vpop.f32.mrf.mxu3 }
  0xae   :  { %316 = vst.msk [vmem:[%s637_s4 + $0x10] sm:$0xff] %vm313_vm1, %v299_v15  ;;  %v271_v18 = vmax.f32 %v149_v16, %v246_v17  ;;  %v131_v19 = vpop.f32.mrf.mxu0 }
  0xaf   :  { %v228_v20 = vpop.f32.mrf.mxu1 }
  0xb0   :  { %v291_v21 = vadd.f32 %v551_v55, %v271_v18  ;;  %v264_v22 = vmax.f32 %v131_v19, %v228_v20 }
  0xb2   :  { %v307_v23 = vmax.f32 %v291_v21, 0.0  ;;  %v284_v24 = vadd.f32 %v551_v55, %v264_v22 }
  0xb4   :  { %324 = vst.msk [vmem:[%s637_s4 + $0x50] sm:$0xff] %vm313_vm1, %v307_v23  ;;  %v300_v25 = vmax.f32 %v284_v24, 0.0  ;;  %v151_v26 = vpop.f32.mrf.mxu2 }
  0xb5   :  { %v248_v27 = vpop.f32.mrf.mxu3 }
  0xb6   :  { %317 = vst.msk [vmem:[%s637_s4 + $0x18] sm:$0xff] %vm313_vm1, %v300_v25  ;;  %v272_v28 = vmax.f32 %v151_v26, %v248_v27  ;;  %v134_v29 = vpop.f32.mrf.mxu0 }
  0xb7   :  { %v231_v30 = vpop.f32.mrf.mxu1 }
  0xb8   :  { %v292_v31 = vadd.f32 %v551_v55, %v272_v28  ;;  %v265_v32 = vmax.f32 %v134_v29, %v231_v30 }
  0xba   :  { %v308_v33 = vmax.f32 %v292_v31, 0.0  ;;  %v285_v34 = vadd.f32 %v551_v55, %v265_v32 }
  0xbc   :  { %325 = vst.msk [vmem:[%s637_s4 + $0x58] sm:$0xff] %vm313_vm1, %v308_v33  ;;  %v301_v35 = vmax.f32 %v285_v34, 0.0  ;;  %v154_v36 = vpop.f32.mrf.mxu2 }
  0xbd   :  { %v251_v37 = vpop.f32.mrf.mxu3 }
  0xbe   :  { %318 = vst.msk [vmem:[%s637_s4 + $0x20] sm:$0xff] %vm313_vm1, %v301_v35  ;;  %v273_v38 = vmax.f32 %v154_v36, %v251_v37  ;;  %v136_v39 = vpop.f32.mrf.mxu0 }
  0xbf   :  { %v233_v40 = vpop.f32.mrf.mxu1 }
  0xc0   :  { %v293_v41 = vadd.f32 %v551_v55, %v273_v38  ;;  %v266_v42 = vmax.f32 %v136_v39, %v233_v40 }
  0xc2   :  { %v309_v43 = vmax.f32 %v293_v41, 0.0  ;;  %v286_v44 = vadd.f32 %v551_v55, %v266_v42 }
  0xc4   :  { %326 = vst.msk [vmem:[%s637_s4 + $0x60] sm:$0xff] %vm313_vm1, %v309_v43  ;;  %v302_v45 = vmax.f32 %v286_v44, 0.0  ;;  %v156_v46 = vpop.f32.mrf.mxu2 }
  0xc5   :  { %v253_v47 = vpop.f32.mrf.mxu3 }
  0xc6   :  { %319 = vst.msk [vmem:[%s637_s4 + $0x28] sm:$0xff] %vm313_vm1, %v302_v45  ;;  %v274_v48 = vmax.f32 %v156_v46, %v253_v47  ;;  %v139_v49 = vpop.f32.mrf.mxu0 }
  0xc7   :  { %v236_v50 = vpop.f32.mrf.mxu1 }
  0xc8   :  { %v294_v51 = vadd.f32 %v551_v55, %v274_v48  ;;  %v267_v52 = vmax.f32 %v139_v49, %v236_v50 }
  0xca   :  { %v310_v53 = vmax.f32 %v294_v51, 0.0  ;;  %v287_v54 = vadd.f32 %v551_v55, %v267_v52 }
  0xcc   :  { %327 = vst.msk [vmem:[%s637_s4 + $0x68] sm:$0xff] %vm313_vm1, %v310_v53  ;;  %v303_v56 = vmax.f32 %v287_v54, 0.0  ;;  %v159_v57 = vpop.f32.mrf.mxu2 }
  0xcd   :  { %v256_v58 = vpop.f32.mrf.mxu3 }
  0xce   :  { %320 = vst.msk [vmem:[%s637_s4 + $0x30] sm:$0xff] %vm313_vm1, %v303_v56  ;;  %v275_v59 = vmax.f32 %v159_v57, %v256_v58  ;;  %v141_v60 = vpop.f32.mrf.mxu0 }
  0xcf   :  { %v238_v61 = vpop.f32.mrf.mxu1 }
  0xd0   :  { %v295_v62 = vadd.f32 %v551_v55, %v275_v59  ;;  %v268_v63 = vmax.f32 %v141_v60, %v238_v61 }
  0xd2   :  { %v311_v0 = vmax.f32 %v295_v62, 0.0  ;;  %v288_v1 = vadd.f32 %v551_v55, %v268_v63 }
  0xd4   :  { %328 = vst.msk [vmem:[%s637_s4 + $0x70] sm:$0xff] %vm313_vm1, %v311_v0  ;;  %v304_v2 = vmax.f32 %v288_v1, 0.0  ;;  %v161_v3 = vpop.f32.mrf.mxu2 }
  0xd5   :  { %v258_v4 = vpop.f32.mrf.mxu3 }
  0xd6   :  { %321 = vst.msk [vmem:[%s637_s4 + $0x38] sm:$0xff] %vm313_vm1, %v304_v2  ;;  %v276_v5 = vmax.f32 %v161_v3, %v258_v4 }
  0xd8   :  { %v296_v6 = vadd.f32 %v551_v55, %v276_v5 }
  0xda   :  { %v312_v7 = vmax.f32 %v296_v6, 0.0 }
  0xdc   :  { %329 = vst.msk [vmem:[%s637_s4 + $0x78] sm:$0xff] %vm313_vm1, %v312_v7 }

// kernel: forward.30
= control target key start
LH: loop header
LB: loop body
LE: loop exit
PB: predicated region body
PF: predicated region fallthrough
CT: control target
= control target key end

     0   :  { %9 = vsyncpa [#allocation3], 0  ;;  %s673_s0 = inlined_call_operand.vmem [shape: f32[64,192], index: 0, kind: input, shape index: {}]   ;;  %s674_s1 = inlined_call_operand.vmem [shape: f32[64,192], index: 1, kind: input, shape index: {}]   ;;  %s675_s2 = inlined_call_operand.hbm [shape: bf16[192,128], index: 2, kind: input, shape index: {}]   ;;  %s676_s3 = inlined_call_operand.hbm [shape: f32[1,128], index: 3, kind: input, shape index: {}]   ;;  %s677_s4 = inlined_call_operand.vmem [shape: f32[64,128], index: 4, kind: output, shape index: {}]  }
   0x1   :  { %s19_s17 = sshll.u32 %s675_s2, 4  ;;  %s20_s17 = int_to_ptr.hbm [resolvable:$true] %s19_s17 }
   0x2   :  { %10 = vsyncpa [#allocation5], 0  ;;  %s500_s18 = smov [#allocation2]   ;;  %s33_s22 = sshll.u32 %s676_s3, 4  ;;  %s34_s22 = int_to_ptr.hbm [resolvable:$true] %s33_s22 }
   0x3   :  { %s21_s19 = sshll.u32 %s500_s18, 4  ;;  %s501_s23 = smov 64   ;;  %s22_s19 = int_to_ptr.vmem [resolvable:$true] %s21_s19 }
   0x4   :  { %s502_s24 = smov 4   ;;  %s503_s25 = smov [#allocation4]  }
   0x5   :  { %27 = dma.hbm_to_vmem [thread:$0]  %s20_s17, 1536, %s22_s19, [#allocation3], %s501_s23, %s501_s23, %s502_s24  }
   0x6   :  { %s35_s26 = sshll.u32 %s503_s25, 4  ;;  %s36_s26 = int_to_ptr.vmem [resolvable:$true] %s35_s26 }
   0x7   :  { %38 = dma.hbm_to_vmem [thread:$0]  %s34_s22, 16, %s36_s26, [#allocation5]  }
   0x8   :  { %496 = dma.done.wait [#allocation3], 1536  }
   0x9   :  { %497 = vsyncadd [#allocation3], 4294965760 }
   0xa   :  { %498 = dma.done.wait [#allocation5], 16  }
   0xb   :  { %499 = vsyncadd [#allocation5], 4294967280  ;;  %v438_v0 = vld [vmem:[#allocation2 + $0x38] sm:$0xff]  ;;  %v437_v2 = vld [vmem:[#allocation2 + $0x30] sm:$0xff]  ;;  %vm168_vm0 = vcmask 523264  }
   0xc   :  { %v442_v1 = vld [vmem:[#allocation2 + $0x58] sm:$0xff]  ;;  %181 = vmatpush.bf16.msra.mxu0 %v438_v0  ;;  %275 = vmatpush.bf16.msra.mxu2 %v438_v0  ;;  %v441_v3 = vld [vmem:[#allocation2 + $0x50] sm:$0xff]  ;;  %v436_v4 = vld [vmem:[#allocation2 + $0x28] sm:$0xff] }
   0xd   :  { %308 = vmatpush.bf16.msra.mxu3 %v442_v1  ;;  %214 = vmatpush.bf16.msra.mxu1 %v442_v1  ;;  %v440_v5 = vld [vmem:[#allocation2 + $0x48] sm:$0xff]  ;;  %v435_v6 = vld [vmem:[#allocation2 + $0x20] sm:$0xff]  ;;  %v242_v9 = vld [vmem:[%s674_s1 + $0x18] sm:$0xff] }
   0xe   :  { %v439_v7 = vld [vmem:[#allocation2 + $0x40] sm:$0xff]  ;;  %v240_v8 = vld [vmem:[%s674_s1 + $0x8] sm:$0xff]  ;;  %v75_v11 = vld [vmem:[%s673_s0 + $0x18] sm:$0xff] }
   0xf   :  { %v73_v10 = vld [vmem:[%s673_s0 + $0x8] sm:$0xff]  ;;  %v434_v12 = vld [vmem:[#allocation2 + $0x18] sm:$0xff]  ;;  %v256_v13 = vpack.c.bf16 %v242_v9, %v240_v8  ;;  %v433_v15 = vld [vmem:[#allocation2 + $0x10] sm:$0xff] }
  0x10   :  { %182 = vmatpush.bf16.msra.mxu0 %v437_v2  ;;  %276 = vmatpush.bf16.msra.mxu2 %v437_v2  ;;  %v89_v14 = vpack.c.bf16 %v75_v11, %v73_v10  ;;  %v432_v16 = vld [vmem:[#allocation2 + $0x8] sm:$0xff]  ;;  %v431_v17 = vld [vmem:[#allocation2] sm:$0xff]  ;;  %v74_v19 = vld [vmem:[%s673_s0 + $0x10] sm:$0xff] }
  0x11   :  { %309 = vmatpush.bf16.msra.mxu3 %v441_v3  ;;  %215 = vmatpush.bf16.msra.mxu1 %v441_v3  ;;  %v72_v18 = vld [vmem:[%s673_s0] sm:$0xff]  ;;  %v241_v21 = vld [vmem:[%s674_s1 + $0x10] sm:$0xff]  ;;  %v244_v22 = vld [vmem:[%s674_s1 + $0x28] sm:$0xff] }
  0x12   :  { %v239_v20 = vld [vmem:[%s674_s1] sm:$0xff]  ;;  %v246_v23 = vld [vmem:[%s674_s1 + $0x38] sm:$0xff]  ;;  %v77_v24 = vld [vmem:[%s673_s0 + $0x28] sm:$0xff]  ;;  %v88_v26 = vpack.c.bf16 %v74_v19, %v72_v18 }
  0x13   :  { %v79_v25 = vld [vmem:[%s673_s0 + $0x38] sm:$0xff]  ;;  %v255_v27 = vpack.c.bf16 %v241_v21, %v239_v20  ;;  %v258_v28 = vpack.c.bf16 %v246_v23, %v244_v22  ;;  %v76_v30 = vld [vmem:[%s673_s0 + $0x20] sm:$0xff]  ;;  %v78_v31 = vld [vmem:[%s673_s0 + $0x30] sm:$0xff] }
  0x14   :  { %183 = vmatpush.bf16.msra.mxu0 %v436_v4  ;;  %277 = vmatpush.bf16.msra.mxu2 %v436_v4  ;;  %v91_v29 = vpack.c.bf16 %v79_v25, %v77_v24  ;;  %v243_v32 = vld [vmem:[%s674_s1 + $0x20] sm:$0xff]  ;;  %v245_v33 = vld [vmem:[%s674_s1 + $0x30] sm:$0xff]  ;;  %v248_v34 = vld [vmem:[%s674_s1 + $0x48] sm:$0xff]  ;;  %v90_v38 = vpack.c.bf16 %v78_v31, %v76_v30 }
  0x15   :  { %310 = vmatpush.bf16.msra.mxu3 %v440_v5  ;;  %216 = vmatpush.bf16.msra.mxu1 %v440_v5  ;;  %v250_v35 = vld [vmem:[%s674_s1 + $0x58] sm:$0xff]  ;;  %v81_v36 = vld [vmem:[%s673_s0 + $0x48] sm:$0xff]  ;;  %v257_v39 = vpack.c.bf16 %v245_v33, %v243_v32  ;;  %v80_v42 = vld [vmem:[%s673_s0 + $0x40] sm:$0xff] }
  0x16   :  { %v83_v37 = vld [vmem:[%s673_s0 + $0x58] sm:$0xff]  ;;  %v260_v40 = vpack.c.bf16 %v250_v35, %v248_v34  ;;  %v82_v43 = vld [vmem:[%s673_s0 + $0x50] sm:$0xff]  ;;  %v247_v44 = vld [vmem:[%s674_s1 + $0x40] sm:$0xff] }
  0x17   :  { %v93_v41 = vpack.c.bf16 %v83_v37, %v81_v36  ;;  %v249_v45 = vld [vmem:[%s674_s1 + $0x50] sm:$0xff]  ;;  %v252_v46 = vld [vmem:[%s674_s1 + $0x68] sm:$0xff]  ;;  %v254_v47 = vld [vmem:[%s674_s1 + $0x78] sm:$0xff]  ;;  %v92_v50 = vpack.c.bf16 %v82_v43, %v80_v42 }
  0x18   :  { %184 = vmatpush.bf16.msra.mxu0 %v435_v6  ;;  %278 = vmatpush.bf16.msra.mxu2 %v435_v6  ;;  %v85_v48 = vld [vmem:[%s673_s0 + $0x68] sm:$0xff]  ;;  %v87_v49 = vld [vmem:[%s673_s0 + $0x78] sm:$0xff]  ;;  %v259_v51 = vpack.c.bf16 %v249_v45, %v247_v44  ;;  %v262_v52 = vpack.c.bf16 %v254_v47, %v252_v46  ;;  %v84_v54 = vld [vmem:[%s673_s0 + $0x60] sm:$0xff] }
  0x19   :  { %311 = vmatpush.bf16.msra.mxu3 %v439_v7  ;;  %217 = vmatpush.bf16.msra.mxu1 %v439_v7  ;;  %v95_v53 = vpack.c.bf16 %v87_v49, %v85_v48  ;;  %v86_v55 = vld [vmem:[%s673_s0 + $0x70] sm:$0xff]  ;;  %v251_v56 = vld [vmem:[%s674_s1 + $0x60] sm:$0xff] }
  0x1a   :  { %v253_v57 = vld [vmem:[%s674_s1 + $0x70] sm:$0xff]  ;;  %v94_v58 = vpack.c.bf16 %v86_v55, %v84_v54  ;;  %v639_v4 = vld [vmem:[#allocation4] ss:$0 sm:$0xff] }
  0x1b   :  { %v261_v59 = vpack.c.bf16 %v253_v57, %v251_v56 }
  0x1c   :  { %185 = vmatpush.bf16.msra.mxu0 %v434_v12  ;;  %279 = vmatpush.bf16.msra.mxu2 %v434_v12 }
  0x1d   :  { %427 = vmatmul.msk.bf16.vlgmr.msra.gmra.mxu3 %vm168_vm0, %v256_v13  ;;  %423 = vmatmul.msk.bf16.vlgmr.msra.gmra.mxu1 %vm168_vm0, %v89_v14 }
  0x20   :  { %186 = vmatpush.bf16.msra.mxu0 %v433_v15  ;;  %280 = vmatpush.bf16.msra.mxu2 %v433_v15 }
  0x24   :  { %187 = vmatpush.bf16.msra.mxu0 %v432_v16  ;;  %281 = vmatpush.bf16.msra.mxu2 %v432_v16 }
  0x28   :  { %188 = vmatpush.bf16.msra.mxu0 %v431_v17  ;;  %282 = vmatpush.bf16.msra.mxu2 %v431_v17 }
  0x2b   :  { %189 = vmatmul.bf16.vlgmr.msra.gmra.mxu0 %v88_v26  ;;  %283 = vmatmul.bf16.vlgmr.msra.gmra.mxu2 %v255_v27 }
  0x2d   :  { %428 = vmatmul.msk.bf16.gmra.mxu3 %vm168_vm0, %v258_v28  ;;  %424 = vmatmul.msk.bf16.gmra.mxu1 %vm168_vm0, %v91_v29 }
  0x3b   :  { %194 = vmatmul.bf16.gmra.mxu0 %v90_v38  ;;  %288 = vmatmul.bf16.gmra.mxu2 %v257_v39 }
  0x3d   :  { %429 = vmatmul.msk.bf16.gmra.mxu3 %vm168_vm0, %v260_v40  ;;  %425 = vmatmul.msk.bf16.gmra.mxu1 %vm168_vm0, %v93_v41 }
  0x4b   :  { %199 = vmatmul.bf16.gmra.mxu0 %v92_v50  ;;  %293 = vmatmul.bf16.gmra.mxu2 %v259_v51 }
  0x4d   :  { %430 = vmatmul.msk.bf16.gmra.mxu3 %vm168_vm0, %v262_v52  ;;  %426 = vmatmul.msk.bf16.gmra.mxu1 %vm168_vm0, %v95_v53 }
  0x5b   :  { %204 = vmatmul.bf16.gmra.mxu0 %v94_v58  ;;  %298 = vmatmul.bf16.gmra.mxu2 %v261_v59 }
  0x9a   :  { %v219_v60 = vpop.f32.mrf.mxu1 }
  0xa0   :  { %v313_v61 = vpop.f32.mrf.mxu3 }
  0xa2   :  { %v221_v63 = vpop.f32.mrf.mxu1 }
  0xa8   :  { %v190_v62 = vpop.f32.mrf.mxu0  ;;  %v315_v0 = vpop.f32.mrf.mxu3 }
  0xa9   :  { %v220_v1 = vadd.f32 %v219_v60, %v190_v62 }
  0xaa   :  { %v224_v8 = vpop.f32.mrf.mxu1 }
  0xae   :  { %v284_v2 = vpop.f32.mrf.mxu2 }
  0xaf   :  { %v314_v3 = vadd.f32 %v313_v61, %v284_v2 }
  0xb0   :  { %v192_v5 = vpop.f32.mrf.mxu0  ;;  %v318_v9 = vpop.f32.mrf.mxu3 }
  0xb1   :  { %v333_v6 = vmax.f32 %v220_v1, %v314_v3  ;;  %v222_v12 = vadd.f32 %v221_v63, %v192_v5 }
  0xb2   :  { %v226_v19 = vpop.f32.mrf.mxu1 }
  0xb3   :  { %v345_v7 = vadd.f32 %v639_v4, %v333_v6 }
  0xb5   :  { %v353_v10 = vmax.f32 %v345_v7, 0.0 }
  0xb6   :  { %v286_v11 = vpop.f32.mrf.mxu2 }
  0xb7   :  { %361 = vst [vmem:[%s677_s4] sm:$0xff] %v353_v10  ;;  %v316_v13 = vadd.f32 %v315_v0, %v286_v11 }
  0xb8   :  { %v195_v14 = vpop.f32.mrf.mxu0  ;;  %v320_v21 = vpop.f32.mrf.mxu3 }
  0xb9   :  { %v334_v15 = vmax.f32 %v222_v12, %v316_v13  ;;  %v225_v18 = vadd.f32 %v224_v8, %v195_v14 }
  0xba   :  { %v229_v29 = vpop.f32.mrf.mxu1 }
  0xbb   :  { %v346_v16 = vadd.f32 %v639_v4, %v334_v15 }
  0xbd   :  { %v354_v17 = vmax.f32 %v346_v16, 0.0 }
  0xbe   :  { %v289_v20 = vpop.f32.mrf.mxu2 }
  0xbf   :  { %362 = vst [vmem:[%s677_s4 + $0x8] sm:$0xff] %v354_v17  ;;  %v319_v22 = vadd.f32 %v318_v9, %v289_v20 }
  0xc0   :  { %v197_v23 = vpop.f32.mrf.mxu0  ;;  %v323_v31 = vpop.f32.mrf.mxu3 }
  0xc1   :  { %v335_v24 = vmax.f32 %v225_v18, %v319_v22  ;;  %v227_v28 = vadd.f32 %v226_v19, %v197_v23 }
  0xc2   :  { %v231_v40 = vpop.f32.mrf.mxu1 }
  0xc3   :  { %v347_v25 = vadd.f32 %v639_v4, %v335_v24 }
  0xc5   :  { %v355_v26 = vmax.f32 %v347_v25, 0.0 }
  0xc6   :  { %v291_v27 = vpop.f32.mrf.mxu2 }
  0xc7   :  { %363 = vst [vmem:[%s677_s4 + $0x10] sm:$0xff] %v355_v26  ;;  %v321_v30 = vadd.f32 %v320_v21, %v291_v27 }
  0xc8   :  { %v200_v32 = vpop.f32.mrf.mxu0  ;;  %v325_v42 = vpop.f32.mrf.mxu3 }
  0xc9   :  { %v336_v33 = vmax.f32 %v227_v28, %v321_v30  ;;  %v230_v36 = vadd.f32 %v229_v29, %v200_v32 }
  0xca   :  { %v234_v50 = vpop.f32.mrf.mxu1 }
  0xcb   :  { %v348_v34 = vadd.f32 %v639_v4, %v336_v33 }
  0xcd   :  { %v356_v35 = vmax.f32 %v348_v34, 0.0 }
  0xce   :  { %v294_v37 = vpop.f32.mrf.mxu2 }
  0xcf   :  { %364 = vst [vmem:[%s677_s4 + $0x18] sm:$0xff] %v356_v35  ;;  %v324_v38 = vadd.f32 %v323_v31, %v294_v37 }
  0xd0   :  { %v202_v39 = vpop.f32.mrf.mxu0  ;;  %v328_v52 = vpop.f32.mrf.mxu3 }
  0xd1   :  { %v337_v41 = vmax.f32 %v230_v36, %v324_v38  ;;  %v232_v46 = vadd.f32 %v231_v40, %v202_v39 }
  0xd2   :  { %v236_v60 = vpop.f32.mrf.mxu1 }
  0xd3   :  { %v349_v43 = vadd.f32 %v639_v4, %v337_v41 }
  0xd5   :  { %v357_v44 = vmax.f32 %v349_v43, 0.0 }
  0xd6   :  { %v296_v45 = vpop.f32.mrf.mxu2 }
  0xd7   :  { %365 = vst [vmem:[%s677_s4 + $0x20] sm:$0xff] %v357_v44  ;;  %v326_v47 = vadd.f32 %v325_v42, %v296_v45 }
  0xd8   :  { %v205_v49 = vpop.f32.mrf.mxu0  ;;  %v330_v62 = vpop.f32.mrf.mxu3 }
  0xd9   :  { %v338_v48 = vmax.f32 %v232_v46, %v326_v47  ;;  %v235_v54 = vadd.f32 %v234_v50, %v205_v49 }
  0xdb   :  { %v350_v51 = vadd.f32 %v639_v4, %v338_v48 }
  0xdd   :  { %v358_v53 = vmax.f32 %v350_v51, 0.0 }
  0xde   :  { %v299_v55 = vpop.f32.mrf.mxu2 }
  0xdf   :  { %366 = vst [vmem:[%s677_s4 + $0x28] sm:$0xff] %v358_v53  ;;  %v329_v56 = vadd.f32 %v328_v52, %v299_v55 }
  0xe0   :  { %v207_v59 = vpop.f32.mrf.mxu0 }
  0xe1   :  { %v339_v57 = vmax.f32 %v235_v54, %v329_v56  ;;  %v237_v0 = vadd.f32 %v236_v60, %v207_v59 }
  0xe3   :  { %v351_v58 = vadd.f32 %v639_v4, %v339_v57 }
  0xe5   :  { %v359_v61 = vmax.f32 %v351_v58, 0.0 }
  0xe6   :  { %v301_v63 = vpop.f32.mrf.mxu2 }
  0xe7   :  { %367 = vst [vmem:[%s677_s4 + $0x30] sm:$0xff] %v359_v61  ;;  %v331_v1 = vadd.f32 %v330_v62, %v301_v63 }
  0xe9   :  { %v340_v2 = vmax.f32 %v237_v0, %v331_v1 }
  0xeb   :  { %v352_v3 = vadd.f32 %v639_v4, %v340_v2 }
  0xed   :  { %v360_v5 = vmax.f32 %v352_v3, 0.0 }
  0xef   :  { %368 = vst [vmem:[%s677_s4 + $0x38] sm:$0xff] %v360_v5 }
  0xf0   :  { %373 = vsyncpa [#allocation3], 1 }
  0xf1   :  { %374 = vsyncpa [#allocation5], 1 }

// kernel: forward.33
= control target key start
LH: loop header
LB: loop body
LE: loop exit
PB: predicated region body
PF: predicated region fallthrough
CT: control target
= control target key end

     0   :  { %8 = vsyncpa [#allocation3], 0  ;;  %s493_s0 = inlined_call_operand.vmem [shape: f32[64,192], index: 0, kind: input, shape index: {}]   ;;  %s494_s1 = inlined_call_operand.hbm [shape: bf16[192,128], index: 1, kind: input, shape index: {}]   ;;  %s495_s2 = inlined_call_operand.hbm [shape: f32[1,128], index: 2, kind: input, shape index: {}]   ;;  %s496_s3 = inlined_call_operand.vmem [shape: f32[64,128], index: 3, kind: output, shape index: {}]  }
   0x1   :  { %s16_s14 = sshll.u32 %s494_s1, 4  ;;  %s17_s14 = int_to_ptr.hbm [resolvable:$true] %s16_s14 }
   0x2   :  { %9 = vsyncpa [#allocation5], 0  ;;  %s387_s15 = smov [#allocation2]   ;;  %s30_s19 = sshll.u32 %s495_s2, 4  ;;  %s31_s19 = int_to_ptr.hbm [resolvable:$true] %s30_s19 }
   0x3   :  { %s18_s16 = sshll.u32 %s387_s15, 4  ;;  %s388_s20 = smov 64   ;;  %s19_s16 = int_to_ptr.vmem [resolvable:$true] %s18_s16 }
   0x4   :  { %s389_s21 = smov 4   ;;  %s390_s22 = smov [#allocation4]  }
   0x5   :  { %24 = dma.hbm_to_vmem [thread:$0]  %s17_s14, 1536, %s19_s16, [#allocation3], %s388_s20, %s388_s20, %s389_s21  }
   0x6   :  { %s32_s23 = sshll.u32 %s390_s22, 4  ;;  %s33_s23 = int_to_ptr.vmem [resolvable:$true] %s32_s23 }
   0x7   :  { %35 = dma.hbm_to_vmem [thread:$0]  %s31_s19, 16, %s33_s23, [#allocation5]  }
   0x8   :  { %383 = dma.done.wait [#allocation3], 1536  }
   0x9   :  { %384 = vsyncadd [#allocation3], 4294965760 }
   0xa   :  { %385 = dma.done.wait [#allocation5], 16  }
   0xb   :  { %386 = vsyncadd [#allocation5], 4294967280  ;;  %v313_v0 = vld [vmem:[#allocation2 + $0x38] sm:$0xff]  ;;  %v312_v2 = vld [vmem:[#allocation2 + $0x30] sm:$0xff]  ;;  %vm169_vm0 = vcmask 523264  }
   0xc   :  { %v317_v1 = vld [vmem:[#allocation2 + $0x58] sm:$0xff]  ;;  %182 = vmatpush.bf16.msra.mxu0 %v313_v0  ;;  %318 = vmatpush.bf16.msra.mxu2 %v313_v0  ;;  %v316_v3 = vld [vmem:[#allocation2 + $0x50] sm:$0xff]  ;;  %v311_v4 = vld [vmem:[#allocation2 + $0x28] sm:$0xff] }
   0xd   :  { %326 = vmatpush.bf16.msra.mxu3 %v317_v1  ;;  %215 = vmatpush.bf16.msra.mxu1 %v317_v1  ;;  %v315_v5 = vld [vmem:[#allocation2 + $0x48] sm:$0xff]  ;;  %v310_v6 = vld [vmem:[#allocation2 + $0x20] sm:$0xff]  ;;  %v52_v9 = vld [vmem:[%s493_s0 + $0x38] sm:$0xff] }
   0xe   :  { %v314_v7 = vld [vmem:[#allocation2 + $0x40] sm:$0xff]  ;;  %v50_v8 = vld [vmem:[%s493_s0 + $0x28] sm:$0xff]  ;;  %v48_v11 = vld [vmem:[%s493_s0 + $0x18] sm:$0xff] }
   0xf   :  { %v46_v10 = vld [vmem:[%s493_s0 + $0x8] sm:$0xff]  ;;  %v64_v12 = vpack.c.bf16 %v52_v9, %v50_v8  ;;  %v309_v13 = vld [vmem:[#allocation2 + $0x18] sm:$0xff]  ;;  %v308_v15 = vld [vmem:[#allocation2 + $0x10] sm:$0xff] }
  0x10   :  { %183 = vmatpush.bf16.msra.mxu0 %v312_v2  ;;  %319 = vmatpush.bf16.msra.mxu2 %v312_v2  ;;  %v62_v14 = vpack.c.bf16 %v48_v11, %v46_v10  ;;  %v307_v16 = vld [vmem:[#allocation2 + $0x8] sm:$0xff]  ;;  %v306_v17 = vld [vmem:[#allocation2] sm:$0xff]  ;;  %v47_v19 = vld [vmem:[%s493_s0 + $0x10] sm:$0xff] }
  0x11   :  { %327 = vmatpush.bf16.msra.mxu3 %v316_v3  ;;  %216 = vmatpush.bf16.msra.mxu1 %v316_v3  ;;  %v45_v18 = vld [vmem:[%s493_s0] sm:$0xff]  ;;  %v55_v21 = vld [vmem:[%s493_s0 + $0x50] sm:$0xff]  ;;  %v54_v22 = vld [vmem:[%s493_s0 + $0x48] sm:$0xff] }
  0x12   :  { %v53_v20 = vld [vmem:[%s493_s0 + $0x40] sm:$0xff]  ;;  %v56_v23 = vld [vmem:[%s493_s0 + $0x58] sm:$0xff]  ;;  %v61_v24 = vpack.c.bf16 %v47_v19, %v45_v18  ;;  %v51_v28 = vld [vmem:[%s493_s0 + $0x30] sm:$0xff] }
  0x13   :  { %v65_v25 = vpack.c.bf16 %v55_v21, %v53_v20  ;;  %v66_v26 = vpack.c.bf16 %v56_v23, %v54_v22  ;;  %v49_v27 = vld [vmem:[%s493_s0 + $0x20] sm:$0xff]  ;;  %v59_v30 = vld [vmem:[%s493_s0 + $0x70] sm:$0xff]  ;;  %v58_v31 = vld [vmem:[%s493_s0 + $0x68] sm:$0xff] }
  0x14   :  { %184 = vmatpush.bf16.msra.mxu0 %v311_v4  ;;  %320 = vmatpush.bf16.msra.mxu2 %v311_v4  ;;  %v57_v29 = vld [vmem:[%s493_s0 + $0x60] sm:$0xff]  ;;  %v60_v32 = vld [vmem:[%s493_s0 + $0x78] sm:$0xff]  ;;  %v63_v33 = vpack.c.bf16 %v51_v28, %v49_v27 }
  0x15   :  { %328 = vmatpush.bf16.msra.mxu3 %v315_v5  ;;  %217 = vmatpush.bf16.msra.mxu1 %v315_v5  ;;  %v67_v34 = vpack.c.bf16 %v59_v30, %v57_v29  ;;  %v68_v35 = vpack.c.bf16 %v60_v32, %v58_v31  ;;  %v334_v37 = vld [vmem:[#allocation4] ss:$0 sm:$0xff] }
  0x18   :  { %185 = vmatpush.bf16.msra.mxu0 %v310_v6  ;;  %321 = vmatpush.bf16.msra.mxu2 %v310_v6 }
  0x19   :  { %329 = vmatpush.bf16.msra.mxu3 %v314_v7  ;;  %218 = vmatpush.bf16.msra.mxu1 %v314_v7 }
  0x1c   :  { %303 = vmatmul.msk.bf16.vlgmr.msra.gmra.mxu3 %vm169_vm0, %v64_v12  ;;  %186 = vmatpush.bf16.msra.mxu0 %v309_v13 }
  0x1d   :  { %322 = vmatpush.bf16.msra.mxu2 %v309_v13  ;;  %302 = vmatmul.msk.bf16.vlgmr.msra.gmra.mxu1 %vm169_vm0, %v62_v14 }
  0x20   :  { %187 = vmatpush.bf16.msra.mxu0 %v308_v15 }
  0x21   :  { %323 = vmatpush.bf16.msra.mxu2 %v308_v15 }
  0x24   :  { %188 = vmatpush.bf16.msra.mxu0 %v307_v16 }
  0x25   :  { %324 = vmatpush.bf16.msra.mxu2 %v307_v16 }
  0x28   :  { %189 = vmatpush.bf16.msra.mxu0 %v306_v17 }
  0x29   :  { %325 = vmatpush.bf16.msra.mxu2 %v306_v17 }
  0x2b   :  { %190 = vmatmul.bf16.vlgmr.msra.gmra.mxu0 %v61_v24 }
  0x2c   :  { %200 = vmatmul.bf16.vlgmr.msra.gmra.mxu2 %v65_v25  ;;  %304 = vmatmul.msk.bf16.gmra.mxu3 %vm169_vm0, %v66_v26 }
  0x3b   :  { %195 = vmatmul.bf16.gmra.mxu0 %v63_v33 }
  0x3c   :  { %205 = vmatmul.bf16.gmra.mxu2 %v67_v34  ;;  %305 = vmatmul.msk.bf16.gmra.mxu3 %vm169_vm0, %v68_v35 }
  0x9a   :  { %v220_v38 = vpop.f32.mrf.mxu1 }
  0x9f   :  { %v225_v36 = vpop.f32.mrf.mxu3 }
  0xa2   :  { %v222_v47 = vpop.f32.mrf.mxu1 }
  0xa7   :  { %v227_v39 = vpop.f32.mrf.mxu3 }
  0xa8   :  { %v191_v40 = vpop.f32.mrf.mxu0 }
  0xa9   :  { %v192_v41 = vadd.f32 %v334_v37, %v191_v40 }
  0xab   :  { %v221_v42 = vadd.f32 %v220_v38, %v192_v41 }
  0xad   :  { %240 = vst [vmem:[%s496_s3] sm:$0xff] %v221_v42 }
  0xaf   :  { %v201_v43 = vpop.f32.mrf.mxu2  ;;  %v230_v44 = vpop.f32.mrf.mxu3 }
  0xb0   :  { %v202_v45 = vadd.f32 %v334_v37, %v201_v43  ;;  %v193_v46 = vpop.f32.mrf.mxu0 }
  0xb1   :  { %v194_v48 = vadd.f32 %v334_v37, %v193_v46 }
  0xb2   :  { %v231_v49 = vadd.f32 %v230_v44, %v202_v45 }
  0xb3   :  { %v223_v50 = vadd.f32 %v222_v47, %v194_v48 }
  0xb4   :  { %244 = vst [vmem:[%s496_s3 + $0x20] sm:$0xff] %v231_v49 }
  0xb5   :  { %241 = vst [vmem:[%s496_s3 + $0x8] sm:$0xff] %v223_v50 }
  0xb7   :  { %v203_v51 = vpop.f32.mrf.mxu2  ;;  %v232_v52 = vpop.f32.mrf.mxu3 }
  0xb8   :  { %v204_v53 = vadd.f32 %v334_v37, %v203_v51  ;;  %v196_v54 = vpop.f32.mrf.mxu0 }
  0xb9   :  { %v197_v55 = vadd.f32 %v334_v37, %v196_v54 }
  0xba   :  { %v233_v56 = vadd.f32 %v232_v52, %v204_v53 }
  0xbb   :  { %v226_v57 = vadd.f32 %v225_v36, %v197_v55 }
  0xbc   :  { %245 = vst [vmem:[%s496_s3 + $0x28] sm:$0xff] %v233_v56 }
  0xbd   :  { %242 = vst [vmem:[%s496_s3 + $0x10] sm:$0xff] %v226_v57 }
  0xbf   :  { %v206_v58 = vpop.f32.mrf.mxu2  ;;  %v235_v59 = vpop.f32.mrf.mxu3 }
  0xc0   :  { %v207_v60 = vadd.f32 %v334_v37, %v206_v58  ;;  %v198_v61 = vpop.f32.mrf.mxu0 }
  0xc1   :  { %v199_v62 = vadd.f32 %v334_v37, %v198_v61 }
  0xc2   :  { %v236_v63 = vadd.f32 %v235_v59, %v207_v60 }
  0xc3   :  { %v228_v0 = vadd.f32 %v227_v39, %v199_v62 }
  0xc4   :  { %246 = vst [vmem:[%s496_s3 + $0x30] sm:$0xff] %v236_v63 }
  0xc5   :  { %243 = vst [vmem:[%s496_s3 + $0x18] sm:$0xff] %v228_v0 }
  0xc7   :  { %v208_v1 = vpop.f32.mrf.mxu2  ;;  %v237_v3 = vpop.f32.mrf.mxu3 }
  0xc8   :  { %v209_v2 = vadd.f32 %v334_v37, %v208_v1 }
  0xca   :  { %v238_v4 = vadd.f32 %v237_v3, %v209_v2 }
  0xcc   :  { %247 = vst [vmem:[%s496_s3 + $0x38] sm:$0xff] %v238_v4 }
  0xcd   :  { %252 = vsyncpa [#allocation3], 1 }
  0xce   :  { %253 = vsyncpa [#allocation5], 1 }

// kernel: forward.35
= control target key start
LH: loop header
LB: loop body
LE: loop exit
PB: predicated region body
PF: predicated region fallthrough
CT: control target
= control target key end

     0   :  { %s2874_s0 = inlined_call_operand.vmem [shape: f32[64,128], index: 0, kind: input, shape index: {}]   ;;  %s2875_s1 = inlined_call_operand.vmem [shape: bf16[128,2048], index: 1, kind: input, shape index: {}]   ;;  %s2876_s2 = inlined_call_operand.hbm [shape: f32[1,2048], index: 2, kind: input, shape index: {}]   ;;  %s2877_s3 = inlined_call_operand.vmem [shape: bf16[2048,128], index: 3, kind: input, shape index: {}]   ;;  %s2878_s4 = inlined_call_operand.hbm [shape: f32[1,128], index: 4, kind: input, shape index: {}]   ;;  %s2879_s5 = inlined_call_operand.hbm [shape: f32[1,128], index: 5, kind: input, shape index: {}]   ;;  %s2880_s6 = inlined_call_operand.hbm [shape: f32[1,128], index: 6, kind: input, shape index: {}]   ;;  %s2881_s7 = inlined_call_operand.vmem [shape: f32[64,128], index: 7, kind: output, shape index: {}]  }
   0x1   :  { %2882 = sst [smem:[#allocation14_spill]] %s2875_s1 }
   0x2   :  { %2883 = sst [smem:[#allocation15_spill]] %s2878_s4 }
   0x3   :  { %12 = vsyncpa [#allocation5], 0 }
   0x4   :  { %14 = vsyncpa [#allocation5 + $0x1], 0 }
   0x5   :  { %15 = vsyncpa [#allocation7], 0 }
   0x6   :  { %16 = vsyncpa [#allocation10], 0  ;;  %s2349_s24 = smov 0   ;;  %s2351_s25 = smov 0  }
   0x7   :  { %s2353_s26 = smov 0   ;;  %s2355_s27 = smov 0  }
   0x8   :  { %s2357_s28 = smov 0   ;;  %s2359_s29 = smov 0  }
   0x9 LB: > { %s1675_s30 = sadd.s32 4294967295, %s2302_s29   ;;  %s31_s8 = sadd.s32 1, %s2298_s28  ;;  %s2302_s29 = sphi %s2359_s29, %s22_s29   ;;  %s2298_s28 = sphi %s2357_s28, %s2896_s28   ;;  %s2294_s27 = sphi %s2355_s27, %s2895_s27   ;;  %s2290_s26 = sphi %s2353_s26, %s2894_s26   ;;  %s2286_s25 = sphi %s2351_s25, %s2893_s25   ;;  %s2282_s24 = sphi %s2349_s24, %s2892_s24  }
   0xa   : > { %p32_p0 = scmp.ge.s32.totalorder %s31_s8, 4  ;;  %s67_s9 = sadd.s32 1, %s2290_s26 }
   0xb   : > { %p74_p1 = scmp.ne.s32.totalorder %s2290_s26, %s2286_s25  ;;  %p75_p2 = scmp.eq.s32.totalorder %s2302_s29, 0 }
   0xc   : > { %s2898_s8 = smov (%p32_p0, %s31_s8), 0  ;;  %p106_p4 = scmp.ne.s32.totalorder %s2286_s25, %s2282_s24 }
   0xd   : > { %p2385_p3 = por %p75_p2, %p74_p1  ;;  %s64_s11 = ssub.s32 %s2298_s28, %s2898_s8 }
   0xe   : > { %p2392_p5 = scmp.eq.s32.totalorder %s1675_s30, 0  ;;  %p65_p6 = scmp.eq.s32.totalorder %s64_s11, 0 }
   0xf   : > { %p1676_p7 = scmp.ge.s32.totalorder %s2302_s29, 1  ;;  %p232_p9 = scmp.lt.s32.totalorder %s2302_s29, 5 }
  0x10   : > { %p2399_p8 = por %p2392_p5, %p106_p4  ;;  %s2888_s4 = sld [smem:[#allocation15_spill]] }
  0x11   : > { %s2405_s14 = scalar_select %p65_p6, %s2290_s26, %s67_s9  }
  0x12   : > { %p2407_p10 = pnand %p1676_p7, %p232_p9  ;;  %s2304_s19 = smov [#allocation6]  }
  0x13   : > { %s255_s20 = sshll.u32 %s2304_s19, 4  ;;  %s265_s23 = sshll.u32 %s2879_s5, 4  ;;  %s256_s20 = int_to_ptr.vmem [resolvable:$true] %s255_s20  ;;  %s266_s23 = int_to_ptr.hbm [resolvable:$true] %s265_s23 }
  0x14   : > { %p2036_p11 = pneg %p2407_p10  ;;  %s2305_s24 = smov [#allocation8]  }
  0x15   : > { %s267_s30 = sshll.u32 %s2305_s24, 4  ;;  %s277_s16 = sshll.u32 %s2880_s6, 4  ;;  %s268_s30 = int_to_ptr.vmem [resolvable:$true] %s267_s30  ;;  %s278_s16 = int_to_ptr.hbm [resolvable:$true] %s277_s16 }
  0x16   : > { %s253_s18 = sshll.u32 %s2888_s4, 4  ;;  %p2037_p12 = pnand %p2036_p11, %p2392_p5  ;;  %s254_s18 = int_to_ptr.hbm [resolvable:$true] %s253_s18 }
  0x17   : > { %s2306_s17 = smov [#allocation9]   ;;  %p1681_p13 = scmp.ge.s32.totalorder %s2302_s29, 4 }
  0x18   : > { %2039 = dma.hbm_to_vmem [thread:$0]  (!%p2037_p12), %s254_s18, 16, %s256_s20, [#allocation7]  }
  0x19   : > { %2042 = dma.hbm_to_vmem [thread:$0]  (!%p2037_p12), %s266_s23, 16, %s268_s30, [#allocation7]  }
  0x1a   : > { %s279_s19 = sshll.u32 %s2306_s17, 4  ;;  %286 = sbr.rel (%p1681_p13) target bundleno = 78 (0x4e), region = 32  ;;  %s280_s19 = int_to_ptr.vmem [resolvable:$true] %s279_s19 }
  0x1b   : > { %2045 = dma.hbm_to_vmem [thread:$0]  (!%p2037_p12), %s278_s16, 16, %s280_s19, [#allocation10]  }
  0x1f   : > { %289 = sbr.rel (!%p2385_p3) target bundleno = 73 (0x49), region = 36  ;;  %s291_s18 = sand.u32 (%p2385_p3), 1, %s2290_s26  }
  0x20   : > { %s1957_s20 = sshll.u32 (%p2385_p3), %s2298_s28, 4  ;;  %s1682_s21 = sshll.u32 (%p2385_p3), %s291_s18, 8 }
  0x21   : > { %s2889_s1 = sld [smem:[#allocation14_spill]] (%p2385_p3)  ;;  %s2437_s30 = scalar_lea.vmem (%p2385_p3), [#allocation3], %s1682_s21 }
  0x27   : > { %s2432_s23 = scalar_lea.vmem %s2889_s1, %s1957_s20 }
  0x28   : > { %v309_v0 = vld [vmem:[%s2432_s23] sm:$0xff]  ;;  %v311_v1 = vld [vmem:[%s2432_s23 + $0x8] sm:$0xff] }
  0x29   : > { %v313_v2 = vld [vmem:[%s2432_s23 + $0x40] sm:$0xff]  ;;  %310 = vst [vmem:[%s2437_s30] sm:$0xff] %v309_v0  ;;  %v315_v3 = vld [vmem:[%s2432_s23 + $0x48] sm:$0xff] }
  0x2a   : > { %312 = vst [vmem:[%s2437_s30 + $0x8] sm:$0xff] %v311_v1  ;;  %v317_v4 = vld [vmem:[%s2432_s23 + $0x80] sm:$0xff]  ;;  %v319_v5 = vld [vmem:[%s2432_s23 + $0x88] sm:$0xff] }
  0x2b   : > { %314 = vst [vmem:[%s2437_s30 + $0x10] sm:$0xff] %v313_v2  ;;  %v321_v6 = vld [vmem:[%s2432_s23 + $0xc0] sm:$0xff]  ;;  %v323_v7 = vld [vmem:[%s2432_s23 + $0xc8] sm:$0xff] }
  0x2c   : > { %316 = vst [vmem:[%s2437_s30 + $0x18] sm:$0xff] %v315_v3  ;;  %v325_v8 = vld [vmem:[%s2432_s23 + $0x100] sm:$0xff]  ;;  %v327_v9 = vld [vmem:[%s2432_s23 + $0x108] sm:$0xff] }
  0x2d   : > { %318 = vst [vmem:[%s2437_s30 + $0x20] sm:$0xff] %v317_v4  ;;  %v329_v10 = vld [vmem:[%s2432_s23 + $0x140] sm:$0xff]  ;;  %v331_v11 = vld [vmem:[%s2432_s23 + $0x148] sm:$0xff] }
  0x2e   : > { %320 = vst [vmem:[%s2437_s30 + $0x28] sm:$0xff] %v319_v5  ;;  %v333_v12 = vld [vmem:[%s2432_s23 + $0x180] sm:$0xff]  ;;  %v335_v13 = vld [vmem:[%s2432_s23 + $0x188] sm:$0xff] }
  0x2f   : > { %322 = vst [vmem:[%s2437_s30 + $0x30] sm:$0xff] %v321_v6  ;;  %v337_v14 = vld [vmem:[%s2432_s23 + $0x1c0] sm:$0xff]  ;;  %v339_v15 = vld [vmem:[%s2432_s23 + $0x1c8] sm:$0xff] }
  0x30   : > { %324 = vst [vmem:[%s2437_s30 + $0x38] sm:$0xff] %v323_v7  ;;  %v341_v16 = vld [vmem:[%s2432_s23 + $0x200] sm:$0xff]  ;;  %v343_v17 = vld [vmem:[%s2432_s23 + $0x208] sm:$0xff] }
  0x31   : > { %326 = vst [vmem:[%s2437_s30 + $0x40] sm:$0xff] %v325_v8  ;;  %v345_v18 = vld [vmem:[%s2432_s23 + $0x240] sm:$0xff]  ;;  %v347_v19 = vld [vmem:[%s2432_s23 + $0x248] sm:$0xff] }
  0x32   : > { %328 = vst [vmem:[%s2437_s30 + $0x48] sm:$0xff] %v327_v9  ;;  %v349_v20 = vld [vmem:[%s2432_s23 + $0x280] sm:$0xff]  ;;  %v351_v21 = vld [vmem:[%s2432_s23 + $0x288] sm:$0xff] }
  0x33   : > { %330 = vst [vmem:[%s2437_s30 + $0x50] sm:$0xff] %v329_v10  ;;  %v353_v22 = vld [vmem:[%s2432_s23 + $0x2c0] sm:$0xff]  ;;  %v355_v23 = vld [vmem:[%s2432_s23 + $0x2c8] sm:$0xff] }
  0x34   : > { %332 = vst [vmem:[%s2437_s30 + $0x58] sm:$0xff] %v331_v11  ;;  %v357_v24 = vld [vmem:[%s2432_s23 + $0x300] sm:$0xff]  ;;  %v359_v25 = vld [vmem:[%s2432_s23 + $0x308] sm:$0xff] }
  0x35   : > { %334 = vst [vmem:[%s2437_s30 + $0x60] sm:$0xff] %v333_v12  ;;  %v361_v26 = vld [vmem:[%s2432_s23 + $0x340] sm:$0xff]  ;;  %v363_v27 = vld [vmem:[%s2432_s23 + $0x348] sm:$0xff] }
  0x36   : > { %336 = vst [vmem:[%s2437_s30 + $0x68] sm:$0xff] %v335_v13  ;;  %v365_v28 = vld [vmem:[%s2432_s23 + $0x380] sm:$0xff]  ;;  %v367_v29 = vld [vmem:[%s2432_s23 + $0x388] sm:$0xff] }
  0x37   : > { %338 = vst [vmem:[%s2437_s30 + $0x70] sm:$0xff] %v337_v14  ;;  %v369_v30 = vld [vmem:[%s2432_s23 + $0x3c0] sm:$0xff]  ;;  %v371_v31 = vld [vmem:[%s2432_s23 + $0x3c8] sm:$0xff] }
  0x38   : > { %340 = vst [vmem:[%s2437_s30 + $0x78] sm:$0xff] %v339_v15 }
  0x39   : > { %342 = vst [vmem:[%s2437_s30 + $0x80] sm:$0xff] %v341_v16 }
  0x3a   : > { %344 = vst [vmem:[%s2437_s30 + $0x88] sm:$0xff] %v343_v17 }
  0x3b   : > { %346 = vst [vmem:[%s2437_s30 + $0x90] sm:$0xff] %v345_v18 }
  0x3c   : > { %348 = vst [vmem:[%s2437_s30 + $0x98] sm:$0xff] %v347_v19 }
  0x3d   : > { %350 = vst [vmem:[%s2437_s30 + $0xa0] sm:$0xff] %v349_v20 }
  0x3e   : > { %352 = vst [vmem:[%s2437_s30 + $0xa8] sm:$0xff] %v351_v21 }
  0x3f   : > { %354 = vst [vmem:[%s2437_s30 + $0xb0] sm:$0xff] %v353_v22 }
  0x40   : > { %356 = vst [vmem:[%s2437_s30 + $0xb8] sm:$0xff] %v355_v23 }
  0x41   : > { %358 = vst [vmem:[%s2437_s30 + $0xc0] sm:$0xff] %v357_v24 }
  0x42   : > { %360 = vst [vmem:[%s2437_s30 + $0xc8] sm:$0xff] %v359_v25 }
  0x43   : > { %362 = vst [vmem:[%s2437_s30 + $0xd0] sm:$0xff] %v361_v26 }
  0x44   : > { %364 = vst [vmem:[%s2437_s30 + $0xd8] sm:$0xff] %v363_v27 }
  0x45   : > { %366 = vst [vmem:[%s2437_s30 + $0xe0] sm:$0xff] %v365_v28 }
  0x46   : > { %368 = vst [vmem:[%s2437_s30 + $0xe8] sm:$0xff] %v367_v29 }
  0x47   : > { %370 = vst [vmem:[%s2437_s30 + $0xf0] sm:$0xff] %v369_v30 }
  0x48   : > { %372 = vst [vmem:[%s2437_s30 + $0xf8] sm:$0xff] %v371_v31 }
  0x49 PF: > { %s379_s9 = sand.u32 1, %s2290_s26   ;;  %s1686_s11 = sshll.u32 %s2298_s28, 2 }
  0x4a   : > { %s1685_s16 = sshll.u32 %s379_s9, 2  ;;  %s387_s18 = scalar_lea.hbm %s2876_s2, %s1686_s11 }
  0x4b   : > { %s389_s20 = sshll.u32 %s387_s18, 4  ;;  %s383_s21 = scalar_lea.vmem [#allocation4], %s1685_s16  ;;  %s390_s20 = int_to_ptr.hbm [resolvable:$true] %s389_s20 }
  0x4c   : > { %s391_s22 = sshll.u32 %s383_s21, 4  ;;  %s380_s24 = scalar_lea.sflag [#allocation5], %s379_s9  ;;  %s392_s22 = int_to_ptr.vmem [resolvable:$true] %s391_s22 }
  0x4d   : > { %2028 = dma.hbm_to_vmem [thread:$0]  (%p2385_p3), %s390_s20, 64, %s392_s22, %s380_s24  }
  0x4e PF: > { %409 = sbr.rel (%p2407_p10) target bundleno = 778 (0x30a), region = 67  ;;  %s412_s23 = sand.u32 (!%p2407_p10), 1, %s2286_s25  }
  0x4f   : > { %s1688_s30 = sshll.u32 (!%p2407_p10), %s412_s23, 8  ;;  %s1689_s1 = sshll.u32 (!%p2407_p10), %s412_s23, 2 }
  0x50   : > { %s2510_s4 = scalar_lea.vmem (!%p2407_p10), [#allocation3], %s1688_s30  ;;  %s419_s11 = scalar_lea.sflag (!%p2407_p10), [#allocation5], %s412_s23 }
  0x51   : > { %s2512_s17 = scalar_lea.vmem (!%p2407_p10), [#allocation4], %s1689_s1 }
  0x53   : > { %2269 = dma.done.wait (%p2399_p8), %s419_s11, 64  }
  0x54   : > { %2271 = vsyncadd (%p2399_p8), %s419_s11, 4294967232 }
  0x55   : > { %2273 = dma.done.wait (%p2392_p5), [#allocation7], 32  }
  0x56   : > { %2275 = vsyncadd (%p2392_p5), [#allocation7], 4294967264 }
  0x57   : > { %2277 = dma.done.wait (%p2392_p5), [#allocation10], 16  }
  0x58   : > { %2279 = vsyncadd (%p2392_p5), [#allocation10], 4294967280  ;;  %s1693_s1 = sshll.u32 %s2294_s27, 6  ;;  %p1695_p1 = scmp.ne.s32.totalorder %s2294_s27, 0 }
  0x59   : > { %p492_p0 = scmp.lt.s32.totalorder %s1693_s1, 255 }
  0x5a   : > { %506 = sbr.rel (%p1695_p1) target bundleno = 104 (0x68), region = 91 }
  0x5b   : > { %s2900_s1 = smov (!%p492_p0, %s1693_s1), 255 }
  0x5c   : > { %s1694_s10 = sshll.u32 %s2900_s1, 2 }
  0x5d   : > { %s2530_s9 = scalar_lea.vmem %s2877_s3, %s1694_s10 }
  0x5f   : > { %v2307_v32 = vmov 0.0  }
  0x60   : > { %507 = vst [vmem:[#allocation2 + $0x30] sm:$0xff] %v2307_v32 }
  0x61   : > { %508 = vst [vmem:[#allocation2] sm:$0xff] %v2307_v32 }
  0x62   : > { %509 = vst [vmem:[#allocation2 + $0x18] sm:$0xff] %v2307_v32 }
  0x63   : > { %510 = vst [vmem:[#allocation2 + $0x10] sm:$0xff] %v2307_v32 }
  0x64   : > { %511 = vst [vmem:[#allocation2 + $0x8] sm:$0xff] %v2307_v32 }
  0x65   : > { %512 = vst [vmem:[#allocation2 + $0x20] sm:$0xff] %v2307_v32 }
  0x66   : > { %513 = vst [vmem:[#allocation2 + $0x28] sm:$0xff] %v2307_v32 }
  0x67   : > { %514 = vst [vmem:[#allocation2 + $0x38] sm:$0xff] %v2307_v32 }
  0x68 PF: > { %v1810_v33 = vld [vmem:[%s2510_s4 + $0xe0] sm:$0xf]  ;;  %v1988_v34 = vld [vmem:[%s2510_s4 + $0xec] sm:$0xf0]  ;;  %v1986_v35 = vld [vmem:[%s2510_s4 + $0xe4] sm:$0xf] }
  0x69   : > { %v1811_v36 = vor.u32 %v1988_v34, %v1810_v33  ;;  %v1812_v37 = vld [vmem:[%s2510_s4 + $0xf0] sm:$0xf0]  ;;  %v1818_v38 = vld [vmem:[%s2510_s4 + $0xe8] sm:$0xf]  ;;  %v1989_v39 = vld [vmem:[%s2510_s4 + $0xf4] sm:$0xf0] }
  0x6a   : > { %v1815_v40 = vor.u32 %v1986_v35, %v1812_v37  ;;  %v1819_v41 = vor.u32 %v1989_v39, %v1818_v38  ;;  %v1987_v42 = vld [vmem:[%s2510_s4 + $0xec] sm:$0xf]  ;;  %v1820_v43 = vld [vmem:[%s2510_s4 + $0xf8] sm:$0xf0]  ;;  %v1794_v44 = vld [vmem:[%s2510_s4 + $0xc0] sm:$0xf] }
  0x6b   : > { %729 = vmatpush.bf16.msra.mxu0 %v1811_v36  ;;  %v1823_v45 = vor.u32 %v1987_v42, %v1820_v43  ;;  %v1984_v46 = vld [vmem:[%s2510_s4 + $0xcc] sm:$0xf0]  ;;  %v1982_v47 = vld [vmem:[%s2510_s4 + $0xc4] sm:$0xf]  ;;  %v1796_v48 = vld [vmem:[%s2510_s4 + $0xd0] sm:$0xf0] }
  0x6c   : > { %758 = vmatpush.bf16.msra.mxu1 %v1815_v40  ;;  %787 = vmatpush.bf16.msra.mxu2 %v1819_v41  ;;  %v1795_v49 = vor.u32 %v1984_v46, %v1794_v44  ;;  %v1799_v50 = vor.u32 %v1982_v47, %v1796_v48  ;;  %v1802_v51 = vld [vmem:[%s2510_s4 + $0xc8] sm:$0xf]  ;;  %v1985_v52 = vld [vmem:[%s2510_s4 + $0xd4] sm:$0xf0]  ;;  %v1983_v53 = vld [vmem:[%s2510_s4 + $0xcc] sm:$0xf] }
  0x6d   : > { %816 = vmatpush.bf16.msra.mxu3 %v1823_v45  ;;  %v1803_v54 = vor.u32 %v1985_v52, %v1802_v51  ;;  %v1804_v55 = vld [vmem:[%s2510_s4 + $0xd8] sm:$0xf0]  ;;  %v1778_v56 = vld [vmem:[%s2510_s4 + $0xa0] sm:$0xf]  ;;  %v1980_v57 = vld [vmem:[%s2510_s4 + $0xac] sm:$0xf0] }
  0x6e   : > { %v1807_v58 = vor.u32 %v1983_v53, %v1804_v55  ;;  %v1978_v59 = vld [vmem:[%s2510_s4 + $0xa4] sm:$0xf]  ;;  %v1780_v60 = vld [vmem:[%s2510_s4 + $0xb0] sm:$0xf0]  ;;  %v1786_v61 = vld [vmem:[%s2510_s4 + $0xa8] sm:$0xf]  ;;  %v1779_v62 = vor.u32 %v1980_v57, %v1778_v56 }
  0x6f   : > { %730 = vmatpush.bf16.msra.mxu0 %v1795_v49  ;;  %v1981_v63 = vld [vmem:[%s2510_s4 + $0xb4] sm:$0xf0]  ;;  %v1979_v0 = vld [vmem:[%s2510_s4 + $0xac] sm:$0xf]  ;;  %v1788_v1 = vld [vmem:[%s2510_s4 + $0xb8] sm:$0xf0]  ;;  %v1783_v2 = vor.u32 %v1978_v59, %v1780_v60 }
  0x70   : > { %759 = vmatpush.bf16.msra.mxu1 %v1799_v50  ;;  %788 = vmatpush.bf16.msra.mxu2 %v1803_v54  ;;  %v1787_v3 = vor.u32 %v1981_v63, %v1786_v61  ;;  %v1762_v4 = vld [vmem:[%s2510_s4 + $0x80] sm:$0xf]  ;;  %v1976_v5 = vld [vmem:[%s2510_s4 + $0x8c] sm:$0xf0]  ;;  %v1974_v6 = vld [vmem:[%s2510_s4 + $0x84] sm:$0xf]  ;;  %v1791_v7 = vor.u32 %v1979_v0, %v1788_v1 }
  0x71   : > { %817 = vmatpush.bf16.msra.mxu3 %v1807_v58  ;;  %v1764_v8 = vld [vmem:[%s2510_s4 + $0x90] sm:$0xf0]  ;;  %v1770_v9 = vld [vmem:[%s2510_s4 + $0x88] sm:$0xf]  ;;  %v1977_v10 = vld [vmem:[%s2510_s4 + $0x94] sm:$0xf0]  ;;  %v1763_v13 = vor.u32 %v1976_v5, %v1762_v4 }
  0x72   : > { %v1975_v11 = vld [vmem:[%s2510_s4 + $0x8c] sm:$0xf]  ;;  %v1772_v12 = vld [vmem:[%s2510_s4 + $0x98] sm:$0xf0]  ;;  %v1767_v14 = vor.u32 %v1974_v6, %v1764_v8  ;;  %v1771_v15 = vor.u32 %v1977_v10, %v1770_v9  ;;  %v1746_v16 = vld [vmem:[%s2510_s4 + $0x60] sm:$0xf] }
  0x73   : > { %731 = vmatpush.bf16.msra.mxu0 %v1779_v62  ;;  %v1972_v17 = vld [vmem:[%s2510_s4 + $0x6c] sm:$0xf0]  ;;  %v1970_v18 = vld [vmem:[%s2510_s4 + $0x64] sm:$0xf]  ;;  %v1775_v19 = vor.u32 %v1975_v11, %v1772_v12  ;;  %v1748_v20 = vld [vmem:[%s2510_s4 + $0x70] sm:$0xf0] }
  0x74   : > { %760 = vmatpush.bf16.msra.mxu1 %v1783_v2  ;;  %789 = vmatpush.bf16.msra.mxu2 %v1787_v3  ;;  %v1754_v21 = vld [vmem:[%s2510_s4 + $0x68] sm:$0xf]  ;;  %v1973_v22 = vld [vmem:[%s2510_s4 + $0x74] sm:$0xf0]  ;;  %v1971_v23 = vld [vmem:[%s2510_s4 + $0x6c] sm:$0xf]  ;;  %v1747_v25 = vor.u32 %v1972_v17, %v1746_v16  ;;  %v1751_v26 = vor.u32 %v1970_v18, %v1748_v20 }
  0x75   : > { %818 = vmatpush.bf16.msra.mxu3 %v1791_v7  ;;  %v1756_v24 = vld [vmem:[%s2510_s4 + $0x78] sm:$0xf0]  ;;  %v1755_v27 = vor.u32 %v1973_v22, %v1754_v21  ;;  %v1730_v28 = vld [vmem:[%s2510_s4 + $0x40] sm:$0xf]  ;;  %v1968_v29 = vld [vmem:[%s2510_s4 + $0x4c] sm:$0xf0] }
  0x76   : > { %v1966_v30 = vld [vmem:[%s2510_s4 + $0x44] sm:$0xf]  ;;  %v1759_v31 = vor.u32 %v1971_v23, %v1756_v24  ;;  %v1732_v32 = vld [vmem:[%s2510_s4 + $0x50] sm:$0xf0]  ;;  %v1738_v33 = vld [vmem:[%s2510_s4 + $0x48] sm:$0xf]  ;;  %v1731_v37 = vor.u32 %v1968_v29, %v1730_v28 }
  0x77   : > { %732 = vmatpush.bf16.msra.mxu0 %v1763_v13  ;;  %v1969_v34 = vld [vmem:[%s2510_s4 + $0x54] sm:$0xf0]  ;;  %v1967_v35 = vld [vmem:[%s2510_s4 + $0x4c] sm:$0xf]  ;;  %v1740_v36 = vld [vmem:[%s2510_s4 + $0x58] sm:$0xf0]  ;;  %v1735_v38 = vor.u32 %v1966_v30, %v1732_v32 }
  0x78   : > { %761 = vmatpush.bf16.msra.mxu1 %v1767_v14  ;;  %790 = vmatpush.bf16.msra.mxu2 %v1771_v15  ;;  %v1739_v39 = vor.u32 %v1969_v34, %v1738_v33  ;;  %v1714_v40 = vld [vmem:[%s2510_s4 + $0x20] sm:$0xf]  ;;  %v1964_v41 = vld [vmem:[%s2510_s4 + $0x2c] sm:$0xf0]  ;;  %v1962_v42 = vld [vmem:[%s2510_s4 + $0x24] sm:$0xf]  ;;  %v1743_v43 = vor.u32 %v1967_v35, %v1740_v36 }
  0x79   : > { %819 = vmatpush.bf16.msra.mxu3 %v1775_v19  ;;  %v1716_v44 = vld [vmem:[%s2510_s4 + $0x30] sm:$0xf0]  ;;  %v1722_v45 = vld [vmem:[%s2510_s4 + $0x28] sm:$0xf]  ;;  %v1965_v46 = vld [vmem:[%s2510_s4 + $0x34] sm:$0xf0]  ;;  %v1715_v49 = vor.u32 %v1964_v41, %v1714_v40 }
  0x7a   : > { %v1963_v47 = vld [vmem:[%s2510_s4 + $0x2c] sm:$0xf]  ;;  %v1724_v48 = vld [vmem:[%s2510_s4 + $0x38] sm:$0xf0]  ;;  %v1719_v50 = vor.u32 %v1962_v42, %v1716_v44  ;;  %v1723_v51 = vor.u32 %v1965_v46, %v1722_v45  ;;  %v1698_v52 = vld [vmem:[%s2510_s4] sm:$0xf] }
  0x7b   : > { %733 = vmatpush.bf16.msra.mxu0 %v1747_v25  ;;  %v1960_v53 = vld [vmem:[%s2510_s4 + $0xc] sm:$0xf0]  ;;  %v1958_v54 = vld [vmem:[%s2510_s4 + $0x4] sm:$0xf]  ;;  %v1727_v55 = vor.u32 %v1963_v47, %v1724_v48  ;;  %v1700_v56 = vld [vmem:[%s2510_s4 + $0x10] sm:$0xf0] }
  0x7c   : > { %762 = vmatpush.bf16.msra.mxu1 %v1751_v26  ;;  %791 = vmatpush.bf16.msra.mxu2 %v1755_v27  ;;  %v1706_v57 = vld [vmem:[%s2510_s4 + $0x8] sm:$0xf]  ;;  %v1961_v58 = vld [vmem:[%s2510_s4 + $0x14] sm:$0xf0]  ;;  %v1959_v59 = vld [vmem:[%s2510_s4 + $0xc] sm:$0xf]  ;;  %v1699_v61 = vor.u32 %v1960_v53, %v1698_v52  ;;  %v1703_v0 = vor.u32 %v1958_v54, %v1700_v56 }
  0x7d   : > { %820 = vmatpush.bf16.msra.mxu3 %v1759_v31  ;;  %v1708_v60 = vld [vmem:[%s2510_s4 + $0x18] sm:$0xf0]  ;;  %v515_v62 = vld [vmem:[%s2874_s0] sm:$0xff]  ;;  %v516_v63 = vld [vmem:[%s2874_s0 + $0x8] sm:$0xff]  ;;  %v1707_v1 = vor.u32 %v1961_v58, %v1706_v57  ;;  %p1952_p2 = scmp.ne.s32.totalorder %s2294_s27, 3 }
  0x7e   : > { %v1711_v2 = vor.u32 %v1959_v59, %v1708_v60  ;;  %v523_v3 = vpack.c.bf16 %v516_v63, %v515_v62  ;;  %v517_v4 = vld [vmem:[%s2874_s0 + $0x10] sm:$0xff]  ;;  %v518_v5 = vld [vmem:[%s2874_s0 + $0x18] sm:$0xff]  ;;  %v519_v15 = vld [vmem:[%s2874_s0 + $0x20] sm:$0xff] }
  0x7f   : > { %734 = vmatpush.bf16.msra.mxu0 %v1731_v37  ;;  %v524_v6 = vpack.c.bf16 %v518_v5, %v517_v4  ;;  %v2013_v7 = vld [vmem:[%s2530_s9 + $0xb8] sm:$0xff]  ;;  %v2012_v11 = vld [vmem:[%s2530_s9 + $0xb0] sm:$0xff]  ;;  %v2011_v16 = vld [vmem:[%s2530_s9 + $0xa8] sm:$0xff] }
  0x80   : > { %763 = vmatpush.bf16.msra.mxu1 %v1735_v38  ;;  %792 = vmatpush.bf16.msra.mxu2 %v1739_v39  ;;  %v2021_v8 = vld [vmem:[%s2530_s9 + $0xf8] sm:$0xff]  ;;  %v2020_v12 = vld [vmem:[%s2530_s9 + $0xf0] sm:$0xff]  ;;  %v2019_v17 = vld [vmem:[%s2530_s9 + $0xe8] sm:$0xff] }
  0x81   : > { %821 = vmatpush.bf16.msra.mxu3 %v1743_v43  ;;  %v1997_v9 = vld [vmem:[%s2530_s9 + $0x38] sm:$0xff]  ;;  %v1996_v13 = vld [vmem:[%s2530_s9 + $0x30] sm:$0xff]  ;;  %v520_v18 = vld [vmem:[%s2874_s0 + $0x28] sm:$0xff] }
  0x82   : > { %v2005_v10 = vld [vmem:[%s2530_s9 + $0x78] sm:$0xff]  ;;  %v2004_v14 = vld [vmem:[%s2530_s9 + $0x70] sm:$0xff]  ;;  %v1995_v19 = vld [vmem:[%s2530_s9 + $0x28] sm:$0xff]  ;;  %v525_v21 = vpack.c.bf16 %v520_v18, %v519_v15 }
  0x83   : > { %735 = vmatpush.bf16.msra.mxu0 %v1715_v49  ;;  %v2003_v20 = vld [vmem:[%s2530_s9 + $0x68] sm:$0xff]  ;;  %v2010_v22 = vld [vmem:[%s2530_s9 + $0xa0] sm:$0xff]  ;;  %v2009_v26 = vld [vmem:[%s2530_s9 + $0x98] sm:$0xff] }
  0x84   : > { %764 = vmatpush.bf16.msra.mxu1 %v1719_v50  ;;  %793 = vmatpush.bf16.msra.mxu2 %v1723_v51  ;;  %v1994_v23 = vld [vmem:[%s2530_s9 + $0x20] sm:$0xff]  ;;  %v1993_v27 = vld [vmem:[%s2530_s9 + $0x18] sm:$0xff]  ;;  %v2008_v30 = vld [vmem:[%s2530_s9 + $0x90] sm:$0xff] }
  0x85   : > { %822 = vmatpush.bf16.msra.mxu3 %v1727_v55  ;;  %v2018_v24 = vld [vmem:[%s2530_s9 + $0xe0] sm:$0xff]  ;;  %v2017_v28 = vld [vmem:[%s2530_s9 + $0xd8] sm:$0xff]  ;;  %v2016_v31 = vld [vmem:[%s2530_s9 + $0xd0] sm:$0xff] }
  0x86   : > { %v2002_v25 = vld [vmem:[%s2530_s9 + $0x60] sm:$0xff]  ;;  %v2001_v29 = vld [vmem:[%s2530_s9 + $0x58] sm:$0xff]  ;;  %v521_v32 = vld [vmem:[%s2874_s0 + $0x30] sm:$0xff] }
  0x87   : > { %736 = vmatpush.bf16.msra.mxu0 %v1699_v61  ;;  %v522_v33 = vld [vmem:[%s2874_s0 + $0x38] sm:$0xff]  ;;  %v1992_v35 = vld [vmem:[%s2530_s9 + $0x10] sm:$0xff]  ;;  %v2007_v37 = vld [vmem:[%s2530_s9 + $0x88] sm:$0xff] }
  0x88   : > { %765 = vmatpush.bf16.msra.mxu1 %v1703_v0  ;;  %794 = vmatpush.bf16.msra.mxu2 %v1707_v1  ;;  %v526_v34 = vpack.c.bf16 %v522_v33, %v521_v32  ;;  %v2000_v36 = vld [vmem:[%s2530_s9 + $0x50] sm:$0xff]  ;;  %v1991_v38 = vld [vmem:[%s2530_s9 + $0x8] sm:$0xff]  ;;  %v1990_v41 = vld [vmem:[%s2530_s9] sm:$0xff] }
  0x89   : > { %823 = vmatpush.bf16.msra.mxu3 %v1711_v2  ;;  %v1999_v39 = vld [vmem:[%s2530_s9 + $0x48] sm:$0xff]  ;;  %v1998_v42 = vld [vmem:[%s2530_s9 + $0x40] sm:$0xff] }
  0x8a   : > { %737 = vmatmul.bf16.vlgmr.msra.gmra.mxu0 %v523_v3  ;;  %v2015_v40 = vld [vmem:[%s2530_s9 + $0xc8] sm:$0xff]  ;;  %v2006_v43 = vld [vmem:[%s2530_s9 + $0x80] sm:$0xff] }
  0x8b   : > { %766 = vmatmul.bf16.vlgmr.msra.gmra.mxu1 %v523_v3  ;;  %795 = vmatmul.bf16.vlgmr.msra.gmra.mxu2 %v523_v3  ;;  %v2014_v44 = vld [vmem:[%s2530_s9 + $0xc0] sm:$0xff] }
  0x8c   : > { %824 = vmatmul.bf16.vlgmr.msra.gmra.mxu3 %v523_v3  ;;  %1215 = vmatpush.bf16.msrb.mxu2 %v2013_v7  ;;  %v559_v45 = vld [vmem:[%s2512_s17] sm:$0xf] }
  0x8d   : > { %1244 = vmatpush.bf16.msrb.mxu3 %v2021_v8  ;;  %1157 = vmatpush.bf16.msrb.mxu0 %v1997_v9  ;;  %v2654_v47 = vperm.slane %v559_v45, 0  ;;  %v2656_v49 = vperm.slane %v559_v45, 1  ;;  %v2661_v59 = vperm.slane %v559_v45, 2  ;;  %v2664_v61 = vperm.slane %v559_v45, 3 }
  0x8e   : > { %1186 = vmatpush.bf16.msrb.mxu1 %v2005_v10 }
  0x90   : > { %1216 = vmatpush.bf16.msrb.mxu2 %v2012_v11 }
  0x91   : > { %1245 = vmatpush.bf16.msrb.mxu3 %v2020_v12  ;;  %1158 = vmatpush.bf16.msrb.mxu0 %v1996_v13 }
  0x92   : > { %1187 = vmatpush.bf16.msrb.mxu1 %v2004_v14 }
  0x94   : > { %1217 = vmatpush.bf16.msrb.mxu2 %v2011_v16 }
  0x95   : > { %1246 = vmatpush.bf16.msrb.mxu3 %v2019_v17  ;;  %1159 = vmatpush.bf16.msrb.mxu0 %v1995_v19 }
  0x96   : > { %1188 = vmatpush.bf16.msrb.mxu1 %v2003_v20 }
  0x98   : > { %1218 = vmatpush.bf16.msrb.mxu2 %v2010_v22 }
  0x99   : > { %1160 = vmatpush.bf16.msrb.mxu0 %v1994_v23  ;;  %1247 = vmatpush.bf16.msrb.mxu3 %v2018_v24 }
  0x9a   : > { %742 = vmatmul.bf16.gmra.mxu0 %v524_v6  ;;  %1189 = vmatpush.bf16.msrb.mxu1 %v2002_v25 }
  0x9b   : > { %771 = vmatmul.bf16.gmra.mxu1 %v524_v6  ;;  %800 = vmatmul.bf16.gmra.mxu2 %v524_v6 }
  0x9c   : > { %829 = vmatmul.bf16.gmra.mxu3 %v524_v6  ;;  %1219 = vmatpush.bf16.msrb.mxu2 %v2009_v26 }
  0x9d   : > { %1161 = vmatpush.bf16.msrb.mxu0 %v1993_v27  ;;  %1248 = vmatpush.bf16.msrb.mxu3 %v2017_v28 }
  0x9e   : > { %1190 = vmatpush.bf16.msrb.mxu1 %v2001_v29 }
  0xa0   : > { %1220 = vmatpush.bf16.msrb.mxu2 %v2008_v30 }
  0xa1   : > { %1249 = vmatpush.bf16.msrb.mxu3 %v2016_v31  ;;  %1162 = vmatpush.bf16.msrb.mxu0 %v1992_v35 }
  0xa2   : > { %1191 = vmatpush.bf16.msrb.mxu1 %v2000_v36 }
  0xa4   : > { %1221 = vmatpush.bf16.msrb.mxu2 %v2007_v37 }
  0xa5   : > { %1163 = vmatpush.bf16.msrb.mxu0 %v1991_v38  ;;  %1250 = vmatpush.bf16.msrb.mxu3 %v2015_v40 }
  0xa6   : > { %1192 = vmatpush.bf16.msrb.mxu1 %v1999_v39 }
  0xa8   : > { %1222 = vmatpush.bf16.msrb.mxu2 %v2006_v43 }
  0xa9   : > { %1164 = vmatpush.bf16.msrb.mxu0 %v1990_v41  ;;  %1251 = vmatpush.bf16.msrb.mxu3 %v2014_v44 }
  0xaa   : > { %747 = vmatmul.bf16.gmra.mxu0 %v525_v21  ;;  %1193 = vmatpush.bf16.msrb.mxu1 %v1998_v42 }
  0xab   : > { %776 = vmatmul.bf16.gmra.mxu1 %v525_v21  ;;  %805 = vmatmul.bf16.gmra.mxu2 %v525_v21 }
  0xac   : > { %834 = vmatmul.bf16.gmra.mxu3 %v525_v21 }
  0xba   : > { %752 = vmatmul.bf16.gmra.mxu0 %v526_v34 }
  0xbb   : > { %781 = vmatmul.bf16.gmra.mxu1 %v526_v34  ;;  %810 = vmatmul.bf16.gmra.mxu2 %v526_v34 }
  0xbc   : > { %839 = vmatmul.bf16.gmra.mxu3 %v526_v34 }
 0x107   : > { %v738_v46 = vpop.f32.mrf.mxu0 }
 0x108   : > { %v767_v48 = vpop.f32.mrf.mxu1  ;;  %v739_v50 = vadd.f32 %v738_v46, %v2654_v47 }
 0x109   : > { %v768_v51 = vadd.f32 %v767_v48, %v2656_v49 }
 0x10a   : > { %v845_v55 = vmax.f32 %v739_v50, 0.0 }
 0x10b   : > { %v846_v58 = vmax.f32 %v768_v51, 0.0 }
 0x10e   : > { %v796_v52 = vpop.f32.mrf.mxu2 }
 0x10f   : > { %v825_v53 = vpop.f32.mrf.mxu3  ;;  %v740_v54 = vpop.f32.mrf.mxu0  ;;  %v797_v1 = vadd.f32 %v796_v52, %v2661_v59 }
 0x110   : > { %v741_v56 = vadd.f32 %v740_v54, %v2654_v47  ;;  %v769_v57 = vpop.f32.mrf.mxu1  ;;  %v826_v3 = vadd.f32 %v825_v53, %v2664_v61 }
 0x111   : > { %v770_v60 = vadd.f32 %v769_v57, %v2656_v49  ;;  %v847_v10 = vmax.f32 %v797_v1, 0.0 }
 0x112   : > { %v849_v62 = vmax.f32 %v741_v56, 0.0  ;;  %v848_v12 = vmax.f32 %v826_v3, 0.0 }
 0x113   : > { %v850_v63 = vmax.f32 %v770_v60, 0.0 }
 0x114   : > { %v885_v0 = vpack.c.bf16 %v849_v62, %v845_v55 }
 0x115   : > { %v886_v2 = vpack.c.bf16 %v850_v63, %v846_v58 }
 0x116   : > { %v798_v4 = vpop.f32.mrf.mxu2  ;;  %1165 = vmatmul.bf16.vlgmr.msrb.gmra.mxu0 %v885_v0 }
 0x117   : > { %v799_v5 = vadd.f32 %v798_v4, %v2661_v59  ;;  %v827_v6 = vpop.f32.mrf.mxu3  ;;  %1194 = vmatmul.bf16.vlgmr.msrb.gmra.mxu1 %v886_v2  ;;  %v743_v7 = vpop.f32.mrf.mxu0 }
 0x118   : > { %v828_v8 = vadd.f32 %v827_v6, %v2664_v61  ;;  %v772_v9 = vpop.f32.mrf.mxu1  ;;  %v744_v16 = vadd.f32 %v743_v7, %v2654_v47 }
 0x119   : > { %v851_v11 = vmax.f32 %v799_v5, 0.0  ;;  %v773_v17 = vadd.f32 %v772_v9, %v2656_v49 }
 0x11a   : > { %v852_v13 = vmax.f32 %v828_v8, 0.0  ;;  %v853_v21 = vmax.f32 %v744_v16, 0.0 }
 0x11b   : > { %v887_v14 = vpack.c.bf16 %v851_v11, %v847_v10  ;;  %v854_v24 = vmax.f32 %v773_v17, 0.0 }
 0x11c   : > { %v888_v15 = vpack.c.bf16 %v852_v13, %v848_v12 }
 0x11d   : > { %1223 = vmatmul.bf16.vlgmr.msrb.gmra.mxu2 %v887_v14 }
 0x11e   : > { %1252 = vmatmul.bf16.vlgmr.msrb.gmra.mxu3 %v888_v15  ;;  %v801_v18 = vpop.f32.mrf.mxu2 }
 0x11f   : > { %v830_v19 = vpop.f32.mrf.mxu3  ;;  %v745_v20 = vpop.f32.mrf.mxu0  ;;  %v802_v29 = vadd.f32 %v801_v18, %v2661_v59 }
 0x120   : > { %v746_v22 = vadd.f32 %v745_v20, %v2654_v47  ;;  %v774_v23 = vpop.f32.mrf.mxu1  ;;  %v831_v31 = vadd.f32 %v830_v19, %v2664_v61 }
 0x121   : > { %v775_v25 = vadd.f32 %v774_v23, %v2656_v49  ;;  %v855_v38 = vmax.f32 %v802_v29, 0.0 }
 0x122   : > { %v857_v26 = vmax.f32 %v746_v22, 0.0  ;;  %v856_v40 = vmax.f32 %v831_v31, 0.0 }
 0x123   : > { %v858_v27 = vmax.f32 %v775_v25, 0.0 }
 0x124   : > { %v889_v28 = vpack.c.bf16 %v857_v26, %v853_v21 }
 0x125   : > { %v890_v30 = vpack.c.bf16 %v858_v27, %v854_v24 }
 0x126   : > { %v803_v32 = vpop.f32.mrf.mxu2  ;;  %1170 = vmatmul.bf16.gmra.mxu0 %v889_v28 }
 0x127   : > { %v804_v33 = vadd.f32 %v803_v32, %v2661_v59  ;;  %v832_v34 = vpop.f32.mrf.mxu3  ;;  %1199 = vmatmul.bf16.gmra.mxu1 %v890_v30  ;;  %v748_v35 = vpop.f32.mrf.mxu0 }
 0x128   : > { %v833_v36 = vadd.f32 %v832_v34, %v2664_v61  ;;  %v777_v37 = vpop.f32.mrf.mxu1  ;;  %v749_v43 = vadd.f32 %v748_v35, %v2654_v47 }
 0x129   : > { %v859_v39 = vmax.f32 %v804_v33, 0.0  ;;  %v778_v45 = vadd.f32 %v777_v37, %v2656_v49 }
 0x12a   : > { %v860_v41 = vmax.f32 %v833_v36, 0.0  ;;  %v861_v51 = vmax.f32 %v749_v43, 0.0  ;;  %v877_v43 = vld [vmem:[#allocation2 + $0x30] sm:$0xff] }
 0x12b   : > { %v891_v42 = vpack.c.bf16 %v859_v39, %v855_v38  ;;  %v862_v54 = vmax.f32 %v778_v45, 0.0 }
 0x12c   : > { %v892_v44 = vpack.c.bf16 %v860_v41, %v856_v40 }
 0x12d   : > { %1228 = vmatmul.bf16.gmra.mxu2 %v891_v42 }
 0x12e   : > { %1257 = vmatmul.bf16.gmra.mxu3 %v892_v44  ;;  %v806_v46 = vpop.f32.mrf.mxu2 }
 0x12f   : > { %v835_v48 = vpop.f32.mrf.mxu3  ;;  %v750_v50 = vpop.f32.mrf.mxu0  ;;  %v807_v60 = vadd.f32 %v806_v46, %v2661_v59 }
 0x130   : > { %v751_v52 = vadd.f32 %v750_v50, %v2654_v47  ;;  %v779_v53 = vpop.f32.mrf.mxu1  ;;  %v836_v63 = vadd.f32 %v835_v48, %v2664_v61 }
 0x131   : > { %v780_v55 = vadd.f32 %v779_v53, %v2656_v49  ;;  %v863_v6 = vmax.f32 %v807_v60, 0.0  ;;  %v878_v53 = vld [vmem:[#allocation2] sm:$0xff] }
 0x132   : > { %v865_v56 = vmax.f32 %v751_v52, 0.0  ;;  %v864_v8 = vmax.f32 %v836_v63, 0.0 }
 0x133   : > { %v866_v57 = vmax.f32 %v780_v55, 0.0 }
 0x134   : > { %v893_v58 = vpack.c.bf16 %v865_v56, %v861_v51 }
 0x135   : > { %v894_v62 = vpack.c.bf16 %v866_v57, %v862_v54 }
 0x136   : > { %v808_v0 = vpop.f32.mrf.mxu2  ;;  %1175 = vmatmul.bf16.gmra.mxu0 %v893_v58 }
 0x137   : > { %v809_v1 = vadd.f32 %v808_v0, %v2661_v59  ;;  %v837_v2 = vpop.f32.mrf.mxu3  ;;  %1204 = vmatmul.bf16.gmra.mxu1 %v894_v62  ;;  %v753_v3 = vpop.f32.mrf.mxu0  ;;  %v879_v0 = vld [vmem:[#allocation2 + $0x18] sm:$0xff] }
 0x138   : > { %v838_v4 = vadd.f32 %v837_v2, %v2664_v61  ;;  %v782_v5 = vpop.f32.mrf.mxu1  ;;  %v754_v11 = vadd.f32 %v753_v3, %v2654_v47 }
 0x139   : > { %v867_v7 = vmax.f32 %v809_v1, 0.0  ;;  %v783_v13 = vadd.f32 %v782_v5, %v2656_v49 }
 0x13a   : > { %v868_v9 = vmax.f32 %v838_v4, 0.0  ;;  %v869_v17 = vmax.f32 %v754_v11, 0.0 }
 0x13b   : > { %v895_v10 = vpack.c.bf16 %v867_v7, %v863_v6  ;;  %v870_v20 = vmax.f32 %v783_v13, 0.0 }
 0x13c   : > { %v896_v12 = vpack.c.bf16 %v868_v9, %v864_v8  ;;  %v880_v9 = vld [vmem:[#allocation2 + $0x10] sm:$0xff] }
 0x13d   : > { %1233 = vmatmul.bf16.gmra.mxu2 %v895_v10 }
 0x13e   : > { %1262 = vmatmul.bf16.gmra.mxu3 %v896_v12  ;;  %v811_v14 = vpop.f32.mrf.mxu2 }
 0x13f   : > { %v840_v15 = vpop.f32.mrf.mxu3  ;;  %v755_v16 = vpop.f32.mrf.mxu0  ;;  %v812_v25 = vadd.f32 %v811_v14, %v2661_v59 }
 0x140   : > { %v756_v18 = vadd.f32 %v755_v16, %v2654_v47  ;;  %v784_v19 = vpop.f32.mrf.mxu1  ;;  %v841_v27 = vadd.f32 %v840_v15, %v2664_v61 }
 0x141   : > { %v785_v21 = vadd.f32 %v784_v19, %v2656_v49  ;;  %v871_v31 = vmax.f32 %v812_v25, 0.0 }
 0x142   : > { %v873_v22 = vmax.f32 %v756_v18, 0.0  ;;  %v872_v33 = vmax.f32 %v841_v27, 0.0  ;;  %v881_v18 = vld [vmem:[#allocation2 + $0x8] sm:$0xff]  ;;  %v882_v27 = vld [vmem:[#allocation2 + $0x20] sm:$0xff] }
 0x143   : > { %v874_v23 = vmax.f32 %v785_v21, 0.0 }
 0x144   : > { %v897_v24 = vpack.c.bf16 %v873_v22, %v869_v17 }
 0x145   : > { %v898_v26 = vpack.c.bf16 %v874_v23, %v870_v20 }
 0x146   : > { %v813_v28 = vpop.f32.mrf.mxu2  ;;  %1180 = vmatmul.bf16.gmra.mxu0 %v897_v24 }
 0x147   : > { %v814_v29 = vadd.f32 %v813_v28, %v2661_v59  ;;  %v842_v30 = vpop.f32.mrf.mxu3  ;;  %1209 = vmatmul.bf16.gmra.mxu1 %v898_v26 }
 0x148   : > { %v843_v47 = vadd.f32 %v842_v30, %v2664_v61 }
 0x149   : > { %v875_v32 = vmax.f32 %v814_v29, 0.0 }
 0x14a   : > { %v876_v49 = vmax.f32 %v843_v47, 0.0 }
 0x14b   : > { %v899_v34 = vpack.c.bf16 %v875_v32, %v871_v31 }
 0x14c   : > { %v900_v35 = vpack.c.bf16 %v876_v49, %v872_v33  ;;  %v883_v33 = vld [vmem:[#allocation2 + $0x28] sm:$0xff] }
 0x14d   : > { %1238 = vmatmul.bf16.gmra.mxu2 %v899_v34 }
 0x14e   : > { %1267 = vmatmul.bf16.gmra.mxu3 %v900_v35 }
 0x193   : > { %v1166_v36 = vpop.f32.mrf.mxu0 }
 0x194   : > { %v1195_v37 = vpop.f32.mrf.mxu1 }
 0x195   : > { %v1196_v40 = vadd.f32 %v1195_v37, %v1166_v36 }
 0x19b   : > { %v1168_v38 = vpop.f32.mrf.mxu0 }
 0x19c   : > { %v1197_v39 = vpop.f32.mrf.mxu1 }
 0x19d   : > { %v1198_v48 = vadd.f32 %v1197_v39, %v1168_v38 }
 0x1a0   : > { %v1224_v41 = vpop.f32.mrf.mxu2 }
 0x1a1   : > { %v1225_v42 = vadd.f32 %v1224_v41, %v1196_v40  ;;  %v1253_v59 = vpop.f32.mrf.mxu3  ;;  %v884_v40 = vld [vmem:[#allocation2 + $0x38] sm:$0xff] }
 0x1a3   : > { %v1254_v44 = vadd.f32 %v1253_v59, %v1225_v42  ;;  %v1171_v45 = vpop.f32.mrf.mxu0 }
 0x1a4   : > { %v1200_v61 = vpop.f32.mrf.mxu1 }
 0x1a5   : > { %v1273_v46 = vadd.f32 %v1254_v44, %v877_v43  ;;  %v1201_v58 = vadd.f32 %v1200_v61, %v1171_v45 }
 0x1a7   : > { %1281 = vst [vmem:[#allocation2 + $0x30] sm:$0xff] %v1273_v46 }
 0x1a8   : > { %v1226_v50 = vpop.f32.mrf.mxu2 }
 0x1a9   : > { %v1227_v51 = vadd.f32 %v1226_v50, %v1198_v48  ;;  %v1255_v52 = vpop.f32.mrf.mxu3 }
 0x1ab   : > { %v1256_v54 = vadd.f32 %v1255_v52, %v1227_v51  ;;  %v1173_v55 = vpop.f32.mrf.mxu0 }
 0x1ac   : > { %v1202_v56 = vpop.f32.mrf.mxu1 }
 0x1ad   : > { %v1274_v57 = vadd.f32 %v1256_v54, %v878_v53  ;;  %v1203_v5 = vadd.f32 %v1202_v56, %v1173_v55 }
 0x1af   : > { %1282 = vst [vmem:[#allocation2] sm:$0xff] %v1274_v57 }
 0x1b0   : > { %v1229_v60 = vpop.f32.mrf.mxu2 }
 0x1b1   : > { %v1230_v62 = vadd.f32 %v1229_v60, %v1201_v58  ;;  %v1258_v63 = vpop.f32.mrf.mxu3 }
 0x1b3   : > { %v1259_v1 = vadd.f32 %v1258_v63, %v1230_v62  ;;  %v1176_v3 = vpop.f32.mrf.mxu0 }
 0x1b4   : > { %v1205_v4 = vpop.f32.mrf.mxu1 }
 0x1b5   : > { %v1275_v2 = vadd.f32 %v1259_v1, %v879_v0  ;;  %v1206_v12 = vadd.f32 %v1205_v4, %v1176_v3 }
 0x1b7   : > { %1283 = vst [vmem:[#allocation2 + $0x18] sm:$0xff] %v1275_v2 }
 0x1b8   : > { %v1231_v6 = vpop.f32.mrf.mxu2 }
 0x1b9   : > { %v1232_v7 = vadd.f32 %v1231_v6, %v1203_v5  ;;  %v1260_v8 = vpop.f32.mrf.mxu3 }
 0x1bb   : > { %v1261_v10 = vadd.f32 %v1260_v8, %v1232_v7  ;;  %v1178_v13 = vpop.f32.mrf.mxu0 }
 0x1bc   : > { %v1207_v14 = vpop.f32.mrf.mxu1 }
 0x1bd   : > { %v1276_v11 = vadd.f32 %v1261_v10, %v880_v9  ;;  %v1208_v21 = vadd.f32 %v1207_v14, %v1178_v13 }
 0x1bf   : > { %1284 = vst [vmem:[#allocation2 + $0x10] sm:$0xff] %v1276_v11 }
 0x1c0   : > { %v1234_v15 = vpop.f32.mrf.mxu2 }
 0x1c1   : > { %v1235_v16 = vadd.f32 %v1234_v15, %v1206_v12  ;;  %v1263_v17 = vpop.f32.mrf.mxu3 }
 0x1c3   : > { %v1264_v19 = vadd.f32 %v1263_v17, %v1235_v16  ;;  %v1181_v25 = vpop.f32.mrf.mxu0 }
 0x1c4   : > { %v1210_v26 = vpop.f32.mrf.mxu1 }
 0x1c5   : > { %v1277_v20 = vadd.f32 %v1264_v19, %v881_v18  ;;  %v1211_v30 = vadd.f32 %v1210_v26, %v1181_v25 }
 0x1c7   : > { %1285 = vst [vmem:[#allocation2 + $0x8] sm:$0xff] %v1277_v20 }
 0x1c8   : > { %v1236_v22 = vpop.f32.mrf.mxu2 }
 0x1c9   : > { %v1237_v23 = vadd.f32 %v1236_v22, %v1208_v21  ;;  %v1265_v24 = vpop.f32.mrf.mxu3 }
 0x1cb   : > { %v1266_v28 = vadd.f32 %v1265_v24, %v1237_v23  ;;  %v1183_v34 = vpop.f32.mrf.mxu0 }
 0x1cc   : > { %v1212_v35 = vpop.f32.mrf.mxu1 }
 0x1cd   : > { %v1278_v29 = vadd.f32 %v1266_v28, %v882_v27  ;;  %v1213_v37 = vadd.f32 %v1212_v35, %v1183_v34 }
 0x1cf   : > { %1286 = vst [vmem:[#allocation2 + $0x20] sm:$0xff] %v1278_v29 }
 0x1d0   : > { %v1239_v47 = vpop.f32.mrf.mxu2 }
 0x1d1   : > { %v1240_v31 = vadd.f32 %v1239_v47, %v1211_v30  ;;  %v1268_v32 = vpop.f32.mrf.mxu3 }
 0x1d3   : > { %v1269_v49 = vadd.f32 %v1268_v32, %v1240_v31 }
 0x1d5   : > { %v1279_v36 = vadd.f32 %v1269_v49, %v883_v33 }
 0x1d7   : > { %1287 = vst [vmem:[#allocation2 + $0x28] sm:$0xff] %v1279_v36 }
 0x1d8   : > { %v1241_v38 = vpop.f32.mrf.mxu2 }
 0x1d9   : > { %v1242_v39 = vadd.f32 %v1241_v38, %v1213_v37  ;;  %v1270_v41 = vpop.f32.mrf.mxu3 }
 0x1db   : > { %v1271_v42 = vadd.f32 %v1270_v41, %v1242_v39  ;;  %1292 = sbr.rel (%p1952_p2) target bundleno = 778 (0x30a), region = 95 }
 0x1dd   : > { %v1280_v59 = vadd.f32 %v1271_v42, %v884_v40 }
 0x1df   : > { %1288 = vst [vmem:[#allocation2 + $0x38] sm:$0xff] %v1280_v59 }
 0x1e0   : > { %v1297_v43 = vld [vmem:[%s2874_s0 + $0x20] sm:$0xff]  ;;  %v1305_v44 = vld [vmem:[#allocation2 + $0x8] sm:$0xff]  ;;  %v1295_v46 = vld [vmem:[%s2874_s0 + $0x10] sm:$0xff]  ;;  %v2308_v15 = vmov 128.0  }
 0x1e1   : > { %v1313_v45 = vadd.f32 %v1305_v44, %v1297_v43  ;;  %v2105_v61 = vld [vmem:[#allocation6] ss:$0 sm:$0xff]  ;;  %v1303_v48 = vld [vmem:[#allocation2 + $0x18] sm:$0xff]  ;;  %v1293_v51 = vld [vmem:[%s2874_s0] sm:$0xff]  ;;  %2108 = vrcp.f32 %v2308_v15 }
 0x1e2   : > { %v1311_v50 = vadd.f32 %v1303_v48, %v1295_v46  ;;  %v1301_v52 = vld [vmem:[#allocation2 + $0x30] sm:$0xff]  ;;  %v1298_v53 = vld [vmem:[%s2874_s0 + $0x28] sm:$0xff]  ;;  %v1306_v56 = vld [vmem:[#allocation2 + $0x20] sm:$0xff] }
 0x1e3   : > { %v2707_v54 = vadd.f32 %v2105_v61, %v1313_v45  ;;  %v1309_v55 = vadd.f32 %v1301_v52, %v1293_v51  ;;  %v1296_v57 = vld [vmem:[%s2874_s0 + $0x18] sm:$0xff]  ;;  %v1304_v58 = vld [vmem:[#allocation2 + $0x10] sm:$0xff]  ;;  %v1294_v62 = vld [vmem:[%s2874_s0 + $0x8] sm:$0xff]  ;;  %v1314_v1 = vadd.f32 %v1306_v56, %v1298_v53 }
 0x1e4   : > { %v1323_v60 = vadd.f32 %v2105_v61, %v1311_v50  ;;  %v1302_v63 = vld [vmem:[#allocation2] sm:$0xff]  ;;  %v1312_v2 = vadd.f32 %v1304_v58, %v1296_v57  ;;  %v1300_v7 = vld [vmem:[%s2874_s0 + $0x38] sm:$0xff]  ;;  %v1299_v9 = vld [vmem:[%s2874_s0 + $0x30] sm:$0xff] }
 0x1e5   : > { %1337 = vadd.xlane.f32.xlu2 %v2707_v54  ;;  %v1321_v0 = vadd.f32 %v2105_v61, %v1309_v55  ;;  %v1310_v3 = vadd.f32 %v1302_v63, %v1294_v62  ;;  %v1326_v4 = vadd.f32 %v2105_v61, %v1314_v1  ;;  %v1307_v10 = vld [vmem:[#allocation2 + $0x28] sm:$0xff] }
 0x1e6   : > { %1333 = vadd.xlane.f32.xlu1 %v1323_v60  ;;  %v1324_v5 = vadd.f32 %v2105_v61, %v1312_v2  ;;  %v1308_v8 = vld [vmem:[#allocation2 + $0x38] sm:$0xff]  ;;  %v1315_v12 = vadd.f32 %v1307_v10, %v1299_v9 }
 0x1e7   : > { %1329 = vadd.xlane.f32.xlu0 %v1321_v0  ;;  %v1322_v6 = vadd.f32 %v2105_v61, %v1310_v3  ;;  %v1316_v11 = vadd.f32 %v1308_v8, %v1300_v7  ;;  %v2109_v16 = vpop.eup %2108 }
 0x1e8   : > { %v1327_v14 = vadd.f32 %v2105_v61, %v1315_v12  ;;  %v1346_v17 = vmul.f32 128.0, %v2109_v16  ;;  %vm1350_vm0 = vweird.f32 %v2109_v16 }
 0x1e9   : > { %v1328_v13 = vadd.f32 %v2105_v61, %v1316_v11 }
 0x1ea   : > { %v1347_v18 = vsub.f32 1.0, %v1346_v17 }
 0x1ec   : > { %v1348_v19 = vmul.f32 %v2109_v16, %v1347_v18 }
 0x1ed   : > { %1339 = vadd.xlane.f32.xlu2 %v1326_v4 }
 0x1ee   : > { %1335 = vadd.xlane.f32.xlu1 %v1324_v5  ;;  %v1349_v20 = vadd.f32 %v2109_v16, %v1348_v19 }
 0x1ef   : > { %1331 = vadd.xlane.f32.xlu0 %v1322_v6 }
 0x1f0   : > { %v2722_v21 = vsel %vm1350_vm0, %v2109_v16, %v1349_v20 }
 0x1f6   : > { %1343 = vadd.xlane.f32.xlu1 %v1328_v13 }
 0x1f7   : > { %1341 = vadd.xlane.f32.xlu0 %v1327_v14 }
 0x258   : > { %v1338_v22 = vpop.xlane.xlu2 %1337 }
 0x259   : > { %v1334_v23 = vpop.xlane.xlu1 %1333  ;;  %v1356_v37 = vmul.f32 %v2722_v21, %v1338_v22 }
 0x25a   : > { %v1354_v24 = vmul.f32 %v2722_v21, %v1334_v23  ;;  %v1330_v25 = vpop.xlane.xlu0 %1329 }
 0x25b   : > { %v1352_v26 = vmul.f32 %v2722_v21, %v1330_v25  ;;  %v2751_v42 = vsub.f32 %v2707_v54, %v1356_v37 }
 0x25c   : > { %v2726_v27 = vsub.f32 %v1323_v60, %v1354_v24 }
 0x25d   : > { %v2728_v28 = vsub.f32 %v1321_v0, %v1352_v26  ;;  %v1372_v61 = vmul.f32 %v2751_v42, %v2751_v42  ;;  %v2780_v26 = vld [vmem:[#allocation8] ss:$0 sm:$0xff] }
 0x25e   : > { %v1370_v29 = vmul.f32 %v2726_v27, %v2726_v27 }
 0x25f   : > { %v1368_v30 = vmul.f32 %v2728_v28, %v2728_v28 }
 0x260   : > { %1380 = vadd.xlane.f32.xlu1 %v1370_v29  ;;  %v1340_v47 = vpop.xlane.xlu2 %1339 }
 0x261   : > { %1376 = vadd.xlane.f32.xlu2 %v1368_v30  ;;  %v1357_v31 = vmul.f32 %v2722_v21, %v1340_v47  ;;  %v1336_v32 = vpop.xlane.xlu1 %1335 }
 0x262   : > { %v1355_v33 = vmul.f32 %v2722_v21, %v1336_v32  ;;  %v1332_v49 = vpop.xlane.xlu0 %1331 }
 0x263   : > { %v2736_v34 = vsub.f32 %v1326_v4, %v1357_v31  ;;  %v1353_v35 = vmul.f32 %v2722_v21, %v1332_v49  ;;  %v2787_v49 = vld [vmem:[#allocation9] ss:$0 sm:$0xff] }
 0x264   : > { %v2739_v36 = vsub.f32 %v1324_v5, %v1355_v33 }
 0x265   : > { %v2742_v38 = vsub.f32 %v1322_v6, %v1353_v35  ;;  %v1373_v39 = vmul.f32 %v2736_v34, %v2736_v34 }
 0x266   : > { %v1371_v40 = vmul.f32 %v2739_v36, %v2739_v36 }
 0x267   : > { %v1369_v41 = vmul.f32 %v2742_v38, %v2742_v38 }
 0x268   : > { %1386 = vadd.xlane.f32.xlu1 %v1373_v39 }
 0x269   : > { %1382 = vadd.xlane.f32.xlu2 %v1371_v40  ;;  %1378 = vadd.xlane.f32.xlu0 %v1369_v41  ;;  %v1344_v43 = vpop.xlane.xlu1 %1343 }
 0x26a   : > { %v1342_v59 = vpop.xlane.xlu0 %1341  ;;  %v1359_v46 = vmul.f32 %v2722_v21, %v1344_v43 }
 0x26b   : > { %v1358_v44 = vmul.f32 %v2722_v21, %v1342_v59 }
 0x26c   : > { %v2761_v50 = vsub.f32 %v1328_v13, %v1359_v46 }
 0x26d   : > { %v2754_v45 = vsub.f32 %v1327_v14, %v1358_v44 }
 0x26e   : > { %v1375_v51 = vmul.f32 %v2761_v50, %v2761_v50 }
 0x26f   : > { %v1374_v48 = vmul.f32 %v2754_v45, %v2754_v45 }
 0x271   : > { %1384 = vadd.xlane.f32.xlu0 %v1372_v61  ;;  %1388 = vadd.xlane.f32.xlu2 %v1374_v48 }
 0x279   : > { %1390 = vadd.xlane.f32.xlu0 %v1375_v51 }
 0x2d3   : > { %v1381_v52 = vpop.xlane.xlu1 %1380 }
 0x2d4   : > { %v1394_v53 = vmul.f32 %v1381_v52, %v2722_v21  ;;  %v1377_v54 = vpop.xlane.xlu2 %1376 }
 0x2d5   : > { %v1392_v55 = vmul.f32 %v1377_v54, %v2722_v21 }
 0x2d6   : > { %v1402_v56 = vadd.f32 1e-05, %v1394_v53 }
 0x2d7   : > { %v1400_v57 = vadd.f32 1e-05, %v1392_v55 }
 0x2d8   : > { %2110 = vrsqrt.f32 %v1402_v56  ;;  %vm1434_vm1 = vweird.f32 %v1402_v56 }
 0x2d9   : > { %2112 = vrsqrt.f32 %v1400_v57  ;;  %vm1414_vm5 = vweird.f32 %v1400_v57 }
 0x2db   : > { %v1387_v58 = vpop.xlane.xlu1 %1386 }
 0x2dc   : > { %v1397_v60 = vmul.f32 %v1387_v58, %v2722_v21  ;;  %v1383_v62 = vpop.xlane.xlu2 %1382  ;;  %v1379_v63 = vpop.xlane.xlu0 %1378 }
 0x2dd   : > { %v1395_v0 = vmul.f32 %v1383_v62, %v2722_v21  ;;  %v1393_v1 = vmul.f32 %v1379_v63, %v2722_v21 }
 0x2de   : > { %v2111_v2 = vpop.eup %2110  ;;  %v1405_v3 = vadd.f32 1e-05, %v1397_v60 }
 0x2df   : > { %v2113_v4 = vpop.eup %2112  ;;  %v1429_v5 = vmul.f32 %v2111_v2, %v1402_v56  ;;  %v2770_v6 = vadd.f32 1e-05, %v1395_v0  ;;  %v2772_v7 = vadd.f32 1e-05, %v1393_v1  ;;  %vm1435_vm2 = vweird.f32 %v2111_v2 }
 0x2e0   : > { %v1409_v8 = vmul.f32 %v2113_v4, %v1400_v57  ;;  %2114 = vrsqrt.f32 %v1405_v3  ;;  %vm1415_vm3 = vweird.f32 %v2113_v4  ;;  %vm1436_vm4 = vmor %vm1434_vm1, %vm1435_vm2  ;;  %vm1464_vm7 = vweird.f32 %v1405_v3 }
 0x2e1   : > { %v1430_v9 = vmul.f32 %v2111_v2, %v1429_v5  ;;  %2116 = vrsqrt.f32 %v2770_v6  ;;  %vm1416_vm6 = vmor %vm1414_vm5, %vm1415_vm3  ;;  %vm1444_vm9 = vweird.f32 %v2770_v6  ;;  %vm1424_vm14 = vweird.f32 %v2772_v7 }
 0x2e2   : > { %v1410_v10 = vmul.f32 %v2113_v4, %v1409_v8  ;;  %2118 = vrsqrt.f32 %v2772_v7 }
 0x2e3   : > { %v1431_v11 = vmul.f32 0.5, %v1430_v9 }
 0x2e4   : > { %v1411_v12 = vmul.f32 0.5, %v1410_v10  ;;  %v1389_v13 = vpop.xlane.xlu2 %1388  ;;  %v1385_v14 = vpop.xlane.xlu0 %1384 }
 0x2e5   : > { %v1432_v15 = vsub.f32 1.5, %v1431_v11  ;;  %v1398_v16 = vmul.f32 %v1389_v13, %v2722_v21  ;;  %v1396_v17 = vmul.f32 %v1385_v14, %v2722_v21 }
 0x2e6   : > { %v2115_v18 = vpop.eup %2114  ;;  %v1412_v19 = vsub.f32 1.5, %v1411_v12 }
 0x2e7   : > { %v2117_v20 = vpop.eup %2116  ;;  %v1433_v22 = vmul.f32 %v2111_v2, %v1432_v15  ;;  %v1459_v23 = vmul.f32 %v2115_v18, %v1405_v3  ;;  %v2778_v24 = vadd.f32 1e-05, %v1398_v16  ;;  %v2784_v47 = vadd.f32 1e-05, %v1396_v17 }
 0x2e8   : > { %v2119_v25 = vpop.eup %2118  ;;  %v1413_v29 = vmul.f32 %v2113_v4, %v1412_v19  ;;  %v1439_v30 = vmul.f32 %v2117_v20, %v2770_v6  ;;  %vm1465_vm8 = vweird.f32 %v2115_v18  ;;  %vm1445_vm11 = vweird.f32 %v2117_v20 }
 0x2e9   : > { %v1437_v31 = vsel %vm1436_vm4, %v2111_v2, %v1433_v22  ;;  %v1460_v32 = vmul.f32 %v2115_v18, %v1459_v23  ;;  %v1419_v33 = vmul.f32 %v2119_v25, %v2772_v7  ;;  %2120 = vrsqrt.f32 %v2778_v24  ;;  %vm2799_vm10 = vmor %vm1464_vm7, %vm1465_vm8 }
 0x2ea   : > { %v1490_v35 = vmul.f32 %v1437_v31, %v2726_v27  ;;  %v1417_v37 = vsel %vm1416_vm6, %v2113_v4, %v1413_v29  ;;  %v1440_v39 = vmul.f32 %v2117_v20, %v1439_v30  ;;  %2122 = vrsqrt.f32 %v2784_v47  ;;  %vm1446_vm13 = vmor %vm1444_vm9, %vm1445_vm11 }
 0x2eb   : > { %v1488_v40 = vmul.f32 %v1417_v37, %v2728_v28  ;;  %v1461_v41 = vmul.f32 0.5, %v1460_v32  ;;  %v1420_v59 = vmul.f32 %v2119_v25, %v1419_v33  ;;  %vm1425_vm12 = vweird.f32 %v2119_v25 }
 0x2ec   : > { %v1502_v43 = vmul.f32 %v2780_v26, %v1490_v35  ;;  %v1441_v44 = vmul.f32 0.5, %v1440_v39  ;;  %v1391_v61 = vpop.xlane.xlu0 %1390  ;;  %vm1426_vm15 = vmor %vm1424_vm14, %vm1425_vm12  ;;  %vm1474_vm0 = vweird.f32 %v2778_v24  ;;  %vm1454_vm4 = vweird.f32 %v2784_v47 }
 0x2ed   : > { %v1500_v46 = vmul.f32 %v2780_v26, %v1488_v40  ;;  %v1462_v27 = vsub.f32 1.5, %v1461_v41  ;;  %v1421_v48 = vmul.f32 0.5, %v1420_v59  ;;  %v1399_v51 = vmul.f32 %v1391_v61, %v2722_v21 }
 0x2ee   : > { %v1514_v52 = vadd.f32 %v2787_v49, %v1502_v43  ;;  %v1442_v53 = vsub.f32 1.5, %v1441_v44 }
 0x2ef   : > { %v1512_v54 = vadd.f32 %v2787_v49, %v1500_v46  ;;  %v1463_v55 = vmul.f32 %v2115_v18, %v1462_v27  ;;  %v1422_v56 = vsub.f32 1.5, %v1421_v48  ;;  %v1407_v57 = vadd.f32 1e-05, %v1399_v51  ;;  %v2121_v58 = vpop.eup %2120 }
 0x2f0   : > { %1522 = vst [vmem:[%s2881_s7 + $0x10] sm:$0xff] %v1514_v52  ;;  %v1443_v21 = vmul.f32 %v2117_v20, %v1442_v53  ;;  %v1469_v63 = vmul.f32 %v2121_v58, %v2778_v24  ;;  %v2123_v0 = vpop.eup %2122  ;;  %vm1475_vm1 = vweird.f32 %v2121_v58 }
 0x2f1   : > { %1520 = vst [vmem:[%s2881_s7] sm:$0xff] %v1512_v54  ;;  %v1467_v60 = vsel %vm2799_vm10, %v2115_v18, %v1463_v55  ;;  %v1423_v62 = vmul.f32 %v2119_v25, %v1422_v56  ;;  %2124 = vrsqrt.f32 %v1407_v57  ;;  %v1449_v8 = vmul.f32 %v2123_v0, %v2784_v47  ;;  %vm1476_vm3 = vmor %vm1474_vm0, %vm1475_vm1 }
 0x2f2   : > { %v1493_v1 = vmul.f32 %v1467_v60, %v2736_v34  ;;  %v1447_v2 = vsel %vm1446_vm13, %v2117_v20, %v1443_v21  ;;  %v1470_v5 = vmul.f32 %v2121_v58, %v1469_v63  ;;  %vm1455_vm2 = vweird.f32 %v2123_v0 }
 0x2f3   : > { %v1491_v3 = vmul.f32 %v1447_v2, %v2739_v36  ;;  %v1427_v4 = vsel %vm1426_vm15, %v2119_v25, %v1423_v62  ;;  %v1450_v11 = vmul.f32 %v2123_v0, %v1449_v8  ;;  %vm1456_vm5 = vmor %vm1454_vm4, %vm1455_vm2  ;;  %vm1484_vm7 = vweird.f32 %v1407_v57 }
 0x2f4   : > { %v1505_v6 = vmul.f32 %v2780_v26, %v1493_v1  ;;  %v1489_v9 = vmul.f32 %v1427_v4, %v2742_v38  ;;  %v1471_v10 = vmul.f32 0.5, %v1470_v5 }
 0x2f5   : > { %v1503_v7 = vmul.f32 %v2780_v26, %v1491_v3  ;;  %v1451_v14 = vmul.f32 0.5, %v1450_v11 }
 0x2f6   : > { %v1517_v34 = vadd.f32 %v2787_v49, %v1505_v6  ;;  %v1501_v12 = vmul.f32 %v2780_v26, %v1489_v9  ;;  %v1472_v13 = vsub.f32 1.5, %v1471_v10 }
 0x2f7   : > { %v1515_v36 = vadd.f32 %v2787_v49, %v1503_v7  ;;  %v2125_v15 = vpop.eup %2124  ;;  %v1452_v17 = vsub.f32 1.5, %v1451_v14 }
 0x2f8   : > { %1525 = vst [vmem:[%s2881_s7 + $0x28] sm:$0xff] %v1517_v34  ;;  %v1513_v38 = vadd.f32 %v2787_v49, %v1501_v12  ;;  %v1473_v16 = vmul.f32 %v2121_v58, %v1472_v13  ;;  %v1479_v18 = vmul.f32 %v2125_v15, %v1407_v57  ;;  %vm1485_vm6 = vweird.f32 %v2125_v15 }
 0x2f9   : > { %1523 = vst [vmem:[%s2881_s7 + $0x18] sm:$0xff] %v1515_v36  ;;  %v1453_v20 = vmul.f32 %v2123_v0, %v1452_v17  ;;  %vm1486_vm8 = vmor %vm1484_vm7, %vm1485_vm6 }
 0x2fa   : > { %1521 = vst [vmem:[%s2881_s7 + $0x8] sm:$0xff] %v1513_v38  ;;  %v1477_v19 = vsel %vm1476_vm3, %v2121_v58, %v1473_v16  ;;  %v1480_v22 = vmul.f32 %v2125_v15, %v1479_v18 }
 0x2fb   : > { %v1494_v23 = vmul.f32 %v1477_v19, %v2754_v45  ;;  %v1457_v24 = vsel %vm1456_vm5, %v2123_v0, %v1453_v20 }
 0x2fc   : > { %v1481_v25 = vmul.f32 0.5, %v1480_v22  ;;  %v1492_v30 = vmul.f32 %v1457_v24, %v2751_v42 }
 0x2fd   : > { %v1506_v29 = vmul.f32 %v2780_v26, %v1494_v23 }
 0x2fe   : > { %v1482_v31 = vsub.f32 1.5, %v1481_v25  ;;  %v1504_v33 = vmul.f32 %v2780_v26, %v1492_v30 }
 0x2ff   : > { %v1518_v32 = vadd.f32 %v2787_v49, %v1506_v29 }
 0x300   : > { %v1483_v35 = vmul.f32 %v2125_v15, %v1482_v31  ;;  %v1516_v45 = vadd.f32 %v2787_v49, %v1504_v33 }
 0x301   : > { %1526 = vst [vmem:[%s2881_s7 + $0x30] sm:$0xff] %v1518_v32 }
 0x302   : > { %v1487_v47 = vsel %vm1486_vm8, %v2125_v15, %v1483_v35  ;;  %1524 = vst [vmem:[%s2881_s7 + $0x20] sm:$0xff] %v1516_v45 }
 0x303   : > { %v1495_v42 = vmul.f32 %v1487_v47, %v2761_v50 }
 0x305   : > { %v1507_v37 = vmul.f32 %v2780_v26, %v1495_v42 }
 0x307   : > { %v1519_v39 = vadd.f32 %v2787_v49, %v1507_v37 }
 0x309   : > { %1527 = vst [vmem:[%s2881_s7 + $0x38] sm:$0xff] %v1519_v39 }
 0x30a PF: > { %s22_s29 = sadd.s32 1, %s2302_s29   ;;  %s2892_s24 = smov %s2286_s25 }
 0x30b   : > { %p19_p3 = scmp.ge.s32.totalorder %s22_s29, 6   ;;  %s2893_s25 = smov %s2290_s26 }
 0x30c   : > { %s2894_s26 = smov %s2405_s14  ;;  %s2895_s27 = smov %s2298_s28 }
 0x30d   : > { %s2896_s28 = smov %s2898_s8  ;;  %21 = sbr.rel (!%p19_p3) target bundleno = 9 (0x9), region = 145 }
 0x312   :  { %1550 = vsyncpa [#allocation5], 1 }
 0x313   :  { %1552 = vsyncpa [#allocation5 + $0x1], 1 }
 0x314   :  { %1553 = vsyncpa [#allocation7], 1 }
 0x315   :  { %1554 = vsyncpa [#allocation10], 1 }

// kernel: forward.34
= control target key start
LH: loop header
LB: loop body
LE: loop exit
PB: predicated region body
PF: predicated region fallthrough
CT: control target
= control target key end

     0   :  { %12 = vsyncpa [#allocation3], 0  ;;  %s3289_s0 = inlined_call_operand.vmem [shape: f32[2,32,128], index: 0, kind: input, shape index: {}]   ;;  %s3290_s1 = inlined_call_operand.vmem [shape: bf16[128,384], index: 1, kind: input, shape index: {}]   ;;  %s3291_s2 = inlined_call_operand.vmem [shape: f32[1,384], index: 2, kind: input, shape index: {}]   ;;  %s3292_s3 = inlined_call_operand.hbm [shape: bf16[128,128], index: 3, kind: input, shape index: {}]   ;;  %s3293_s4 = inlined_call_operand.hbm [shape: f32[1,128], index: 4, kind: input, shape index: {}]   ;;  %s3294_s5 = inlined_call_operand.hbm [shape: f32[1,128], index: 5, kind: input, shape index: {}]   ;;  %s3295_s6 = inlined_call_operand.hbm [shape: f32[1,128], index: 6, kind: input, shape index: {}]   ;;  %s3296_s7 = inlined_call_operand.vmem [shape: f32[2,32,128], index: 7, kind: output, shape index: {}]  }
   0x1   :  { %13 = vsyncpa [#allocation5], 0 }
   0x2   :  { %14 = vsyncpa [#allocation8], 0  ;;  %s2652_s24 = smov 0  }
   0x3 LB: > { %s235_s27 = sshll.u32 %s3293_s4, 4  ;;  %s2661_s28 = sadd.s32 4294967295, %s2596_s24   ;;  %s2596_s24 = sphi %s2652_s24, %s20_s24   ;;  %s236_s27 = int_to_ptr.hbm [resolvable:$true] %s235_s27 }
   0x4   : > { %p2025_p0 = scmp.ge.s32.totalorder %s2596_s24, 1  ;;  %p203_p1 = scmp.lt.s32.totalorder %s2596_s24, 3 }
   0x5   : > { %p2283_p2 = scmp.eq.s32.totalorder %s2661_s28, 0  ;;  %s2598_s30 = smov [#allocation4]  }
   0x6   : > { %p2666_p3 = pnand %p2025_p0, %p203_p1  ;;  %s237_s8 = sshll.u32 %s2598_s30, 4  ;;  %s238_s8 = int_to_ptr.vmem [resolvable:$true] %s237_s8 }
   0x7   : > { %s220_s11 = sshll.u32 %s3292_s3, 4  ;;  %s2599_s13 = smov [#allocation2]   ;;  %s221_s11 = int_to_ptr.hbm [resolvable:$true] %s220_s11 }
   0x8   : > { %p2270_p4 = pneg %p2666_p3  ;;  %s222_s14 = sshll.u32 %s2599_s13, 4  ;;  %s223_s14 = int_to_ptr.vmem [resolvable:$true] %s222_s14 }
   0x9   : > { %s247_s17 = sshll.u32 %s3294_s5, 4  ;;  %s2600_s18 = smov 64   ;;  %s248_s17 = int_to_ptr.hbm [resolvable:$true] %s247_s17 }
   0xa   : > { %p2677_p5 = pnand %p2283_p2, %p2270_p4  ;;  %s2601_s19 = smov 4  }
   0xb   : > { %s2602_s20 = smov [#allocation6]   ;;  %s259_s25 = sshll.u32 %s3295_s6, 4  ;;  %s260_s25 = int_to_ptr.hbm [resolvable:$true] %s259_s25 }
   0xc   : > { %2276 = dma.hbm_to_vmem [thread:$0]  (!%p2677_p5), %s236_s27, 16, %s238_s8, [#allocation5]  }
   0xd   : > { %2273 = dma.hbm_to_vmem [thread:$0]  (!%p2677_p5), %s221_s11, 1024, %s223_s14, [#allocation3], %s2600_s18, %s2600_s18, %s2601_s19  }
   0xe   : > { %s249_s21 = sshll.u32 %s2602_s20, 4  ;;  %s2603_s26 = smov [#allocation7]   ;;  %s250_s21 = int_to_ptr.vmem [resolvable:$true] %s249_s21 }
   0xf   : > { %2279 = dma.hbm_to_vmem [thread:$0]  (!%p2677_p5), %s248_s17, 16, %s250_s21, [#allocation5]  }
  0x10   : > { %s261_s30 = sshll.u32 %s2603_s26, 4  ;;  %282 = sbr.rel (%p2666_p3) target bundleno = 3209 (0xc89), region = 48  ;;  %s262_s30 = int_to_ptr.vmem [resolvable:$true] %s261_s30 }
  0x11   : > { %2282 = dma.hbm_to_vmem [thread:$0]  (!%p2677_p5), %s260_s25, 16, %s262_s30, [#allocation8]  }
  0x15   : > { %2583 = dma.done.wait (%p2283_p2), [#allocation3], 1024  }
  0x16   : > { %2585 = vsyncadd (%p2283_p2), [#allocation3], 4294966272 }
  0x17   : > { %2587 = dma.done.wait (%p2283_p2), [#allocation5], 32  }
  0x18   : > { %2589 = vsyncadd (%p2283_p2), [#allocation5], 4294967264 }
  0x19   : > { %2591 = dma.done.wait (%p2283_p2), [#allocation8], 16  }
  0x1a   : > { %2593 = vsyncadd (%p2283_p2), [#allocation8], 4294967280  ;;  %v2241_v0 = vld [vmem:[%s3290_s1 + $0xac] sm:$0xf]  ;;  %v2128_v1 = vld [vmem:[%s3290_s1 + $0xb4] sm:$0xf0] }
  0x1b   : > { %v2238_v2 = vld [vmem:[%s3290_s1 + $0x94] sm:$0xf]  ;;  %v2131_v3 = vor.u32 %v2241_v0, %v2128_v1  ;;  %v2116_v4 = vld [vmem:[%s3290_s1 + $0x9c] sm:$0xf0]  ;;  %v2235_v6 = vld [vmem:[%s3290_s1 + $0x7c] sm:$0xf] }
  0x1c   : > { %v2119_v5 = vor.u32 %v2238_v2, %v2116_v4  ;;  %v2104_v7 = vld [vmem:[%s3290_s1 + $0x84] sm:$0xf0]  ;;  %v2242_v9 = vld [vmem:[%s3290_s1 + $0xb0] sm:$0xf0]  ;;  %v2114_v11 = vld [vmem:[%s3290_s1 + $0x90] sm:$0xf] }
  0x1d   : > { %534 = vmatpush.bf16.msra.mxu1 %v2131_v3  ;;  %v2126_v8 = vld [vmem:[%s3290_s1 + $0xa8] sm:$0xf]  ;;  %v2239_v12 = vld [vmem:[%s3290_s1 + $0x98] sm:$0xf0]  ;;  %v2107_v13 = vor.u32 %v2235_v6, %v2104_v7  ;;  %v2232_v14 = vld [vmem:[%s3290_s1 + $0x64] sm:$0xf] }
  0x1e   : > { %v2127_v10 = vor.u32 %v2242_v9, %v2126_v8  ;;  %v2115_v15 = vor.u32 %v2239_v12, %v2114_v11  ;;  %v2092_v16 = vld [vmem:[%s3290_s1 + $0x6c] sm:$0xf0]  ;;  %v2102_v17 = vld [vmem:[%s3290_s1 + $0x78] sm:$0xf]  ;;  %v2236_v18 = vld [vmem:[%s3290_s1 + $0x80] sm:$0xf0] }
  0x1f   : > { %v2229_v19 = vld [vmem:[%s3290_s1 + $0x4c] sm:$0xf]  ;;  %v2095_v20 = vor.u32 %v2232_v14, %v2092_v16  ;;  %v2080_v21 = vld [vmem:[%s3290_s1 + $0x54] sm:$0xf0]  ;;  %v2103_v22 = vor.u32 %v2236_v18, %v2102_v17  ;;  %v2090_v23 = vld [vmem:[%s3290_s1 + $0x60] sm:$0xf] }
  0x20   : > { %515 = vmatpush.bf16.msra.mxu0 %v2127_v10  ;;  %v2233_v24 = vld [vmem:[%s3290_s1 + $0x68] sm:$0xf0]  ;;  %p330_p6 = scmp.lt.s32.totalorder %s2661_s28, 1  ;;  %v2083_v25 = vor.u32 %v2229_v19, %v2080_v21  ;;  %v2226_v26 = vld [vmem:[%s3290_s1 + $0x34] sm:$0xf]  ;;  %vm582_vm0 = vcmask 130048  }
  0x21   : > { %535 = vmatpush.bf16.msra.mxu1 %v2119_v5  ;;  %v2091_v27 = vor.u32 %v2233_v24, %v2090_v23  ;;  %v2068_v28 = vld [vmem:[%s3290_s1 + $0x3c] sm:$0xf0]  ;;  %v2078_v29 = vld [vmem:[%s3290_s1 + $0x48] sm:$0xf]  ;;  %v2230_v30 = vld [vmem:[%s3290_s1 + $0x50] sm:$0xf0] }
  0x22   : > { %s3300_s28 = smov (!%p330_p6, %s2661_s28), 1  ;;  %v2071_v31 = vor.u32 %v2226_v26, %v2068_v28  ;;  %v2223_v32 = vld [vmem:[%s3290_s1 + $0x1c] sm:$0xf]  ;;  %v2079_v33 = vor.u32 %v2230_v30, %v2078_v29  ;;  %v2056_v34 = vld [vmem:[%s3290_s1 + $0x24] sm:$0xf0]  ;;  %vm614_vm1 = vcmask 261120  }
  0x23   : > { %v2066_v35 = vld [vmem:[%s3290_s1 + $0x30] sm:$0xf]  ;;  %v2227_v36 = vld [vmem:[%s3290_s1 + $0x38] sm:$0xf0]  ;;  %s2218_s16 = sshll.u32 %s3300_s28, 5  ;;  %v2059_v37 = vor.u32 %v2223_v32, %v2056_v34  ;;  %s2604_s29 = smov 112  }
  0x24   : > { %516 = vmatpush.bf16.msra.mxu0 %v2115_v15  ;;  %v2220_v38 = vld [vmem:[%s3290_s1 + $0x4] sm:$0xf]  ;;  %v2067_v39 = vor.u32 %v2227_v36, %v2066_v35  ;;  %v2044_v40 = vld [vmem:[%s3290_s1 + $0xc] sm:$0xf0]  ;;  %s2803_s23 = scalar_lea.vmem %s3289_s0, %s2218_s16  ;;  %v2054_v41 = vld [vmem:[%s3290_s1 + $0x18] sm:$0xf]  ;;  %s3276_s15 = scalar_lea.vmem %s3296_s7, %s2218_s16 }
  0x25   : > { %536 = vmatpush.bf16.msra.mxu1 %v2107_v13  ;;  %v2224_v42 = vld [vmem:[%s3290_s1 + $0x20] sm:$0xf0]  ;;  %v2047_v43 = vor.u32 %v2220_v38, %v2044_v40  ;;  %v342_v45 = vld [vmem:[%s2803_s23 + $0x8] sm:$0xff]  ;;  %v2042_v47 = vld [vmem:[%s3290_s1] sm:$0xf]  ;;  %s2605_s8 = smov 96  }
  0x26   : > { %v341_v44 = vld [vmem:[%s2803_s23] sm:$0xff]  ;;  %v2055_v46 = vor.u32 %v2224_v42, %v2054_v41  ;;  %v2221_v48 = vld [vmem:[%s3290_s1 + $0x8] sm:$0xf0]  ;;  %v343_v51 = vld [vmem:[%s2803_s23 + $0x10] sm:$0xff]  ;;  %s2606_s9 = smov 80   ;;  %s2607_s10 = smov 64  }
  0x27   : > { %v2819_v49 = vpack.c.bf16 %v342_v45, %v341_v44  ;;  %v2043_v50 = vor.u32 %v2221_v48, %v2042_v47  ;;  %v344_v52 = vld [vmem:[%s2803_s23 + $0x18] sm:$0xff]  ;;  %v2832_v58 = vld [vmem:[%s3291_s2] sm:$0x7]  ;;  %v2134_v19 = vld [vmem:[%s3290_s1 + $0xb0] sm:$0xf]  ;;  %s2608_s11 = smov 48  }
  0x28   : > { %517 = vmatpush.bf16.msra.mxu0 %v2103_v22  ;;  %v2825_v53 = vpack.c.bf16 %v344_v52, %v343_v51  ;;  %v382_v59 = vperm.slane %v2832_v58, 1  ;;  %v381_v4 = vperm.slane %v2832_v58, 0  ;;  %v2122_v21 = vld [vmem:[%s3290_s1 + $0x98] sm:$0xf]  ;;  %v2240_v23 = vld [vmem:[%s3290_s1 + $0xa0] sm:$0xf0] }
  0x29   : > { %537 = vmatpush.bf16.msra.mxu1 %v2095_v20  ;;  %v2243_v20 = vld [vmem:[%s3290_s1 + $0xb8] sm:$0xf0]  ;;  %v2123_v24 = vor.u32 %v2240_v23, %v2122_v21  ;;  %v2237_v26 = vld [vmem:[%s3290_s1 + $0x88] sm:$0xf0]  ;;  %v2098_v30 = vld [vmem:[%s3290_s1 + $0x68] sm:$0xf] }
  0x2a   : > { %v2135_v22 = vor.u32 %v2243_v20, %v2134_v19  ;;  %v2231_v34 = vld [vmem:[%s3290_s1 + $0x58] sm:$0xf0]  ;;  %v2074_v38 = vld [vmem:[%s3290_s1 + $0x38] sm:$0xf]  ;;  %v2062_v41 = vld [vmem:[%s3290_s1 + $0x20] sm:$0xf] }
  0x2b   : > { %v2225_v42 = vld [vmem:[%s3290_s1 + $0x28] sm:$0xf0]  ;;  %v2222_v47 = vld [vmem:[%s3290_s1 + $0x10] sm:$0xf0]  ;;  %s2609_s12 = smov 32   ;;  %s2610_s13 = smov 16  }
  0x2c   : > { %518 = vmatpush.bf16.msra.mxu0 %v2091_v27  ;;  %553 = vmatpush.bf16.msra.mxu2 %v2135_v22  ;;  %v2063_v45 = vor.u32 %v2225_v42, %v2062_v41  ;;  %v2244_v22 = vld [vmem:[#allocation2] sm:$0xff] }
  0x2d   : > { %538 = vmatpush.bf16.msra.mxu1 %v2083_v25  ;;  %v2110_v25 = vld [vmem:[%s3290_s1 + $0x80] sm:$0xf] }
  0x2e   : > { %v2111_v29 = vor.u32 %v2237_v26, %v2110_v25 }
  0x30   : > { %519 = vmatpush.bf16.msra.mxu0 %v2079_v33  ;;  %554 = vmatpush.bf16.msra.mxu2 %v2123_v24  ;;  %v2086_v33 = vld [vmem:[%s3290_s1 + $0x50] sm:$0xf] }
  0x31   : > { %539 = vmatpush.bf16.msra.mxu1 %v2071_v31  ;;  %v2234_v31 = vld [vmem:[%s3290_s1 + $0x70] sm:$0xf0] }
  0x32   : > { %v2099_v32 = vor.u32 %v2234_v31, %v2098_v30 }
  0x34   : > { %520 = vmatpush.bf16.msra.mxu0 %v2067_v39  ;;  %555 = vmatpush.bf16.msra.mxu2 %v2111_v29  ;;  %v2228_v39 = vld [vmem:[%s3290_s1 + $0x40] sm:$0xf0] }
  0x35   : > { %540 = vmatpush.bf16.msra.mxu1 %v2059_v37  ;;  %v2087_v37 = vor.u32 %v2231_v34, %v2086_v33  ;;  %v2075_v40 = vor.u32 %v2228_v39, %v2074_v38 }
  0x38   : > { %521 = vmatpush.bf16.msra.mxu0 %v2055_v46  ;;  %556 = vmatpush.bf16.msra.mxu2 %v2099_v32  ;;  %v2050_v46 = vld [vmem:[%s3290_s1 + $0x8] sm:$0xf] }
  0x39   : > { %541 = vmatpush.bf16.msra.mxu1 %v2047_v43  ;;  %v2051_v48 = vor.u32 %v2222_v47, %v2050_v46 }
  0x3c   : > { %542 = vmatmul.bf16.vlgmr.msra.gmra.mxu1 %v2819_v49  ;;  %522 = vmatpush.bf16.msra.mxu0 %v2043_v50 }
  0x3d   : > { %557 = vmatpush.bf16.msra.mxu2 %v2087_v37 }
  0x3f   : > { %523 = vmatmul.bf16.vlgmr.msra.gmra.mxu0 %v2819_v49 }
  0x41   : > { %558 = vmatpush.bf16.msra.mxu2 %v2075_v40 }
  0x45   : > { %559 = vmatpush.bf16.msra.mxu2 %v2063_v45 }
  0x49   : > { %560 = vmatpush.bf16.msra.mxu2 %v2051_v48 }
  0x4c   : > { %547 = vmatmul.bf16.gmra.mxu1 %v2825_v53  ;;  %561 = vmatmul.bf16.vlgmr.msra.gmra.mxu2 %v2819_v49 }
  0x4f   : > { %528 = vmatmul.bf16.gmra.mxu0 %v2825_v53 }
  0x5c   : > { %566 = vmatmul.bf16.gmra.mxu2 %v2825_v53 }
  0xb9   : > { %v543_v54 = vpop.f32.mrf.mxu1 }
  0xba   : > { %v544_v3 = vadd.f32 %v543_v54, %v382_v59 }
  0xbc   : > { %v524_v57 = vpop.f32.mrf.mxu0 }
  0xbd   : > { %v525_v6 = vadd.f32 %v524_v57, %v381_v4 }
  0xbf   : > { %v572_v10 = vmul.f32 0.25, %v525_v6 }
  0xc1   : > { %v545_v55 = vpop.f32.mrf.mxu1 }
  0xc2   : > { %v546_v1 = vadd.f32 %v545_v55, %v382_v59 }
  0xc4   : > { %v526_v0 = vpop.f32.mrf.mxu0  ;;  %v2840_v5 = vpack.c.bf16 %v546_v1, %v544_v3 }
  0xc5   : > { %v527_v7 = vadd.f32 %v526_v0, %v381_v4 }
  0xc6   : > { %v590_v8 = vsel %vm582_vm0, %v2840_v5, 0 }
  0xc7   : > { %v573_v11 = vmul.f32 0.25, %v527_v7 }
  0xc9   : > { %v548_v56 = vpop.f32.mrf.mxu1  ;;  %v2844_v12 = vpack.c.bf16 %v573_v11, %v572_v10 }
  0xca   : > { %v549_v61 = vadd.f32 %v548_v56, %v382_v59 }
  0xcc   : > { %v529_v9 = vpop.f32.mrf.mxu0 }
  0xcd   : > { %v530_v14 = vadd.f32 %v529_v9, %v381_v4 }
  0xcf   : > { %v574_v16 = vmul.f32 0.25, %v530_v14  ;;  %v562_v10 = vpop.f32.mrf.mxu2  ;;  %v383_v14 = vperm.slane %v2832_v58, 2 }
  0xd1   : > { %v550_v60 = vpop.f32.mrf.mxu1 }
  0xd2   : > { %v551_v62 = vadd.f32 %v550_v60, %v382_v59 }
  0xd4   : > { %v2835_v63 = vpack.c.bf16 %v551_v62, %v549_v61  ;;  %v531_v13 = vpop.f32.mrf.mxu0 }
  0xd5   : > { %v532_v15 = vadd.f32 %v531_v13, %v381_v4 }
  0xd6   : > { %v593_v2 = vsel %vm582_vm0, %v2835_v63, 0 }
  0xd7   : > { %601 = vmatpush.bf16.xpose.msra.mxu3 %v593_v2  ;;  %v575_v17 = vmul.f32 0.25, %v532_v15  ;;  %v564_v11 = vpop.f32.mrf.mxu2 }
  0xd8   : > { %v565_v19 = vadd.f32 %v564_v11, %v383_v14 }
  0xd9   : > { %v2848_v18 = vpack.c.bf16 %v575_v17, %v574_v16  ;;  %v563_v17 = vadd.f32 %v562_v10, %v383_v14 }
  0xdb   : > { %v2931_v58 = vpack.c.bf16 %v565_v19, %v563_v17 }
  0xdf   : > { %602 = vmatpush.bf16.xpose.msra.mxu3 %v590_v8  ;;  %v567_v13 = vpop.f32.mrf.mxu2 }
  0xe0   : > { %v568_v15 = vadd.f32 %v567_v13, %v383_v14 }
  0xe6   : > { %2136 = vmatmul.msk.bf16.vlgmr.msra.gmra.mxu3 %vm582_vm0, %v2844_v12 }
  0xe7   : > { %v569_v16 = vpop.f32.mrf.mxu2 }
  0xe8   : > { %v570_v20 = vadd.f32 %v569_v16, %v383_v14 }
  0xea   : > { %v2927_v21 = vpack.c.bf16 %v570_v20, %v568_v15 }
  0xec   : > { %673 = vmatpush.bf16.msrb.mxu3 %v2927_v21 }
  0xf0   : > { %674 = vmatpush.bf16.msrb.mxu3 %v2931_v58 }
  0xf4   : > { %866 = vmatpush.bf16.msra.mxu3 %v2244_v22 }
  0xf6   : > { %2137 = vmatmul.msk.bf16.gmra.mxu3 %vm582_vm0, %v2848_v18 }
 0x169   : > { %v604_v27 = vpop.f32.mrf.mxu3 }
 0x16a   : > { %v615_v28 = vsel %vm614_vm1, %v604_v27, -inf }
 0x16b   : > { %616 = vmax.xlane.f32.xlu0 %v615_v28 }
 0x171   : > { %v606_v35 = vpop.f32.mrf.mxu3 }
 0x172   : > { %v618_v36 = vsel %vm614_vm1, %v606_v35, -inf }
 0x173   : > { %619 = vmax.xlane.f32.xlu0 %v618_v36 }
 0x179   : > { %v609_v43 = vpop.f32.mrf.mxu3 }
 0x17a   : > { %v621_v44 = vsel %vm614_vm1, %v609_v43, -inf }
 0x17b   : > { %622 = vmax.xlane.f32.xlu1 %v621_v44 }
 0x181   : > { %v611_v50 = vpop.f32.mrf.mxu3 }
 0x182   : > { %v624_v51 = vsel %vm614_vm1, %v611_v50, -inf }
 0x183   : > { %625 = vmax.xlane.f32.xlu1 %v624_v51 }
 0x1de   : > { %v617_v52 = vpop.xlane.xlu0 %616 }
 0x1df   : > { %v627_v54 = vsub.f32 %v604_v27, %v617_v52 }
 0x1e1   : > { %v631_v55 = vmul.f32 1.442695, %v627_v54 }
 0x1e3   : > { %2316 = vpow2.f32 %v631_v55 }
 0x1e6   : > { %v620_v56 = vpop.xlane.xlu0 %619 }
 0x1e7   : > { %v628_v57 = vsub.f32 %v606_v35, %v620_v56 }
 0x1e9   : > { %v2317_v59 = vpop.eup %2316  ;;  %v633_v60 = vmul.f32 1.442695, %v628_v57 }
 0x1ea   : > { %v639_v61 = vsel %vm614_vm1, %v2317_v59, 0.0 }
 0x1eb   : > { %2318 = vpow2.f32 %v633_v60  ;;  %640 = vadd.xlane.f32.xlu2 %v639_v61 }
 0x1ee   : > { %v623_v62 = vpop.xlane.xlu1 %622 }
 0x1ef   : > { %v629_v0 = vsub.f32 %v609_v43, %v623_v62 }
 0x1f1   : > { %v2319_v1 = vpop.eup %2318  ;;  %v635_v2 = vmul.f32 1.442695, %v629_v0 }
 0x1f2   : > { %v642_v49 = vsel %vm614_vm1, %v2319_v1, 0.0 }
 0x1f3   : > { %2320 = vpow2.f32 %v635_v2  ;;  %643 = vadd.xlane.f32.xlu2 %v642_v49 }
 0x1f6   : > { %v626_v53 = vpop.xlane.xlu1 %625 }
 0x1f7   : > { %v630_v3 = vsub.f32 %v611_v50, %v626_v53 }
 0x1f9   : > { %v2321_v4 = vpop.eup %2320  ;;  %v637_v6 = vmul.f32 1.442695, %v630_v3 }
 0x1fa   : > { %v645_v7 = vsel %vm614_vm1, %v2321_v4, 0.0 }
 0x1fb   : > { %2322 = vpow2.f32 %v637_v6  ;;  %646 = vadd.xlane.f32.xlu0 %v645_v7 }
 0x201   : > { %v2323_v8 = vpop.eup %2322 }
 0x202   : > { %v648_v9 = vsel %vm614_vm1, %v2323_v8, 0.0 }
 0x203   : > { %649 = vadd.xlane.f32.xlu1 %v648_v9 }
 0x20b   : > { %700 = vrot.lane.b32.xlu2 %v2835_v63, %s2604_s29 }
 0x20f   : > { %698 = vrot.lane.b32.xlu0 %v2840_v5, %s2604_s29 }
 0x213   : > { %694 = vrot.lane.b32.xlu2 %v2848_v18, %s2604_s29 }
 0x217   : > { %884 = vrot.lane.b32.xlu0 %v2835_v63, %s2605_s8 }
 0x21b   : > { %1039 = vrot.lane.b32.xlu2 %v2835_v63, %s2606_s9 }
 0x21c   : > { %692 = vrot.lane.b32.xlu1 %v2844_v12, %s2604_s29 }
 0x21f   : > { %1037 = vrot.lane.b32.xlu0 %v2840_v5, %s2606_s9 }
 0x223   : > { %878 = vrot.lane.b32.xlu2 %v2844_v12, %s2605_s8 }
 0x224   : > { %882 = vrot.lane.b32.xlu1 %v2840_v5, %s2605_s8 }
 0x227   : > { %880 = vrot.lane.b32.xlu0 %v2848_v18, %s2605_s8 }
 0x22b   : > { %1035 = vrot.lane.b32.xlu2 %v2848_v18, %s2606_s9 }
 0x22c   : > { %1033 = vrot.lane.b32.xlu1 %v2844_v12, %s2606_s9 }
 0x25e   : > { %v641_v23 = vpop.xlane.xlu2 %640 }
 0x25f   : > { %2324 = vrcp.f32 %v641_v23 }
 0x265   : > { %v2325_v25 = vpop.eup %2324 }
 0x266   : > { %v644_v24 = vpop.xlane.xlu2 %643  ;;  %v655_v27 = vmul.f32 %v2325_v25, %v2317_v59 }
 0x267   : > { %2326 = vrcp.f32 %v644_v24 }
 0x26d   : > { %v2327_v26 = vpop.eup %2326 }
 0x26e   : > { %v656_v28 = vmul.f32 %v2327_v26, %v2319_v1  ;;  %v701_v29 = vpop.permute.xlu2 %700  ;;  %v647_v32 = vpop.xlane.xlu0 %646 }
 0x26f   : > { %v712_v30 = vsel %vm582_vm0, %v701_v29, 0  ;;  %2328 = vrcp.f32 %v647_v32 }
 0x270   : > { %720 = vmatpush.bf16.xpose.msrb.mxu0 %v712_v30  ;;  %2252 = vmatpush.bf16.xpose.msrb.mxu2 %v712_v30  ;;  %v659_v31 = vpack.c.bf16 %v656_v28, %v655_v27 }
 0x272   : > { %2138 = vmatmul.msk.bf16.vlgmr.msrb.gmra.mxu3 %vm614_vm1, %v659_v31 }
 0x275   : > { %v2329_v35 = vpop.eup %2328 }
 0x276   : > { %v695_v33 = vpop.permute.xlu2 %694  ;;  %v650_v34 = vpop.xlane.xlu1 %649  ;;  %v657_v38 = vmul.f32 %v2329_v35, %v2321_v4 }
 0x277   : > { %2330 = vrcp.f32 %v650_v34 }
 0x27d   : > { %v2331_v36 = vpop.eup %2330 }
 0x27e   : > { %v1040_v37 = vpop.permute.xlu2 %1039  ;;  %v658_v39 = vmul.f32 %v2331_v36, %v2323_v8 }
 0x27f   : > { %v1051_v40 = vsel %vm582_vm0, %v1040_v37, 0 }
 0x280   : > { %1059 = vmatpush.bf16.xpose.msrb.mxu3 %v1051_v40  ;;  %v660_v41 = vpack.c.bf16 %v658_v39, %v657_v38 }
 0x281   : > { %v699_v42 = vpop.permute.xlu0 %698 }
 0x282   : > { %2139 = vmatmul.msk.bf16.gmra.mxu3 %vm614_vm1, %v660_v41  ;;  %v709_v43 = vsel %vm582_vm0, %v699_v42, 0 }
 0x283   : > { %721 = vmatpush.bf16.xpose.msrb.mxu0 %v709_v43  ;;  %2253 = vmatpush.bf16.xpose.msrb.mxu2 %v709_v43 }
 0x286   : > { %v879_v52 = vpop.permute.xlu2 %878 }
 0x289   : > { %v885_v44 = vpop.permute.xlu0 %884 }
 0x28a   : > { %v896_v45 = vsel %vm582_vm0, %v885_v44, 0  ;;  %2141 = vmatmul.msk.bf16.vlgmr.msrb.gmra.mxu2 %vm582_vm0, %v695_v33 }
 0x28b   : > { %904 = vmatpush.bf16.xpose.msra.mxu0 %v896_v45 }
 0x28e   : > { %v693_v46 = vpop.permute.xlu1 %692  ;;  %v1036_v14 = vpop.permute.xlu2 %1035 }
 0x28f   : > { %2140 = vmatmul.msk.bf16.vlgmr.msrb.gmra.mxu0 %vm582_vm0, %v693_v46 }
 0x291   : > { %v1038_v47 = vpop.permute.xlu0 %1037 }
 0x292   : > { %v1048_v48 = vsel %vm582_vm0, %v1038_v47, 0 }
 0x293   : > { %1060 = vmatpush.bf16.xpose.msrb.mxu3 %v1048_v48 }
 0x296   : > { %v883_v50 = vpop.permute.xlu1 %882 }
 0x297   : > { %v893_v51 = vsel %vm582_vm0, %v883_v50, 0 }
 0x298   : > { %905 = vmatpush.bf16.xpose.msra.mxu0 %v893_v51 }
 0x299   : > { %v881_v54 = vpop.permute.xlu0 %880 }
 0x29e   : > { %v1034_v8 = vpop.permute.xlu1 %1033 }
 0x29f   : > { %2156 = vmatmul.msk.bf16.vlgmr.msra.gmra.mxu0 %vm582_vm0, %v879_v52 }
 0x2af   : > { %2157 = vmatmul.msk.bf16.gmra.mxu0 %vm582_vm0, %v881_v54 }
 0x2f5   : > { %v676_v55 = vpop.f32.mrf.mxu3 }
 0x2fd   : > { %v678_v56 = vpop.f32.mrf.mxu3 }
 0x2fe   : > { %v686_v57 = vpack.c.bf16 %v678_v56, %v676_v55 }
 0x300   : > { %2154 = vmatmul.msk.bf16.vlgmr.msra.gmra.mxu3 %vm582_vm0, %v686_v57 }
 0x305   : > { %v681_v59 = vpop.f32.mrf.mxu3 }
 0x30c   : > { %v723_v60 = vpop.f32.mrf.mxu0 }
 0x30d   : > { %v683_v61 = vpop.f32.mrf.mxu3  ;;  %v728_v62 = vpop.f32.mrf.mxu2  ;;  %v733_v0 = vsel %vm614_vm1, %v723_v60, -inf }
 0x30e   : > { %v687_v1 = vpack.c.bf16 %v683_v61, %v681_v59  ;;  %734 = vmax.xlane.f32.xlu1 %v733_v0  ;;  %v739_v2 = vsel %vm614_vm1, %v728_v62, -inf }
 0x30f   : > { %740 = vmax.xlane.f32.xlu2 %v739_v2 }
 0x310   : > { %2155 = vmatmul.msk.bf16.gmra.mxu3 %vm582_vm0, %v687_v1 }
 0x314   : > { %v725_v49 = vpop.f32.mrf.mxu0 }
 0x315   : > { %v730_v53 = vpop.f32.mrf.mxu2  ;;  %v736_v3 = vsel %vm614_vm1, %v725_v49, -inf }
 0x316   : > { %737 = vmax.xlane.f32.xlu0 %v736_v3  ;;  %v742_v4 = vsel %vm614_vm1, %v730_v53, -inf }
 0x317   : > { %743 = vmax.xlane.f32.xlu1 %v742_v4 }
 0x31c   : > { %v907_v6 = vpop.f32.mrf.mxu0 }
 0x31d   : > { %v917_v7 = vsel %vm614_vm1, %v907_v6, -inf }
 0x31e   : > { %918 = vmax.xlane.f32.xlu0 %v917_v7 }
 0x320   : > { %2166 = vmatmul.msk.bf16.vlgmr.msrb.gmra.mxu3 %vm582_vm0, %v1034_v8 }
 0x324   : > { %v909_v9 = vpop.f32.mrf.mxu0 }
 0x325   : > { %v920_v10 = vsel %vm614_vm1, %v909_v9, -inf }
 0x326   : > { %921 = vmax.xlane.f32.xlu2 %v920_v10 }
 0x32c   : > { %v2962_v11 = vpop.f32.mrf.mxu0 }
 0x32d   : > { %v923_v13 = vsel %vm614_vm1, %v2962_v11, -inf }
 0x32e   : > { %924 = vmax.xlane.f32.xlu2 %v923_v13 }
 0x330   : > { %2167 = vmatmul.msk.bf16.gmra.mxu3 %vm582_vm0, %v1036_v14 }
 0x334   : > { %v914_v15 = vpop.f32.mrf.mxu0 }
 0x335   : > { %v926_v16 = vsel %vm614_vm1, %v914_v15, -inf }
 0x336   : > { %927 = vmax.xlane.f32.xlu1 %v926_v16 }
 0x346   : > { %783 = vrot.lane.b32.xlu2 %v2927_v21, %s2604_s29 }
 0x34f   : > { %781 = vrot.lane.b32.xlu1 %v2931_v58, %s2604_s29 }
 0x381   : > { %v735_v17 = vpop.xlane.xlu1 %734 }
 0x382   : > { %v745_v19 = vsub.f32 %v723_v60, %v735_v17  ;;  %v741_v20 = vpop.xlane.xlu2 %740 }
 0x383   : > { %v2972_v22 = vpop.f32.mrf.mxu3  ;;  %v747_v24 = vsub.f32 %v728_v62, %v741_v20 }
 0x384   : > { %v749_v23 = vmul.f32 1.442695, %v745_v19 }
 0x385   : > { %v753_v25 = vmul.f32 1.442695, %v747_v24 }
 0x386   : > { %2332 = vpow2.f32 %v749_v23 }
 0x387   : > { %2334 = vpow2.f32 %v753_v25 }
 0x389   : > { %v738_v26 = vpop.xlane.xlu0 %737 }
 0x38a   : > { %v746_v27 = vsub.f32 %v725_v49, %v738_v26  ;;  %v744_v28 = vpop.xlane.xlu1 %743 }
 0x38b   : > { %v2974_v29 = vpop.f32.mrf.mxu3  ;;  %v748_v32 = vsub.f32 %v730_v53, %v744_v28 }
 0x38c   : > { %v2976_v30 = vpop.eup %2332  ;;  %v751_v31 = vmul.f32 1.442695, %v746_v27 }
 0x38d   : > { %v757_v33 = vsel %vm614_vm1, %v2976_v30, 0.0  ;;  %v755_v34 = vmul.f32 1.442695, %v748_v32  ;;  %v2980_v36 = vpop.eup %2334 }
 0x38e   : > { %2336 = vpow2.f32 %v751_v31  ;;  %758 = vadd.xlane.f32.xlu0 %v757_v33  ;;  %v763_v41 = vsel %vm614_vm1, %v2980_v36, 0.0 }
 0x38f   : > { %2338 = vpow2.f32 %v755_v34 }
 0x391   : > { %v919_v35 = vpop.xlane.xlu0 %918 }
 0x392   : > { %v929_v39 = vsub.f32 %v907_v6, %v919_v35 }
 0x393   : > { %v2982_v37 = vpop.f32.mrf.mxu3 }
 0x394   : > { %v2984_v38 = vpop.eup %2336  ;;  %v933_v42 = vmul.f32 1.442695, %v929_v39 }
 0x395   : > { %v760_v40 = vsel %vm614_vm1, %v2984_v38, 0.0  ;;  %v2990_v44 = vpop.eup %2338 }
 0x396   : > { %761 = vadd.xlane.f32.xlu2 %v760_v40  ;;  %764 = vadd.xlane.f32.xlu0 %v763_v41  ;;  %2340 = vpow2.f32 %v933_v42  ;;  %v766_v48 = vsel %vm614_vm1, %v2990_v44, 0.0 }
 0x399   : > { %v922_v43 = vpop.xlane.xlu2 %921 }
 0x39a   : > { %v930_v45 = vsub.f32 %v909_v9, %v922_v43 }
 0x39b   : > { %v2992_v46 = vpop.f32.mrf.mxu3 }
 0x39c   : > { %v935_v47 = vmul.f32 1.442695, %v930_v45  ;;  %v2998_v51 = vpop.eup %2340 }
 0x39d   : > { %v941_v57 = vsel %vm614_vm1, %v2998_v51, 0.0 }
 0x39e   : > { %2342 = vpow2.f32 %v935_v47  ;;  %767 = vadd.xlane.f32.xlu0 %v766_v48 }
 0x3a1   : > { %v2996_v50 = vpop.xlane.xlu2 %924 }
 0x3a2   : > { %v931_v31 = vsub.f32 %v2962_v11, %v2996_v50 }
 0x3a3   : > { %v1062_v52 = vpop.f32.mrf.mxu3 }
 0x3a4   : > { %v3000_v54 = vpop.eup %2342  ;;  %v1072_v55 = vsel %vm614_vm1, %v1062_v52, -inf }
 0x3a5   : > { %1073 = vmax.xlane.f32.xlu1 %v1072_v55  ;;  %v944_v56 = vsel %vm614_vm1, %v3000_v54, 0.0 }
 0x3a6   : > { %945 = vadd.xlane.f32.xlu2 %v944_v56  ;;  %942 = vadd.xlane.f32.xlu0 %v941_v57 }
 0x3a9   : > { %v784_v59 = vpop.permute.xlu2 %783  ;;  %v928_v60 = vpop.xlane.xlu1 %927 }
 0x3aa   : > { %v932_v61 = vsub.f32 %v914_v15, %v928_v60  ;;  %799 = vmatpush.bf16.msrb.mxu1 %v784_v59 }
 0x3ab   : > { %v1064_v62 = vpop.f32.mrf.mxu3 }
 0x3ac   : > { %v939_v0 = vmul.f32 1.442695, %v932_v61  ;;  %v1075_v1 = vsel %vm614_vm1, %v1064_v62, -inf }
 0x3ae   : > { %2344 = vpow2.f32 %v939_v0  ;;  %1076 = vmax.xlane.f32.xlu0 %v1075_v1  ;;  %v2247_v0 = vld [vmem:[#allocation2 + $0x18] sm:$0xff] }
 0x3b3   : > { %v1067_v2 = vpop.f32.mrf.mxu3 }
 0x3b4   : > { %v3008_v49 = vpop.eup %2344  ;;  %v1078_v53 = vsel %vm614_vm1, %v1067_v2, -inf }
 0x3b5   : > { %1079 = vmax.xlane.f32.xlu1 %v1078_v53  ;;  %v950_v3 = vsel %vm614_vm1, %v3008_v49, 0.0 }
 0x3b6   : > { %951 = vadd.xlane.f32.xlu2 %v950_v3 }
 0x3bb   : > { %v3025_v6 = vpop.f32.mrf.mxu3 }
 0x3bc   : > { %v1081_v7 = vsel %vm614_vm1, %v3025_v6, -inf }
 0x3c1   : > { %v782_v4 = vpop.permute.xlu1 %781 }
 0x3c2   : > { %963 = vrot.lane.b32.xlu0 %v2931_v58, %s2605_s8  ;;  %800 = vmatpush.bf16.msrb.mxu1 %v782_v4 }
 0x3ce   : > { %965 = vrot.lane.b32.xlu1 %v2927_v21, %s2605_s8  ;;  %1118 = vrot.lane.b32.xlu2 %v2931_v58, %s2606_s9 }
 0x3d6   : > { %1192 = vrot.lane.b32.xlu2 %v2840_v5, %s2607_s10 }
 0x3de   : > { %1349 = vrot.lane.b32.xlu2 %v2835_v63, %s2608_s11 }
 0x3e6   : > { %1347 = vrot.lane.b32.xlu2 %v2840_v5, %s2608_s11 }
 0x3ec   : > { %1082 = vmax.xlane.f32.xlu0 %v1081_v7 }
 0x3ee   : > { %1190 = vrot.lane.b32.xlu2 %v2848_v18, %s2607_s10 }
 0x400   : > { %1120 = vrot.lane.b32.xlu0 %v2927_v21, %s2606_s9 }
 0x401   : > { %v759_v8 = vpop.xlane.xlu0 %758 }
 0x402   : > { %2346 = vrcp.f32 %v759_v8 }
 0x408   : > { %v2347_v13 = vpop.eup %2346 }
 0x409   : > { %v762_v9 = vpop.xlane.xlu2 %761  ;;  %v765_v10 = vpop.xlane.xlu0 %764  ;;  %v773_v15 = vmul.f32 %v2347_v13, %v2976_v30 }
 0x40a   : > { %2348 = vrcp.f32 %v762_v9 }
 0x410   : > { %v2349_v14 = vpop.eup %2348 }
 0x411   : > { %v774_v16 = vmul.f32 %v2349_v14, %v2984_v38  ;;  %v768_v17 = vpop.xlane.xlu0 %767  ;;  %v937_v38 = vmul.f32 1.442695, %v931_v31  ;;  %v2245_v14 = vld [vmem:[#allocation2 + $0x8] sm:$0xff] }
 0x412   : > { %2350 = vrcp.f32 %v768_v17  ;;  %835 = vmatpush.bf16.msra.mxu2 %v2245_v14 }
 0x413   : > { %v777_v19 = vpack.c.bf16 %v774_v16, %v773_v15  ;;  %2352 = vrcp.f32 %v765_v10 }
 0x415   : > { %2142 = vmatmul.msk.bf16.vlgmr.msrb.gmra.mxu1 %vm614_vm1, %v777_v19 }
 0x418   : > { %v1074_v20 = vpop.xlane.xlu1 %1073  ;;  %v2351_v25 = vpop.eup %2350 }
 0x419   : > { %v1084_v23 = vsub.f32 %v1062_v52, %v1074_v20  ;;  %v943_v24 = vpop.xlane.xlu0 %942  ;;  %v2353_v27 = vpop.eup %2352  ;;  %v776_v28 = vmul.f32 %v2351_v25, %v2990_v44 }
 0x41a   : > { %v946_v30 = vpop.xlane.xlu2 %945  ;;  %v775_v33 = vmul.f32 %v2353_v27, %v2980_v36 }
 0x41b   : > { %v1088_v26 = vmul.f32 1.442695, %v1084_v23 }
 0x41c   : > { %v778_v35 = vpack.c.bf16 %v776_v28, %v775_v33 }
 0x41d   : > { %2354 = vpow2.f32 %v1088_v26 }
 0x421   : > { %v1077_v32 = vpop.xlane.xlu0 %1076 }
 0x422   : > { %v1085_v34 = vsub.f32 %v1064_v62, %v1077_v32 }
 0x423   : > { %v3041_v40 = vpop.eup %2354 }
 0x424   : > { %v1090_v39 = vmul.f32 1.442695, %v1085_v34  ;;  %v1096_v11 = vsel %vm614_vm1, %v3041_v40, 0.0  ;;  %v2246_v34 = vld [vmem:[#allocation2 + $0x10] sm:$0xff] }
 0x425   : > { %2143 = vmatmul.msk.bf16.gmra.mxu1 %vm614_vm1, %v778_v35  ;;  %1017 = vmatpush.bf16.msrb.mxu2 %v2246_v34 }
 0x426   : > { %2356 = vpow2.f32 %v1090_v39 }
 0x427   : > { %2358 = vpow2.f32 %v937_v38 }
 0x428   : > { %v1080_v41 = vpop.xlane.xlu1 %1079 }
 0x429   : > { %v1086_v42 = vsub.f32 %v1067_v2, %v1080_v41  ;;  %v952_v43 = vpop.xlane.xlu2 %951 }
 0x42a   : > { %1097 = vadd.xlane.f32.xlu0 %v1096_v11 }
 0x42b   : > { %v1092_v44 = vmul.f32 1.442695, %v1086_v42 }
 0x42c   : > { %v3045_v45 = vpop.eup %2356 }
 0x42d   : > { %2360 = vpow2.f32 %v1092_v44  ;;  %v1099_v36 = vsel %vm614_vm1, %v3045_v45, 0.0  ;;  %v3049_v47 = vpop.eup %2358 }
 0x42e   : > { %1100 = vadd.xlane.f32.xlu1 %v1099_v36  ;;  %v947_v50 = vsel %vm614_vm1, %v3049_v47, 0.0  ;;  %2362 = vrcp.f32 %v946_v30 }
 0x42f   : > { %2364 = vrcp.f32 %v943_v24 }
 0x431   : > { %v1119_v48 = vpop.permute.xlu2 %1118 }
 0x432   : > { %948 = vadd.xlane.f32.xlu0 %v947_v50 }
 0x433   : > { %v3053_v52 = vpop.eup %2360 }
 0x434   : > { %v1102_v55 = vsel %vm614_vm1, %v3053_v52, 0.0  ;;  %v2363_v57 = vpop.eup %2362  ;;  %v964_v2 = vpop.permute.xlu0 %963 }
 0x435   : > { %v2365_v59 = vpop.eup %2364  ;;  %v958_v61 = vmul.f32 %v2363_v57, %v3000_v54 }
 0x436   : > { %1103 = vadd.xlane.f32.xlu1 %v1102_v55  ;;  %v957_v62 = vmul.f32 %v2365_v59, %v2998_v51 }
 0x438   : > { %v961_v53 = vpack.c.bf16 %v958_v61, %v957_v62 }
 0x439   : > { %v3057_v56 = vpop.permute.xlu2 %1192 }
 0x43a   : > { %v1203_v55 = vsel %vm582_vm0, %v3057_v56, 0 }
 0x440   : > { %v966_v60 = vpop.permute.xlu1 %965 }
 0x441   : > { %981 = vmatpush.bf16.msra.mxu1 %v966_v60  ;;  %v1350_v1 = vpop.permute.xlu2 %1349 }
 0x442   : > { %v1361_v3 = vsel %vm582_vm0, %v1350_v1, 0 }
 0x445   : > { %982 = vmatpush.bf16.msra.mxu1 %v964_v2 }
 0x446   : > { %1188 = vrot.lane.b32.xlu0 %v2844_v12, %s2607_s10 }
 0x448   : > { %2158 = vmatmul.msk.bf16.vlgmr.msra.gmra.mxu1 %vm614_vm1, %v961_v53 }
 0x449   : > { %1172 = vmatpush.bf16.msrb.mxu1 %v2247_v0  ;;  %v1348_v4 = vpop.permute.xlu2 %1347 }
 0x44a   : > { %v1358_v7 = vsel %vm582_vm0, %v1348_v4, 0 }
 0x44d   : > { %1369 = vmatpush.bf16.xpose.msra.mxu1 %v1361_v3 }
 0x455   : > { %1370 = vmatpush.bf16.xpose.msra.mxu1 %v1358_v7 }
 0x45f   : > { %v1083_v54 = vpop.xlane.xlu0 %1082 }
 0x460   : > { %v1087_v51 = vsub.f32 %v3025_v6, %v1083_v54  ;;  %v1191_v54 = vpop.permute.xlu2 %1190 }
 0x462   : > { %v1094_v8 = vmul.f32 1.442695, %v1087_v51 }
 0x464   : > { %2366 = vpow2.f32 %v1094_v8 }
 0x46a   : > { %v2367_v9 = vpop.eup %2366 }
 0x46b   : > { %v1105_v10 = vsel %vm614_vm1, %v2367_v9, 0.0 }
 0x46c   : > { %1106 = vadd.xlane.f32.xlu1 %v1105_v10 }
 0x472   : > { %v1121_v13 = vpop.permute.xlu0 %1120 }
 0x473   : > { %1136 = vmatpush.bf16.msrb.mxu0 %v1121_v13 }
 0x477   : > { %1137 = vmatpush.bf16.msrb.mxu0 %v1119_v48 }
 0x485   : > { %1194 = vrot.lane.b32.xlu1 %v2835_v63, %s2607_s10 }
 0x48d   : > { %1343 = vrot.lane.b32.xlu1 %v2844_v12, %s2608_s11 }
 0x492   : > { %v802_v15 = vpop.f32.mrf.mxu1 }
 0x495   : > { %1345 = vrot.lane.b32.xlu1 %v2848_v18, %s2608_s11 }
 0x49a   : > { %v804_v6 = vpop.f32.mrf.mxu1 }
 0x49b   : > { %v812_v16 = vpack.c.bf16 %v804_v6, %v802_v15 }
 0x49d   : > { %2148 = vmatmul.msk.bf16.vlgmr.msra.gmra.mxu2 %vm582_vm0, %v812_v16  ;;  %v1098_v17 = vpop.xlane.xlu0 %1097 }
 0x49e   : > { %2368 = vrcp.f32 %v1098_v17 }
 0x4a1   : > { %v1101_v19 = vpop.xlane.xlu1 %1100 }
 0x4a2   : > { %2370 = vrcp.f32 %v1101_v19  ;;  %v807_v20 = vpop.f32.mrf.mxu1 }
 0x4a3   : > { %2372 = vrcp.f32 %v952_v43 }
 0x4a4   : > { %v2369_v24 = vpop.eup %2368 }
 0x4a5   : > { %v949_v23 = vpop.xlane.xlu0 %948  ;;  %v1112_v26 = vmul.f32 %v2369_v24, %v3041_v40 }
 0x4a6   : > { %2374 = vrcp.f32 %v949_v23 }
 0x4a8   : > { %v2371_v25 = vpop.eup %2370 }
 0x4a9   : > { %v1113_v27 = vmul.f32 %v2371_v25, %v3045_v45  ;;  %v2373_v28 = vpop.eup %2372  ;;  %v1104_v43 = vpop.xlane.xlu1 %1103 }
 0x4aa   : > { %v809_v31 = vpop.f32.mrf.mxu1  ;;  %v960_v38 = vmul.f32 %v2373_v28, %v3008_v49  ;;  %2376 = vrcp.f32 %v1104_v43 }
 0x4ab   : > { %v1116_v30 = vpack.c.bf16 %v1113_v27, %v1112_v26  ;;  %v813_v32 = vpack.c.bf16 %v809_v31, %v807_v20 }
 0x4ac   : > { %v2375_v33 = vpop.eup %2374 }
 0x4ad   : > { %2149 = vmatmul.msk.bf16.gmra.mxu2 %vm582_vm0, %v813_v32  ;;  %2168 = vmatmul.msk.bf16.vlgmr.msrb.gmra.mxu0 %vm614_vm1, %v1116_v30  ;;  %v959_v35 = vmul.f32 %v2375_v33, %v3049_v47 }
 0x4af   : > { %v962_v39 = vpack.c.bf16 %v960_v38, %v959_v35 }
 0x4b0   : > { %v2377_v44 = vpop.eup %2376 }
 0x4b1   : > { %2159 = vmatmul.msk.bf16.gmra.mxu1 %vm614_vm1, %v962_v39  ;;  %v1114_v36 = vmul.f32 %v2377_v44, %v3053_v52 }
 0x4b8   : > { %v1189_v53 = vpop.permute.xlu0 %1188 }
 0x4c5   : > { %v984_v40 = vpop.f32.mrf.mxu1 }
 0x4cd   : > { %v986_v41 = vpop.f32.mrf.mxu1 }
 0x4ce   : > { %v994_v42 = vpack.c.bf16 %v986_v41, %v984_v40 }
 0x4d0   : > { %2164 = vmatmul.msk.bf16.vlgmr.msrb.gmra.mxu2 %vm582_vm0, %v994_v42 }
 0x4df   : > { %v1107_v11 = vpop.xlane.xlu1 %1106 }
 0x4e0   : > { %2378 = vrcp.f32 %v1107_v11 }
 0x4e6   : > { %v2379_v45 = vpop.eup %2378 }
 0x4e7   : > { %v1115_v47 = vmul.f32 %v2379_v45, %v2367_v9 }
 0x4e9   : > { %v1117_v48 = vpack.c.bf16 %v1115_v47, %v1114_v36 }
 0x4eb   : > { %2169 = vmatmul.msk.bf16.gmra.mxu0 %vm614_vm1, %v1117_v48 }
 0x4f7   : > { %v1195_v49 = vpop.permute.xlu1 %1194 }
 0x4f8   : > { %v1206_v50 = vsel %vm582_vm0, %v1195_v49, 0 }
 0x4f9   : > { %1214 = vmatpush.bf16.xpose.msra.mxu2 %v1206_v50 }
 0x4ff   : > { %v1344_v10 = vpop.permute.xlu1 %1343 }
 0x501   : > { %1215 = vmatpush.bf16.xpose.msra.mxu2 %v1203_v55 }
 0x507   : > { %v1346_v13 = vpop.permute.xlu1 %1345 }
 0x520   : > { %v837_v59 = vpop.f32.mrf.mxu2 }
 0x521   : > { %v869_v56 = vadd.f32 %v2972_v22, %v837_v59 }
 0x528   : > { %v839_v0 = vpop.f32.mrf.mxu2 }
 0x529   : > { %v871_v6 = vadd.f32 %v2974_v29, %v839_v0 }
 0x52a   : > { %v1139_v57 = vpop.f32.mrf.mxu0 }
 0x52e   : > { %v989_v60 = vpop.f32.mrf.mxu1 }
 0x530   : > { %v842_v2 = vpop.f32.mrf.mxu2 }
 0x531   : > { %v874_v19 = vadd.f32 %v2982_v37, %v842_v2 }
 0x532   : > { %v1141_v61 = vpop.f32.mrf.mxu0 }
 0x533   : > { %v1149_v62 = vpack.c.bf16 %v1141_v61, %v1139_v57 }
 0x535   : > { %2174 = vmatmul.msk.bf16.vlgmr.msrb.gmra.mxu1 %vm582_vm0, %v1149_v62 }
 0x536   : > { %v991_v52 = vpop.f32.mrf.mxu1 }
 0x537   : > { %v995_v1 = vpack.c.bf16 %v991_v52, %v989_v60 }
 0x538   : > { %v844_v3 = vpop.f32.mrf.mxu2 }
 0x539   : > { %2165 = vmatmul.msk.bf16.gmra.mxu2 %vm582_vm0, %v995_v1  ;;  %v876_v25 = vadd.f32 %v2992_v46, %v844_v3 }
 0x549   : > { %2176 = vmatmul.msk.bf16.vlgmr.msra.gmra.mxu2 %vm582_vm0, %v1189_v53 }
 0x553   : > { %v1019_v4 = vpop.f32.mrf.mxu2 }
 0x554   : > { %v1029_v7 = vadd.f32 %v1019_v4, %v869_v56 }
 0x559   : > { %2177 = vmatmul.msk.bf16.gmra.mxu2 %vm582_vm0, %v1191_v54 }
 0x55b   : > { %v1021_v22 = vpop.f32.mrf.mxu2 }
 0x55c   : > { %v1030_v16 = vadd.f32 %v1021_v22, %v871_v6 }
 0x568   : > { %v1144_v51 = vpop.f32.mrf.mxu0 }
 0x570   : > { %v1146_v8 = vpop.f32.mrf.mxu0 }
 0x571   : > { %v1150_v9 = vpack.c.bf16 %v1146_v8, %v1144_v51 }
 0x573   : > { %2175 = vmatmul.msk.bf16.gmra.mxu1 %vm582_vm0, %v1150_v9 }
 0x583   : > { %2186 = vmatmul.msk.bf16.vlgmr.msra.gmra.mxu1 %vm582_vm0, %v1344_v10 }
 0x593   : > { %2187 = vmatmul.msk.bf16.gmra.mxu1 %vm582_vm0, %v1346_v13 }
 0x5b2   : > { %v1174_v14 = vpop.f32.mrf.mxu1 }
 0x5b3   : > { %v3096_v15 = vadd.f32 %v1174_v14, %v1029_v7 }
 0x5ba   : > { %v1176_v17 = vpop.f32.mrf.mxu1 }
 0x5bb   : > { %v3100_v20 = vadd.f32 %v1176_v17, %v1030_v16 }
 0x5bc   : > { %v1024_v23 = vpop.f32.mrf.mxu2 }
 0x5bd   : > { %v1031_v24 = vadd.f32 %v1024_v23, %v874_v19 }
 0x5c4   : > { %v1026_v26 = vpop.f32.mrf.mxu2 }
 0x5c5   : > { %v1032_v27 = vadd.f32 %v1026_v26, %v876_v25 }
 0x5cc   : > { %v1217_v28 = vpop.f32.mrf.mxu2 }
 0x5cd   : > { %v1227_v31 = vsel %vm614_vm1, %v1217_v28, -inf }
 0x5ce   : > { %1228 = vmax.xlane.f32.xlu0 %v1227_v31 }
 0x5d4   : > { %v1219_v30 = vpop.f32.mrf.mxu2 }
 0x5d5   : > { %v1230_v32 = vsel %vm614_vm1, %v1219_v30, -inf }
 0x5d6   : > { %1231 = vmax.xlane.f32.xlu2 %v1230_v32 }
 0x5dc   : > { %v3105_v29 = vpop.f32.mrf.mxu2 }
 0x5dd   : > { %v1233_v37 = vsel %vm614_vm1, %v3105_v29, -inf }
 0x5de   : > { %1234 = vmax.xlane.f32.xlu2 %v1233_v37 }
 0x5e2   : > { %1275 = vrot.lane.b32.xlu0 %v2927_v21, %s2607_s10 }
 0x5e4   : > { %v1224_v46 = vpop.f32.mrf.mxu2 }
 0x5e5   : > { %v1236_v33 = vsel %vm614_vm1, %v1224_v46, -inf }
 0x5e6   : > { %1237 = vmax.xlane.f32.xlu1 %v1236_v33 }
 0x5f0   : > { %v1179_v34 = vpop.f32.mrf.mxu1 }
 0x5f1   : > { %v3112_v35 = vadd.f32 %v1179_v34, %v1031_v24 }
 0x5f8   : > { %v1181_v38 = vpop.f32.mrf.mxu1 }
 0x5f9   : > { %v3114_v39 = vadd.f32 %v1181_v38, %v1032_v27 }
 0x600   : > { %v1372_v40 = vpop.f32.mrf.mxu1 }
 0x601   : > { %v1382_v61 = vsel %vm614_vm1, %v1372_v40, -inf }
 0x608   : > { %v3116_v41 = vpop.f32.mrf.mxu1 }
 0x609   : > { %v1385_v62 = vsel %vm614_vm1, %v3116_v41, -inf }
 0x610   : > { %v3118_v42 = vpop.f32.mrf.mxu1 }
 0x611   : > { %v1388_v52 = vsel %vm614_vm1, %v3118_v42, -inf }
 0x618   : > { %v3120_v43 = vpop.f32.mrf.mxu1 }
 0x619   : > { %v1391_v11 = vsel %vm614_vm1, %v3120_v43, -inf }
 0x61a   : > { %1392 = vmax.xlane.f32.xlu2 %v1391_v11 }
 0x632   : > { %1430 = vrot.lane.b32.xlu2 %v2927_v21, %s2608_s11 }
 0x641   : > { %v1229_v44 = vpop.xlane.xlu0 %1228 }
 0x642   : > { %v1239_v45 = vsub.f32 %v1217_v28, %v1229_v44 }
 0x644   : > { %v1243_v36 = vmul.f32 1.442695, %v1239_v45 }
 0x646   : > { %2380 = vpow2.f32 %v1243_v36 }
 0x649   : > { %v1232_v47 = vpop.xlane.xlu2 %1231 }
 0x64a   : > { %v1240_v48 = vsub.f32 %v1219_v30, %v1232_v47 }
 0x64c   : > { %v2381_v49 = vpop.eup %2380  ;;  %v1245_v50 = vmul.f32 1.442695, %v1240_v48 }
 0x64d   : > { %v1251_v55 = vsel %vm614_vm1, %v2381_v49, 0.0 }
 0x64e   : > { %2382 = vpow2.f32 %v1245_v50  ;;  %1252 = vadd.xlane.f32.xlu1 %v1251_v55 }
 0x651   : > { %v1235_v0 = vpop.xlane.xlu2 %1234 }
 0x652   : > { %v1241_v10 = vsub.f32 %v3105_v29, %v1235_v0 }
 0x654   : > { %v2383_v57 = vpop.eup %2382  ;;  %v1276_v59 = vpop.permute.xlu0 %1275  ;;  %v1247_v6 = vmul.f32 1.442695, %v1241_v10 }
 0x655   : > { %1291 = vmatpush.bf16.msra.mxu3 %v1276_v59  ;;  %v1254_v60 = vsel %vm614_vm1, %v2383_v57, 0.0 }
 0x656   : > { %1255 = vadd.xlane.f32.xlu0 %v1254_v60  ;;  %1383 = vmax.xlane.f32.xlu1 %v1382_v61 }
 0x659   : > { %v1238_v2 = vpop.xlane.xlu1 %1237 }
 0x65a   : > { %v1242_v53 = vsub.f32 %v1224_v46, %v1238_v2  ;;  %v2249_v2 = vld [vmem:[#allocation2 + $0x28] sm:$0xff] }
 0x65c   : > { %v1249_v56 = vmul.f32 1.442695, %v1242_v53 }
 0x65e   : > { %1386 = vmax.xlane.f32.xlu0 %v1385_v62  ;;  %2384 = vpow2.f32 %v1249_v56 }
 0x664   : > { %v3135_v4 = vpop.eup %2384 }
 0x665   : > { %v1260_v7 = vsel %vm614_vm1, %v3135_v4, 0.0 }
 0x666   : > { %1389 = vmax.xlane.f32.xlu0 %v1388_v52 }
 0x67a   : > { %1428 = vrot.lane.b32.xlu0 %v2931_v58, %s2608_s11 }
 0x68d   : > { %v1393_v1 = vpop.xlane.xlu2 %1392 }
 0x68e   : > { %v1397_v26 = vsub.f32 %v3120_v43, %v1393_v1 }
 0x690   : > { %v1404_v31 = vmul.f32 1.442695, %v1397_v26 }
 0x695   : > { %v1431_v3 = vpop.permute.xlu2 %1430 }
 0x696   : > { %1446 = vmatpush.bf16.msrb.mxu2 %v1431_v3 }
 0x6a4   : > { %1261 = vadd.xlane.f32.xlu0 %v1260_v7 }
 0x6b8   : > { %1504 = vrot.lane.b32.xlu0 %v2835_v63, %s2609_s12 }
 0x6c0   : > { %1657 = vrot.lane.b32.xlu0 %v2840_v5, %s2610_s13 }
 0x6c1   : > { %v1253_v54 = vpop.xlane.xlu1 %1252 }
 0x6c2   : > { %2386 = vrcp.f32 %v1253_v54 }
 0x6c8   : > { %1498 = vrot.lane.b32.xlu0 %v2844_v12, %s2609_s12  ;;  %v2387_v14 = vpop.eup %2386 }
 0x6c9   : > { %v1256_v51 = vpop.xlane.xlu0 %1255  ;;  %v1384_v8 = vpop.xlane.xlu1 %1383  ;;  %v1267_v16 = vmul.f32 %v2387_v14, %v2381_v49 }
 0x6ca   : > { %2388 = vrcp.f32 %v1256_v51  ;;  %v1394_v9 = vsub.f32 %v1372_v40, %v1384_v8  ;;  %v2248_v40 = vld [vmem:[#allocation2 + $0x20] sm:$0xff] }
 0x6cb   : > { %1327 = vmatpush.bf16.msra.mxu0 %v2248_v40 }
 0x6cc   : > { %v1398_v13 = vmul.f32 1.442695, %v1394_v9 }
 0x6ce   : > { %2390 = vpow2.f32 %v1398_v13 }
 0x6cf   : > { %2392 = vpow2.f32 %v1247_v6 }
 0x6d0   : > { %v2389_v22 = vpop.eup %2388  ;;  %1655 = vrot.lane.b32.xlu0 %v2848_v18, %s2610_s13 }
 0x6d1   : > { %v1268_v17 = vmul.f32 %v2389_v22, %v2383_v57  ;;  %v1387_v19 = vpop.xlane.xlu0 %1386 }
 0x6d2   : > { %v1395_v23 = vsub.f32 %v3116_v41, %v1387_v19 }
 0x6d3   : > { %v1271_v24 = vpack.c.bf16 %v1268_v17, %v1267_v16 }
 0x6d4   : > { %v2391_v25 = vpop.eup %2390  ;;  %v1400_v27 = vmul.f32 1.442695, %v1395_v23 }
 0x6d5   : > { %v1406_v28 = vsel %vm614_vm1, %v2391_v25, 0.0  ;;  %v2393_v30 = vpop.eup %2392 }
 0x6d6   : > { %2394 = vpow2.f32 %v1400_v27  ;;  %1407 = vadd.xlane.f32.xlu2 %v1406_v28  ;;  %v1257_v37 = vsel %vm614_vm1, %v2393_v30, 0.0 }
 0x6d7   : > { %2396 = vpow2.f32 %v1404_v31 }
 0x6d9   : > { %v1390_v33 = vpop.xlane.xlu0 %1389 }
 0x6da   : > { %v1396_v41 = vsub.f32 %v3118_v42, %v1390_v33 }
 0x6dc   : > { %v2395_v32 = vpop.eup %2394  ;;  %v1402_v43 = vmul.f32 1.442695, %v1396_v41 }
 0x6dd   : > { %v1409_v29 = vsel %vm614_vm1, %v2395_v32, 0.0  ;;  %v2397_v46 = vpop.eup %2396 }
 0x6de   : > { %1410 = vadd.xlane.f32.xlu1 %v1409_v29  ;;  %1258 = vadd.xlane.f32.xlu2 %v1257_v37  ;;  %v1415_v34 = vsel %vm614_vm1, %v2397_v46, 0.0  ;;  %2398 = vpow2.f32 %v1402_v43 }
 0x6e4   : > { %v2399_v11 = vpop.eup %2398 }
 0x6e5   : > { %v1412_v44 = vsel %vm614_vm1, %v2399_v11, 0.0 }
 0x6e6   : > { %1416 = vadd.xlane.f32.xlu2 %v1415_v34 }
 0x6ec   : > { %v1429_v38 = vpop.permute.xlu0 %1428 }
 0x6ed   : > { %1447 = vmatpush.bf16.msrb.mxu2 %v1429_v38 }
 0x6f7   : > { %1273 = vrot.lane.b32.xlu1 %v2931_v58, %s2607_s10 }
 0x6fe   : > { %1502 = vrot.lane.b32.xlu2 %v2840_v5, %s2609_s12 }
 0x706   : > { %1653 = vrot.lane.b32.xlu2 %v2844_v12, %s2610_s13 }
 0x717   : > { %v1262_v45 = vpop.xlane.xlu0 %1261 }
 0x721   : > { %1413 = vadd.xlane.f32.xlu1 %v1412_v44 }
 0x72a   : > { %v1505_v36 = vpop.permute.xlu0 %1504 }
 0x72b   : > { %v1516_v47 = vsel %vm582_vm0, %v1505_v36, 0 }
 0x72c   : > { %1524 = vmatpush.bf16.xpose.msrb.mxu0 %v1516_v47 }
 0x73a   : > { %1659 = vrot.lane.b32.xlu1 %v2835_v63, %s2610_s13 }
 0x742   : > { %1500 = vrot.lane.b32.xlu1 %v2848_v18, %s2609_s12 }
 0x749   : > { %v1408_v5 = vpop.xlane.xlu2 %1407 }
 0x74a   : > { %2400 = vrcp.f32 %v1408_v5 }
 0x750   : > { %v2401_v48 = vpop.eup %2400 }
 0x751   : > { %v1259_v12 = vpop.xlane.xlu2 %1258  ;;  %v1411_v42 = vpop.xlane.xlu1 %1410  ;;  %v1422_v55 = vmul.f32 %v2401_v48, %v2391_v25 }
 0x752   : > { %2402 = vrcp.f32 %v1411_v42 }
 0x753   : > { %2404 = vrcp.f32 %v1259_v12 }
 0x754   : > { %2406 = vrcp.f32 %v1262_v45 }
 0x758   : > { %v2403_v49 = vpop.eup %2402 }
 0x759   : > { %v1417_v50 = vpop.xlane.xlu2 %1416  ;;  %v1423_v57 = vmul.f32 %v2403_v49, %v2395_v32  ;;  %v2405_v18 = vpop.eup %2404 }
 0x75a   : > { %v2407_v62 = vpop.eup %2406  ;;  %v1269_v52 = vmul.f32 %v2405_v18, %v2393_v30  ;;  %2408 = vrcp.f32 %v1417_v50 }
 0x75b   : > { %v1426_v59 = vpack.c.bf16 %v1423_v57, %v1422_v55  ;;  %v1270_v0 = vmul.f32 %v2407_v62, %v3135_v4  ;;  %v1658_v4 = vpop.permute.xlu0 %1657 }
 0x75c   : > { %v1668_v10 = vsel %vm582_vm0, %v1658_v4, 0 }
 0x75d   : > { %2188 = vmatmul.msk.bf16.vlgmr.msrb.gmra.mxu2 %vm614_vm1, %v1426_v59  ;;  %v1272_v1 = vpack.c.bf16 %v1270_v0, %v1269_v52 }
 0x760   : > { %v2409_v3 = vpop.eup %2408 }
 0x761   : > { %v1503_v60 = vpop.permute.xlu2 %1502  ;;  %v1425_v54 = vmul.f32 %v2409_v3, %v2397_v46 }
 0x762   : > { %v1513_v61 = vsel %vm582_vm0, %v1503_v60, 0 }
 0x763   : > { %1525 = vmatpush.bf16.xpose.msrb.mxu0 %v1513_v61  ;;  %v1499_v25 = vpop.permute.xlu0 %1498 }
 0x769   : > { %v1274_v63 = vpop.permute.xlu1 %1273  ;;  %v1654_v30 = vpop.permute.xlu2 %1653 }
 0x76a   : > { %1292 = vmatpush.bf16.msra.mxu3 %v1274_v63 }
 0x76b   : > { %v1656_v32 = vpop.permute.xlu0 %1655 }
 0x76d   : > { %2178 = vmatmul.msk.bf16.vlgmr.msra.gmra.mxu3 %vm614_vm1, %v1271_v24 }
 0x76e   : > { %1482 = vmatpush.bf16.msrb.mxu3 %v2249_v2 }
 0x77d   : > { %2179 = vmatmul.msk.bf16.gmra.mxu3 %vm614_vm1, %v1272_v1 }
 0x794   : > { %v1414_v53 = vpop.xlane.xlu1 %1413 }
 0x795   : > { %2410 = vrcp.f32 %v1414_v53 }
 0x79b   : > { %v2411_v56 = vpop.eup %2410 }
 0x79c   : > { %v1424_v7 = vmul.f32 %v2411_v56, %v2399_v11 }
 0x79e   : > { %v1427_v51 = vpack.c.bf16 %v1425_v54, %v1424_v7 }
 0x7a0   : > { %2189 = vmatmul.msk.bf16.gmra.mxu2 %vm614_vm1, %v1427_v51 }
 0x7ac   : > { %v1660_v8 = vpop.permute.xlu1 %1659 }
 0x7ad   : > { %v1671_v9 = vsel %vm582_vm0, %v1660_v8, 0 }
 0x7ae   : > { %1679 = vmatpush.bf16.xpose.msra.mxu3 %v1671_v9 }
 0x7b4   : > { %v1501_v27 = vpop.permute.xlu1 %1500 }
 0x7b6   : > { %1680 = vmatpush.bf16.xpose.msra.mxu3 %v1668_v10 }
 0x7e0   : > { %v1449_v13 = vpop.f32.mrf.mxu2 }
 0x7e8   : > { %v1451_v14 = vpop.f32.mrf.mxu2 }
 0x7e9   : > { %v1459_v22 = vpack.c.bf16 %v1451_v14, %v1449_v13 }
 0x7eb   : > { %2194 = vmatmul.msk.bf16.vlgmr.msrb.gmra.mxu3 %vm582_vm0, %v1459_v22 }
 0x7f0   : > { %v1294_v6 = vpop.f32.mrf.mxu3 }
 0x7f8   : > { %v1296_v16 = vpop.f32.mrf.mxu3 }
 0x7f9   : > { %v1304_v17 = vpack.c.bf16 %v1296_v16, %v1294_v6 }
 0x7fb   : > { %2184 = vmatmul.msk.bf16.vlgmr.msra.gmra.mxu0 %vm582_vm0, %v1304_v17 }
 0x800   : > { %v1299_v19 = vpop.f32.mrf.mxu3 }
 0x808   : > { %v1301_v23 = vpop.f32.mrf.mxu3 }
 0x809   : > { %v1305_v24 = vpack.c.bf16 %v1301_v23, %v1299_v19 }
 0x80b   : > { %2185 = vmatmul.msk.bf16.gmra.mxu0 %vm582_vm0, %v1305_v24 }
 0x81b   : > { %2196 = vmatmul.msk.bf16.vlgmr.msrb.gmra.mxu0 %vm582_vm0, %v1499_v25 }
 0x823   : > { %v1454_v26 = vpop.f32.mrf.mxu2 }
 0x82b   : > { %v1456_v28 = vpop.f32.mrf.mxu2  ;;  %2197 = vmatmul.msk.bf16.gmra.mxu0 %vm582_vm0, %v1501_v27 }
 0x82c   : > { %v1460_v31 = vpack.c.bf16 %v1456_v28, %v1454_v26 }
 0x82e   : > { %2195 = vmatmul.msk.bf16.gmra.mxu3 %vm582_vm0, %v1460_v31 }
 0x83e   : > { %2206 = vmatmul.msk.bf16.vlgmr.msra.gmra.mxu3 %vm582_vm0, %v1654_v30 }
 0x84e   : > { %2207 = vmatmul.msk.bf16.gmra.mxu3 %vm582_vm0, %v1656_v32 }
 0x86e   : > { %v1484_v29 = vpop.f32.mrf.mxu3 }
 0x876   : > { %v1486_v40 = vpop.f32.mrf.mxu3 }
 0x878   : > { %v1329_v37 = vpop.f32.mrf.mxu0 }
 0x879   : > { %v1339_v46 = vadd.f32 %v1329_v37, %v3096_v15 }
 0x87b   : > { %v3184_v33 = vadd.f32 %v1484_v29, %v1339_v46 }
 0x880   : > { %v1331_v34 = vpop.f32.mrf.mxu0 }
 0x881   : > { %v1340_v38 = vadd.f32 %v1331_v34, %v3100_v20 }
 0x883   : > { %v3187_v41 = vadd.f32 %v1486_v40, %v1340_v38 }
 0x888   : > { %v1334_v43 = vpop.f32.mrf.mxu0 }
 0x889   : > { %v1341_v11 = vadd.f32 %v1334_v43, %v3112_v35 }
 0x890   : > { %v1336_v44 = vpop.f32.mrf.mxu0 }
 0x891   : > { %v1342_v45 = vadd.f32 %v1336_v44, %v3114_v39 }
 0x898   : > { %v1527_v36 = vpop.f32.mrf.mxu0 }
 0x899   : > { %v1537_v47 = vsel %vm614_vm1, %v1527_v36, -inf }
 0x89a   : > { %1538 = vmax.xlane.f32.xlu2 %v1537_v47 }
 0x8a0   : > { %v1529_v5 = vpop.f32.mrf.mxu0 }
 0x8a1   : > { %v1540_v15 = vsel %vm614_vm1, %v1529_v5, -inf }
 0x8a2   : > { %1541 = vmax.xlane.f32.xlu1 %v1540_v15 }
 0x8a8   : > { %v1532_v12 = vpop.f32.mrf.mxu0 }
 0x8a9   : > { %v1543_v20 = vsel %vm614_vm1, %v1532_v12, -inf }
 0x8aa   : > { %1544 = vmax.xlane.f32.xlu1 %v1543_v20 }
 0x8b0   : > { %v3194_v42 = vpop.f32.mrf.mxu0 }
 0x8b1   : > { %v1489_v48 = vpop.f32.mrf.mxu3  ;;  %v1546_v35 = vsel %vm614_vm1, %v3194_v42, -inf }
 0x8b2   : > { %v3198_v49 = vadd.f32 %v1489_v48, %v1341_v11  ;;  %1547 = vmax.xlane.f32.xlu2 %v1546_v35 }
 0x8b9   : > { %v1491_v39 = vpop.f32.mrf.mxu3 }
 0x8ba   : > { %v3200_v50 = vadd.f32 %v1491_v39, %v1342_v45  ;;  %v2250_v39 = vld [vmem:[#allocation2 + $0x30] sm:$0xff] }
 0x8bb   : > { %1637 = vmatpush.bf16.msra.mxu2 %v2250_v39  ;;  %v2457_v39 = vld [vmem:[%s2803_s23 + $0x18] sm:$0xff] }
 0x8c1   : > { %v3202_v55 = vpop.f32.mrf.mxu3 }
 0x8c2   : > { %v1692_v4 = vsel %vm614_vm1, %v3202_v55, -inf }
 0x8c9   : > { %v1684_v57 = vpop.f32.mrf.mxu3 }
 0x8ca   : > { %v1695_v51 = vsel %vm614_vm1, %v1684_v57, -inf }
 0x8d1   : > { %v3204_v59 = vpop.f32.mrf.mxu3 }
 0x8d2   : > { %v1698_v13 = vsel %vm614_vm1, %v3204_v59, -inf }
 0x8d9   : > { %v1689_v60 = vpop.f32.mrf.mxu3 }
 0x8da   : > { %v1701_v61 = vsel %vm614_vm1, %v1689_v60, -inf }
 0x8db   : > { %1702 = vmax.xlane.f32.xlu1 %v1701_v61 }
 0x8f4   : > { %1585 = vrot.lane.b32.xlu1 %v2927_v21, %s2609_s12 }
 0x90d   : > { %v1539_v63 = vpop.xlane.xlu2 %1538 }
 0x90e   : > { %v1549_v18 = vsub.f32 %v1527_v36, %v1539_v63 }
 0x910   : > { %v1553_v62 = vmul.f32 1.442695, %v1549_v18 }
 0x912   : > { %2412 = vpow2.f32 %v1553_v62 }
 0x915   : > { %v1542_v52 = vpop.xlane.xlu1 %1541 }
 0x916   : > { %v1550_v0 = vsub.f32 %v1529_v5, %v1542_v52 }
 0x918   : > { %v2413_v1 = vpop.eup %2412  ;;  %v1555_v2 = vmul.f32 1.442695, %v1550_v0 }
 0x919   : > { %v1561_v53 = vsel %vm614_vm1, %v2413_v1, 0.0 }
 0x91a   : > { %2414 = vpow2.f32 %v1555_v2  ;;  %1562 = vadd.xlane.f32.xlu2 %v1561_v53 }
 0x91d   : > { %v1545_v3 = vpop.xlane.xlu1 %1544 }
 0x91e   : > { %v1551_v56 = vsub.f32 %v1532_v12, %v1545_v3 }
 0x920   : > { %v2415_v7 = vpop.eup %2414  ;;  %v1557_v54 = vmul.f32 1.442695, %v1551_v56 }
 0x921   : > { %v1564_v8 = vsel %vm614_vm1, %v2415_v7, 0.0 }
 0x922   : > { %2416 = vpow2.f32 %v1557_v54  ;;  %1696 = vmax.xlane.f32.xlu2 %v1695_v51  ;;  %1565 = vadd.xlane.f32.xlu0 %v1564_v8 }
 0x925   : > { %v1548_v23 = vpop.xlane.xlu2 %1547 }
 0x928   : > { %v3212_v9 = vpop.eup %2416 }
 0x929   : > { %v1567_v10 = vsel %vm614_vm1, %v3212_v9, 0.0 }
 0x92a   : > { %1693 = vmax.xlane.f32.xlu0 %v1692_v4  ;;  %1568 = vadd.xlane.f32.xlu1 %v1567_v10 }
 0x932   : > { %1699 = vmax.xlane.f32.xlu0 %v1698_v13 }
 0x93a   : > { %1583 = vrot.lane.b32.xlu2 %v2931_v58, %s2609_s12 }
 0x946   : > { %1740 = vrot.lane.b32.xlu0 %v2927_v21, %s2610_s13  ;;  %v1552_v21 = vsub.f32 %v3194_v42, %v1548_v23 }
 0x948   : > { %v1559_v32 = vmul.f32 1.442695, %v1552_v21 }
 0x94e   : > { %v1703_v14 = vpop.xlane.xlu1 %1702 }
 0x94f   : > { %v1707_v22 = vsub.f32 %v1689_v60, %v1703_v14 }
 0x951   : > { %v1714_v6 = vmul.f32 1.442695, %v1707_v22  ;;  %v2251_v22 = vld [vmem:[#allocation2 + $0x38] sm:$0xff] }
 0x953   : > { %2418 = vpow2.f32 %v1714_v6 }
 0x959   : > { %v3224_v16 = vpop.eup %2418 }
 0x95a   : > { %v1725_v17 = vsel %vm614_vm1, %v3224_v16, 0.0 }
 0x95b   : > { %1726 = vadd.xlane.f32.xlu1 %v1725_v17 }
 0x966   : > { %v1586_v19 = vpop.permute.xlu1 %1585 }
 0x967   : > { %1601 = vmatpush.bf16.msrb.mxu1 %v1586_v19 }
 0x98d   : > { %v1563_v24 = vpop.xlane.xlu2 %1562 }
 0x98e   : > { %2420 = vrcp.f32 %v1563_v24 }
 0x994   : > { %v2421_v31 = vpop.eup %2420 }
 0x995   : > { %v1697_v25 = vpop.xlane.xlu2 %1696  ;;  %v1566_v26 = vpop.xlane.xlu0 %1565  ;;  %v1577_v29 = vmul.f32 %v2421_v31, %v2413_v1 }
 0x996   : > { %v1705_v27 = vsub.f32 %v1684_v57, %v1697_v25  ;;  %2422 = vrcp.f32 %v1566_v26 }
 0x998   : > { %v1710_v28 = vmul.f32 1.442695, %v1705_v27 }
 0x99a   : > { %2424 = vpow2.f32 %v1710_v28 }
 0x99b   : > { %2426 = vpow2.f32 %v1559_v32  ;;  %v2313_v32 = vld [vmem:[#allocation4] ss:$0 sm:$0xff] }
 0x99c   : > { %v2423_v30 = vpop.eup %2422 }
 0x99d   : > { %v1578_v37 = vmul.f32 %v2423_v30, %v2415_v7  ;;  %v1584_v46 = vpop.permute.xlu2 %1583  ;;  %v1694_v34 = vpop.xlane.xlu0 %1693 }
 0x99e   : > { %v1704_v38 = vsub.f32 %v3202_v55, %v1694_v34  ;;  %1602 = vmatpush.bf16.msrb.mxu1 %v1584_v46  ;;  %v1569_v57 = vpop.xlane.xlu1 %1568 }
 0x99f   : > { %v1581_v40 = vpack.c.bf16 %v1578_v37, %v1577_v29  ;;  %v2454_v29 = vld [vmem:[%s2803_s23] sm:$0xff] }
 0x9a0   : > { %v2425_v43 = vpop.eup %2424  ;;  %v1708_v11 = vmul.f32 1.442695, %v1704_v38 }
 0x9a1   : > { %2198 = vmatmul.msk.bf16.vlgmr.msrb.gmra.mxu1 %vm614_vm1, %v1581_v40  ;;  %v1719_v44 = vsel %vm614_vm1, %v2425_v43, 0.0  ;;  %v2427_v45 = vpop.eup %2426 }
 0x9a2   : > { %2428 = vpow2.f32 %v1708_v11  ;;  %1720 = vadd.xlane.f32.xlu0 %v1719_v44  ;;  %v1570_v47 = vsel %vm614_vm1, %v2427_v45, 0.0  ;;  %1792 = vmatpush.bf16.msra.mxu1 %v2251_v22  ;;  %v2455_v11 = vld [vmem:[%s2803_s23 + $0x8] sm:$0xff] }
 0x9a5   : > { %v1700_v15 = vpop.xlane.xlu0 %1699 }
 0x9a6   : > { %v1706_v20 = vsub.f32 %v3204_v59, %v1700_v15  ;;  %v2456_v15 = vld [vmem:[%s2803_s23 + $0x10] sm:$0xff] }
 0x9a8   : > { %v2429_v36 = vpop.eup %2428  ;;  %v1712_v42 = vmul.f32 1.442695, %v1706_v20 }
 0x9a9   : > { %v1716_v5 = vsel %vm614_vm1, %v2429_v36, 0.0 }
 0x9aa   : > { %1571 = vadd.xlane.f32.xlu0 %v1570_v47  ;;  %1717 = vadd.xlane.f32.xlu2 %v1716_v5  ;;  %2430 = vpow2.f32 %v1712_v42 }
 0x9b0   : > { %v2431_v48 = vpop.eup %2430 }
 0x9b1   : > { %v1722_v35 = vsel %vm614_vm1, %v2431_v48, 0.0 }
 0x9b8   : > { %v1741_v12 = vpop.permute.xlu0 %1740 }
 0x9b9   : > { %1756 = vmatpush.bf16.msra.mxu0 %v1741_v12 }
 0x9c2   : > { %1738 = vrot.lane.b32.xlu2 %v2931_v58, %s2610_s13 }
 0x9ce   : > { %v1727_v51 = vpop.xlane.xlu1 %1726 }
 0x9eb   : > { %1723 = vadd.xlane.f32.xlu2 %v1722_v35 }
 0xa15   : > { %v1721_v55 = vpop.xlane.xlu0 %1720 }
 0xa16   : > { %2432 = vrcp.f32 %v1721_v55 }
 0xa17   : > { %2434 = vrcp.f32 %v1569_v57 }
 0xa1c   : > { %v2433_v58 = vpop.eup %2432 }
 0xa1d   : > { %v1718_v60 = vpop.xlane.xlu2 %1717  ;;  %v1572_v61 = vpop.xlane.xlu0 %1571  ;;  %v1733_v52 = vmul.f32 %v2433_v58, %v2425_v43 }
 0xa1e   : > { %2436 = vrcp.f32 %v1718_v60  ;;  %v1604_v63 = vpop.f32.mrf.mxu1  ;;  %v2435_v18 = vpop.eup %2434  ;;  %v2611_v60 = vmov 128.0  }
 0xa1f   : > { %2438 = vrcp.f32 %v1572_v61  ;;  %v1579_v53 = vmul.f32 %v2435_v18, %v3212_v9 }
 0xa20   : > { %2440 = vrcp.f32 %v1727_v51 }
 0xa24   : > { %v2437_v59 = vpop.eup %2436 }
 0xa25   : > { %v2439_v62 = vpop.eup %2438  ;;  %v1732_v0 = vmul.f32 %v2437_v59, %v2429_v36  ;;  %v1739_v1 = vpop.permute.xlu2 %1738 }
 0xa26   : > { %v1606_v2 = vpop.f32.mrf.mxu1  ;;  %1757 = vmatpush.bf16.msra.mxu0 %v1739_v1  ;;  %v1580_v3 = vmul.f32 %v2439_v62, %v2427_v45  ;;  %v2441_v4 = vpop.eup %2440 }
 0xa27   : > { %v1736_v56 = vpack.c.bf16 %v1733_v52, %v1732_v0  ;;  %v1614_v7 = vpack.c.bf16 %v1606_v2, %v1604_v63  ;;  %v1735_v13 = vmul.f32 %v2441_v4, %v3224_v16 }
 0xa28   : > { %v1582_v54 = vpack.c.bf16 %v1580_v3, %v1579_v53 }
 0xa29   : > { %2204 = vmatmul.msk.bf16.vlgmr.msra.gmra.mxu2 %vm582_vm0, %v1614_v7  ;;  %2208 = vmatmul.msk.bf16.vlgmr.msra.gmra.mxu0 %vm614_vm1, %v1736_v56 }
 0xa2a   : > { %2199 = vmatmul.msk.bf16.gmra.mxu1 %vm614_vm1, %v1582_v54 }
 0xa5e   : > { %v1724_v8 = vpop.xlane.xlu2 %1723 }
 0xa5f   : > { %2442 = vrcp.f32 %v1724_v8 }
 0xa60   : > { %2444 = vrcp.f32 %v2611_v60 }
 0xa65   : > { %v2443_v10 = vpop.eup %2442 }
 0xa66   : > { %v1734_v14 = vmul.f32 %v2443_v10, %v2431_v48  ;;  %v2445_v61 = vpop.eup %2444 }
 0xa67   : > { %v1829_v63 = vmul.f32 128.0, %v2445_v61  ;;  %vm1833_vm2 = vweird.f32 %v2445_v61 }
 0xa68   : > { %v1737_v9 = vpack.c.bf16 %v1735_v13, %v1734_v14 }
 0xa6a   : > { %2209 = vmatmul.msk.bf16.gmra.mxu0 %vm614_vm1, %v1737_v9 }
 0xaa6   : > { %v1759_v6 = vpop.f32.mrf.mxu0 }
 0xaa7   : > { %v1609_v17 = vpop.f32.mrf.mxu1 }
 0xaac   : > { %v1639_v21 = vpop.f32.mrf.mxu2 }
 0xaad   : > { %v1649_v28 = vadd.f32 %v1639_v21, %v3184_v33 }
 0xaae   : > { %v1761_v19 = vpop.f32.mrf.mxu0 }
 0xaaf   : > { %v1611_v23 = vpop.f32.mrf.mxu1  ;;  %v1769_v24 = vpack.c.bf16 %v1761_v19, %v1759_v6 }
 0xab0   : > { %v1615_v25 = vpack.c.bf16 %v1611_v23, %v1609_v17 }
 0xab1   : > { %2214 = vmatmul.msk.bf16.vlgmr.msra.gmra.mxu1 %vm582_vm0, %v1769_v24 }
 0xab2   : > { %2205 = vmatmul.msk.bf16.gmra.mxu2 %vm582_vm0, %v1615_v25 }
 0xab4   : > { %v1641_v46 = vpop.f32.mrf.mxu2 }
 0xab5   : > { %v1650_v38 = vadd.f32 %v1641_v46, %v3187_v41 }
 0xae7   : > { %v1764_v26 = vpop.f32.mrf.mxu0 }
 0xaef   : > { %v1766_v27 = vpop.f32.mrf.mxu0 }
 0xaf0   : > { %v1770_v16 = vpack.c.bf16 %v1766_v27, %v1764_v26 }
 0xaf2   : > { %2215 = vmatmul.msk.bf16.gmra.mxu1 %vm582_vm0, %v1770_v16 }
 0xb2e   : > { %v1794_v31 = vpop.f32.mrf.mxu1 }
 0xb2f   : > { %v1804_v30 = vadd.f32 %v1794_v31, %v1649_v28  ;;  %v2314_v31 = vld [vmem:[#allocation6] ss:$0 sm:$0xff] }
 0xb31   : > { %v1808_v37 = vadd.f32 %v2454_v29, %v1804_v30  ;;  %v2315_v29 = vld [vmem:[#allocation7] ss:$0 sm:$0xff] }
 0xb33   : > { %v1816_v34 = vadd.f32 %v2313_v32, %v1808_v37 }
 0xb35   : > { %1820 = vadd.xlane.f32.xlu1 %v1816_v34  ;;  %v1644_v36 = vpop.f32.mrf.mxu2 }
 0xb36   : > { %v1796_v40 = vpop.f32.mrf.mxu1  ;;  %v1651_v33 = vadd.f32 %v1644_v36, %v3198_v49  ;;  %v1830_v49 = vsub.f32 1.0, %v1829_v63 }
 0xb37   : > { %v1805_v43 = vadd.f32 %v1796_v40, %v1650_v38 }
 0xb38   : > { %v1831_v58 = vmul.f32 %v2445_v61, %v1830_v49 }
 0xb39   : > { %v1809_v44 = vadd.f32 %v2455_v11, %v1805_v43 }
 0xb3a   : > { %v1832_v18 = vadd.f32 %v2445_v61, %v1831_v58 }
 0xb3b   : > { %v1817_v45 = vadd.f32 %v2313_v32, %v1809_v44 }
 0xb3c   : > { %v3255_v59 = vsel %vm1833_vm2, %v2445_v61, %v1832_v18 }
 0xb3d   : > { %1822 = vadd.xlane.f32.xlu0 %v1817_v45  ;;  %v1646_v20 = vpop.f32.mrf.mxu2 }
 0xb3e   : > { %v1652_v48 = vadd.f32 %v1646_v20, %v3200_v50 }
 0xb6f   : > { %v1799_v47 = vpop.f32.mrf.mxu1 }
 0xb70   : > { %v1806_v5 = vadd.f32 %v1799_v47, %v1651_v33 }
 0xb72   : > { %v1810_v12 = vadd.f32 %v2456_v15, %v1806_v5 }
 0xb74   : > { %v1818_v42 = vadd.f32 %v2313_v32, %v1810_v12 }
 0xb76   : > { %1824 = vadd.xlane.f32.xlu1 %v1818_v42 }
 0xb77   : > { %v1801_v41 = vpop.f32.mrf.mxu1 }
 0xb78   : > { %v1807_v35 = vadd.f32 %v1801_v41, %v1652_v48 }
 0xb7a   : > { %v1811_v55 = vadd.f32 %v2457_v39, %v1807_v35 }
 0xb7c   : > { %v1819_v57 = vadd.f32 %v2313_v32, %v1811_v55 }
 0xb7e   : > { %1826 = vadd.xlane.f32.xlu0 %v1819_v57 }
 0xba8   : > { %v1821_v62 = vpop.xlane.xlu1 %1820 }
 0xba9   : > { %v1835_v50 = vmul.f32 %v3255_v59, %v1821_v62 }
 0xbab   : > { %v1839_v52 = vsub.f32 %v1816_v34, %v1835_v50 }
 0xbad   : > { %v1843_v0 = vmul.f32 %v1839_v52, %v1839_v52 }
 0xbaf   : > { %1847 = vadd.xlane.f32.xlu2 %v1843_v0 }
 0xbb0   : > { %v1823_v1 = vpop.xlane.xlu0 %1822 }
 0xbb1   : > { %v1836_v2 = vmul.f32 %v3255_v59, %v1823_v1 }
 0xbb3   : > { %v1840_v53 = vsub.f32 %v1817_v45, %v1836_v2 }
 0xbb5   : > { %v1844_v3 = vmul.f32 %v1840_v53, %v1840_v53 }
 0xbb7   : > { %1849 = vadd.xlane.f32.xlu1 %v1844_v3 }
 0xbe9   : > { %v1825_v56 = vpop.xlane.xlu1 %1824 }
 0xbea   : > { %v1837_v7 = vmul.f32 %v3255_v59, %v1825_v56 }
 0xbec   : > { %v3260_v54 = vsub.f32 %v1818_v42, %v1837_v7 }
 0xbee   : > { %v1845_v51 = vmul.f32 %v3260_v54, %v3260_v54 }
 0xbf0   : > { %1851 = vadd.xlane.f32.xlu0 %v1845_v51 }
 0xbf1   : > { %v1827_v8 = vpop.xlane.xlu0 %1826 }
 0xbf2   : > { %v1838_v4 = vmul.f32 %v3255_v59, %v1827_v8 }
 0xbf4   : > { %v3265_v10 = vsub.f32 %v1819_v57, %v1838_v4 }
 0xbf6   : > { %v1846_v13 = vmul.f32 %v3265_v10, %v3265_v10 }
 0xbf8   : > { %1853 = vadd.xlane.f32.xlu2 %v1846_v13 }
 0xc22   : > { %v1848_v14 = vpop.xlane.xlu2 %1847 }
 0xc23   : > { %v1855_v9 = vmul.f32 %v1848_v14, %v3255_v59 }
 0xc25   : > { %v1859_v22 = vadd.f32 1e-05, %v1855_v9 }
 0xc27   : > { %2446 = vrsqrt.f32 %v1859_v22  ;;  %vm1869_vm4 = vweird.f32 %v1859_v22 }
 0xc2a   : > { %v1850_v6 = vpop.xlane.xlu1 %1849 }
 0xc2b   : > { %v1856_v17 = vmul.f32 %v1850_v6, %v3255_v59 }
 0xc2d   : > { %v2447_v19 = vpop.eup %2446  ;;  %v1860_v23 = vadd.f32 1e-05, %v1856_v17 }
 0xc2e   : > { %v1864_v24 = vmul.f32 %v2447_v19, %v1859_v22  ;;  %vm1870_vm3 = vweird.f32 %v2447_v19 }
 0xc2f   : > { %2448 = vrsqrt.f32 %v1860_v23  ;;  %vm1871_vm5 = vmor %vm1869_vm4, %vm1870_vm3  ;;  %vm1879_vm7 = vweird.f32 %v1860_v23 }
 0xc30   : > { %v1865_v25 = vmul.f32 %v2447_v19, %v1864_v24 }
 0xc32   : > { %v1866_v26 = vmul.f32 0.5, %v1865_v25 }
 0xc34   : > { %v1867_v27 = vsub.f32 1.5, %v1866_v26 }
 0xc35   : > { %v2449_v16 = vpop.eup %2448 }
 0xc36   : > { %v1868_v21 = vmul.f32 %v2447_v19, %v1867_v27  ;;  %v1874_v28 = vmul.f32 %v2449_v16, %v1860_v23  ;;  %vm1880_vm6 = vweird.f32 %v2449_v16 }
 0xc37   : > { %vm1881_vm8 = vmor %vm1879_vm7, %vm1880_vm6 }
 0xc38   : > { %v1872_v30 = vsel %vm1871_vm5, %v2447_v19, %v1868_v21  ;;  %v1875_v32 = vmul.f32 %v2449_v16, %v1874_v28 }
 0xc39   : > { %v1903_v37 = vmul.f32 %v1872_v30, %v1839_v52 }
 0xc3a   : > { %v1876_v46 = vmul.f32 0.5, %v1875_v32 }
 0xc3b   : > { %v1911_v34 = vmul.f32 %v2314_v31, %v1903_v37 }
 0xc3c   : > { %v1877_v38 = vsub.f32 1.5, %v1876_v46 }
 0xc3d   : > { %v1919_v40 = vadd.f32 %v2315_v29, %v1911_v34 }
 0xc3e   : > { %v1878_v43 = vmul.f32 %v2449_v16, %v1877_v38 }
 0xc3f   : > { %1923 = vst [vmem:[%s3276_s15] sm:$0xff] %v1919_v40 }
 0xc40   : > { %v1882_v11 = vsel %vm1881_vm8, %v2449_v16, %v1878_v43 }
 0xc41   : > { %v1904_v44 = vmul.f32 %v1882_v11, %v1840_v53 }
 0xc43   : > { %v1912_v45 = vmul.f32 %v2314_v31, %v1904_v44 }
 0xc45   : > { %v1920_v36 = vadd.f32 %v2315_v29, %v1912_v45 }
 0xc47   : > { %1924 = vst [vmem:[%s3276_s15 + $0x8] sm:$0xff] %v1920_v36 }
 0xc63   : > { %v1852_v33 = vpop.xlane.xlu0 %1851 }
 0xc64   : > { %v1857_v47 = vmul.f32 %v1852_v33, %v3255_v59 }
 0xc66   : > { %v1861_v5 = vadd.f32 1e-05, %v1857_v47 }
 0xc68   : > { %2450 = vrsqrt.f32 %v1861_v5  ;;  %vm1889_vm10 = vweird.f32 %v1861_v5 }
 0xc6b   : > { %v1854_v15 = vpop.xlane.xlu2 %1853 }
 0xc6c   : > { %v1858_v12 = vmul.f32 %v1854_v15, %v3255_v59 }
 0xc6e   : > { %v2451_v20 = vpop.eup %2450  ;;  %v1862_v42 = vadd.f32 1e-05, %v1858_v12 }
 0xc6f   : > { %v1884_v48 = vmul.f32 %v2451_v20, %v1861_v5  ;;  %vm1890_vm9 = vweird.f32 %v2451_v20 }
 0xc70   : > { %2452 = vrsqrt.f32 %v1862_v42  ;;  %vm1891_vm11 = vmor %vm1889_vm10, %vm1890_vm9  ;;  %vm1899_vm13 = vweird.f32 %v1862_v42 }
 0xc71   : > { %v1885_v41 = vmul.f32 %v2451_v20, %v1884_v48 }
 0xc73   : > { %v1886_v35 = vmul.f32 0.5, %v1885_v41 }
 0xc75   : > { %v1887_v39 = vsub.f32 1.5, %v1886_v35 }
 0xc76   : > { %v2453_v55 = vpop.eup %2452 }
 0xc77   : > { %v1888_v57 = vmul.f32 %v2451_v20, %v1887_v39  ;;  %v1894_v60 = vmul.f32 %v2453_v55, %v1862_v42  ;;  %vm1900_vm12 = vweird.f32 %v2453_v55 }
 0xc78   : > { %vm1901_vm14 = vmor %vm1899_vm13, %vm1900_vm12 }
 0xc79   : > { %v1892_v61 = vsel %vm1891_vm11, %v2451_v20, %v1888_v57  ;;  %v1895_v63 = vmul.f32 %v2453_v55, %v1894_v60 }
 0xc7a   : > { %v1905_v49 = vmul.f32 %v1892_v61, %v3260_v54 }
 0xc7b   : > { %v1896_v58 = vmul.f32 0.5, %v1895_v63 }
 0xc7c   : > { %v1913_v18 = vmul.f32 %v2314_v31, %v1905_v49 }
 0xc7d   : > { %v1897_v59 = vsub.f32 1.5, %v1896_v58 }
 0xc7e   : > { %v1921_v62 = vadd.f32 %v2315_v29, %v1913_v18 }
 0xc7f   : > { %v1898_v50 = vmul.f32 %v2453_v55, %v1897_v59 }
 0xc80   : > { %1925 = vst [vmem:[%s3276_s15 + $0x10] sm:$0xff] %v1921_v62 }
 0xc81   : > { %v1902_v52 = vsel %vm1901_vm14, %v2453_v55, %v1898_v50 }
 0xc82   : > { %v1906_v0 = vmul.f32 %v1902_v52, %v3265_v10 }
 0xc84   : > { %v1914_v1 = vmul.f32 %v2314_v31, %v1906_v0 }
 0xc86   : > { %v1922_v2 = vadd.f32 %v2315_v29, %v1914_v1 }
 0xc88   : > { %1926 = vst [vmem:[%s3276_s15 + $0x18] sm:$0xff] %v1922_v2 }
 0xc89 PF: > { %s20_s24 = sadd.s32 1, %s2596_s24  }
 0xc8a   : > { %p17_p7 = scmp.ge.s32.totalorder %s20_s24, 4  }
 0xc8c   :  { %19 = sbr.rel (!%p17_p7) target bundleno = 3 (0x3), region = 95 }
 0xc91   :  { %1948 = vsyncpa [#allocation3], 1 }
 0xc92   :  { %1950 = vsyncpa [#allocation3 + $0x1], 1 }
 0xc93   :  { %1951 = vsyncpa [#allocation5], 1 }
 0xc94   :  { %1952 = vsyncpa [#allocation8], 1 }

// kernel: forward.38
= control target key start
LH: loop header
LB: loop body
LE: loop exit
PB: predicated region body
PF: predicated region fallthrough
CT: control target
= control target key end

     0   :  { %8 = vsyncpa [#allocation3], 0  ;;  %s516_s0 = inlined_call_operand.vmem [shape: f32[64,128], index: 0, kind: input, shape index: {}]   ;;  %s517_s1 = inlined_call_operand.hbm [shape: f32[1,128], index: 1, kind: input, shape index: {}]   ;;  %s518_s2 = inlined_call_operand.hbm [shape: f32[1,128], index: 2, kind: input, shape index: {}]   ;;  %s519_s3 = inlined_call_operand.vmem [shape: f32[64,128], index: 3, kind: output, shape index: {}]  }
   0x1   :  { %s17_s14 = sshll.u32 %s517_s1, 4  ;;  %s18_s14 = int_to_ptr.hbm [resolvable:$true] %s17_s14 }
   0x2   :  { %9 = vsyncpa [#allocation5], 0  ;;  %s330_s15 = smov [#allocation2]   ;;  %s28_s19 = sshll.u32 %s518_s2, 4  ;;  %s29_s19 = int_to_ptr.hbm [resolvable:$true] %s28_s19 }
   0x3   :  { %s19_s16 = sshll.u32 %s330_s15, 4  ;;  %s331_s20 = smov [#allocation4]   ;;  %s20_s16 = int_to_ptr.vmem [resolvable:$true] %s19_s16 }
   0x4   :  { %22 = dma.hbm_to_vmem [thread:$0]  %s18_s14, 16, %s20_s16, [#allocation3]  }
   0x5   :  { %s30_s21 = sshll.u32 %s331_s20, 4  ;;  %s31_s21 = int_to_ptr.vmem [resolvable:$true] %s30_s21 }
   0x6   :  { %33 = dma.hbm_to_vmem [thread:$0]  %s29_s19, 16, %s31_s21, [#allocation5]  }
   0x7   :  { %326 = dma.done.wait [#allocation3], 16  }
   0x8   :  { %327 = vsyncadd [#allocation3], 4294967280 }
   0x9   :  { %328 = dma.done.wait [#allocation5], 16  }
   0xa   :  { %329 = vsyncadd [#allocation5], 4294967280  ;;  %v46_v0 = vld [vmem:[%s516_s0 + $0x20] sm:$0xff]  ;;  %v44_v1 = vld [vmem:[%s516_s0 + $0x10] sm:$0xff]  ;;  %v332_v8 = vmov 128.0  }
   0xb   :  { %v42_v2 = vld [vmem:[%s516_s0] sm:$0xff]  ;;  %58 = vadd.xlane.f32.xlu2 %v46_v0  ;;  %54 = vadd.xlane.f32.xlu1 %v44_v1  ;;  %v47_v3 = vld [vmem:[%s516_s0 + $0x28] sm:$0xff]  ;;  %v45_v4 = vld [vmem:[%s516_s0 + $0x18] sm:$0xff]  ;;  %260 = vrcp.f32 %v332_v8 }
   0xc   :  { %50 = vadd.xlane.f32.xlu0 %v42_v2  ;;  %v43_v5 = vld [vmem:[%s516_s0 + $0x8] sm:$0xff]  ;;  %v49_v6 = vld [vmem:[%s516_s0 + $0x38] sm:$0xff]  ;;  %v48_v7 = vld [vmem:[%s516_s0 + $0x30] sm:$0xff] }
  0x11   :  { %v261_v9 = vpop.eup %260 }
  0x12   :  { %v67_v10 = vmul.f32 128.0, %v261_v9  ;;  %vm71_vm0 = vweird.f32 %v261_v9 }
  0x13   :  { %60 = vadd.xlane.f32.xlu2 %v47_v3  ;;  %56 = vadd.xlane.f32.xlu1 %v45_v4 }
  0x14   :  { %52 = vadd.xlane.f32.xlu0 %v43_v5  ;;  %v68_v11 = vsub.f32 1.0, %v67_v10 }
  0x16   :  { %v69_v12 = vmul.f32 %v261_v9, %v68_v11 }
  0x18   :  { %v70_v13 = vadd.f32 %v261_v9, %v69_v12 }
  0x1a   :  { %v383_v14 = vsel %vm71_vm0, %v261_v9, %v70_v13 }
  0x1b   :  { %64 = vadd.xlane.f32.xlu1 %v49_v6 }
  0x1c   :  { %62 = vadd.xlane.f32.xlu0 %v48_v7 }
  0x7e   :  { %v59_v15 = vpop.xlane.xlu2 %58  ;;  %v55_v16 = vpop.xlane.xlu1 %54 }
  0x7f   :  { %v75_v17 = vmul.f32 %v383_v14, %v55_v16  ;;  %v51_v18 = vpop.xlane.xlu0 %50  ;;  %v77_v32 = vmul.f32 %v383_v14, %v59_v15 }
  0x80   :  { %v73_v19 = vmul.f32 %v383_v14, %v51_v18 }
  0x81   :  { %v387_v20 = vsub.f32 %v44_v1, %v75_v17  ;;  %v411_v37 = vsub.f32 %v46_v0, %v77_v32 }
  0x82   :  { %v389_v21 = vsub.f32 %v42_v2, %v73_v19  ;;  %v440_v19 = vld [vmem:[#allocation2] ss:$0 sm:$0xff] }
  0x83   :  { %v91_v22 = vmul.f32 %v387_v20, %v387_v20  ;;  %v93_v42 = vmul.f32 %v411_v37, %v411_v37 }
  0x84   :  { %v89_v23 = vmul.f32 %v389_v21, %v389_v21 }
  0x85   :  { %101 = vadd.xlane.f32.xlu1 %v91_v22 }
  0x86   :  { %97 = vadd.xlane.f32.xlu2 %v89_v23  ;;  %v61_v24 = vpop.xlane.xlu2 %60  ;;  %v57_v25 = vpop.xlane.xlu1 %56 }
  0x87   :  { %v78_v26 = vmul.f32 %v383_v14, %v61_v24  ;;  %v76_v27 = vmul.f32 %v383_v14, %v57_v25  ;;  %v53_v28 = vpop.xlane.xlu0 %52 }
  0x88   :  { %v74_v29 = vmul.f32 %v383_v14, %v53_v28  ;;  %v447_v28 = vld [vmem:[#allocation4] ss:$0 sm:$0xff] }
  0x89   :  { %v398_v30 = vsub.f32 %v47_v3, %v78_v26  ;;  %v400_v31 = vsub.f32 %v45_v4, %v76_v27 }
  0x8a   :  { %v403_v33 = vsub.f32 %v43_v5, %v74_v29 }
  0x8b   :  { %v94_v34 = vmul.f32 %v398_v30, %v398_v30  ;;  %v92_v35 = vmul.f32 %v400_v31, %v400_v31 }
  0x8c   :  { %v90_v36 = vmul.f32 %v403_v33, %v403_v33 }
  0x8d   :  { %107 = vadd.xlane.f32.xlu1 %v94_v34 }
  0x8e   :  { %103 = vadd.xlane.f32.xlu2 %v92_v35  ;;  %99 = vadd.xlane.f32.xlu0 %v90_v36  ;;  %v65_v39 = vpop.xlane.xlu1 %64 }
  0x8f   :  { %v63_v38 = vpop.xlane.xlu0 %62  ;;  %v80_v43 = vmul.f32 %v383_v14, %v65_v39 }
  0x90   :  { %v79_v40 = vmul.f32 %v383_v14, %v63_v38 }
  0x91   :  { %v421_v45 = vsub.f32 %v49_v6, %v80_v43 }
  0x92   :  { %v414_v41 = vsub.f32 %v48_v7, %v79_v40 }
  0x93   :  { %v96_v46 = vmul.f32 %v421_v45, %v421_v45 }
  0x94   :  { %v95_v44 = vmul.f32 %v414_v41, %v414_v41 }
  0x96   :  { %105 = vadd.xlane.f32.xlu0 %v93_v42  ;;  %109 = vadd.xlane.f32.xlu2 %v95_v44 }
  0x9e   :  { %111 = vadd.xlane.f32.xlu0 %v96_v46 }
  0xf8   :  { %v102_v47 = vpop.xlane.xlu1 %101 }
  0xf9   :  { %v115_v48 = vmul.f32 %v102_v47, %v383_v14  ;;  %v98_v49 = vpop.xlane.xlu2 %97 }
  0xfa   :  { %v113_v50 = vmul.f32 %v98_v49, %v383_v14 }
  0xfb   :  { %v123_v51 = vadd.f32 1e-05, %v115_v48 }
  0xfc   :  { %v121_v52 = vadd.f32 1e-05, %v113_v50 }
  0xfd   :  { %262 = vrsqrt.f32 %v123_v51  ;;  %vm155_vm1 = vweird.f32 %v123_v51 }
  0xfe   :  { %264 = vrsqrt.f32 %v121_v52  ;;  %vm135_vm5 = vweird.f32 %v121_v52 }
 0x100   :  { %v108_v53 = vpop.xlane.xlu1 %107 }
 0x101   :  { %v118_v54 = vmul.f32 %v108_v53, %v383_v14  ;;  %v104_v55 = vpop.xlane.xlu2 %103  ;;  %v100_v56 = vpop.xlane.xlu0 %99 }
 0x102   :  { %v116_v57 = vmul.f32 %v104_v55, %v383_v14  ;;  %v114_v58 = vmul.f32 %v100_v56, %v383_v14 }
 0x103   :  { %v263_v59 = vpop.eup %262  ;;  %v126_v60 = vadd.f32 1e-05, %v118_v54 }
 0x104   :  { %v265_v61 = vpop.eup %264  ;;  %v150_v62 = vmul.f32 %v263_v59, %v123_v51  ;;  %v430_v63 = vadd.f32 1e-05, %v116_v57  ;;  %v432_v0 = vadd.f32 1e-05, %v114_v58  ;;  %vm156_vm2 = vweird.f32 %v263_v59 }
 0x105   :  { %v130_v1 = vmul.f32 %v265_v61, %v121_v52  ;;  %266 = vrsqrt.f32 %v126_v60  ;;  %vm136_vm3 = vweird.f32 %v265_v61  ;;  %vm157_vm4 = vmor %vm155_vm1, %vm156_vm2  ;;  %vm185_vm7 = vweird.f32 %v126_v60 }
 0x106   :  { %v151_v2 = vmul.f32 %v263_v59, %v150_v62  ;;  %268 = vrsqrt.f32 %v430_v63  ;;  %vm137_vm6 = vmor %vm135_vm5, %vm136_vm3  ;;  %vm165_vm9 = vweird.f32 %v430_v63  ;;  %vm145_vm14 = vweird.f32 %v432_v0 }
 0x107   :  { %v131_v3 = vmul.f32 %v265_v61, %v130_v1  ;;  %270 = vrsqrt.f32 %v432_v0 }
 0x108   :  { %v152_v4 = vmul.f32 0.5, %v151_v2 }
 0x109   :  { %v132_v5 = vmul.f32 0.5, %v131_v3  ;;  %v110_v6 = vpop.xlane.xlu2 %109  ;;  %v106_v7 = vpop.xlane.xlu0 %105 }
 0x10a   :  { %v153_v8 = vsub.f32 1.5, %v152_v4  ;;  %v119_v9 = vmul.f32 %v110_v6, %v383_v14  ;;  %v117_v10 = vmul.f32 %v106_v7, %v383_v14 }
 0x10b   :  { %v267_v11 = vpop.eup %266  ;;  %v133_v12 = vsub.f32 1.5, %v132_v5 }
 0x10c   :  { %v269_v13 = vpop.eup %268  ;;  %v154_v15 = vmul.f32 %v263_v59, %v153_v8  ;;  %v180_v16 = vmul.f32 %v267_v11, %v126_v60  ;;  %v438_v17 = vadd.f32 1e-05, %v119_v9  ;;  %v444_v24 = vadd.f32 1e-05, %v117_v10 }
 0x10d   :  { %v271_v18 = vpop.eup %270  ;;  %v134_v22 = vmul.f32 %v265_v61, %v133_v12  ;;  %v160_v23 = vmul.f32 %v269_v13, %v430_v63  ;;  %vm186_vm8 = vweird.f32 %v267_v11  ;;  %vm166_vm11 = vweird.f32 %v269_v13 }
 0x10e   :  { %v158_v25 = vsel %vm157_vm4, %v263_v59, %v154_v15  ;;  %v181_v26 = vmul.f32 %v267_v11, %v180_v16  ;;  %v140_v27 = vmul.f32 %v271_v18, %v432_v0  ;;  %272 = vrsqrt.f32 %v438_v17  ;;  %vm459_vm10 = vmor %vm185_vm7, %vm186_vm8 }
 0x10f   :  { %v211_v29 = vmul.f32 %v158_v25, %v387_v20  ;;  %v138_v32 = vsel %vm137_vm6, %v265_v61, %v134_v22  ;;  %v161_v34 = vmul.f32 %v269_v13, %v160_v23  ;;  %274 = vrsqrt.f32 %v444_v24  ;;  %vm167_vm13 = vmor %vm165_vm9, %vm166_vm11 }
 0x110   :  { %v209_v35 = vmul.f32 %v138_v32, %v389_v21  ;;  %v182_v36 = vmul.f32 0.5, %v181_v26  ;;  %v141_v38 = vmul.f32 %v271_v18, %v140_v27  ;;  %vm146_vm12 = vweird.f32 %v271_v18 }
 0x111   :  { %v223_v39 = vmul.f32 %v440_v19, %v211_v29  ;;  %v162_v40 = vmul.f32 0.5, %v161_v34  ;;  %v112_v42 = vpop.xlane.xlu0 %111  ;;  %vm147_vm15 = vmor %vm145_vm14, %vm146_vm12  ;;  %vm195_vm0 = vweird.f32 %v438_v17  ;;  %vm175_vm4 = vweird.f32 %v444_v24 }
 0x112   :  { %v221_v43 = vmul.f32 %v440_v19, %v209_v35  ;;  %v183_v20 = vsub.f32 1.5, %v182_v36  ;;  %v142_v44 = vmul.f32 0.5, %v141_v38  ;;  %v120_v46 = vmul.f32 %v112_v42, %v383_v14 }
 0x113   :  { %v235_v47 = vadd.f32 %v447_v28, %v223_v39  ;;  %v163_v48 = vsub.f32 1.5, %v162_v40 }
 0x114   :  { %v233_v49 = vadd.f32 %v447_v28, %v221_v43  ;;  %v184_v50 = vmul.f32 %v267_v11, %v183_v20  ;;  %v143_v51 = vsub.f32 1.5, %v142_v44  ;;  %v128_v52 = vadd.f32 1e-05, %v120_v46  ;;  %v273_v53 = vpop.eup %272 }
 0x115   :  { %243 = vst [vmem:[%s519_s3 + $0x10] sm:$0xff] %v235_v47  ;;  %v164_v14 = vmul.f32 %v269_v13, %v163_v48  ;;  %v190_v56 = vmul.f32 %v273_v53, %v438_v17  ;;  %v275_v57 = vpop.eup %274  ;;  %vm196_vm1 = vweird.f32 %v273_v53 }
 0x116   :  { %241 = vst [vmem:[%s519_s3] sm:$0xff] %v233_v49  ;;  %v188_v54 = vsel %vm459_vm10, %v267_v11, %v184_v50  ;;  %v144_v55 = vmul.f32 %v271_v18, %v143_v51  ;;  %276 = vrsqrt.f32 %v128_v52  ;;  %v170_v1 = vmul.f32 %v275_v57, %v444_v24  ;;  %vm197_vm3 = vmor %vm195_vm0, %vm196_vm1 }
 0x117   :  { %v214_v58 = vmul.f32 %v188_v54, %v398_v30  ;;  %v168_v59 = vsel %vm167_vm13, %v269_v13, %v164_v14  ;;  %v191_v62 = vmul.f32 %v273_v53, %v190_v56  ;;  %vm176_vm2 = vweird.f32 %v275_v57 }
 0x118   :  { %v212_v60 = vmul.f32 %v168_v59, %v400_v31  ;;  %v148_v61 = vsel %vm147_vm15, %v271_v18, %v144_v55  ;;  %v171_v4 = vmul.f32 %v275_v57, %v170_v1  ;;  %vm177_vm5 = vmor %vm175_vm4, %vm176_vm2  ;;  %vm205_vm7 = vweird.f32 %v128_v52 }
 0x119   :  { %v226_v63 = vmul.f32 %v440_v19, %v214_v58  ;;  %v210_v2 = vmul.f32 %v148_v61, %v403_v33  ;;  %v192_v3 = vmul.f32 0.5, %v191_v62 }
 0x11a   :  { %v224_v0 = vmul.f32 %v440_v19, %v212_v60  ;;  %v172_v7 = vmul.f32 0.5, %v171_v4 }
 0x11b   :  { %v238_v30 = vadd.f32 %v447_v28, %v226_v63  ;;  %v222_v5 = vmul.f32 %v440_v19, %v210_v2  ;;  %v193_v6 = vsub.f32 1.5, %v192_v3 }
 0x11c   :  { %v236_v31 = vadd.f32 %v447_v28, %v224_v0  ;;  %v277_v8 = vpop.eup %276  ;;  %v173_v10 = vsub.f32 1.5, %v172_v7 }
 0x11d   :  { %246 = vst [vmem:[%s519_s3 + $0x28] sm:$0xff] %v238_v30  ;;  %v234_v33 = vadd.f32 %v447_v28, %v222_v5  ;;  %v194_v9 = vmul.f32 %v273_v53, %v193_v6  ;;  %v200_v11 = vmul.f32 %v277_v8, %v128_v52  ;;  %vm206_vm6 = vweird.f32 %v277_v8 }
 0x11e   :  { %244 = vst [vmem:[%s519_s3 + $0x18] sm:$0xff] %v236_v31  ;;  %v174_v13 = vmul.f32 %v275_v57, %v173_v10  ;;  %vm207_vm8 = vmor %vm205_vm7, %vm206_vm6 }
 0x11f   :  { %242 = vst [vmem:[%s519_s3 + $0x8] sm:$0xff] %v234_v33  ;;  %v198_v12 = vsel %vm197_vm3, %v273_v53, %v194_v9  ;;  %v201_v15 = vmul.f32 %v277_v8, %v200_v11 }
 0x120   :  { %v215_v16 = vmul.f32 %v198_v12, %v414_v41  ;;  %v178_v17 = vsel %vm177_vm5, %v275_v57, %v174_v13 }
 0x121   :  { %v202_v18 = vmul.f32 0.5, %v201_v15  ;;  %v213_v23 = vmul.f32 %v178_v17, %v411_v37 }
 0x122   :  { %v227_v22 = vmul.f32 %v440_v19, %v215_v16 }
 0x123   :  { %v203_v25 = vsub.f32 1.5, %v202_v18  ;;  %v225_v27 = vmul.f32 %v440_v19, %v213_v23 }
 0x124   :  { %v239_v26 = vadd.f32 %v447_v28, %v227_v22 }
 0x125   :  { %v204_v29 = vmul.f32 %v277_v8, %v203_v25  ;;  %v237_v41 = vadd.f32 %v447_v28, %v225_v27 }
 0x126   :  { %247 = vst [vmem:[%s519_s3 + $0x30] sm:$0xff] %v239_v26 }
 0x127   :  { %v208_v24 = vsel %vm207_vm8, %v277_v8, %v204_v29  ;;  %245 = vst [vmem:[%s519_s3 + $0x20] sm:$0xff] %v237_v41 }
 0x128   :  { %v216_v37 = vmul.f32 %v208_v24, %v421_v45 }
 0x12a   :  { %v228_v32 = vmul.f32 %v440_v19, %v216_v37 }
 0x12c   :  { %v240_v34 = vadd.f32 %v447_v28, %v228_v32 }
 0x12e   :  { %248 = vst [vmem:[%s519_s3 + $0x38] sm:$0xff] %v240_v34 }
 0x12f   :  { %253 = vsyncpa [#allocation3], 1 }
 0x130   :  { %254 = vsyncpa [#allocation5], 1 }

// kernel: forward.40
= control target key start
LH: loop header
LB: loop body
LE: loop exit
PB: predicated region body
PF: predicated region fallthrough
CT: control target
= control target key end

     0   :  { %15 = vsyncpa [#allocation3], 0  ;;  %s3601_s0 = inlined_call_operand.vmem [shape: f32[2,32,128], index: 0, kind: input, shape index: {}]   ;;  %s3602_s1 = inlined_call_operand.vmem [shape: f32[2,32,128], index: 1, kind: input, shape index: {}]   ;;  %s3603_s2 = inlined_call_operand.hbm [shape: bf16[128,128], index: 2, kind: input, shape index: {}]   ;;  %s3604_s3 = inlined_call_operand.hbm [shape: f32[1,128], index: 3, kind: input, shape index: {}]   ;;  %s3605_s4 = inlined_call_operand.vmem [shape: bf16[128,256], index: 4, kind: input, shape index: {}]   ;;  %s3606_s5 = inlined_call_operand.hbm [shape: f32[1,256], index: 5, kind: input, shape index: {}]   ;;  %s3607_s6 = inlined_call_operand.hbm [shape: bf16[128,128], index: 6, kind: input, shape index: {}]   ;;  %s3608_s7 = inlined_call_operand.hbm [shape: f32[1,128], index: 7, kind: input, shape index: {}]   ;;  %s3609_s8 = inlined_call_operand.hbm [shape: f32[1,128], index: 8, kind: input, shape index: {}]   ;;  %s3610_s9 = inlined_call_operand.hbm [shape: f32[1,128], index: 9, kind: input, shape index: {}]   ;;  %s3611_s10 = inlined_call_operand.vmem [shape: f32[2,32,128], index: 10, kind: output, shape index: {}]  }
   0x1   :  { %16 = vsyncpa [#allocation5], 0 }
   0x2   :  { %17 = vsyncpa [#allocation8], 0 }
   0x3   :  { %18 = vsyncpa [#allocation11], 0  ;;  %s2998_s13 = smov 0  }
   0x4 LB: > { %s301_s16 = sshll.u32 %s3604_s3, 4  ;;  %s3007_s17 = sadd.s32 4294967295, %s2924_s13   ;;  %s2924_s13 = sphi %s2998_s13, %s24_s13   ;;  %s302_s16 = int_to_ptr.hbm [resolvable:$true] %s301_s16 }
   0x5   : > { %p2219_p0 = scmp.ge.s32.totalorder %s2924_s13, 1  ;;  %p275_p1 = scmp.lt.s32.totalorder %s2924_s13, 3 }
   0x6   : > { %p2507_p2 = scmp.eq.s32.totalorder %s3007_s17, 0  ;;  %s2926_s19 = smov [#allocation4]  }
   0x7   : > { %p3012_p3 = pnand %p2219_p0, %p275_p1  ;;  %s303_s20 = sshll.u32 %s2926_s19, 4  ;;  %s304_s20 = int_to_ptr.vmem [resolvable:$true] %s303_s20 }
   0x8   : > { %s327_s23 = sshll.u32 %s3607_s6, 4  ;;  %s2927_s25 = smov [#allocation7]   ;;  %s328_s23 = int_to_ptr.hbm [resolvable:$true] %s327_s23 }
   0x9   : > { %p2485_p4 = pneg %p3012_p3  ;;  %s329_s26 = sshll.u32 %s2927_s25, 4  ;;  %s330_s26 = int_to_ptr.vmem [resolvable:$true] %s329_s26 }
   0xa   : > { %s354_s29 = sshll.u32 %s3609_s8, 4  ;;  %s2928_s30 = smov 64   ;;  %s355_s29 = int_to_ptr.hbm [resolvable:$true] %s354_s29 }
   0xb   : > { %p3023_p5 = pnand %p2507_p2, %p2485_p4  ;;  %s2929_s11 = smov 4  }
   0xc   : > { %s2930_s12 = smov [#allocation10]   ;;  %s286_s21 = sshll.u32 %s3603_s2, 4  ;;  %s287_s21 = int_to_ptr.hbm [resolvable:$true] %s286_s21 }
   0xd   : > { %2491 = dma.hbm_to_vmem [thread:$0]  (!%p3023_p5), %s302_s16, 16, %s304_s20, [#allocation5]  }
   0xe   : > { %2497 = dma.hbm_to_vmem [thread:$0]  (!%p3023_p5), %s328_s23, 1024, %s330_s26, [#allocation8], %s2928_s30, %s2928_s30, %s2929_s11  }
   0xf   : > { %s356_s14 = sshll.u32 %s2930_s12, 4  ;;  %s316_s16 = sshll.u32 %s3606_s5, 4  ;;  %s357_s14 = int_to_ptr.vmem [resolvable:$true] %s356_s14  ;;  %s317_s16 = int_to_ptr.hbm [resolvable:$true] %s316_s16 }
  0x10   : > { %2503 = dma.hbm_to_vmem [thread:$0]  (!%p3023_p5), %s355_s29, 16, %s357_s14, [#allocation11]  }
  0x11   : > { %s2931_s20 = smov [#allocation2]   ;;  %s2932_s23 = smov [#allocation6]  }
  0x12   : > { %s288_s27 = sshll.u32 %s2931_s20, 4  ;;  %s318_s26 = sshll.u32 %s2932_s23, 4  ;;  %s289_s27 = int_to_ptr.vmem [resolvable:$true] %s288_s27  ;;  %s319_s26 = int_to_ptr.vmem [resolvable:$true] %s318_s26 }
  0x13   : > { %2488 = dma.hbm_to_vmem [thread:$0]  (!%p3023_p5), %s287_s21, 1024, %s289_s27, [#allocation3], %s2928_s30, %s2928_s30, %s2929_s11  }
  0x14   : > { %s342_s15 = sshll.u32 %s3608_s7, 4  ;;  %s366_s19 = sshll.u32 %s3610_s9, 4  ;;  %s343_s15 = int_to_ptr.hbm [resolvable:$true] %s342_s15  ;;  %s367_s19 = int_to_ptr.hbm [resolvable:$true] %s366_s19 }
  0x15   : > { %2494 = dma.hbm_to_vmem [thread:$0]  (!%p3023_p5), %s317_s16, 32, %s319_s26, [#allocation5]  }
  0x16   : > { %s2933_s22 = smov [#allocation9]   ;;  %s2934_s30 = smov [#allocation12]  }
  0x17   : > { %s344_s25 = sshll.u32 %s2933_s22, 4  ;;  %s368_s11 = sshll.u32 %s2934_s30, 4  ;;  %s345_s25 = int_to_ptr.vmem [resolvable:$true] %s344_s25  ;;  %s369_s11 = int_to_ptr.vmem [resolvable:$true] %s368_s11 }
  0x18   : > { %2500 = dma.hbm_to_vmem [thread:$0]  (!%p3023_p5), %s343_s15, 16, %s345_s25, [#allocation8]  }
  0x19   : > { %2506 = dma.hbm_to_vmem [thread:$0]  (!%p3023_p5), %s367_s19, 16, %s369_s11, [#allocation11]  }
  0x1a   : > { %397 = sbr.rel (%p3012_p3) target bundleno = 3221 (0xc95), region = 60 }
  0x1f   : > { %2907 = dma.done.wait (%p2507_p2), [#allocation3], 1024  }
  0x20   : > { %2909 = vsyncadd (%p2507_p2), [#allocation3], 4294966272 }
  0x21   : > { %2911 = dma.done.wait (%p2507_p2), [#allocation5], 48  }
  0x22   : > { %2913 = vsyncadd (%p2507_p2), [#allocation5], 4294967248 }
  0x23   : > { %2915 = dma.done.wait (%p2507_p2), [#allocation8], 1040  }
  0x24   : > { %2917 = vsyncadd (%p2507_p2), [#allocation8], 4294966256 }
  0x25   : > { %2919 = dma.done.wait (%p2507_p2), [#allocation11], 32  }
  0x26   : > { %2921 = vsyncadd (%p2507_p2), [#allocation11], 4294967264  ;;  %v2332_v0 = vld [vmem:[%s3605_s4 + $0x70] sm:$0xf]  ;;  %v2446_v1 = vld [vmem:[%s3605_s4 + $0x74] sm:$0xf0] }
  0x27   : > { %v2324_v2 = vld [vmem:[%s3605_s4 + $0x60] sm:$0xf]  ;;  %v2333_v3 = vor.u32 %v2446_v1, %v2332_v0  ;;  %v2444_v4 = vld [vmem:[%s3605_s4 + $0x64] sm:$0xf0]  ;;  %v2316_v6 = vld [vmem:[%s3605_s4 + $0x50] sm:$0xf] }
  0x28   : > { %v2325_v5 = vor.u32 %v2444_v4, %v2324_v2  ;;  %v2442_v7 = vld [vmem:[%s3605_s4 + $0x54] sm:$0xf0]  ;;  %v2429_v9 = vld [vmem:[#allocation2 + $0x30] sm:$0xff]  ;;  %v2308_v11 = vld [vmem:[%s3605_s4 + $0x40] sm:$0xf]  ;;  %p471_p6 = scmp.lt.s32.totalorder %s3007_s17, 1 }
  0x29   : > { %688 = vmatpush.bf16.msra.mxu1 %v2333_v3  ;;  %v2430_v8 = vld [vmem:[#allocation2 + $0x38] sm:$0xff]  ;;  %v2317_v10 = vor.u32 %v2442_v7, %v2316_v6  ;;  %v2440_v12 = vld [vmem:[%s3605_s4 + $0x44] sm:$0xf0]  ;;  %v2300_v15 = vld [vmem:[%s3605_s4 + $0x30] sm:$0xf]  ;;  %vm736_vm0 = vcmask 130048  }
  0x2a   : > { %565 = vmatpush.bf16.msra.mxu0 %v2430_v8  ;;  %v2428_v13 = vld [vmem:[#allocation2 + $0x28] sm:$0xff]  ;;  %v2309_v14 = vor.u32 %v2440_v12, %v2308_v11  ;;  %v2438_v16 = vld [vmem:[%s3605_s4 + $0x34] sm:$0xf0]  ;;  %v2427_v17 = vld [vmem:[#allocation2 + $0x20] sm:$0xff]  ;;  %s3615_s17 = smov (!%p471_p6, %s3007_s17), 1  ;;  %vm768_vm1 = vcmask 261120  }
  0x2b   : > { %v2301_v18 = vor.u32 %v2438_v16, %v2300_v15  ;;  %v2292_v19 = vld [vmem:[%s3605_s4 + $0x20] sm:$0xf]  ;;  %v2436_v20 = vld [vmem:[%s3605_s4 + $0x24] sm:$0xf0]  ;;  %v2426_v21 = vld [vmem:[#allocation2 + $0x18] sm:$0xff]  ;;  %s3118_s15 = sshll.u32 %s3615_s17, 5 }
  0x2c   : > { %v2293_v22 = vor.u32 %v2436_v20, %v2292_v19  ;;  %v2284_v23 = vld [vmem:[%s3605_s4 + $0x10] sm:$0xf]  ;;  %v2434_v24 = vld [vmem:[%s3605_s4 + $0x14] sm:$0xf0]  ;;  %v2276_v27 = vld [vmem:[%s3605_s4] sm:$0xf]  ;;  %s480_s11 = scalar_lea.vmem %s3602_s1, %s3118_s15  ;;  %s3134_s24 = scalar_lea.vmem %s3601_s0, %s3118_s15 }
  0x2d   : > { %689 = vmatpush.bf16.msra.mxu1 %v2325_v5  ;;  %v2425_v25 = vld [vmem:[#allocation2 + $0x10] sm:$0xff]  ;;  %v2285_v26 = vor.u32 %v2434_v24, %v2284_v23  ;;  %v2432_v28 = vld [vmem:[%s3605_s4 + $0x4] sm:$0xf0]  ;;  %v491_v31 = vld [vmem:[%s480_s11] sm:$0xff]  ;;  %s2935_s17 = smov 112   ;;  %s2936_s18 = smov 96  }
  0x2e   : > { %566 = vmatpush.bf16.msra.mxu0 %v2429_v9  ;;  %v2424_v29 = vld [vmem:[#allocation2 + $0x8] sm:$0xff]  ;;  %v2277_v30 = vor.u32 %v2432_v28, %v2276_v27  ;;  %v2423_v34 = vld [vmem:[#allocation2] sm:$0xff]  ;;  %v493_v38 = vld [vmem:[%s480_s11 + $0x10] sm:$0xff]  ;;  %s2937_s21 = smov 80   ;;  %s2938_s16 = smov 64  }
  0x2f   : > { %v492_v32 = vld [vmem:[%s480_s11 + $0x8] sm:$0xff]  ;;  %v487_v35 = vld [vmem:[%s3134_s24] sm:$0xff]  ;;  %v494_v39 = vld [vmem:[%s480_s11 + $0x18] sm:$0xff]  ;;  %s2939_s20 = smov 48   ;;  %s2940_s27 = smov 32  }
  0x30   : > { %v3136_v33 = vpack.c.bf16 %v492_v32, %v491_v31  ;;  %v488_v36 = vld [vmem:[%s3134_s24 + $0x8] sm:$0xff]  ;;  %v3141_v40 = vpack.c.bf16 %v494_v39, %v493_v38  ;;  %v489_v41 = vld [vmem:[%s3134_s24 + $0x10] sm:$0xff]  ;;  %v490_v42 = vld [vmem:[%s3134_s24 + $0x18] sm:$0xff]  ;;  %s2941_s23 = smov 16   ;;  %s3588_s28 = scalar_lea.vmem %s3611_s10, %s3118_s15 }
  0x31   : > { %690 = vmatpush.bf16.msra.mxu1 %v2317_v10  ;;  %v495_v37 = vpack.c.bf16 %v488_v36, %v487_v35  ;;  %v496_v43 = vpack.c.bf16 %v490_v42, %v489_v41  ;;  %v3146_v48 = vld [vmem:[#allocation6] sm:$0x3]  ;;  %v2546_v58 = vld [vmem:[#allocation4] ss:$0 sm:$0xff]  ;;  %v2445_v9 = vld [vmem:[%s3605_s4 + $0x74] sm:$0xf] }
  0x32   : > { %567 = vmatpush.bf16.msra.mxu0 %v2428_v13  ;;  %v604_v49 = vperm.slane %v3146_v48, 0  ;;  %v2334_v10 = vld [vmem:[%s3605_s4 + $0x78] sm:$0xf0]  ;;  %v2443_v11 = vld [vmem:[%s3605_s4 + $0x64] sm:$0xf] }
  0x33   : > { %v2337_v12 = vor.u32 %v2445_v9, %v2334_v10  ;;  %v2326_v13 = vld [vmem:[%s3605_s4 + $0x68] sm:$0xf0]  ;;  %v2441_v15 = vld [vmem:[%s3605_s4 + $0x54] sm:$0xf]  ;;  %v2318_v16 = vld [vmem:[%s3605_s4 + $0x58] sm:$0xf0] }
  0x34   : > { %v2321_v19 = vor.u32 %v2441_v15, %v2318_v16  ;;  %v2439_v20 = vld [vmem:[%s3605_s4 + $0x44] sm:$0xf]  ;;  %v2437_v23 = vld [vmem:[%s3605_s4 + $0x34] sm:$0xf]  ;;  %v2302_v24 = vld [vmem:[%s3605_s4 + $0x38] sm:$0xf0] }
  0x35   : > { %691 = vmatpush.bf16.msra.mxu1 %v2309_v14  ;;  %707 = vmatpush.bf16.msra.mxu2 %v2337_v12  ;;  %v2329_v14 = vor.u32 %v2443_v11, %v2326_v13  ;;  %v2305_v27 = vor.u32 %v2437_v23, %v2302_v24  ;;  %v2435_v28 = vld [vmem:[%s3605_s4 + $0x24] sm:$0xf]  ;;  %v2433_v31 = vld [vmem:[%s3605_s4 + $0x14] sm:$0xf]  ;;  %v2286_v32 = vld [vmem:[%s3605_s4 + $0x18] sm:$0xf0] }
  0x36   : > { %568 = vmatpush.bf16.msra.mxu0 %v2427_v17  ;;  %v2289_v36 = vor.u32 %v2433_v31, %v2286_v32  ;;  %v2278_v38 = vld [vmem:[%s3605_s4 + $0x8] sm:$0xf0]  ;;  %v2447_v12 = vld [vmem:[#allocation7] sm:$0xff] }
  0x39   : > { %692 = vmatpush.bf16.msra.mxu1 %v2301_v18  ;;  %708 = vmatpush.bf16.msra.mxu2 %v2329_v14 }
  0x3a   : > { %569 = vmatpush.bf16.msra.mxu0 %v2426_v21  ;;  %v2310_v21 = vld [vmem:[%s3605_s4 + $0x48] sm:$0xf0] }
  0x3d   : > { %693 = vmatpush.bf16.msra.mxu1 %v2293_v22  ;;  %709 = vmatpush.bf16.msra.mxu2 %v2321_v19  ;;  %v2313_v22 = vor.u32 %v2439_v20, %v2310_v21 }
  0x3e   : > { %570 = vmatpush.bf16.msra.mxu0 %v2425_v25 }
  0x41   : > { %694 = vmatpush.bf16.msra.mxu1 %v2285_v26  ;;  %710 = vmatpush.bf16.msra.mxu2 %v2313_v22 }
  0x42   : > { %571 = vmatpush.bf16.msra.mxu0 %v2424_v29  ;;  %v2294_v29 = vld [vmem:[%s3605_s4 + $0x28] sm:$0xf0] }
  0x45   : > { %695 = vmatpush.bf16.msra.mxu1 %v2277_v30  ;;  %711 = vmatpush.bf16.msra.mxu2 %v2305_v27  ;;  %v2297_v30 = vor.u32 %v2435_v28, %v2294_v29 }
  0x46   : > { %572 = vmatpush.bf16.msra.mxu0 %v2423_v34 }
  0x48   : > { %696 = vmatmul.bf16.vlgmr.msra.gmra.mxu1 %v3136_v33 }
  0x49   : > { %573 = vmatmul.bf16.vlgmr.msra.gmra.mxu0 %v495_v37  ;;  %712 = vmatpush.bf16.msra.mxu2 %v2297_v30  ;;  %v2431_v37 = vld [vmem:[%s3605_s4 + $0x4] sm:$0xf] }
  0x4a   : > { %v2281_v39 = vor.u32 %v2431_v37, %v2278_v38 }
  0x4d   : > { %713 = vmatpush.bf16.msra.mxu2 %v2289_v36 }
  0x51   : > { %714 = vmatpush.bf16.msra.mxu2 %v2281_v39 }
  0x54   : > { %715 = vmatmul.bf16.vlgmr.msra.gmra.mxu2 %v3136_v33 }
  0x58   : > { %701 = vmatmul.bf16.gmra.mxu1 %v3141_v40 }
  0x59   : > { %578 = vmatmul.bf16.gmra.mxu0 %v496_v43 }
  0x64   : > { %720 = vmatmul.bf16.gmra.mxu2 %v3141_v40 }
  0xc5   : > { %v697_v44 = vpop.f32.mrf.mxu1 }
  0xc6   : > { %v574_v47 = vpop.f32.mrf.mxu0  ;;  %v698_v57 = vadd.f32 %v697_v44, %v604_v49 }
  0xc7   : > { %v575_v60 = vadd.f32 %v2546_v58, %v574_v47 }
  0xc9   : > { %v726_v0 = vmul.f32 0.25, %v575_v60 }
  0xcd   : > { %v699_v45 = vpop.f32.mrf.mxu1 }
  0xce   : > { %v576_v54 = vpop.f32.mrf.mxu0  ;;  %v700_v55 = vadd.f32 %v699_v45, %v604_v49 }
  0xcf   : > { %v577_v61 = vadd.f32 %v2546_v58, %v576_v54 }
  0xd0   : > { %v3153_v59 = vpack.c.bf16 %v700_v55, %v698_v57 }
  0xd1   : > { %v727_v1 = vmul.f32 0.25, %v577_v61 }
  0xd2   : > { %v744_v62 = vsel %vm736_vm0, %v3153_v59, 0 }
  0xd3   : > { %v3157_v2 = vpack.c.bf16 %v727_v1, %v726_v0 }
  0xd5   : > { %v702_v46 = vpop.f32.mrf.mxu1 }
  0xd6   : > { %v703_v51 = vadd.f32 %v702_v46, %v604_v49  ;;  %v579_v63 = vpop.f32.mrf.mxu0 }
  0xd7   : > { %v580_v4 = vadd.f32 %v2546_v58, %v579_v63  ;;  %v716_v0 = vpop.f32.mrf.mxu2 }
  0xd9   : > { %v728_v6 = vmul.f32 0.25, %v580_v4  ;;  %v605_v4 = vperm.slane %v3146_v48, 1 }
  0xdd   : > { %v704_v50 = vpop.f32.mrf.mxu1 }
  0xde   : > { %v705_v52 = vadd.f32 %v704_v50, %v604_v49  ;;  %v581_v3 = vpop.f32.mrf.mxu0 }
  0xdf   : > { %v582_v5 = vadd.f32 %v2546_v58, %v581_v3  ;;  %v718_v1 = vpop.f32.mrf.mxu2 }
  0xe0   : > { %v3149_v53 = vpack.c.bf16 %v705_v52, %v703_v51  ;;  %v719_v9 = vadd.f32 %v718_v1, %v605_v4 }
  0xe1   : > { %v729_v7 = vmul.f32 0.25, %v582_v5 }
  0xe2   : > { %v747_v56 = vsel %vm736_vm0, %v3149_v53, 0 }
  0xe3   : > { %755 = vmatpush.bf16.xpose.msra.mxu3 %v747_v56  ;;  %v3161_v8 = vpack.c.bf16 %v729_v7, %v728_v6  ;;  %v717_v7 = vadd.f32 %v716_v0, %v605_v4 }
  0xe5   : > { %v3244_v48 = vpack.c.bf16 %v719_v9, %v717_v7 }
  0xe7   : > { %v721_v3 = vpop.f32.mrf.mxu2 }
  0xe8   : > { %v722_v5 = vadd.f32 %v721_v3, %v605_v4 }
  0xeb   : > { %756 = vmatpush.bf16.xpose.msra.mxu3 %v744_v62 }
  0xef   : > { %v723_v6 = vpop.f32.mrf.mxu2 }
  0xf0   : > { %v724_v10 = vadd.f32 %v723_v6, %v605_v4 }
  0xf2   : > { %2338 = vmatmul.msk.bf16.vlgmr.msra.gmra.mxu3 %vm736_vm0, %v3157_v2  ;;  %v3240_v11 = vpack.c.bf16 %v724_v10, %v722_v5 }
  0xf4   : > { %827 = vmatpush.bf16.msrb.mxu3 %v3240_v11 }
  0xf8   : > { %828 = vmatpush.bf16.msrb.mxu3 %v3244_v48 }
  0xfc   : > { %1020 = vmatpush.bf16.msra.mxu3 %v2447_v12 }
 0x102   : > { %2339 = vmatmul.msk.bf16.gmra.mxu3 %vm736_vm0, %v3161_v8 }
 0x175   : > { %v758_v17 = vpop.f32.mrf.mxu3 }
 0x176   : > { %v769_v18 = vsel %vm768_vm1, %v758_v17, -inf }
 0x177   : > { %770 = vmax.xlane.f32.xlu0 %v769_v18 }
 0x17d   : > { %v760_v25 = vpop.f32.mrf.mxu3 }
 0x17e   : > { %v772_v26 = vsel %vm768_vm1, %v760_v25, -inf }
 0x17f   : > { %773 = vmax.xlane.f32.xlu0 %v772_v26 }
 0x185   : > { %v763_v34 = vpop.f32.mrf.mxu3 }
 0x186   : > { %v775_v35 = vsel %vm768_vm1, %v763_v34, -inf }
 0x187   : > { %776 = vmax.xlane.f32.xlu1 %v775_v35 }
 0x18d   : > { %v765_v41 = vpop.f32.mrf.mxu3 }
 0x18e   : > { %v778_v42 = vsel %vm768_vm1, %v765_v41, -inf }
 0x18f   : > { %779 = vmax.xlane.f32.xlu1 %v778_v42 }
 0x1ea   : > { %v771_v43 = vpop.xlane.xlu0 %770 }
 0x1eb   : > { %v781_v44 = vsub.f32 %v758_v17, %v771_v43 }
 0x1ed   : > { %v785_v45 = vmul.f32 1.442695, %v781_v44 }
 0x1ef   : > { %2550 = vpow2.f32 %v785_v45 }
 0x1f2   : > { %v774_v46 = vpop.xlane.xlu0 %773 }
 0x1f3   : > { %v782_v47 = vsub.f32 %v760_v25, %v774_v46 }
 0x1f5   : > { %v2551_v49 = vpop.eup %2550  ;;  %v787_v50 = vmul.f32 1.442695, %v782_v47 }
 0x1f6   : > { %v793_v51 = vsel %vm768_vm1, %v2551_v49, 0.0 }
 0x1f7   : > { %2552 = vpow2.f32 %v787_v50  ;;  %794 = vadd.xlane.f32.xlu2 %v793_v51 }
 0x1fa   : > { %v777_v52 = vpop.xlane.xlu1 %776 }
 0x1fb   : > { %v783_v54 = vsub.f32 %v763_v34, %v777_v52 }
 0x1fd   : > { %v2553_v55 = vpop.eup %2552  ;;  %v789_v56 = vmul.f32 1.442695, %v783_v54 }
 0x1fe   : > { %v796_v33 = vsel %vm768_vm1, %v2553_v55, 0.0 }
 0x1ff   : > { %2554 = vpow2.f32 %v789_v56  ;;  %797 = vadd.xlane.f32.xlu2 %v796_v33 }
 0x202   : > { %v780_v40 = vpop.xlane.xlu1 %779 }
 0x203   : > { %v784_v57 = vsub.f32 %v765_v41, %v780_v40 }
 0x205   : > { %v2555_v58 = vpop.eup %2554  ;;  %v791_v60 = vmul.f32 1.442695, %v784_v57 }
 0x206   : > { %v799_v61 = vsel %vm768_vm1, %v2555_v58, 0.0 }
 0x207   : > { %2556 = vpow2.f32 %v791_v60  ;;  %800 = vadd.xlane.f32.xlu0 %v799_v61 }
 0x20d   : > { %v2557_v62 = vpop.eup %2556 }
 0x20e   : > { %v802_v63 = vsel %vm768_vm1, %v2557_v62, 0.0 }
 0x20f   : > { %803 = vadd.xlane.f32.xlu1 %v802_v63 }
 0x217   : > { %854 = vrot.lane.b32.xlu2 %v3149_v53, %s2935_s17 }
 0x21b   : > { %852 = vrot.lane.b32.xlu0 %v3153_v59, %s2935_s17 }
 0x21f   : > { %848 = vrot.lane.b32.xlu2 %v3161_v8, %s2935_s17 }
 0x223   : > { %1038 = vrot.lane.b32.xlu0 %v3149_v53, %s2936_s18 }
 0x227   : > { %1193 = vrot.lane.b32.xlu2 %v3149_v53, %s2937_s21 }
 0x228   : > { %846 = vrot.lane.b32.xlu1 %v3157_v2, %s2935_s17 }
 0x22b   : > { %1191 = vrot.lane.b32.xlu0 %v3153_v59, %s2937_s21 }
 0x22f   : > { %1032 = vrot.lane.b32.xlu2 %v3157_v2, %s2936_s18 }
 0x230   : > { %1036 = vrot.lane.b32.xlu1 %v3153_v59, %s2936_s18 }
 0x233   : > { %1034 = vrot.lane.b32.xlu0 %v3161_v8, %s2936_s18 }
 0x237   : > { %1189 = vrot.lane.b32.xlu2 %v3161_v8, %s2937_s21 }
 0x238   : > { %1187 = vrot.lane.b32.xlu1 %v3157_v2, %s2937_s21 }
 0x26a   : > { %v795_v13 = vpop.xlane.xlu2 %794 }
 0x26b   : > { %2558 = vrcp.f32 %v795_v13 }
 0x271   : > { %v2559_v15 = vpop.eup %2558 }
 0x272   : > { %v798_v14 = vpop.xlane.xlu2 %797  ;;  %v809_v17 = vmul.f32 %v2559_v15, %v2551_v49 }
 0x273   : > { %2560 = vrcp.f32 %v798_v14 }
 0x279   : > { %v2561_v16 = vpop.eup %2560 }
 0x27a   : > { %v810_v18 = vmul.f32 %v2561_v16, %v2553_v55  ;;  %v855_v19 = vpop.permute.xlu2 %854  ;;  %v801_v22 = vpop.xlane.xlu0 %800 }
 0x27b   : > { %v866_v20 = vsel %vm736_vm0, %v855_v19, 0  ;;  %2562 = vrcp.f32 %v801_v22 }
 0x27c   : > { %874 = vmatpush.bf16.xpose.msrb.mxu0 %v866_v20  ;;  %2455 = vmatpush.bf16.xpose.msrb.mxu2 %v866_v20  ;;  %v813_v21 = vpack.c.bf16 %v810_v18, %v809_v17 }
 0x27e   : > { %2340 = vmatmul.msk.bf16.vlgmr.msrb.gmra.mxu3 %vm768_vm1, %v813_v21 }
 0x281   : > { %v2563_v25 = vpop.eup %2562 }
 0x282   : > { %v849_v23 = vpop.permute.xlu2 %848  ;;  %v804_v24 = vpop.xlane.xlu1 %803  ;;  %v811_v28 = vmul.f32 %v2563_v25, %v2555_v58 }
 0x283   : > { %2564 = vrcp.f32 %v804_v24 }
 0x289   : > { %v2565_v26 = vpop.eup %2564 }
 0x28a   : > { %v1194_v27 = vpop.permute.xlu2 %1193  ;;  %v812_v29 = vmul.f32 %v2565_v26, %v2557_v62 }
 0x28b   : > { %v1205_v30 = vsel %vm736_vm0, %v1194_v27, 0 }
 0x28c   : > { %1213 = vmatpush.bf16.xpose.msrb.mxu3 %v1205_v30  ;;  %v814_v31 = vpack.c.bf16 %v812_v29, %v811_v28 }
 0x28d   : > { %v853_v32 = vpop.permute.xlu0 %852 }
 0x28e   : > { %2341 = vmatmul.msk.bf16.gmra.mxu3 %vm768_vm1, %v814_v31  ;;  %v863_v34 = vsel %vm736_vm0, %v853_v32, 0 }
 0x28f   : > { %875 = vmatpush.bf16.xpose.msrb.mxu0 %v863_v34  ;;  %2456 = vmatpush.bf16.xpose.msrb.mxu2 %v863_v34 }
 0x292   : > { %v1033_v43 = vpop.permute.xlu2 %1032 }
 0x295   : > { %v1039_v35 = vpop.permute.xlu0 %1038 }
 0x296   : > { %v1050_v36 = vsel %vm736_vm0, %v1039_v35, 0  ;;  %2343 = vmatmul.msk.bf16.vlgmr.msrb.gmra.mxu2 %vm736_vm0, %v849_v23 }
 0x297   : > { %1058 = vmatpush.bf16.xpose.msra.mxu0 %v1050_v36 }
 0x29a   : > { %v847_v37 = vpop.permute.xlu1 %846  ;;  %v1190_v4 = vpop.permute.xlu2 %1189 }
 0x29b   : > { %2342 = vmatmul.msk.bf16.vlgmr.msrb.gmra.mxu0 %vm736_vm0, %v847_v37 }
 0x29d   : > { %v1192_v38 = vpop.permute.xlu0 %1191 }
 0x29e   : > { %v1202_v39 = vsel %vm736_vm0, %v1192_v38, 0 }
 0x29f   : > { %1214 = vmatpush.bf16.xpose.msrb.mxu3 %v1202_v39 }
 0x2a2   : > { %v1037_v41 = vpop.permute.xlu1 %1036 }
 0x2a3   : > { %v1047_v42 = vsel %vm736_vm0, %v1037_v41, 0 }
 0x2a4   : > { %1059 = vmatpush.bf16.xpose.msra.mxu0 %v1047_v42 }
 0x2a5   : > { %v1035_v44 = vpop.permute.xlu0 %1034 }
 0x2aa   : > { %v1188_v62 = vpop.permute.xlu1 %1187 }
 0x2ab   : > { %2358 = vmatmul.msk.bf16.vlgmr.msra.gmra.mxu0 %vm736_vm0, %v1033_v43 }
 0x2bb   : > { %2359 = vmatmul.msk.bf16.gmra.mxu0 %vm736_vm0, %v1035_v44 }
 0x301   : > { %v830_v45 = vpop.f32.mrf.mxu3 }
 0x309   : > { %v832_v46 = vpop.f32.mrf.mxu3 }
 0x30a   : > { %v840_v47 = vpack.c.bf16 %v832_v46, %v830_v45 }
 0x30c   : > { %2356 = vmatmul.msk.bf16.vlgmr.msra.gmra.mxu3 %vm736_vm0, %v840_v47 }
 0x311   : > { %v835_v49 = vpop.f32.mrf.mxu3 }
 0x318   : > { %v877_v50 = vpop.f32.mrf.mxu0 }
 0x319   : > { %v837_v51 = vpop.f32.mrf.mxu3  ;;  %v882_v52 = vpop.f32.mrf.mxu2  ;;  %v887_v54 = vsel %vm768_vm1, %v877_v50, -inf }
 0x31a   : > { %v841_v55 = vpack.c.bf16 %v837_v51, %v835_v49  ;;  %888 = vmax.xlane.f32.xlu1 %v887_v54  ;;  %v893_v56 = vsel %vm768_vm1, %v882_v52, -inf }
 0x31b   : > { %894 = vmax.xlane.f32.xlu2 %v893_v56 }
 0x31c   : > { %2357 = vmatmul.msk.bf16.gmra.mxu3 %vm736_vm0, %v841_v55 }
 0x320   : > { %v879_v33 = vpop.f32.mrf.mxu0 }
 0x321   : > { %v884_v40 = vpop.f32.mrf.mxu2  ;;  %v890_v57 = vsel %vm768_vm1, %v879_v33, -inf }
 0x322   : > { %891 = vmax.xlane.f32.xlu0 %v890_v57  ;;  %v896_v58 = vsel %vm768_vm1, %v884_v40, -inf }
 0x323   : > { %897 = vmax.xlane.f32.xlu1 %v896_v58 }
 0x328   : > { %v1061_v60 = vpop.f32.mrf.mxu0 }
 0x329   : > { %v1071_v61 = vsel %vm768_vm1, %v1061_v60, -inf }
 0x32a   : > { %1072 = vmax.xlane.f32.xlu0 %v1071_v61 }
 0x32c   : > { %2368 = vmatmul.msk.bf16.vlgmr.msrb.gmra.mxu3 %vm736_vm0, %v1188_v62 }
 0x330   : > { %v1063_v63 = vpop.f32.mrf.mxu0 }
 0x331   : > { %v1074_v0 = vsel %vm768_vm1, %v1063_v63, -inf }
 0x332   : > { %1075 = vmax.xlane.f32.xlu2 %v1074_v0 }
 0x338   : > { %v3275_v1 = vpop.f32.mrf.mxu0 }
 0x339   : > { %v1077_v3 = vsel %vm768_vm1, %v3275_v1, -inf }
 0x33a   : > { %1078 = vmax.xlane.f32.xlu2 %v1077_v3 }
 0x33c   : > { %2369 = vmatmul.msk.bf16.gmra.mxu3 %vm736_vm0, %v1190_v4 }
 0x340   : > { %v1068_v5 = vpop.f32.mrf.mxu0 }
 0x341   : > { %v1080_v6 = vsel %vm768_vm1, %v1068_v5, -inf }
 0x342   : > { %1081 = vmax.xlane.f32.xlu1 %v1080_v6 }
 0x352   : > { %937 = vrot.lane.b32.xlu2 %v3240_v11, %s2935_s17 }
 0x35b   : > { %935 = vrot.lane.b32.xlu1 %v3244_v48, %s2935_s17 }
 0x38d   : > { %v889_v7 = vpop.xlane.xlu1 %888 }
 0x38e   : > { %v899_v9 = vsub.f32 %v877_v50, %v889_v7  ;;  %v895_v10 = vpop.xlane.xlu2 %894 }
 0x38f   : > { %v3285_v12 = vpop.f32.mrf.mxu3  ;;  %v901_v14 = vsub.f32 %v882_v52, %v895_v10 }
 0x390   : > { %v903_v13 = vmul.f32 1.442695, %v899_v9 }
 0x391   : > { %v907_v15 = vmul.f32 1.442695, %v901_v14 }
 0x392   : > { %2566 = vpow2.f32 %v903_v13 }
 0x393   : > { %2568 = vpow2.f32 %v907_v15 }
 0x395   : > { %v892_v16 = vpop.xlane.xlu0 %891 }
 0x396   : > { %v900_v17 = vsub.f32 %v879_v33, %v892_v16  ;;  %v898_v18 = vpop.xlane.xlu1 %897 }
 0x397   : > { %v3287_v19 = vpop.f32.mrf.mxu3  ;;  %v902_v22 = vsub.f32 %v884_v40, %v898_v18 }
 0x398   : > { %v3289_v20 = vpop.eup %2566  ;;  %v905_v21 = vmul.f32 1.442695, %v900_v17 }
 0x399   : > { %v911_v23 = vsel %vm768_vm1, %v3289_v20, 0.0  ;;  %v909_v24 = vmul.f32 1.442695, %v902_v22  ;;  %v3293_v26 = vpop.eup %2568 }
 0x39a   : > { %2570 = vpow2.f32 %v905_v21  ;;  %912 = vadd.xlane.f32.xlu0 %v911_v23  ;;  %v917_v31 = vsel %vm768_vm1, %v3293_v26, 0.0 }
 0x39b   : > { %2572 = vpow2.f32 %v909_v24 }
 0x39d   : > { %v1073_v25 = vpop.xlane.xlu0 %1072 }
 0x39e   : > { %v1083_v29 = vsub.f32 %v1061_v60, %v1073_v25 }
 0x39f   : > { %v3295_v27 = vpop.f32.mrf.mxu3 }
 0x3a0   : > { %v3297_v28 = vpop.eup %2570  ;;  %v1087_v32 = vmul.f32 1.442695, %v1083_v29 }
 0x3a1   : > { %v914_v30 = vsel %vm768_vm1, %v3297_v28, 0.0  ;;  %v3303_v35 = vpop.eup %2572 }
 0x3a2   : > { %915 = vadd.xlane.f32.xlu2 %v914_v30  ;;  %918 = vadd.xlane.f32.xlu0 %v917_v31  ;;  %2574 = vpow2.f32 %v1087_v32  ;;  %v920_v39 = vsel %vm768_vm1, %v3303_v35, 0.0 }
 0x3a5   : > { %v1076_v34 = vpop.xlane.xlu2 %1075 }
 0x3a6   : > { %v1084_v36 = vsub.f32 %v1063_v63, %v1076_v34 }
 0x3a7   : > { %v3305_v37 = vpop.f32.mrf.mxu3 }
 0x3a8   : > { %v1089_v38 = vmul.f32 1.442695, %v1084_v36  ;;  %v3311_v42 = vpop.eup %2574 }
 0x3a9   : > { %v1095_v47 = vsel %vm768_vm1, %v3311_v42, 0.0 }
 0x3aa   : > { %2576 = vpow2.f32 %v1089_v38  ;;  %921 = vadd.xlane.f32.xlu0 %v920_v39 }
 0x3ad   : > { %v3309_v41 = vpop.xlane.xlu2 %1078 }
 0x3ae   : > { %v1085_v21 = vsub.f32 %v3275_v1, %v3309_v41 }
 0x3af   : > { %v1216_v43 = vpop.f32.mrf.mxu3 }
 0x3b0   : > { %v3313_v44 = vpop.eup %2576  ;;  %v1226_v45 = vsel %vm768_vm1, %v1216_v43, -inf }
 0x3b1   : > { %1227 = vmax.xlane.f32.xlu1 %v1226_v45  ;;  %v1098_v46 = vsel %vm768_vm1, %v3313_v44, 0.0 }
 0x3b2   : > { %1099 = vadd.xlane.f32.xlu2 %v1098_v46  ;;  %1096 = vadd.xlane.f32.xlu0 %v1095_v47 }
 0x3b5   : > { %v938_v49 = vpop.permute.xlu2 %937  ;;  %v1082_v50 = vpop.xlane.xlu1 %1081 }
 0x3b6   : > { %v1086_v51 = vsub.f32 %v1068_v5, %v1082_v50  ;;  %953 = vmatpush.bf16.msrb.mxu1 %v938_v49 }
 0x3b7   : > { %v1218_v52 = vpop.f32.mrf.mxu3 }
 0x3b8   : > { %v1093_v54 = vmul.f32 1.442695, %v1086_v51  ;;  %v1229_v55 = vsel %vm768_vm1, %v1218_v52, -inf }
 0x3ba   : > { %2578 = vpow2.f32 %v1093_v54  ;;  %1230 = vmax.xlane.f32.xlu0 %v1229_v55  ;;  %v2450_v54 = vld [vmem:[#allocation7 + $0x18] sm:$0xff] }
 0x3bf   : > { %v1221_v56 = vpop.f32.mrf.mxu3 }
 0x3c0   : > { %v3321_v33 = vpop.eup %2578  ;;  %v1232_v40 = vsel %vm768_vm1, %v1221_v56, -inf }
 0x3c1   : > { %1233 = vmax.xlane.f32.xlu1 %v1232_v40  ;;  %v1104_v57 = vsel %vm768_vm1, %v3321_v33, 0.0 }
 0x3c2   : > { %1105 = vadd.xlane.f32.xlu2 %v1104_v57 }
 0x3c7   : > { %v3338_v60 = vpop.f32.mrf.mxu3 }
 0x3c8   : > { %v1235_v61 = vsel %vm768_vm1, %v3338_v60, -inf }
 0x3cd   : > { %v936_v58 = vpop.permute.xlu1 %935 }
 0x3ce   : > { %1117 = vrot.lane.b32.xlu0 %v3244_v48, %s2936_s18  ;;  %954 = vmatpush.bf16.msrb.mxu1 %v936_v58 }
 0x3da   : > { %1119 = vrot.lane.b32.xlu1 %v3240_v11, %s2936_s18  ;;  %1272 = vrot.lane.b32.xlu2 %v3244_v48, %s2937_s21 }
 0x3e2   : > { %1346 = vrot.lane.b32.xlu2 %v3153_v59, %s2938_s16 }
 0x3ea   : > { %1503 = vrot.lane.b32.xlu2 %v3149_v53, %s2939_s20 }
 0x3f2   : > { %1501 = vrot.lane.b32.xlu2 %v3153_v59, %s2939_s20 }
 0x3f8   : > { %1236 = vmax.xlane.f32.xlu0 %v1235_v61 }
 0x3fa   : > { %1344 = vrot.lane.b32.xlu2 %v3161_v8, %s2938_s16 }
 0x40c   : > { %1274 = vrot.lane.b32.xlu0 %v3240_v11, %s2937_s21 }
 0x40d   : > { %v913_v62 = vpop.xlane.xlu0 %912 }
 0x40e   : > { %2580 = vrcp.f32 %v913_v62 }
 0x414   : > { %v2581_v3 = vpop.eup %2580 }
 0x415   : > { %v916_v63 = vpop.xlane.xlu2 %915  ;;  %v919_v0 = vpop.xlane.xlu0 %918  ;;  %v927_v5 = vmul.f32 %v2581_v3, %v3289_v20 }
 0x416   : > { %2582 = vrcp.f32 %v916_v63 }
 0x41c   : > { %v2583_v4 = vpop.eup %2582 }
 0x41d   : > { %v928_v6 = vmul.f32 %v2583_v4, %v3297_v28  ;;  %v922_v7 = vpop.xlane.xlu0 %921  ;;  %v1091_v28 = vmul.f32 1.442695, %v1085_v21  ;;  %v2448_v4 = vld [vmem:[#allocation7 + $0x8] sm:$0xff] }
 0x41e   : > { %2584 = vrcp.f32 %v922_v7  ;;  %989 = vmatpush.bf16.msra.mxu2 %v2448_v4 }
 0x41f   : > { %v931_v9 = vpack.c.bf16 %v928_v6, %v927_v5  ;;  %2586 = vrcp.f32 %v919_v0 }
 0x421   : > { %2344 = vmatmul.msk.bf16.vlgmr.msrb.gmra.mxu1 %vm768_vm1, %v931_v9 }
 0x424   : > { %v1228_v10 = vpop.xlane.xlu1 %1227  ;;  %v2585_v15 = vpop.eup %2584 }
 0x425   : > { %v1238_v13 = vsub.f32 %v1216_v43, %v1228_v10  ;;  %v1097_v14 = vpop.xlane.xlu0 %1096  ;;  %v2587_v17 = vpop.eup %2586  ;;  %v930_v18 = vmul.f32 %v2585_v15, %v3303_v35 }
 0x426   : > { %v1100_v20 = vpop.xlane.xlu2 %1099  ;;  %v929_v23 = vmul.f32 %v2587_v17, %v3293_v26 }
 0x427   : > { %v1242_v16 = vmul.f32 1.442695, %v1238_v13 }
 0x428   : > { %v932_v25 = vpack.c.bf16 %v930_v18, %v929_v23 }
 0x429   : > { %2588 = vpow2.f32 %v1242_v16 }
 0x42d   : > { %v1231_v22 = vpop.xlane.xlu0 %1230 }
 0x42e   : > { %v1239_v24 = vsub.f32 %v1218_v52, %v1231_v22 }
 0x42f   : > { %v3354_v30 = vpop.eup %2588 }
 0x430   : > { %v1244_v29 = vmul.f32 1.442695, %v1239_v24  ;;  %v1250_v1 = vsel %vm768_vm1, %v3354_v30, 0.0  ;;  %v2449_v24 = vld [vmem:[#allocation7 + $0x10] sm:$0xff] }
 0x431   : > { %2345 = vmatmul.msk.bf16.gmra.mxu1 %vm768_vm1, %v932_v25  ;;  %1171 = vmatpush.bf16.msrb.mxu2 %v2449_v24 }
 0x432   : > { %2590 = vpow2.f32 %v1244_v29 }
 0x433   : > { %2592 = vpow2.f32 %v1091_v28 }
 0x434   : > { %v1234_v31 = vpop.xlane.xlu1 %1233 }
 0x435   : > { %v1240_v32 = vsub.f32 %v1221_v56, %v1234_v31  ;;  %v1106_v34 = vpop.xlane.xlu2 %1105 }
 0x436   : > { %1251 = vadd.xlane.f32.xlu0 %v1250_v1 }
 0x437   : > { %v1246_v35 = vmul.f32 1.442695, %v1240_v32 }
 0x438   : > { %v3358_v36 = vpop.eup %2590 }
 0x439   : > { %2594 = vpow2.f32 %v1246_v35  ;;  %v1253_v26 = vsel %vm768_vm1, %v3358_v36, 0.0  ;;  %v3362_v38 = vpop.eup %2592 }
 0x43a   : > { %1254 = vadd.xlane.f32.xlu1 %v1253_v26  ;;  %v1101_v41 = vsel %vm768_vm1, %v3362_v38, 0.0  ;;  %2596 = vrcp.f32 %v1100_v20 }
 0x43b   : > { %2598 = vrcp.f32 %v1097_v14 }
 0x43d   : > { %v1273_v39 = vpop.permute.xlu2 %1272 }
 0x43e   : > { %1102 = vadd.xlane.f32.xlu0 %v1101_v41 }
 0x43f   : > { %v3366_v43 = vpop.eup %2594 }
 0x440   : > { %v1256_v45 = vsel %vm768_vm1, %v3366_v43, 0.0  ;;  %v2597_v47 = vpop.eup %2596  ;;  %v1118_v56 = vpop.permute.xlu0 %1117 }
 0x441   : > { %v2599_v49 = vpop.eup %2598  ;;  %v1112_v51 = vmul.f32 %v2597_v47, %v3313_v44 }
 0x442   : > { %1257 = vadd.xlane.f32.xlu1 %v1256_v45  ;;  %v1111_v52 = vmul.f32 %v2599_v49, %v3311_v42 }
 0x444   : > { %v1115_v40 = vpack.c.bf16 %v1112_v51, %v1111_v52 }
 0x445   : > { %v3370_v46 = vpop.permute.xlu2 %1346 }
 0x446   : > { %v1357_v45 = vsel %vm736_vm0, %v3370_v46, 0 }
 0x44c   : > { %v1120_v50 = vpop.permute.xlu1 %1119 }
 0x44d   : > { %1135 = vmatpush.bf16.msra.mxu1 %v1120_v50  ;;  %v1504_v55 = vpop.permute.xlu2 %1503 }
 0x44e   : > { %v1515_v57 = vsel %vm736_vm0, %v1504_v55, 0 }
 0x451   : > { %1136 = vmatpush.bf16.msra.mxu1 %v1118_v56 }
 0x452   : > { %1342 = vrot.lane.b32.xlu0 %v3157_v2, %s2938_s16 }
 0x454   : > { %2360 = vmatmul.msk.bf16.vlgmr.msra.gmra.mxu1 %vm768_vm1, %v1115_v40 }
 0x455   : > { %1326 = vmatpush.bf16.msrb.mxu1 %v2450_v54  ;;  %v1502_v58 = vpop.permute.xlu2 %1501 }
 0x456   : > { %v1512_v61 = vsel %vm736_vm0, %v1502_v58, 0 }
 0x459   : > { %1523 = vmatpush.bf16.xpose.msra.mxu1 %v1515_v57 }
 0x461   : > { %1524 = vmatpush.bf16.xpose.msra.mxu1 %v1512_v61 }
 0x46b   : > { %v1237_v44 = vpop.xlane.xlu0 %1236 }
 0x46c   : > { %v1241_v42 = vsub.f32 %v3338_v60, %v1237_v44  ;;  %v1345_v44 = vpop.permute.xlu2 %1344 }
 0x46e   : > { %v1248_v62 = vmul.f32 1.442695, %v1241_v42 }
 0x470   : > { %2600 = vpow2.f32 %v1248_v62 }
 0x476   : > { %v2601_v63 = vpop.eup %2600 }
 0x477   : > { %v1259_v0 = vsel %vm768_vm1, %v2601_v63, 0.0 }
 0x478   : > { %1260 = vadd.xlane.f32.xlu1 %v1259_v0 }
 0x47e   : > { %v1275_v3 = vpop.permute.xlu0 %1274 }
 0x47f   : > { %1290 = vmatpush.bf16.msrb.mxu0 %v1275_v3 }
 0x483   : > { %1291 = vmatpush.bf16.msrb.mxu0 %v1273_v39 }
 0x491   : > { %1348 = vrot.lane.b32.xlu1 %v3149_v53, %s2938_s16 }
 0x499   : > { %1497 = vrot.lane.b32.xlu1 %v3157_v2, %s2939_s20 }
 0x49e   : > { %v956_v5 = vpop.f32.mrf.mxu1 }
 0x4a1   : > { %1499 = vrot.lane.b32.xlu1 %v3161_v8, %s2939_s20 }
 0x4a6   : > { %v958_v60 = vpop.f32.mrf.mxu1 }
 0x4a7   : > { %v966_v6 = vpack.c.bf16 %v958_v60, %v956_v5 }
 0x4a9   : > { %2350 = vmatmul.msk.bf16.vlgmr.msra.gmra.mxu2 %vm736_vm0, %v966_v6  ;;  %v1252_v7 = vpop.xlane.xlu0 %1251 }
 0x4aa   : > { %2602 = vrcp.f32 %v1252_v7 }
 0x4ad   : > { %v1255_v9 = vpop.xlane.xlu1 %1254 }
 0x4ae   : > { %2604 = vrcp.f32 %v1255_v9  ;;  %v961_v10 = vpop.f32.mrf.mxu1 }
 0x4af   : > { %2606 = vrcp.f32 %v1106_v34 }
 0x4b0   : > { %v2603_v14 = vpop.eup %2602 }
 0x4b1   : > { %v1103_v13 = vpop.xlane.xlu0 %1102  ;;  %v1266_v16 = vmul.f32 %v2603_v14, %v3354_v30 }
 0x4b2   : > { %2608 = vrcp.f32 %v1103_v13 }
 0x4b4   : > { %v2605_v15 = vpop.eup %2604 }
 0x4b5   : > { %v1267_v17 = vmul.f32 %v2605_v15, %v3358_v36  ;;  %v2607_v18 = vpop.eup %2606  ;;  %v1258_v34 = vpop.xlane.xlu1 %1257 }
 0x4b6   : > { %v963_v21 = vpop.f32.mrf.mxu1  ;;  %v1114_v28 = vmul.f32 %v2607_v18, %v3321_v33  ;;  %2610 = vrcp.f32 %v1258_v34 }
 0x4b7   : > { %v1270_v20 = vpack.c.bf16 %v1267_v17, %v1266_v16  ;;  %v967_v22 = vpack.c.bf16 %v963_v21, %v961_v10 }
 0x4b8   : > { %v2609_v23 = vpop.eup %2608 }
 0x4b9   : > { %2351 = vmatmul.msk.bf16.gmra.mxu2 %vm736_vm0, %v967_v22  ;;  %2370 = vmatmul.msk.bf16.vlgmr.msrb.gmra.mxu0 %vm768_vm1, %v1270_v20  ;;  %v1113_v25 = vmul.f32 %v2609_v23, %v3362_v38 }
 0x4bb   : > { %v1116_v29 = vpack.c.bf16 %v1114_v28, %v1113_v25 }
 0x4bc   : > { %v2611_v35 = vpop.eup %2610 }
 0x4bd   : > { %2361 = vmatmul.msk.bf16.gmra.mxu1 %vm768_vm1, %v1116_v29  ;;  %v1268_v26 = vmul.f32 %v2611_v35, %v3366_v43 }
 0x4c4   : > { %v1343_v40 = vpop.permute.xlu0 %1342 }
 0x4d1   : > { %v1138_v30 = vpop.f32.mrf.mxu1 }
 0x4d9   : > { %v1140_v31 = vpop.f32.mrf.mxu1 }
 0x4da   : > { %v1148_v32 = vpack.c.bf16 %v1140_v31, %v1138_v30 }
 0x4dc   : > { %2366 = vmatmul.msk.bf16.vlgmr.msrb.gmra.mxu2 %vm736_vm0, %v1148_v32 }
 0x4eb   : > { %v1261_v1 = vpop.xlane.xlu1 %1260 }
 0x4ec   : > { %2612 = vrcp.f32 %v1261_v1 }
 0x4f2   : > { %v2613_v36 = vpop.eup %2612 }
 0x4f3   : > { %v1269_v38 = vmul.f32 %v2613_v36, %v2601_v63 }
 0x4f5   : > { %v1271_v39 = vpack.c.bf16 %v1269_v38, %v1268_v26 }
 0x4f7   : > { %2371 = vmatmul.msk.bf16.gmra.mxu0 %vm768_vm1, %v1271_v39 }
 0x503   : > { %v1349_v33 = vpop.permute.xlu1 %1348 }
 0x504   : > { %v1360_v41 = vsel %vm736_vm0, %v1349_v33, 0 }
 0x505   : > { %1368 = vmatpush.bf16.xpose.msra.mxu2 %v1360_v41 }
 0x50b   : > { %v1498_v0 = vpop.permute.xlu1 %1497 }
 0x50d   : > { %1369 = vmatpush.bf16.xpose.msra.mxu2 %v1357_v45 }
 0x513   : > { %v1500_v3 = vpop.permute.xlu1 %1499 }
 0x52c   : > { %v991_v49 = vpop.f32.mrf.mxu2 }
 0x52d   : > { %v1023_v46 = vadd.f32 %v3285_v12, %v991_v49 }
 0x534   : > { %v993_v54 = vpop.f32.mrf.mxu2 }
 0x535   : > { %v1025_v60 = vadd.f32 %v3287_v19, %v993_v54 }
 0x536   : > { %v1293_v47 = vpop.f32.mrf.mxu0 }
 0x53a   : > { %v1143_v50 = vpop.f32.mrf.mxu1 }
 0x53c   : > { %v996_v56 = vpop.f32.mrf.mxu2 }
 0x53d   : > { %v1028_v9 = vadd.f32 %v3295_v27, %v996_v56 }
 0x53e   : > { %v1295_v51 = vpop.f32.mrf.mxu0 }
 0x53f   : > { %v1303_v52 = vpack.c.bf16 %v1295_v51, %v1293_v47 }
 0x541   : > { %2376 = vmatmul.msk.bf16.vlgmr.msrb.gmra.mxu1 %vm736_vm0, %v1303_v52 }
 0x542   : > { %v1145_v43 = vpop.f32.mrf.mxu1 }
 0x543   : > { %v1149_v55 = vpack.c.bf16 %v1145_v43, %v1143_v50 }
 0x544   : > { %v998_v57 = vpop.f32.mrf.mxu2 }
 0x545   : > { %2367 = vmatmul.msk.bf16.gmra.mxu2 %vm736_vm0, %v1149_v55  ;;  %v1030_v15 = vadd.f32 %v3305_v37, %v998_v57 }
 0x555   : > { %2378 = vmatmul.msk.bf16.vlgmr.msra.gmra.mxu2 %vm736_vm0, %v1343_v40 }
 0x55f   : > { %v1173_v58 = vpop.f32.mrf.mxu2 }
 0x560   : > { %v1183_v61 = vadd.f32 %v1173_v58, %v1023_v46 }
 0x565   : > { %2379 = vmatmul.msk.bf16.gmra.mxu2 %vm736_vm0, %v1345_v44 }
 0x567   : > { %v1175_v12 = vpop.f32.mrf.mxu2 }
 0x568   : > { %v1184_v6 = vadd.f32 %v1175_v12, %v1025_v60 }
 0x574   : > { %v1298_v42 = vpop.f32.mrf.mxu0 }
 0x57c   : > { %v1300_v62 = vpop.f32.mrf.mxu0 }
 0x57d   : > { %v1304_v63 = vpack.c.bf16 %v1300_v62, %v1298_v42 }
 0x57f   : > { %2377 = vmatmul.msk.bf16.gmra.mxu1 %vm736_vm0, %v1304_v63 }
 0x58f   : > { %2388 = vmatmul.msk.bf16.vlgmr.msra.gmra.mxu1 %vm736_vm0, %v1498_v0 }
 0x59f   : > { %2389 = vmatmul.msk.bf16.gmra.mxu1 %vm736_vm0, %v1500_v3 }
 0x5be   : > { %v1328_v4 = vpop.f32.mrf.mxu1 }
 0x5bf   : > { %v3409_v5 = vadd.f32 %v1328_v4, %v1183_v61 }
 0x5c6   : > { %v1330_v7 = vpop.f32.mrf.mxu1 }
 0x5c7   : > { %v3413_v10 = vadd.f32 %v1330_v7, %v1184_v6 }
 0x5c8   : > { %v1178_v13 = vpop.f32.mrf.mxu2 }
 0x5c9   : > { %v1185_v14 = vadd.f32 %v1178_v13, %v1028_v9 }
 0x5d0   : > { %v1180_v16 = vpop.f32.mrf.mxu2 }
 0x5d1   : > { %v1186_v17 = vadd.f32 %v1180_v16, %v1030_v15 }
 0x5d8   : > { %v1371_v18 = vpop.f32.mrf.mxu2 }
 0x5d9   : > { %v1381_v21 = vsel %vm768_vm1, %v1371_v18, -inf }
 0x5da   : > { %1382 = vmax.xlane.f32.xlu0 %v1381_v21 }
 0x5e0   : > { %v1373_v20 = vpop.f32.mrf.mxu2 }
 0x5e1   : > { %v1384_v22 = vsel %vm768_vm1, %v1373_v20, -inf }
 0x5e2   : > { %1385 = vmax.xlane.f32.xlu2 %v1384_v22 }
 0x5e8   : > { %v3418_v19 = vpop.f32.mrf.mxu2 }
 0x5e9   : > { %v1387_v27 = vsel %vm768_vm1, %v3418_v19, -inf }
 0x5ea   : > { %1388 = vmax.xlane.f32.xlu2 %v1387_v27 }
 0x5ee   : > { %1429 = vrot.lane.b32.xlu0 %v3240_v11, %s2938_s16 }
 0x5f0   : > { %v1378_v37 = vpop.f32.mrf.mxu2 }
 0x5f1   : > { %v1390_v23 = vsel %vm768_vm1, %v1378_v37, -inf }
 0x5f2   : > { %1391 = vmax.xlane.f32.xlu1 %v1390_v23 }
 0x5fc   : > { %v1333_v24 = vpop.f32.mrf.mxu1 }
 0x5fd   : > { %v3425_v25 = vadd.f32 %v1333_v24, %v1185_v14 }
 0x604   : > { %v1335_v28 = vpop.f32.mrf.mxu1 }
 0x605   : > { %v3427_v29 = vadd.f32 %v1335_v28, %v1186_v17 }
 0x60c   : > { %v1526_v30 = vpop.f32.mrf.mxu1 }
 0x60d   : > { %v1536_v51 = vsel %vm768_vm1, %v1526_v30, -inf }
 0x614   : > { %v3429_v31 = vpop.f32.mrf.mxu1 }
 0x615   : > { %v1539_v52 = vsel %vm768_vm1, %v3429_v31, -inf }
 0x61c   : > { %v3431_v32 = vpop.f32.mrf.mxu1 }
 0x61d   : > { %v1542_v43 = vsel %vm768_vm1, %v3431_v32, -inf }
 0x624   : > { %v3433_v34 = vpop.f32.mrf.mxu1 }
 0x625   : > { %v1545_v1 = vsel %vm768_vm1, %v3433_v34, -inf }
 0x626   : > { %1546 = vmax.xlane.f32.xlu2 %v1545_v1 }
 0x63e   : > { %1584 = vrot.lane.b32.xlu2 %v3240_v11, %s2939_s20 }
 0x64d   : > { %v1383_v35 = vpop.xlane.xlu0 %1382 }
 0x64e   : > { %v1393_v36 = vsub.f32 %v1371_v18, %v1383_v35 }
 0x650   : > { %v1397_v26 = vmul.f32 1.442695, %v1393_v36 }
 0x652   : > { %2614 = vpow2.f32 %v1397_v26 }
 0x655   : > { %v1386_v38 = vpop.xlane.xlu2 %1385 }
 0x656   : > { %v1394_v39 = vsub.f32 %v1373_v20, %v1386_v38 }
 0x658   : > { %v2615_v33 = vpop.eup %2614  ;;  %v1399_v41 = vmul.f32 1.442695, %v1394_v39 }
 0x659   : > { %v1405_v45 = vsel %vm768_vm1, %v2615_v33, 0.0 }
 0x65a   : > { %2616 = vpow2.f32 %v1399_v41  ;;  %1406 = vadd.xlane.f32.xlu1 %v1405_v45 }
 0x65d   : > { %v1389_v54 = vpop.xlane.xlu2 %1388 }
 0x65e   : > { %v1395_v0 = vsub.f32 %v3418_v19, %v1389_v54 }
 0x660   : > { %v2617_v47 = vpop.eup %2616  ;;  %v1430_v49 = vpop.permute.xlu0 %1429  ;;  %v1401_v60 = vmul.f32 1.442695, %v1395_v0 }
 0x661   : > { %1445 = vmatpush.bf16.msra.mxu3 %v1430_v49  ;;  %v1408_v50 = vsel %vm768_vm1, %v2617_v47, 0.0 }
 0x662   : > { %1409 = vadd.xlane.f32.xlu0 %v1408_v50  ;;  %1537 = vmax.xlane.f32.xlu1 %v1536_v51 }
 0x665   : > { %v1392_v56 = vpop.xlane.xlu1 %1391 }
 0x666   : > { %v1396_v40 = vsub.f32 %v1378_v37, %v1392_v56  ;;  %v2452_v56 = vld [vmem:[#allocation7 + $0x28] sm:$0xff] }
 0x668   : > { %v1403_v46 = vmul.f32 1.442695, %v1396_v40 }
 0x66a   : > { %1540 = vmax.xlane.f32.xlu0 %v1539_v52  ;;  %2618 = vpow2.f32 %v1403_v46 }
 0x670   : > { %v3448_v58 = vpop.eup %2618 }
 0x671   : > { %v1414_v61 = vsel %vm768_vm1, %v3448_v58, 0.0 }
 0x672   : > { %1543 = vmax.xlane.f32.xlu0 %v1542_v43 }
 0x686   : > { %1582 = vrot.lane.b32.xlu0 %v3244_v48, %s2939_s20 }
 0x699   : > { %v1547_v55 = vpop.xlane.xlu2 %1546 }
 0x69a   : > { %v1551_v16 = vsub.f32 %v3433_v34, %v1547_v55 }
 0x69c   : > { %v1558_v21 = vmul.f32 1.442695, %v1551_v16 }
 0x6a1   : > { %v1585_v57 = vpop.permute.xlu2 %1584 }
 0x6a2   : > { %1600 = vmatpush.bf16.msrb.mxu2 %v1585_v57 }
 0x6b0   : > { %1415 = vadd.xlane.f32.xlu0 %v1414_v61 }
 0x6c4   : > { %1658 = vrot.lane.b32.xlu0 %v3149_v53, %s2940_s27 }
 0x6cc   : > { %1811 = vrot.lane.b32.xlu0 %v3153_v59, %s2941_s23 }
 0x6cd   : > { %v1407_v44 = vpop.xlane.xlu1 %1406 }
 0x6ce   : > { %2620 = vrcp.f32 %v1407_v44 }
 0x6d4   : > { %1652 = vrot.lane.b32.xlu0 %v3157_v2, %s2940_s27  ;;  %v2621_v4 = vpop.eup %2620 }
 0x6d5   : > { %v1410_v42 = vpop.xlane.xlu0 %1409  ;;  %v1538_v62 = vpop.xlane.xlu1 %1537  ;;  %v1421_v6 = vmul.f32 %v2621_v4, %v2615_v33 }
 0x6d6   : > { %2622 = vrcp.f32 %v1410_v42  ;;  %v1548_v63 = vsub.f32 %v1526_v30, %v1538_v62  ;;  %v2451_v30 = vld [vmem:[#allocation7 + $0x20] sm:$0xff] }
 0x6d7   : > { %1481 = vmatpush.bf16.msra.mxu0 %v2451_v30 }
 0x6d8   : > { %v1552_v3 = vmul.f32 1.442695, %v1548_v63 }
 0x6da   : > { %2624 = vpow2.f32 %v1552_v3 }
 0x6db   : > { %2626 = vpow2.f32 %v1401_v60 }
 0x6dc   : > { %v2623_v12 = vpop.eup %2622  ;;  %1809 = vrot.lane.b32.xlu0 %v3161_v8, %s2941_s23 }
 0x6dd   : > { %v1422_v7 = vmul.f32 %v2623_v12, %v2617_v47  ;;  %v1541_v9 = vpop.xlane.xlu0 %1540 }
 0x6de   : > { %v1549_v13 = vsub.f32 %v3429_v31, %v1541_v9 }
 0x6df   : > { %v1425_v14 = vpack.c.bf16 %v1422_v7, %v1421_v6 }
 0x6e0   : > { %v2625_v15 = vpop.eup %2624  ;;  %v1554_v17 = vmul.f32 1.442695, %v1549_v13 }
 0x6e1   : > { %v1560_v18 = vsel %vm768_vm1, %v2625_v15, 0.0  ;;  %v2627_v20 = vpop.eup %2626 }
 0x6e2   : > { %2628 = vpow2.f32 %v1554_v17  ;;  %1561 = vadd.xlane.f32.xlu2 %v1560_v18  ;;  %v1411_v27 = vsel %vm768_vm1, %v2627_v20, 0.0 }
 0x6e3   : > { %2630 = vpow2.f32 %v1558_v21 }
 0x6e5   : > { %v1544_v23 = vpop.xlane.xlu0 %1543 }
 0x6e6   : > { %v1550_v31 = vsub.f32 %v3431_v32, %v1544_v23 }
 0x6e8   : > { %v2629_v22 = vpop.eup %2628  ;;  %v1556_v34 = vmul.f32 1.442695, %v1550_v31 }
 0x6e9   : > { %v1563_v19 = vsel %vm768_vm1, %v2629_v22, 0.0  ;;  %v2631_v37 = vpop.eup %2630 }
 0x6ea   : > { %1564 = vadd.xlane.f32.xlu1 %v1563_v19  ;;  %1412 = vadd.xlane.f32.xlu2 %v1411_v27  ;;  %v1569_v24 = vsel %vm768_vm1, %v2631_v37, 0.0  ;;  %2632 = vpow2.f32 %v1556_v34 }
 0x6f0   : > { %v2633_v1 = vpop.eup %2632 }
 0x6f1   : > { %v1566_v35 = vsel %vm768_vm1, %v2633_v1, 0.0 }
 0x6f2   : > { %1570 = vadd.xlane.f32.xlu2 %v1569_v24 }
 0x6f8   : > { %v1583_v28 = vpop.permute.xlu0 %1582 }
 0x6f9   : > { %1601 = vmatpush.bf16.msrb.mxu2 %v1583_v28 }
 0x703   : > { %1427 = vrot.lane.b32.xlu1 %v3244_v48, %s2938_s16 }
 0x70a   : > { %1656 = vrot.lane.b32.xlu2 %v3153_v59, %s2940_s27 }
 0x712   : > { %1807 = vrot.lane.b32.xlu2 %v3157_v2, %s2941_s23 }
 0x723   : > { %v1416_v36 = vpop.xlane.xlu0 %1415 }
 0x72d   : > { %1567 = vadd.xlane.f32.xlu1 %v1566_v35 }
 0x736   : > { %v1659_v26 = vpop.permute.xlu0 %1658 }
 0x737   : > { %v1670_v38 = vsel %vm736_vm0, %v1659_v26, 0 }
 0x738   : > { %1678 = vmatpush.bf16.xpose.msrb.mxu0 %v1670_v38 }
 0x746   : > { %1813 = vrot.lane.b32.xlu1 %v3149_v53, %s2941_s23 }
 0x74e   : > { %1654 = vrot.lane.b32.xlu1 %v3161_v8, %s2940_s27 }
 0x755   : > { %v1562_v59 = vpop.xlane.xlu2 %1561 }
 0x756   : > { %2634 = vrcp.f32 %v1562_v59 }
 0x75c   : > { %v2635_v39 = vpop.eup %2634 }
 0x75d   : > { %v1413_v2 = vpop.xlane.xlu2 %1412  ;;  %v1565_v32 = vpop.xlane.xlu1 %1564  ;;  %v1576_v45 = vmul.f32 %v2635_v39, %v2625_v15 }
 0x75e   : > { %2636 = vrcp.f32 %v1565_v32 }
 0x75f   : > { %2638 = vrcp.f32 %v1413_v2 }
 0x760   : > { %2640 = vrcp.f32 %v1416_v36 }
 0x764   : > { %v2637_v33 = vpop.eup %2636 }
 0x765   : > { %v1571_v41 = vpop.xlane.xlu2 %1570  ;;  %v1577_v47 = vmul.f32 %v2637_v33, %v2629_v22  ;;  %v2639_v8 = vpop.eup %2638 }
 0x766   : > { %v2641_v52 = vpop.eup %2640  ;;  %v1423_v43 = vmul.f32 %v2639_v8, %v2627_v20  ;;  %2642 = vrcp.f32 %v1571_v41 }
 0x767   : > { %v1580_v49 = vpack.c.bf16 %v1577_v47, %v1576_v45  ;;  %v1424_v54 = vmul.f32 %v2641_v52, %v3448_v58  ;;  %v1812_v58 = vpop.permute.xlu0 %1811 }
 0x768   : > { %v1822_v0 = vsel %vm736_vm0, %v1812_v58, 0 }
 0x769   : > { %2390 = vmatmul.msk.bf16.vlgmr.msrb.gmra.mxu2 %vm768_vm1, %v1580_v49  ;;  %v1426_v55 = vpack.c.bf16 %v1424_v54, %v1423_v43 }
 0x76c   : > { %v2643_v57 = vpop.eup %2642 }
 0x76d   : > { %v1657_v50 = vpop.permute.xlu2 %1656  ;;  %v1579_v44 = vmul.f32 %v2643_v57, %v2631_v37 }
 0x76e   : > { %v1667_v51 = vsel %vm736_vm0, %v1657_v50, 0 }
 0x76f   : > { %1679 = vmatpush.bf16.xpose.msrb.mxu0 %v1667_v51  ;;  %v1653_v15 = vpop.permute.xlu0 %1652 }
 0x775   : > { %v1428_v53 = vpop.permute.xlu1 %1427  ;;  %v1808_v20 = vpop.permute.xlu2 %1807 }
 0x776   : > { %1446 = vmatpush.bf16.msra.mxu3 %v1428_v53 }
 0x777   : > { %v1810_v22 = vpop.permute.xlu0 %1809 }
 0x779   : > { %2380 = vmatmul.msk.bf16.vlgmr.msra.gmra.mxu3 %vm768_vm1, %v1425_v14 }
 0x77a   : > { %1636 = vmatpush.bf16.msrb.mxu3 %v2452_v56 }
 0x789   : > { %2381 = vmatmul.msk.bf16.gmra.mxu3 %vm768_vm1, %v1426_v55 }
 0x7a0   : > { %v1568_v40 = vpop.xlane.xlu1 %1567 }
 0x7a1   : > { %2644 = vrcp.f32 %v1568_v40 }
 0x7a7   : > { %v2645_v46 = vpop.eup %2644 }
 0x7a8   : > { %v1578_v61 = vmul.f32 %v2645_v46, %v2633_v1 }
 0x7aa   : > { %v1581_v42 = vpack.c.bf16 %v1579_v44, %v1578_v61 }
 0x7ac   : > { %2391 = vmatmul.msk.bf16.gmra.mxu2 %vm768_vm1, %v1581_v42 }
 0x7b8   : > { %v1814_v62 = vpop.permute.xlu1 %1813 }
 0x7b9   : > { %v1825_v63 = vsel %vm736_vm0, %v1814_v62, 0 }
 0x7ba   : > { %1833 = vmatpush.bf16.xpose.msra.mxu3 %v1825_v63 }
 0x7c0   : > { %v1655_v17 = vpop.permute.xlu1 %1654 }
 0x7c2   : > { %1834 = vmatpush.bf16.xpose.msra.mxu3 %v1822_v0 }
 0x7ec   : > { %v1603_v3 = vpop.f32.mrf.mxu2 }
 0x7f4   : > { %v1605_v4 = vpop.f32.mrf.mxu2 }
 0x7f5   : > { %v1613_v12 = vpack.c.bf16 %v1605_v4, %v1603_v3 }
 0x7f7   : > { %2396 = vmatmul.msk.bf16.vlgmr.msrb.gmra.mxu3 %vm736_vm0, %v1613_v12 }
 0x7fc   : > { %v1448_v60 = vpop.f32.mrf.mxu3 }
 0x804   : > { %v1450_v6 = vpop.f32.mrf.mxu3 }
 0x805   : > { %v1458_v7 = vpack.c.bf16 %v1450_v6, %v1448_v60 }
 0x807   : > { %2386 = vmatmul.msk.bf16.vlgmr.msra.gmra.mxu0 %vm736_vm0, %v1458_v7 }
 0x80c   : > { %v1453_v9 = vpop.f32.mrf.mxu3 }
 0x814   : > { %v1455_v13 = vpop.f32.mrf.mxu3 }
 0x815   : > { %v1459_v14 = vpack.c.bf16 %v1455_v13, %v1453_v9 }
 0x817   : > { %2387 = vmatmul.msk.bf16.gmra.mxu0 %vm736_vm0, %v1459_v14 }
 0x827   : > { %2398 = vmatmul.msk.bf16.vlgmr.msrb.gmra.mxu0 %vm736_vm0, %v1653_v15 }
 0x82f   : > { %v1608_v16 = vpop.f32.mrf.mxu2 }
 0x837   : > { %v1610_v18 = vpop.f32.mrf.mxu2  ;;  %2399 = vmatmul.msk.bf16.gmra.mxu0 %vm736_vm0, %v1655_v17 }
 0x838   : > { %v1614_v21 = vpack.c.bf16 %v1610_v18, %v1608_v16 }
 0x83a   : > { %2397 = vmatmul.msk.bf16.gmra.mxu3 %vm736_vm0, %v1614_v21 }
 0x84a   : > { %2408 = vmatmul.msk.bf16.vlgmr.msra.gmra.mxu3 %vm736_vm0, %v1808_v20 }
 0x85a   : > { %2409 = vmatmul.msk.bf16.gmra.mxu3 %vm736_vm0, %v1810_v22 }
 0x87a   : > { %v1638_v19 = vpop.f32.mrf.mxu3 }
 0x882   : > { %v1640_v30 = vpop.f32.mrf.mxu3 }
 0x884   : > { %v1483_v27 = vpop.f32.mrf.mxu0 }
 0x885   : > { %v1493_v37 = vadd.f32 %v1483_v27, %v3409_v5 }
 0x887   : > { %v3497_v23 = vadd.f32 %v1638_v19, %v1493_v37 }
 0x88c   : > { %v1485_v24 = vpop.f32.mrf.mxu0 }
 0x88d   : > { %v1494_v28 = vadd.f32 %v1485_v24, %v3413_v10 }
 0x88f   : > { %v3500_v31 = vadd.f32 %v1640_v30, %v1494_v28 }
 0x894   : > { %v1488_v34 = vpop.f32.mrf.mxu0 }
 0x895   : > { %v1495_v1 = vadd.f32 %v1488_v34, %v3425_v25 }
 0x89c   : > { %v1490_v35 = vpop.f32.mrf.mxu0 }
 0x89d   : > { %v1496_v36 = vadd.f32 %v1490_v35, %v3427_v29 }
 0x8a4   : > { %v1681_v26 = vpop.f32.mrf.mxu0 }
 0x8a5   : > { %v1691_v38 = vsel %vm768_vm1, %v1681_v26, -inf }
 0x8a6   : > { %1692 = vmax.xlane.f32.xlu2 %v1691_v38 }
 0x8ac   : > { %v1683_v59 = vpop.f32.mrf.mxu0 }
 0x8ad   : > { %v1694_v5 = vsel %vm768_vm1, %v1683_v59, -inf }
 0x8ae   : > { %1695 = vmax.xlane.f32.xlu1 %v1694_v5 }
 0x8b4   : > { %v1686_v2 = vpop.f32.mrf.mxu0 }
 0x8b5   : > { %v1697_v10 = vsel %vm768_vm1, %v1686_v2, -inf }
 0x8b6   : > { %1698 = vmax.xlane.f32.xlu1 %v1697_v10 }
 0x8bc   : > { %v3507_v32 = vpop.f32.mrf.mxu0 }
 0x8bd   : > { %v1643_v39 = vpop.f32.mrf.mxu3  ;;  %v1700_v25 = vsel %vm768_vm1, %v3507_v32, -inf }
 0x8be   : > { %v3511_v33 = vadd.f32 %v1643_v39, %v1495_v1  ;;  %1701 = vmax.xlane.f32.xlu2 %v1700_v25 }
 0x8c5   : > { %v1645_v29 = vpop.f32.mrf.mxu3 }
 0x8c6   : > { %v3513_v41 = vadd.f32 %v1645_v29, %v1496_v36  ;;  %v2453_v29 = vld [vmem:[#allocation7 + $0x30] sm:$0xff] }
 0x8c7   : > { %1791 = vmatpush.bf16.msra.mxu2 %v2453_v29  ;;  %v2691_v29 = vld [vmem:[%s3134_s24 + $0x18] sm:$0xff] }
 0x8cd   : > { %v3515_v45 = vpop.f32.mrf.mxu3 }
 0x8ce   : > { %v1846_v58 = vsel %vm768_vm1, %v3515_v45, -inf }
 0x8d5   : > { %v1838_v47 = vpop.f32.mrf.mxu3 }
 0x8d6   : > { %v1849_v42 = vsel %vm768_vm1, %v1838_v47, -inf }
 0x8dd   : > { %v3517_v49 = vpop.f32.mrf.mxu3 }
 0x8de   : > { %v1852_v3 = vsel %vm768_vm1, %v3517_v49, -inf }
 0x8e5   : > { %v1843_v50 = vpop.f32.mrf.mxu3 }
 0x8e6   : > { %v1855_v51 = vsel %vm768_vm1, %v1843_v50, -inf }
 0x8e7   : > { %1856 = vmax.xlane.f32.xlu1 %v1855_v51 }
 0x900   : > { %1739 = vrot.lane.b32.xlu1 %v3240_v11, %s2940_s27 }
 0x919   : > { %v1693_v53 = vpop.xlane.xlu2 %1692 }
 0x91a   : > { %v1703_v8 = vsub.f32 %v1681_v26, %v1693_v53 }
 0x91c   : > { %v1707_v52 = vmul.f32 1.442695, %v1703_v8 }
 0x91e   : > { %2646 = vpow2.f32 %v1707_v52 }
 0x921   : > { %v1696_v43 = vpop.xlane.xlu1 %1695 }
 0x922   : > { %v1704_v54 = vsub.f32 %v1683_v59, %v1696_v43 }
 0x924   : > { %v2647_v55 = vpop.eup %2646  ;;  %v1709_v56 = vmul.f32 1.442695, %v1704_v54 }
 0x925   : > { %v1715_v40 = vsel %vm768_vm1, %v2647_v55, 0.0 }
 0x926   : > { %2648 = vpow2.f32 %v1709_v56  ;;  %1716 = vadd.xlane.f32.xlu2 %v1715_v40 }
 0x929   : > { %v1699_v57 = vpop.xlane.xlu1 %1698 }
 0x92a   : > { %v1705_v46 = vsub.f32 %v1686_v2, %v1699_v57 }
 0x92c   : > { %v2649_v61 = vpop.eup %2648  ;;  %v1711_v44 = vmul.f32 1.442695, %v1705_v46 }
 0x92d   : > { %v1718_v62 = vsel %vm768_vm1, %v2649_v61, 0.0 }
 0x92e   : > { %2650 = vpow2.f32 %v1711_v44  ;;  %1850 = vmax.xlane.f32.xlu2 %v1849_v42  ;;  %1719 = vadd.xlane.f32.xlu0 %v1718_v62 }
 0x931   : > { %v1702_v13 = vpop.xlane.xlu2 %1701 }
 0x934   : > { %v3525_v63 = vpop.eup %2650 }
 0x935   : > { %v1721_v0 = vsel %vm768_vm1, %v3525_v63, 0.0 }
 0x936   : > { %1847 = vmax.xlane.f32.xlu0 %v1846_v58  ;;  %1722 = vadd.xlane.f32.xlu1 %v1721_v0 }
 0x93e   : > { %1853 = vmax.xlane.f32.xlu0 %v1852_v3 }
 0x946   : > { %1737 = vrot.lane.b32.xlu2 %v3244_v48, %s2940_s27 }
 0x952   : > { %1894 = vrot.lane.b32.xlu0 %v3240_v11, %s2941_s23  ;;  %v1706_v11 = vsub.f32 %v3507_v32, %v1702_v13 }
 0x954   : > { %v1713_v22 = vmul.f32 1.442695, %v1706_v11 }
 0x95a   : > { %v1857_v4 = vpop.xlane.xlu1 %1856 }
 0x95b   : > { %v1861_v12 = vsub.f32 %v1843_v50, %v1857_v4 }
 0x95d   : > { %v1868_v60 = vmul.f32 1.442695, %v1861_v12  ;;  %v2454_v12 = vld [vmem:[#allocation7 + $0x38] sm:$0xff] }
 0x95f   : > { %2652 = vpow2.f32 %v1868_v60 }
 0x965   : > { %v3537_v6 = vpop.eup %2652 }
 0x966   : > { %v1879_v7 = vsel %vm768_vm1, %v3537_v6, 0.0 }
 0x967   : > { %1880 = vadd.xlane.f32.xlu1 %v1879_v7 }
 0x972   : > { %v1740_v9 = vpop.permute.xlu1 %1739 }
 0x973   : > { %1755 = vmatpush.bf16.msrb.mxu1 %v1740_v9 }
 0x999   : > { %v1717_v14 = vpop.xlane.xlu2 %1716 }
 0x99a   : > { %2654 = vrcp.f32 %v1717_v14 }
 0x9a0   : > { %v2655_v21 = vpop.eup %2654 }
 0x9a1   : > { %v1851_v15 = vpop.xlane.xlu2 %1850  ;;  %v1720_v16 = vpop.xlane.xlu0 %1719  ;;  %v1731_v19 = vmul.f32 %v2655_v21, %v2647_v55 }
 0x9a2   : > { %v1859_v17 = vsub.f32 %v1838_v47, %v1851_v15  ;;  %2656 = vrcp.f32 %v1720_v16 }
 0x9a4   : > { %v1864_v18 = vmul.f32 1.442695, %v1859_v17 }
 0x9a6   : > { %2658 = vpow2.f32 %v1864_v18 }
 0x9a7   : > { %2660 = vpow2.f32 %v1713_v22  ;;  %v2547_v22 = vld [vmem:[#allocation9] ss:$0 sm:$0xff] }
 0x9a8   : > { %v2657_v20 = vpop.eup %2656 }
 0x9a9   : > { %v1732_v27 = vmul.f32 %v2657_v20, %v2649_v61  ;;  %v1738_v37 = vpop.permute.xlu2 %1737  ;;  %v1848_v24 = vpop.xlane.xlu0 %1847 }
 0x9aa   : > { %v1858_v28 = vsub.f32 %v3515_v45, %v1848_v24  ;;  %1756 = vmatpush.bf16.msrb.mxu1 %v1738_v37  ;;  %v1723_v47 = vpop.xlane.xlu1 %1722 }
 0x9ab   : > { %v1735_v30 = vpack.c.bf16 %v1732_v27, %v1731_v19  ;;  %v2688_v19 = vld [vmem:[%s3134_s24] sm:$0xff] }
 0x9ac   : > { %v2659_v34 = vpop.eup %2658  ;;  %v1862_v1 = vmul.f32 1.442695, %v1858_v28 }
 0x9ad   : > { %2400 = vmatmul.msk.bf16.vlgmr.msrb.gmra.mxu1 %vm768_vm1, %v1735_v30  ;;  %v1873_v35 = vsel %vm768_vm1, %v2659_v34, 0.0  ;;  %v2661_v36 = vpop.eup %2660 }
 0x9ae   : > { %2662 = vpow2.f32 %v1862_v1  ;;  %1874 = vadd.xlane.f32.xlu0 %v1873_v35  ;;  %v1724_v38 = vsel %vm768_vm1, %v2661_v36, 0.0  ;;  %1946 = vmatpush.bf16.msra.mxu1 %v2454_v12  ;;  %v2689_v1 = vld [vmem:[%s3134_s24 + $0x8] sm:$0xff] }
 0x9b1   : > { %v1854_v5 = vpop.xlane.xlu0 %1853 }
 0x9b2   : > { %v1860_v10 = vsub.f32 %v3517_v49, %v1854_v5  ;;  %v2690_v5 = vld [vmem:[%s3134_s24 + $0x10] sm:$0xff] }
 0x9b4   : > { %v2663_v26 = vpop.eup %2662  ;;  %v1866_v32 = vmul.f32 1.442695, %v1860_v10 }
 0x9b5   : > { %v1870_v59 = vsel %vm768_vm1, %v2663_v26, 0.0 }
 0x9b6   : > { %1725 = vadd.xlane.f32.xlu0 %v1724_v38  ;;  %1871 = vadd.xlane.f32.xlu2 %v1870_v59  ;;  %2664 = vpow2.f32 %v1866_v32 }
 0x9bc   : > { %v2665_v39 = vpop.eup %2664 }
 0x9bd   : > { %v1876_v25 = vsel %vm768_vm1, %v2665_v39, 0.0 }
 0x9c4   : > { %v1895_v2 = vpop.permute.xlu0 %1894 }
 0x9c5   : > { %1910 = vmatpush.bf16.msra.mxu0 %v1895_v2 }
 0x9ce   : > { %1892 = vrot.lane.b32.xlu2 %v3244_v48, %s2941_s23 }
 0x9da   : > { %v1881_v42 = vpop.xlane.xlu1 %1880 }
 0x9f7   : > { %1877 = vadd.xlane.f32.xlu2 %v1876_v25 }
 0xa21   : > { %v1875_v45 = vpop.xlane.xlu0 %1874 }
 0xa22   : > { %2666 = vrcp.f32 %v1875_v45 }
 0xa23   : > { %2668 = vrcp.f32 %v1723_v47 }
 0xa28   : > { %v2667_v48 = vpop.eup %2666 }
 0xa29   : > { %v1872_v50 = vpop.xlane.xlu2 %1871  ;;  %v1726_v51 = vpop.xlane.xlu0 %1725  ;;  %v1887_v43 = vmul.f32 %v2667_v48, %v2659_v34 }
 0xa2a   : > { %2670 = vrcp.f32 %v1872_v50  ;;  %v1758_v53 = vpop.f32.mrf.mxu1  ;;  %v2669_v8 = vpop.eup %2668  ;;  %v2942_v50 = vmov 128.0  }
 0xa2b   : > { %2672 = vrcp.f32 %v1726_v51  ;;  %v1733_v40 = vmul.f32 %v2669_v8, %v3525_v63 }
 0xa2c   : > { %2674 = vrcp.f32 %v1881_v42 }
 0xa30   : > { %v2671_v49 = vpop.eup %2670 }
 0xa31   : > { %v2673_v52 = vpop.eup %2672  ;;  %v1886_v54 = vmul.f32 %v2671_v49, %v2663_v26  ;;  %v1893_v55 = vpop.permute.xlu2 %1892 }
 0xa32   : > { %v1760_v56 = vpop.f32.mrf.mxu1  ;;  %1911 = vmatpush.bf16.msra.mxu0 %v1893_v55  ;;  %v1734_v57 = vmul.f32 %v2673_v52, %v2661_v36  ;;  %v2675_v58 = vpop.eup %2674 }
 0xa33   : > { %v1890_v46 = vpack.c.bf16 %v1887_v43, %v1886_v54  ;;  %v1768_v61 = vpack.c.bf16 %v1760_v56, %v1758_v53  ;;  %v1889_v3 = vmul.f32 %v2675_v58, %v3537_v6 }
 0xa34   : > { %v1736_v44 = vpack.c.bf16 %v1734_v57, %v1733_v40 }
 0xa35   : > { %2406 = vmatmul.msk.bf16.vlgmr.msra.gmra.mxu2 %vm736_vm0, %v1768_v61  ;;  %2410 = vmatmul.msk.bf16.vlgmr.msra.gmra.mxu0 %vm768_vm1, %v1890_v46 }
 0xa36   : > { %2401 = vmatmul.msk.bf16.gmra.mxu1 %vm768_vm1, %v1736_v44 }
 0xa6a   : > { %v1878_v62 = vpop.xlane.xlu2 %1877 }
 0xa6b   : > { %2676 = vrcp.f32 %v1878_v62 }
 0xa6c   : > { %2678 = vrcp.f32 %v2942_v50 }
 0xa71   : > { %v2677_v0 = vpop.eup %2676 }
 0xa72   : > { %v1888_v4 = vmul.f32 %v2677_v0, %v2665_v39  ;;  %v2679_v51 = vpop.eup %2678 }
 0xa73   : > { %v1983_v53 = vmul.f32 128.0, %v2679_v51  ;;  %vm1987_vm2 = vweird.f32 %v2679_v51 }
 0xa74   : > { %v1891_v63 = vpack.c.bf16 %v1889_v3, %v1888_v4 }
 0xa76   : > { %2411 = vmatmul.msk.bf16.gmra.mxu0 %vm768_vm1, %v1891_v63 }
 0xab2   : > { %v1913_v60 = vpop.f32.mrf.mxu0 }
 0xab3   : > { %v1763_v7 = vpop.f32.mrf.mxu1 }
 0xab8   : > { %v1793_v11 = vpop.f32.mrf.mxu2 }
 0xab9   : > { %v1803_v18 = vadd.f32 %v1793_v11, %v3497_v23 }
 0xaba   : > { %v1915_v9 = vpop.f32.mrf.mxu0 }
 0xabb   : > { %v1765_v13 = vpop.f32.mrf.mxu1  ;;  %v1923_v14 = vpack.c.bf16 %v1915_v9, %v1913_v60 }
 0xabc   : > { %v1769_v15 = vpack.c.bf16 %v1765_v13, %v1763_v7 }
 0xabd   : > { %2416 = vmatmul.msk.bf16.vlgmr.msra.gmra.mxu1 %vm736_vm0, %v1923_v14 }
 0xabe   : > { %2407 = vmatmul.msk.bf16.gmra.mxu2 %vm736_vm0, %v1769_v15 }
 0xac0   : > { %v1795_v37 = vpop.f32.mrf.mxu2 }
 0xac1   : > { %v1804_v28 = vadd.f32 %v1795_v37, %v3500_v31 }
 0xaf3   : > { %v1918_v16 = vpop.f32.mrf.mxu0 }
 0xafb   : > { %v1920_v17 = vpop.f32.mrf.mxu0 }
 0xafc   : > { %v1924_v6 = vpack.c.bf16 %v1920_v17, %v1918_v16 }
 0xafe   : > { %2417 = vmatmul.msk.bf16.gmra.mxu1 %vm736_vm0, %v1924_v6 }
 0xb3a   : > { %v1948_v21 = vpop.f32.mrf.mxu1 }
 0xb3b   : > { %v1958_v20 = vadd.f32 %v1948_v21, %v1803_v18  ;;  %v2548_v21 = vld [vmem:[#allocation10] ss:$0 sm:$0xff] }
 0xb3d   : > { %v1962_v27 = vadd.f32 %v2688_v19, %v1958_v20  ;;  %v2549_v19 = vld [vmem:[#allocation12] ss:$0 sm:$0xff] }
 0xb3f   : > { %v1970_v24 = vadd.f32 %v2547_v22, %v1962_v27 }
 0xb41   : > { %1974 = vadd.xlane.f32.xlu1 %v1970_v24  ;;  %v1798_v26 = vpop.f32.mrf.mxu2 }
 0xb42   : > { %v1950_v30 = vpop.f32.mrf.mxu1  ;;  %v1805_v23 = vadd.f32 %v1798_v26, %v3511_v33  ;;  %v1984_v33 = vsub.f32 1.0, %v1983_v53 }
 0xb43   : > { %v1959_v34 = vadd.f32 %v1950_v30, %v1804_v28 }
 0xb44   : > { %v1985_v48 = vmul.f32 %v2679_v51, %v1984_v33 }
 0xb45   : > { %v1963_v35 = vadd.f32 %v2689_v1, %v1959_v34 }
 0xb46   : > { %v1986_v8 = vadd.f32 %v2679_v51, %v1985_v48 }
 0xb47   : > { %v1971_v36 = vadd.f32 %v2547_v22, %v1963_v35 }
 0xb48   : > { %v3568_v49 = vsel %vm1987_vm2, %v2679_v51, %v1986_v8 }
 0xb49   : > { %1976 = vadd.xlane.f32.xlu0 %v1971_v36  ;;  %v1800_v10 = vpop.f32.mrf.mxu2 }
 0xb4a   : > { %v1806_v39 = vadd.f32 %v1800_v10, %v3513_v41 }
 0xb7b   : > { %v1953_v38 = vpop.f32.mrf.mxu1 }
 0xb7c   : > { %v1960_v59 = vadd.f32 %v1953_v38, %v1805_v23 }
 0xb7e   : > { %v1964_v2 = vadd.f32 %v2690_v5, %v1960_v59 }
 0xb80   : > { %v1972_v32 = vadd.f32 %v2547_v22, %v1964_v2 }
 0xb82   : > { %1978 = vadd.xlane.f32.xlu1 %v1972_v32 }
 0xb83   : > { %v1955_v31 = vpop.f32.mrf.mxu1 }
 0xb84   : > { %v1961_v25 = vadd.f32 %v1955_v31, %v1806_v39 }
 0xb86   : > { %v1965_v45 = vadd.f32 %v2691_v29, %v1961_v25 }
 0xb88   : > { %v1973_v47 = vadd.f32 %v2547_v22, %v1965_v45 }
 0xb8a   : > { %1980 = vadd.xlane.f32.xlu0 %v1973_v47 }
 0xbb4   : > { %v1975_v52 = vpop.xlane.xlu1 %1974 }
 0xbb5   : > { %v1989_v41 = vmul.f32 %v3568_v49, %v1975_v52 }
 0xbb7   : > { %v1993_v43 = vsub.f32 %v1970_v24, %v1989_v41 }
 0xbb9   : > { %v1997_v54 = vmul.f32 %v1993_v43, %v1993_v43 }
 0xbbb   : > { %2001 = vadd.xlane.f32.xlu2 %v1997_v54 }
 0xbbc   : > { %v1977_v55 = vpop.xlane.xlu0 %1976 }
 0xbbd   : > { %v1990_v56 = vmul.f32 %v3568_v49, %v1977_v55 }
 0xbbf   : > { %v1994_v40 = vsub.f32 %v1971_v36, %v1990_v56 }
 0xbc1   : > { %v1998_v57 = vmul.f32 %v1994_v40, %v1994_v40 }
 0xbc3   : > { %2003 = vadd.xlane.f32.xlu1 %v1998_v57 }
 0xbf5   : > { %v1979_v46 = vpop.xlane.xlu1 %1978 }
 0xbf6   : > { %v1991_v61 = vmul.f32 %v3568_v49, %v1979_v46 }
 0xbf8   : > { %v3573_v44 = vsub.f32 %v1972_v32, %v1991_v61 }
 0xbfa   : > { %v1999_v42 = vmul.f32 %v3573_v44, %v3573_v44 }
 0xbfc   : > { %2005 = vadd.xlane.f32.xlu0 %v1999_v42 }
 0xbfd   : > { %v1981_v62 = vpop.xlane.xlu0 %1980 }
 0xbfe   : > { %v1992_v58 = vmul.f32 %v3568_v49, %v1981_v62 }
 0xc00   : > { %v3578_v0 = vsub.f32 %v1973_v47, %v1992_v58 }
 0xc02   : > { %v2000_v3 = vmul.f32 %v3578_v0, %v3578_v0 }
 0xc04   : > { %2007 = vadd.xlane.f32.xlu2 %v2000_v3 }
 0xc2e   : > { %v2002_v4 = vpop.xlane.xlu2 %2001 }
 0xc2f   : > { %v2009_v63 = vmul.f32 %v2002_v4, %v3568_v49 }
 0xc31   : > { %v2013_v12 = vadd.f32 1e-05, %v2009_v63 }
 0xc33   : > { %2680 = vrsqrt.f32 %v2013_v12  ;;  %vm2023_vm4 = vweird.f32 %v2013_v12 }
 0xc36   : > { %v2004_v60 = vpop.xlane.xlu1 %2003 }
 0xc37   : > { %v2010_v7 = vmul.f32 %v2004_v60, %v3568_v49 }
 0xc39   : > { %v2681_v9 = vpop.eup %2680  ;;  %v2014_v13 = vadd.f32 1e-05, %v2010_v7 }
 0xc3a   : > { %v2018_v14 = vmul.f32 %v2681_v9, %v2013_v12  ;;  %vm2024_vm3 = vweird.f32 %v2681_v9 }
 0xc3b   : > { %2682 = vrsqrt.f32 %v2014_v13  ;;  %vm2025_vm5 = vmor %vm2023_vm4, %vm2024_vm3  ;;  %vm2033_vm7 = vweird.f32 %v2014_v13 }
 0xc3c   : > { %v2019_v15 = vmul.f32 %v2681_v9, %v2018_v14 }
 0xc3e   : > { %v2020_v16 = vmul.f32 0.5, %v2019_v15 }
 0xc40   : > { %v2021_v17 = vsub.f32 1.5, %v2020_v16 }
 0xc41   : > { %v2683_v6 = vpop.eup %2682 }
 0xc42   : > { %v2022_v11 = vmul.f32 %v2681_v9, %v2021_v17  ;;  %v2028_v18 = vmul.f32 %v2683_v6, %v2014_v13  ;;  %vm2034_vm6 = vweird.f32 %v2683_v6 }
 0xc43   : > { %vm2035_vm8 = vmor %vm2033_vm7, %vm2034_vm6 }
 0xc44   : > { %v2026_v20 = vsel %vm2025_vm5, %v2681_v9, %v2022_v11  ;;  %v2029_v22 = vmul.f32 %v2683_v6, %v2028_v18 }
 0xc45   : > { %v2057_v27 = vmul.f32 %v2026_v20, %v1993_v43 }
 0xc46   : > { %v2030_v37 = vmul.f32 0.5, %v2029_v22 }
 0xc47   : > { %v2065_v24 = vmul.f32 %v2548_v21, %v2057_v27 }
 0xc48   : > { %v2031_v28 = vsub.f32 1.5, %v2030_v37 }
 0xc49   : > { %v2073_v30 = vadd.f32 %v2549_v19, %v2065_v24 }
 0xc4a   : > { %v2032_v34 = vmul.f32 %v2683_v6, %v2031_v28 }
 0xc4b   : > { %2077 = vst [vmem:[%s3588_s28] sm:$0xff] %v2073_v30 }
 0xc4c   : > { %v2036_v1 = vsel %vm2035_vm8, %v2683_v6, %v2032_v34 }
 0xc4d   : > { %v2058_v35 = vmul.f32 %v2036_v1, %v1994_v40 }
 0xc4f   : > { %v2066_v36 = vmul.f32 %v2548_v21, %v2058_v35 }
 0xc51   : > { %v2074_v26 = vadd.f32 %v2549_v19, %v2066_v36 }
 0xc53   : > { %2078 = vst [vmem:[%s3588_s28 + $0x8] sm:$0xff] %v2074_v26 }
 0xc6f   : > { %v2006_v23 = vpop.xlane.xlu0 %2005 }
 0xc70   : > { %v2011_v38 = vmul.f32 %v2006_v23, %v3568_v49 }
 0xc72   : > { %v2015_v59 = vadd.f32 1e-05, %v2011_v38 }
 0xc74   : > { %2684 = vrsqrt.f32 %v2015_v59  ;;  %vm2043_vm10 = vweird.f32 %v2015_v59 }
 0xc77   : > { %v2008_v5 = vpop.xlane.xlu2 %2007 }
 0xc78   : > { %v2012_v2 = vmul.f32 %v2008_v5, %v3568_v49 }
 0xc7a   : > { %v2685_v10 = vpop.eup %2684  ;;  %v2016_v32 = vadd.f32 1e-05, %v2012_v2 }
 0xc7b   : > { %v2038_v39 = vmul.f32 %v2685_v10, %v2015_v59  ;;  %vm2044_vm9 = vweird.f32 %v2685_v10 }
 0xc7c   : > { %2686 = vrsqrt.f32 %v2016_v32  ;;  %vm2045_vm11 = vmor %vm2043_vm10, %vm2044_vm9  ;;  %vm2053_vm13 = vweird.f32 %v2016_v32 }
 0xc7d   : > { %v2039_v31 = vmul.f32 %v2685_v10, %v2038_v39 }
 0xc7f   : > { %v2040_v25 = vmul.f32 0.5, %v2039_v31 }
 0xc81   : > { %v2041_v29 = vsub.f32 1.5, %v2040_v25 }
 0xc82   : > { %v2687_v45 = vpop.eup %2686 }
 0xc83   : > { %v2042_v47 = vmul.f32 %v2685_v10, %v2041_v29  ;;  %v2048_v50 = vmul.f32 %v2687_v45, %v2016_v32  ;;  %vm2054_vm12 = vweird.f32 %v2687_v45 }
 0xc84   : > { %vm2055_vm14 = vmor %vm2053_vm13, %vm2054_vm12 }
 0xc85   : > { %v2046_v51 = vsel %vm2045_vm11, %v2685_v10, %v2042_v47  ;;  %v2049_v53 = vmul.f32 %v2687_v45, %v2048_v50 }
 0xc86   : > { %v2059_v33 = vmul.f32 %v2046_v51, %v3573_v44 }
 0xc87   : > { %v2050_v48 = vmul.f32 0.5, %v2049_v53 }
 0xc88   : > { %v2067_v8 = vmul.f32 %v2548_v21, %v2059_v33 }
 0xc89   : > { %v2051_v49 = vsub.f32 1.5, %v2050_v48 }
 0xc8a   : > { %v2075_v52 = vadd.f32 %v2549_v19, %v2067_v8 }
 0xc8b   : > { %v2052_v41 = vmul.f32 %v2687_v45, %v2051_v49 }
 0xc8c   : > { %2079 = vst [vmem:[%s3588_s28 + $0x10] sm:$0xff] %v2075_v52 }
 0xc8d   : > { %v2056_v43 = vsel %vm2055_vm14, %v2687_v45, %v2052_v41 }
 0xc8e   : > { %v2060_v54 = vmul.f32 %v2056_v43, %v3578_v0 }
 0xc90   : > { %v2068_v55 = vmul.f32 %v2548_v21, %v2060_v54 }
 0xc92   : > { %v2076_v56 = vadd.f32 %v2549_v19, %v2068_v55 }
 0xc94   : > { %2080 = vst [vmem:[%s3588_s28 + $0x18] sm:$0xff] %v2076_v56 }
 0xc95 PF: > { %s24_s13 = sadd.s32 1, %s2924_s13  }
 0xc96   : > { %p21_p7 = scmp.ge.s32.totalorder %s24_s13, 4  }
 0xc98   :  { %23 = sbr.rel (!%p21_p7) target bundleno = 4 (0x4), region = 122 }
 0xc9d   :  { %2102 = vsyncpa [#allocation3], 1 }
 0xc9e   :  { %2104 = vsyncpa [#allocation3 + $0x1], 1 }
 0xc9f   :  { %2105 = vsyncpa [#allocation5], 1 }
 0xca0   :  { %2106 = vsyncpa [#allocation8], 1 }
 0xca1   :  { %2107 = vsyncpa [#allocation11], 1 }

</bundles_post_ra>
